<compile_context>
chip_gen: v7x
topology: tpu7x:2x2x1
jax: 0.10.0
libtpu: 0.0.40
codegen_flags: <defaults>
</compile_context>

<pallas_src>
import functools
import numpy as np
import jax
import jax.numpy as jnp
from jax.experimental import pallas as pl
from jax.experimental.pallas import tpu as pltpu

# ----------------------------- hyper-parameters ------------------------------
MAX_SEQ_LEN = 32
VOCAB = 20
N_ENC_LAYER = 1
N_DEC_LAYER = 1
ENC_DIM = 32
DEC_DIM = 32
ENC_HEAD = 2
DEC_HEAD = 2
ENC_FILTER = 64
DEC_FILTER = 64
FFT_KERNEL = (9, 1)
FFT_PAD = (4, 0)
PRED_FILTER = 32
PRED_KERNEL = 3
PRED_PAD = (PRED_KERNEL - 1) // 2
MIN_PITCH, MAX_PITCH = 80.0, 400.0
MIN_ENERGY, MAX_ENERGY = 15.0, 100.0
NUM_BINS = 8
NUM_MELS = 16
PAD = 0
DROPOUT = 0.0  # identity

LN_EPS = 1e-5

# Single-TC chips (v5e/v6e): fold the whole batch into one grid step.
# Multi-TC chips (v4/v5p/v7x): one batch element per "parallel" grid step so
# both TensorCores are busy.
try:
    _KIND = jax.devices()[0].device_kind.lower()
except Exception:  # pragma: no cover
    _KIND = ""
_MULTI_TC = any(t in _KIND for t in ("v4", "v5p", "v7"))


def _grid_split(batch):
    g = batch if (_MULTI_TC and batch > 1) else 1
    return g, batch // g


def _full_spec(shape):
    n = len(shape)
    return pl.BlockSpec(shape, lambda i, _n=n: (0,) * _n)


def _batch_spec(bb, shape):
    n = len(shape)
    return pl.BlockSpec((bb,) + shape, lambda i, _n=n: (i,) + (0,) * _n)


# --------------------------- in-kernel helpers --------------------------------

def _layernorm(x, g, b):
    mu = jnp.mean(x, axis=-1, keepdims=True)
    var = jnp.mean((x - mu) ** 2, axis=-1, keepdims=True)
    return (x - mu) * jax.lax.rsqrt(var + LN_EPS) * g + b


def _conv1d(x2, w3, bias, bb, t, pad, relu):
    """1-D conv along time as per-tap MXU accumulation.

    x2: [bb*t, Cin] (batch folded), w3: [K, Cin, Cout], bias: [1, Cout].
    Zero padding is applied per batch element (no cross-sequence bleed).
    """
    K, cin, _ = w3.shape
    if K == 1:
        out = jnp.dot(x2, w3[0], preferred_element_type=jnp.float32)
    else:
        z = jnp.zeros((pad, cin), jnp.float32)
        pieces = []
        for b in range(bb):                       # tiny static unroll
            xb = x2[b * t:(b + 1) * t, :]         # sublane-aligned (t % 8 == 0)
            xp = jnp.concatenate([z, xb, z], axis=0)     # [t + 2*pad, Cin]
            acc = jnp.dot(xp[0:t, :], w3[0], preferred_element_type=jnp.float32)
            for k in range(1, K):
                acc = acc + jnp.dot(xp[k:k + t, :], w3[k],
                                    preferred_element_type=jnp.float32)
            pieces.append(acc)
        out = jnp.concatenate(pieces, axis=0) if bb > 1 else pieces[0]
    out = out + bias
    if relu:
        out = jnp.maximum(out, 0.0)
    return out


def _predictor_body(x2, w1, b1, g1, be1, w2, b2, g2, be2, wl, bl, bb, t):
    """Variance predictor: conv+ReLU+LN, conv+ReLU+LN, linear+ReLU."""
    h = _conv1d(x2, w1, b1, bb, t, PRED_PAD, relu=True)
    h = _layernorm(h, g1, be1)
    h = _conv1d(h, w2, b2, bb, t, PRED_PAD, relu=True)
    h = _layernorm(h, g2, be2)
    o = jnp.dot(h, wl, preferred_element_type=jnp.float32) + bl
    return jnp.maximum(o, 0.0)                    # [bb*t, 1]


# ------------------------ fused FFT block (+ optional head) -------------------

def _fft_block_kernel(*refs, Bb, T, D, n_head, d_k, scale, conv_pad, head):
    (x_ref, km_ref, np_ref,
     wqkv_ref, bqkv_ref, wo_ref, bo_ref, g1_ref, be1_ref,
     w1_ref, b1_ref, w2_ref, b2_ref, g2_ref, be2_ref) = refs[:15]
    pos = 15
    if head == "mel":
        hw_ref, hb_ref = refs[pos:pos + 2]
        pos += 2
    elif head == "var":
        (pw1_ref, pb1_ref, pg1_ref, pbe1_ref,
         pw2_ref, pb2_ref, pg2_ref, pbe2_ref,
         pwl_ref, pbl_ref) = refs[pos:pos + 10]
        pos += 10
    o_ref = refs[pos]
    oh_ref = refs[pos + 1] if head is not None else None

    x2 = x_ref[...].reshape(Bb * T, D)            # fold batch into MXU rows
    km = km_ref[...]                              # [Bb, 1, T] (1 = valid key)
    np2 = np_ref[...].reshape(Bb * T, 1)          # non-pad positions
    hdk = n_head * d_k

    # ---- multi-head self attention (single fused QKV matmul) ----
    qkv = jnp.dot(x2, wqkv_ref[...],
                  preferred_element_type=jnp.float32) + bqkv_ref[...]
    wo = wo_ref[...]
    attn_pieces = []
    for b in range(Bb):                           # static unroll (Bb <= 2)
        bias_b = (km[b] - 1.0) * 1e9              # additive key mask, [1, T]
        acc_b = None
        for h in range(n_head):                   # static unroll (H = 2)
            q = qkv[b * T:(b + 1) * T, h * d_k:(h + 1) * d_k]
            k = qkv[b * T:(b + 1) * T, hdk + h * d_k:hdk + (h + 1) * d_k]
            v = qkv[b * T:(b + 1) * T, 2 * hdk + h * d_k:2 * hdk + (h + 1) * d_k]
            # q @ k^T without transposing k (contract d_k on both operands)
            s = jax.lax.dot_general(q, k, (((1,), (1,)), ((), ())),
                                    preferred_element_type=jnp.float32)
            s = s * scale + bias_b
            s = s - jnp.max(s, axis=-1, keepdims=True)
            p = jnp.exp(s)
            p = p * pl.reciprocal(jnp.sum(p, axis=-1, keepdims=True), approx=True)
            ctx = jnp.dot(p, v, preferred_element_type=jnp.float32)   # [T, d_k]
            # per-head accumulation of the output projection (no head concat)
            proj = jnp.dot(ctx, wo[h * d_k:(h + 1) * d_k, :],
                           preferred_element_type=jnp.float32)        # [T, D]
            acc_b = proj if acc_b is None else acc_b + proj
        attn_pieces.append(acc_b)
    attn = jnp.concatenate(attn_pieces, axis=0) if Bb > 1 else attn_pieces[0]
    attn = attn + bo_ref[...]

    # residual + LayerNorm + non-pad mask
    y = _layernorm(attn + x2, g1_ref[...], be1_ref[...]) * np2

    # ---- position-wise FFN: conv(k) -> ReLU -> conv(1), residual + LN ----
    h1 = _conv1d(y, w1_ref[...], b1_ref[...], Bb, T, conv_pad, relu=True)
    h2 = _conv1d(h1, w2_ref[...], b2_ref[...], Bb, T, 0, relu=False)
    y2 = _layernorm(h2 + y, g2_ref[...], be2_ref[...]) * np2
    o_ref[...] = y2.reshape(Bb, T, D)

    # ---- fused head on the last layer ----
    if head == "mel":
        # mask_tensor + mel_linear: y2 is already masked; pad rows -> bias only
        mel = jnp.dot(y2, hw_ref[...],
                      preferred_element_type=jnp.float32) + hb_ref[...]
        oh_ref[...] = mel.reshape(Bb, T, mel.shape[-1])
    elif head == "var":
        dp = _predictor_body(y2,
                             pw1_ref[...], pb1_ref[...], pg1_ref[...], pbe1_ref[...],
                             pw2_ref[...], pb2_ref[...], pg2_ref[...], pbe2_ref[...],
                             pwl_ref[...], pbl_ref[...], Bb, T)
        oh_ref[...] = dp.reshape(Bb, T, 1)


def fused_fft_block(lp, x, keymask, nonpad, n_head, d_k, head=None, head_params=None):
    B, T, D = x.shape
    a, f = lp['attn'], lp['ffn']
    K1, _, F = f['w1'].shape
    hdk = n_head * d_k
    G, Bb = _grid_split(B)

    wqkv = jnp.concatenate([a['wq'], a['wk'], a['wv']], axis=1)          # [D, 3*hdk]
    bqkv = jnp.concatenate([a['bq'], a['bk'], a['bv']]).reshape(1, -1)

    in_specs = [_batch_spec(Bb, (T, D)),            # x
                _batch_spec(Bb, (1, T)),            # key-valid row
                _batch_spec(Bb, (T, 1)),            # non-pad column
                _full_spec((D, 3 * hdk)), _full_spec((1, 3 * hdk)),
                _full_spec((hdk, D)), _full_spec((1, D)),
                _full_spec((1, D)), _full_spec((1, D)),
                _full_spec((K1, D, F)), _full_spec((1, F)),
                _full_spec((f['w2'].shape[0], F, D)), _full_spec((1, D)),
                _full_spec((1, D)), _full_spec((1, D))]
    args = [x, keymask, nonpad,
            wqkv, bqkv, a['wo'], a['bo'].reshape(1, -1),
            a['ln_g'].reshape(1, -1), a['ln_b'].reshape(1, -1),
            f['w1'], f['b1'].reshape(1, -1),
            f['w2'], f['b2'].reshape(1, -1),
            f['ln_g'].reshape(1, -1), f['ln_b'].reshape(1, -1)]

    if head is None:
        out_shape = jax.ShapeDtypeStruct((B, T, D), jnp.float32)
        out_specs = _batch_spec(Bb, (T, D))
    elif head == "mel":
        m = head_params['w'].shape[1]
        in_specs += [_full_spec((D, m)), _full_spec((1, m))]
        args += [head_params['w'], head_params['b'].reshape(1, -1)]
        out_shape = (jax.ShapeDtypeStruct((B, T, D), jnp.float32),
                     jax.ShapeDtypeStruct((B, T, m), jnp.float32))
        out_specs = (_batch_spec(Bb, (T, D)), _batch_spec(Bb, (T, m)))
    elif head == "var":
        hp = head_params
        Kp, _, Fp = hp['w1'].shape
        in_specs += [_full_spec((Kp, D, Fp)), _full_spec((1, Fp)),
                     _full_spec((1, Fp)), _full_spec((1, Fp)),
                     _full_spec((Kp, Fp, Fp)), _full_spec((1, Fp)),
                     _full_spec((1, Fp)), _full_spec((1, Fp)),
                     _full_spec((Fp, 1)), _full_spec((1, 1))]
        args += [hp['w1'], hp['b1'].reshape(1, -1),
                 hp['ln1_g'].reshape(1, -1), hp['ln1_b'].reshape(1, -1),
                 hp['w2'], hp['b2'].reshape(1, -1),
                 hp['ln2_g'].reshape(1, -1), hp['ln2_b'].reshape(1, -1),
                 hp['wl'], hp['bl'].reshape(1, 1)]
        out_shape = (jax.ShapeDtypeStruct((B, T, D), jnp.float32),
                     jax.ShapeDtypeStruct((B, T, 1), jnp.float32))
        out_specs = (_batch_spec(Bb, (T, D)), _batch_spec(Bb, (T, 1)))
    else:
        raise ValueError(head)

    kernel = functools.partial(_fft_block_kernel, Bb=Bb, T=T, D=D,
                               n_head=n_head, d_k=d_k,
                               scale=1.0 / float(np.sqrt(d_k)),
                               conv_pad=FFT_PAD[0], head=head)
    return pl.pallas_call(
        kernel,
        out_shape=out_shape,
        grid=(G,),
        in_specs=in_specs,
        out_specs=out_specs,
        compiler_params=pltpu.CompilerParams(dimension_semantics=("parallel",)),
    )(*args)


# ------------------- fused pitch + energy variance predictors -----------------

def _pitch_energy_kernel(x_ref,
                         pw1, pb1, pg1, pbe1, pw2, pb2, pg2, pbe2, pwl, pbl,
                         ew1, eb1, eg1, ebe1, ew2, eb2, eg2, ebe2, ewl, ebl,
                         o_ref, *, Bb, T, D):
    x2 = x_ref[...].reshape(Bb * T, D)            # single read of LR output
    p = _predictor_body(x2, pw1[...], pb1[...], pg1[...], pbe1[...],
                        pw2[...], pb2[...], pg2[...], pbe2[...],
                        pwl[...], pbl[...], Bb, T)
    e = _predictor_body(x2, ew1[...], eb1[...], eg1[...], ebe1[...],
                        ew2[...], eb2[...], eg2[...], ebe2[...],
                        ewl[...], ebl[...], Bb, T)
    o_ref[...] = jnp.concatenate([p, e], axis=1).reshape(Bb, T, 2)


def fused_pitch_energy(pp, ep, x):
    B, T, D = x.shape
    G, Bb = _grid_split(B)
    K, _, F = pp['w1'].shape

    def pred_specs():
        return [_full_spec((K, D, F)), _full_spec((1, F)),
                _full_spec((1, F)), _full_spec((1, F)),
                _full_spec((K, F, F)), _full_spec((1, F)),
                _full_spec((1, F)), _full_spec((1, F)),
                _full_spec((F, 1)), _full_spec((1, 1))]

    def pred_args(q):
        return [q['w1'], q['b1'].reshape(1, -1),
                q['ln1_g'].reshape(1, -1), q['ln1_b'].reshape(1, -1),
                q['w2'], q['b2'].reshape(1, -1),
                q['ln2_g'].reshape(1, -1), q['ln2_b'].reshape(1, -1),
                q['wl'], q['bl'].reshape(1, 1)]

    out = pl.pallas_call(
        functools.partial(_pitch_energy_kernel, Bb=Bb, T=T, D=D),
        out_shape=jax.ShapeDtypeStruct((B, T, 2), jnp.float32),
        grid=(G,),
        in_specs=[_batch_spec(Bb, (T, D))] + pred_specs() + pred_specs(),
        out_specs=_batch_spec(Bb, (T, 2)),
        compiler_params=pltpu.CompilerParams(dimension_semantics=("parallel",)),
    )(x, *pred_args(pp), *pred_args(ep))
    return out[..., 0], out[..., 1]               # pitch, energy: [B, T]


# ------------------------------- model pieces --------------------------------

def sinusoid_table(n_position, d_hid, padding_idx=0):
    pos = np.arange(n_position)[:, None].astype(np.float64)
    i = np.arange(d_hid)[None, :].astype(np.float64)
    angle = pos / np.power(10000.0, 2.0 * (i // 2) / d_hid)
    tbl = np.zeros((n_position, d_hid), dtype=np.float32)
    tbl[:, 0::2] = np.sin(angle[:, 0::2])
    tbl[:, 1::2] = np.cos(angle[:, 1::2])
    tbl[padding_idx] = 0.0
    return tbl


@functools.partial(jax.jit, static_argnums=(4,))
def fastspeech2_forward(p, src_seq, src_pos, mel_pos, mel_max_length,
                        length_target, pitch_target, energy_target):
    # ----- encoder (+ fused duration predictor on last layer) -----
    valid_src = (src_seq != PAD).astype(jnp.float32)
    km_src = valid_src[:, None, :]
    np_src = valid_src[:, :, None]
    x = p['word_emb'][src_seq] + p['pos_table'][src_pos]
    dur3 = None
    n_enc = len(p['enc_layers'])
    for li, lp in enumerate(p['enc_layers']):
        if li == n_enc - 1:
            x, dur3 = fused_fft_block(lp, x, km_src, np_src,
                                      ENC_HEAD, ENC_DIM // ENC_HEAD,
                                      head='var', head_params=p['duration_predictor'])
        else:
            x = fused_fft_block(lp, x, km_src, np_src, ENC_HEAD, ENC_DIM // ENC_HEAD)
    dur_pred = dur3[..., 0]                                          # [B, Ts]

    # ----- length regulator (training path: expand by target durations) -----
    B, Ts, D = x.shape
    cum = jnp.cumsum(length_target, axis=1)                          # [B, Ts]
    t_idx = jnp.arange(mel_max_length)
    src_idx = jnp.sum(t_idx[None, :, None] >= cum[:, None, :], axis=-1)  # [B, Tm]
    valid = src_idx < Ts
    gathered = jnp.take_along_axis(x, jnp.clip(src_idx, 0, Ts - 1)[..., None], axis=1)
    output = jnp.where(valid[..., None], gathered, 0.0)              # [B, Tm, D]

    # ----- pitch + energy predictors (one fused kernel) -----
    pitch_pred, energy_pred = fused_pitch_energy(
        p['pitch_predictor'], p['energy_predictor'], output)

    pitch_idx = jnp.clip(
        jnp.searchsorted(p['pitch_bounds'], jnp.log(pitch_target + 1.0), side='left'),
        0, NUM_BINS - 1)                                             # torch.bucketize
    pitch_emb = p['pitch_embedding'][pitch_idx]
    energy_idx = jnp.clip(
        jnp.searchsorted(p['energy_bounds'], jnp.log(energy_target + 1.0), side='left'),
        0, NUM_BINS - 1)
    energy_emb = p['energy_embedding'][energy_idx]

    # ----- decoder (+ fused mask_tensor/mel-linear on last layer) -----
    # mel mask = (arange < max(mel_pos)) == (mel_pos != PAD) == decoder non-pad mask
    valid_mel = (mel_pos != PAD).astype(jnp.float32)
    km_mel = valid_mel[:, None, :]
    np_mel = valid_mel[:, :, None]
    y = output + pitch_emb + energy_emb + p['pos_table'][mel_pos]
    mel = None
    n_dec = len(p['dec_layers'])
    for li, lp in enumerate(p['dec_layers']):
        if li == n_dec - 1:
            y, mel = fused_fft_block(lp, y, km_mel, np_mel,
                                     DEC_HEAD, DEC_DIM // DEC_HEAD,
                                     head='mel',
                                     head_params={'w': p['mel_w'], 'b': p['mel_b']})
        else:
            y = fused_fft_block(lp, y, km_mel, np_mel, DEC_HEAD, DEC_DIM // DEC_HEAD)

    return {'mel_output': mel,
            'duration_predictor_output': dur_pred,
            'pitch_predictor_output': pitch_pred,
            'energy_predictor_output': energy_pred}


# ----------------------------- parameter init --------------------------------

def init_params(key):
    keys = iter(jax.random.split(key, 256))

    def nrm(shape, scale=0.05):
        return jax.random.normal(next(keys), shape, jnp.float32) * scale

    def zeros(shape):
        return jnp.zeros(shape, jnp.float32)

    def ones(shape):
        return jnp.ones(shape, jnp.float32)

    def attn_params(dim, head):
        dk = dim // head
        return dict(wq=nrm((dim, head * dk)), bq=zeros((head * dk,)),
                    wk=nrm((dim, head * dk)), bk=zeros((head * dk,)),
                    wv=nrm((dim, head * dk)), bv=zeros((head * dk,)),
                    wo=nrm((head * dk, dim)), bo=zeros((dim,)),
                    ln_g=ones((dim,)), ln_b=zeros((dim,)))

    def ffn_params(dim, filt):
        return dict(w1=nrm((FFT_KERNEL[0], dim, filt)), b1=zeros((filt,)),
                    w2=nrm((FFT_KERNEL[1], filt, dim)), b2=zeros((dim,)),
                    ln_g=ones((dim,)), ln_b=zeros((dim,)))

    def fft_params(dim, head, filt):
        return dict(attn=attn_params(dim, head), ffn=ffn_params(dim, filt))

    def pred_params(dim, filt):
        return dict(w1=nrm((PRED_KERNEL, dim, filt)), b1=zeros((filt,)),
                    ln1_g=ones((filt,)), ln1_b=zeros((filt,)),
                    w2=nrm((PRED_KERNEL, filt, filt)), b2=zeros((filt,)),
                    ln2_g=ones((filt,)), ln2_b=zeros((filt,)),
                    wl=nrm((filt, 1)), bl=zeros((1,)))

    word_emb = nrm((VOCAB, ENC_DIM), 0.1).at[PAD].set(0.0)
    pos_table = jnp.asarray(sinusoid_table(MAX_SEQ_LEN + 1, ENC_DIM), jnp.float32)

    return dict(
        word_emb=word_emb,
        pos_table=pos_table,
        enc_layers=[fft_params(ENC_DIM, ENC_HEAD, ENC_FILTER) for _ in range(N_ENC_LAYER)],
        dec_layers=[fft_params(DEC_DIM, DEC_HEAD, DEC_FILTER) for _ in range(N_DEC_LAYER)],
        duration_predictor=pred_params(ENC_DIM, PRED_FILTER),
        pitch_predictor=pred_params(ENC_DIM, PRED_FILTER),
        energy_predictor=pred_params(ENC_DIM, PRED_FILTER),
        pitch_embedding=nrm((NUM_BINS, ENC_DIM), 0.1),
        energy_embedding=nrm((NUM_BINS, ENC_DIM), 0.1),
        pitch_bounds=jnp.linspace(np.log(MIN_PITCH + 1), np.log(MAX_PITCH + 2),
                                  NUM_BINS).astype(jnp.float32),
        energy_bounds=jnp.linspace(np.log(MIN_ENERGY + 1), np.log(MAX_ENERGY + 2),
                                   NUM_BINS).astype(jnp.float32),
        mel_w=nrm((DEC_DIM, NUM_MELS)), mel_b=zeros((NUM_MELS,)),
    )


# ---------------------------------- main --------------------------------------

if __name__ == "__main__":
    key = jax.random.PRNGKey(0)
    pkey, k1, k2, k3 = jax.random.split(key, 4)
    params = init_params(pkey)

    B = 2
    T_SRC = 8
    MEL_MAX = 16

    # source sequences (batch 1 has 2 PAD tokens at the end)
    src_len = np.array([8, 6])
    tok = jax.random.randint(k1, (B, T_SRC), 1, VOCAB, dtype=jnp.int32)
    arange_src = jnp.arange(T_SRC)[None, :]
    src_mask = arange_src < jnp.asarray(src_len)[:, None]
    src_seq = jnp.where(src_mask, tok, PAD).astype(jnp.int32)
    src_pos = jnp.where(src_mask, arange_src + 1, 0).astype(jnp.int32)

    # ground-truth durations (training path), zero on PAD positions
    length_target = jnp.array([[2, 3, 1, 2, 2, 1, 2, 1],
                               [1, 2, 3, 2, 2, 2, 0, 0]], dtype=jnp.int32)
    mel_len = jnp.sum(length_target, axis=1)                      # [14, 12]
    arange_mel = jnp.arange(MEL_MAX)[None, :]
    mel_pos = jnp.where(arange_mel < mel_len[:, None], arange_mel + 1, 0).astype(jnp.int32)

    pitch_target = jax.random.uniform(k2, (B, MEL_MAX), jnp.float32,
                                      MIN_PITCH, MAX_PITCH)
    energy_target = jax.random.uniform(k3, (B, MEL_MAX), jnp.float32,
                                       MIN_ENERGY, MAX_ENERGY)

    out = fastspeech2_forward(params, src_seq, src_pos, mel_pos, MEL_MAX,
                              length_target, pitch_target, energy_target)
    out = jax.block_until_ready(out)

    assert out['mel_output'].shape == (B, MEL_MAX, NUM_MELS)
    assert out['duration_predictor_output'].shape == (B, T_SRC)
    assert out['pitch_predictor_output'].shape == (B, MEL_MAX)
    assert out['energy_predictor_output'].shape == (B, MEL_MAX)
    assert bool(jnp.all(jnp.isfinite(out['mel_output'])))
    assert bool(jnp.all(jnp.isfinite(out['duration_predictor_output'])))
    assert bool(jnp.all(jnp.isfinite(out['pitch_predictor_output'])))
    assert bool(jnp.all(jnp.isfinite(out['energy_predictor_output'])))
    print("KERNEL_OK")
</pallas_src>

<mosaic_0001>
module attributes {stable_mosaic.version = 11 : i64} {
  func.func @_fft_block_kernel(%arg0: i32, %arg1: memref<2x8x32xf32, #tpu.memory_space<vmem>>, %arg2: memref<2x1x8xf32, #tpu.memory_space<vmem>>, %arg3: memref<2x8x1xf32, #tpu.memory_space<vmem>>, %arg4: memref<32x96xf32, #tpu.memory_space<vmem>>, %arg5: memref<1x96xf32, #tpu.memory_space<vmem>>, %arg6: memref<32x32xf32, #tpu.memory_space<vmem>>, %arg7: memref<1x32xf32, #tpu.memory_space<vmem>>, %arg8: memref<1x32xf32, #tpu.memory_space<vmem>>, %arg9: memref<1x32xf32, #tpu.memory_space<vmem>>, %arg10: memref<9x32x64xf32, #tpu.memory_space<vmem>>, %arg11: memref<1x64xf32, #tpu.memory_space<vmem>>, %arg12: memref<1x64x32xf32, #tpu.memory_space<vmem>>, %arg13: memref<1x32xf32, #tpu.memory_space<vmem>>, %arg14: memref<1x32xf32, #tpu.memory_space<vmem>>, %arg15: memref<1x32xf32, #tpu.memory_space<vmem>>, %arg16: memref<3x32x32xf32, #tpu.memory_space<vmem>>, %arg17: memref<1x32xf32, #tpu.memory_space<vmem>>, %arg18: memref<1x32xf32, #tpu.memory_space<vmem>>, %arg19: memref<1x32xf32, #tpu.memory_space<vmem>>, %arg20: memref<3x32x32xf32, #tpu.memory_space<vmem>>, %arg21: memref<1x32xf32, #tpu.memory_space<vmem>>, %arg22: memref<1x32xf32, #tpu.memory_space<vmem>>, %arg23: memref<1x32xf32, #tpu.memory_space<vmem>>, %arg24: memref<32x1xf32, #tpu.memory_space<vmem>>, %arg25: memref<1x1xf32, #tpu.memory_space<vmem>>, %arg26: memref<2x8x32xf32, #tpu.memory_space<vmem>>, %arg27: memref<2x8x1xf32, #tpu.memory_space<vmem>>) attributes {dimension_semantics = [#tpu.dimension_semantics<parallel>], iteration_bounds = array<i64: 1>, scalar_prefetch = 0 : i64, scratch_operands = 0 : i64, tpu.core_type = #tpu.core_type<tc>, window_params = [{transform_indices = @transform_0, window_bounds = array<i64: 2, 8, 32>}, {transform_indices = @transform_1, window_bounds = array<i64: 2, 1, 8>}, {transform_indices = @transform_2, window_bounds = array<i64: 2, 8, 1>}, {pipeline_mode = #tpu.pipeline_mode<synchronous>, transform_indices = @transform_3, window_bounds = array<i64: 32, 96>}, {pipeline_mode = #tpu.pipeline_mode<synchronous>, transform_indices = @transform_4, window_bounds = array<i64: 1, 96>}, {pipeline_mode = #tpu.pipeline_mode<synchronous>, transform_indices = @transform_5, window_bounds = array<i64: 32, 32>}, {pipeline_mode = #tpu.pipeline_mode<synchronous>, transform_indices = @transform_6, window_bounds = array<i64: 1, 32>}, {pipeline_mode = #tpu.pipeline_mode<synchronous>, transform_indices = @transform_7, window_bounds = array<i64: 1, 32>}, {pipeline_mode = #tpu.pipeline_mode<synchronous>, transform_indices = @transform_8, window_bounds = array<i64: 1, 32>}, {pipeline_mode = #tpu.pipeline_mode<synchronous>, transform_indices = @transform_9, window_bounds = array<i64: 9, 32, 64>}, {pipeline_mode = #tpu.pipeline_mode<synchronous>, transform_indices = @transform_10, window_bounds = array<i64: 1, 64>}, {pipeline_mode = #tpu.pipeline_mode<synchronous>, transform_indices = @transform_11, window_bounds = array<i64: 1, 64, 32>}, {pipeline_mode = #tpu.pipeline_mode<synchronous>, transform_indices = @transform_12, window_bounds = array<i64: 1, 32>}, {pipeline_mode = #tpu.pipeline_mode<synchronous>, transform_indices = @transform_13, window_bounds = array<i64: 1, 32>}, {pipeline_mode = #tpu.pipeline_mode<synchronous>, transform_indices = @transform_14, window_bounds = array<i64: 1, 32>}, {pipeline_mode = #tpu.pipeline_mode<synchronous>, transform_indices = @transform_15, window_bounds = array<i64: 3, 32, 32>}, {pipeline_mode = #tpu.pipeline_mode<synchronous>, transform_indices = @transform_16, window_bounds = array<i64: 1, 32>}, {pipeline_mode = #tpu.pipeline_mode<synchronous>, transform_indices = @transform_17, window_bounds = array<i64: 1, 32>}, {pipeline_mode = #tpu.pipeline_mode<synchronous>, transform_indices = @transform_18, window_bounds = array<i64: 1, 32>}, {pipeline_mode = #tpu.pipeline_mode<synchronous>, transform_indices = @transform_19, window_bounds = array<i64: 3, 32, 32>}, {pipeline_mode = #tpu.pipeline_mode<synchronous>, transform_indices = @transform_20, window_bounds = array<i64: 1, 32>}, {pipeline_mode = #tpu.pipeline_mode<synchronous>, transform_indices = @transform_21, window_bounds = array<i64: 1, 32>}, {pipeline_mode = #tpu.pipeline_mode<synchronous>, transform_indices = @transform_22, window_bounds = array<i64: 1, 32>}, {pipeline_mode = #tpu.pipeline_mode<synchronous>, transform_indices = @transform_23, window_bounds = array<i64: 32, 1>}, {pipeline_mode = #tpu.pipeline_mode<synchronous>, transform_indices = @transform_24, window_bounds = array<i64: 1, 1>}, {transform_indices = @transform_25, window_bounds = array<i64: 2, 8, 32>}, {transform_indices = @transform_26, window_bounds = array<i64: 2, 8, 1>}]} {
    %c0 = arith.constant 0 : index
    %c0_0 = arith.constant 0 : index
    %c0_1 = arith.constant 0 : index
    %0 = vector.load %arg1[%c0, %c0_0, %c0_1] : memref<2x8x32xf32, #tpu.memory_space<vmem>>, vector<2x8x32xf32>
    %1 = vector.shape_cast %0 : vector<2x8x32xf32> to vector<16x32xf32>
    %c0_2 = arith.constant 0 : index
    %c0_3 = arith.constant 0 : index
    %c0_4 = arith.constant 0 : index
    %2 = vector.load %arg2[%c0_2, %c0_3, %c0_4] : memref<2x1x8xf32, #tpu.memory_space<vmem>>, vector<2x1x8xf32>
    %c0_5 = arith.constant 0 : index
    %c0_6 = arith.constant 0 : index
    %c0_7 = arith.constant 0 : index
    %3 = vector.load %arg3[%c0_5, %c0_6, %c0_7] : memref<2x8x1xf32, #tpu.memory_space<vmem>>, vector<2x8x1xf32>
    %4 = vector.shape_cast %3 : vector<2x8x1xf32> to vector<16x1xf32>
    %c0_8 = arith.constant 0 : index
    %c0_9 = arith.constant 0 : index
    %5 = vector.load %arg4[%c0_8, %c0_9] : memref<32x96xf32, #tpu.memory_space<vmem>>, vector<32x96xf32>
    %cst = arith.constant dense<0.000000e+00> : vector<16x96xf32>
    %6 = tpu.matmul %1, %5, %cst {dimension_numbers = #tpu.dot_dimension_numbers<[1], [0], [0], [1], [0, 0, 1, 1], [], []>} : vector<16x32xf32>, vector<32x96xf32>, vector<16x96xf32> -> vector<16x96xf32>
    %c0_10 = arith.constant 0 : index
    %c0_11 = arith.constant 0 : index
    %7 = vector.load %arg5[%c0_10, %c0_11] : memref<1x96xf32, #tpu.memory_space<vmem>>, vector<1x96xf32>
    %8 = vector.broadcast %7 : vector<1x96xf32> to vector<16x96xf32>
    %9 = arith.addf %6, %8 : vector<16x96xf32>
    %c0_12 = arith.constant 0 : index
    %c0_13 = arith.constant 0 : index
    %10 = vector.load %arg6[%c0_12, %c0_13] : memref<32x32xf32, #tpu.memory_space<vmem>>, vector<32x32xf32>
    %11 = vector.extract_strided_slice %2 {offsets = [0, 0, 0], sizes = [1, 1, 8], strides = [1, 1, 1]} : vector<2x1x8xf32> to vector<1x1x8xf32>
    %12 = vector.shape_cast %11 : vector<1x1x8xf32> to vector<1x8xf32>
    %cst_14 = arith.constant 1.000000e+00 : f32
    %13 = vector.broadcast %cst_14 : f32 to vector<1x8xf32>
    %14 = arith.subf %12, %13 : vector<1x8xf32>
    %cst_15 = arith.constant 1.000000e+09 : f32
    %15 = vector.broadcast %cst_15 : f32 to vector<1x8xf32>
    %16 = arith.mulf %14, %15 : vector<1x8xf32>
    %17 = vector.extract_strided_slice %9 {offsets = [0, 0], sizes = [8, 16], strides = [1, 1]} : vector<16x96xf32> to vector<8x16xf32>
    %18 = vector.extract_strided_slice %9 {offsets = [0, 32], sizes = [8, 16], strides = [1, 1]} : vector<16x96xf32> to vector<8x16xf32>
    %19 = vector.extract_strided_slice %9 {offsets = [0, 64], sizes = [8, 16], strides = [1, 1]} : vector<16x96xf32> to vector<8x16xf32>
    %cst_16 = arith.constant dense<0.000000e+00> : vector<8x8xf32>
    %20 = tpu.matmul %17, %18, %cst_16 {dimension_numbers = #tpu.dot_dimension_numbers<[1], [1], [0], [0], [0, 0, 1, 0], [], []>} : vector<8x16xf32>, vector<8x16xf32>, vector<8x8xf32> -> vector<8x8xf32>
    %cst_17 = arith.constant 2.500000e-01 : f32
    %21 = vector.broadcast %cst_17 : f32 to vector<8x8xf32>
    %22 = arith.mulf %20, %21 : vector<8x8xf32>
    %23 = vector.broadcast %16 : vector<1x8xf32> to vector<8x8xf32>
    %24 = arith.addf %22, %23 : vector<8x8xf32>
    %cst_18 = arith.constant dense<0xFF800000> : vector<8xf32>
    %25 = vector.multi_reduction <maximumf>, %24, %cst_18 [1] : vector<8x8xf32> to vector<8xf32>
    %26 = vector.shape_cast %25 : vector<8xf32> to vector<8x1xf32>
    %27 = vector.broadcast %26 : vector<8x1xf32> to vector<8x8xf32>
    %28 = arith.subf %24, %27 : vector<8x8xf32>
    %29 = math.exp %28 : vector<8x8xf32>
    %cst_19 = arith.constant dense<0.000000e+00> : vector<8xf32>
    %30 = vector.multi_reduction <add>, %29, %cst_19 [1] : vector<8x8xf32> to vector<8xf32>
    %31 = vector.shape_cast %30 : vector<8xf32> to vector<8x1xf32>
    %32 = tpu.reciprocal %31 {approx = true} : vector<8x1xf32> -> vector<8x1xf32>
    %33 = vector.broadcast %32 : vector<8x1xf32> to vector<8x8xf32>
    %34 = arith.mulf %29, %33 : vector<8x8xf32>
    %cst_20 = arith.constant dense<0.000000e+00> : vector<8x16xf32>
    %35 = tpu.matmul %34, %19, %cst_20 {dimension_numbers = #tpu.dot_dimension_numbers<[1], [0], [0], [1], [0, 0, 1, 1], [], []>} : vector<8x8xf32>, vector<8x16xf32>, vector<8x16xf32> -> vector<8x16xf32>
    %36 = vector.extract_strided_slice %10 {offsets = [0, 0], sizes = [16, 32], strides = [1, 1]} : vector<32x32xf32> to vector<16x32xf32>
    %cst_21 = arith.constant dense<0.000000e+00> : vector<8x32xf32>
    %37 = tpu.matmul %35, %36, %cst_21 {dimension_numbers = #tpu.dot_dimension_numbers<[1], [0], [0], [1], [0, 0, 1, 1], [], []>} : vector<8x16xf32>, vector<16x32xf32>, vector<8x32xf32> -> vector<8x32xf32>
    %38 = vector.extract_strided_slice %9 {offsets = [0, 16], sizes = [8, 16], strides = [1, 1]} : vector<16x96xf32> to vector<8x16xf32>
    %39 = vector.extract_strided_slice %9 {offsets = [0, 48], sizes = [8, 16], strides = [1, 1]} : vector<16x96xf32> to vector<8x16xf32>
    %40 = vector.extract_strided_slice %9 {offsets = [0, 80], sizes = [8, 16], strides = [1, 1]} : vector<16x96xf32> to vector<8x16xf32>
    %cst_22 = arith.constant dense<0.000000e+00> : vector<8x8xf32>
    %41 = tpu.matmul %38, %39, %cst_22 {dimension_numbers = #tpu.dot_dimension_numbers<[1], [1], [0], [0], [0, 0, 1, 0], [], []>} : vector<8x16xf32>, vector<8x16xf32>, vector<8x8xf32> -> vector<8x8xf32>
    %cst_23 = arith.constant 2.500000e-01 : f32
    %42 = vector.broadcast %cst_23 : f32 to vector<8x8xf32>
    %43 = arith.mulf %41, %42 : vector<8x8xf32>
    %44 = vector.broadcast %16 : vector<1x8xf32> to vector<8x8xf32>
    %45 = arith.addf %43, %44 : vector<8x8xf32>
    %cst_24 = arith.constant dense<0xFF800000> : vector<8xf32>
    %46 = vector.multi_reduction <maximumf>, %45, %cst_24 [1] : vector<8x8xf32> to vector<8xf32>
    %47 = vector.shape_cast %46 : vector<8xf32> to vector<8x1xf32>
    %48 = vector.broadcast %47 : vector<8x1xf32> to vector<8x8xf32>
    %49 = arith.subf %45, %48 : vector<8x8xf32>
    %50 = math.exp %49 : vector<8x8xf32>
    %cst_25 = arith.constant dense<0.000000e+00> : vector<8xf32>
    %51 = vector.multi_reduction <add>, %50, %cst_25 [1] : vector<8x8xf32> to vector<8xf32>
    %52 = vector.shape_cast %51 : vector<8xf32> to vector<8x1xf32>
    %53 = tpu.reciprocal %52 {approx = true} : vector<8x1xf32> -> vector<8x1xf32>
    %54 = vector.broadcast %53 : vector<8x1xf32> to vector<8x8xf32>
    %55 = arith.mulf %50, %54 : vector<8x8xf32>
    %cst_26 = arith.constant dense<0.000000e+00> : vector<8x16xf32>
    %56 = tpu.matmul %55, %40, %cst_26 {dimension_numbers = #tpu.dot_dimension_numbers<[1], [0], [0], [1], [0, 0, 1, 1], [], []>} : vector<8x8xf32>, vector<8x16xf32>, vector<8x16xf32> -> vector<8x16xf32>
    %57 = vector.extract_strided_slice %10 {offsets = [16, 0], sizes = [16, 32], strides = [1, 1]} : vector<32x32xf32> to vector<16x32xf32>
    %cst_27 = arith.constant dense<0.000000e+00> : vector<8x32xf32>
    %58 = tpu.matmul %56, %57, %cst_27 {dimension_numbers = #tpu.dot_dimension_numbers<[1], [0], [0], [1], [0, 0, 1, 1], [], []>} : vector<8x16xf32>, vector<16x32xf32>, vector<8x32xf32> -> vector<8x32xf32>
    %59 = arith.addf %37, %58 : vector<8x32xf32>
    %60 = vector.extract_strided_slice %2 {offsets = [1, 0, 0], sizes = [1, 1, 8], strides = [1, 1, 1]} : vector<2x1x8xf32> to vector<1x1x8xf32>
    %61 = vector.shape_cast %60 : vector<1x1x8xf32> to vector<1x8xf32>
    %cst_28 = arith.constant 1.000000e+00 : f32
    %62 = vector.broadcast %cst_28 : f32 to vector<1x8xf32>
    %63 = arith.subf %61, %62 : vector<1x8xf32>
    %cst_29 = arith.constant 1.000000e+09 : f32
    %64 = vector.broadcast %cst_29 : f32 to vector<1x8xf32>
    %65 = arith.mulf %63, %64 : vector<1x8xf32>
    %66 = vector.extract_strided_slice %9 {offsets = [8, 0], sizes = [8, 16], strides = [1, 1]} : vector<16x96xf32> to vector<8x16xf32>
    %67 = vector.extract_strided_slice %9 {offsets = [8, 32], sizes = [8, 16], strides = [1, 1]} : vector<16x96xf32> to vector<8x16xf32>
    %68 = vector.extract_strided_slice %9 {offsets = [8, 64], sizes = [8, 16], strides = [1, 1]} : vector<16x96xf32> to vector<8x16xf32>
    %cst_30 = arith.constant dense<0.000000e+00> : vector<8x8xf32>
    %69 = tpu.matmul %66, %67, %cst_30 {dimension_numbers = #tpu.dot_dimension_numbers<[1], [1], [0], [0], [0, 0, 1, 0], [], []>} : vector<8x16xf32>, vector<8x16xf32>, vector<8x8xf32> -> vector<8x8xf32>
    %cst_31 = arith.constant 2.500000e-01 : f32
    %70 = vector.broadcast %cst_31 : f32 to vector<8x8xf32>
    %71 = arith.mulf %69, %70 : vector<8x8xf32>
    %72 = vector.broadcast %65 : vector<1x8xf32> to vector<8x8xf32>
    %73 = arith.addf %71, %72 : vector<8x8xf32>
    %cst_32 = arith.constant dense<0xFF800000> : vector<8xf32>
    %74 = vector.multi_reduction <maximumf>, %73, %cst_32 [1] : vector<8x8xf32> to vector<8xf32>
    %75 = vector.shape_cast %74 : vector<8xf32> to vector<8x1xf32>
    %76 = vector.broadcast %75 : vector<8x1xf32> to vector<8x8xf32>
    %77 = arith.subf %73, %76 : vector<8x8xf32>
    %78 = math.exp %77 : vector<8x8xf32>
    %cst_33 = arith.constant dense<0.000000e+00> : vector<8xf32>
    %79 = vector.multi_reduction <add>, %78, %cst_33 [1] : vector<8x8xf32> to vector<8xf32>
    %80 = vector.shape_cast %79 : vector<8xf32> to vector<8x1xf32>
    %81 = tpu.reciprocal %80 {approx = true} : vector<8x1xf32> -> vector<8x1xf32>
    %82 = vector.broadcast %81 : vector<8x1xf32> to vector<8x8xf32>
    %83 = arith.mulf %78, %82 : vector<8x8xf32>
    %cst_34 = arith.constant dense<0.000000e+00> : vector<8x16xf32>
    %84 = tpu.matmul %83, %68, %cst_34 {dimension_numbers = #tpu.dot_dimension_numbers<[1], [0], [0], [1], [0, 0, 1, 1], [], []>} : vector<8x8xf32>, vector<8x16xf32>, vector<8x16xf32> -> vector<8x16xf32>
    %85 = vector.extract_strided_slice %10 {offsets = [0, 0], sizes = [16, 32], strides = [1, 1]} : vector<32x32xf32> to vector<16x32xf32>
    %cst_35 = arith.constant dense<0.000000e+00> : vector<8x32xf32>
    %86 = tpu.matmul %84, %85, %cst_35 {dimension_numbers = #tpu.dot_dimension_numbers<[1], [0], [0], [1], [0, 0, 1, 1], [], []>} : vector<8x16xf32>, vector<16x32xf32>, vector<8x32xf32> -> vector<8x32xf32>
    %87 = vector.extract_strided_slice %9 {offsets = [8, 16], sizes = [8, 16], strides = [1, 1]} : vector<16x96xf32> to vector<8x16xf32>
    %88 = vector.extract_strided_slice %9 {offsets = [8, 48], sizes = [8, 16], strides = [1, 1]} : vector<16x96xf32> to vector<8x16xf32>
    %89 = vector.extract_strided_slice %9 {offsets = [8, 80], sizes = [8, 16], strides = [1, 1]} : vector<16x96xf32> to vector<8x16xf32>
    %cst_36 = arith.constant dense<0.000000e+00> : vector<8x8xf32>
    %90 = tpu.matmul %87, %88, %cst_36 {dimension_numbers = #tpu.dot_dimension_numbers<[1], [1], [0], [0], [0, 0, 1, 0], [], []>} : vector<8x16xf32>, vector<8x16xf32>, vector<8x8xf32> -> vector<8x8xf32>
    %cst_37 = arith.constant 2.500000e-01 : f32
    %91 = vector.broadcast %cst_37 : f32 to vector<8x8xf32>
    %92 = arith.mulf %90, %91 : vector<8x8xf32>
    %93 = vector.broadcast %65 : vector<1x8xf32> to vector<8x8xf32>
    %94 = arith.addf %92, %93 : vector<8x8xf32>
    %cst_38 = arith.constant dense<0xFF800000> : vector<8xf32>
    %95 = vector.multi_reduction <maximumf>, %94, %cst_38 [1] : vector<8x8xf32> to vector<8xf32>
    %96 = vector.shape_cast %95 : vector<8xf32> to vector<8x1xf32>
    %97 = vector.broadcast %96 : vector<8x1xf32> to vector<8x8xf32>
    %98 = arith.subf %94, %97 : vector<8x8xf32>
    %99 = math.exp %98 : vector<8x8xf32>
    %cst_39 = arith.constant dense<0.000000e+00> : vector<8xf32>
    %100 = vector.multi_reduction <add>, %99, %cst_39 [1] : vector<8x8xf32> to vector<8xf32>
    %101 = vector.shape_cast %100 : vector<8xf32> to vector<8x1xf32>
    %102 = tpu.reciprocal %101 {approx = true} : vector<8x1xf32> -> vector<8x1xf32>
    %103 = vector.broadcast %102 : vector<8x1xf32> to vector<8x8xf32>
    %104 = arith.mulf %99, %103 : vector<8x8xf32>
    %cst_40 = arith.constant dense<0.000000e+00> : vector<8x16xf32>
    %105 = tpu.matmul %104, %89, %cst_40 {dimension_numbers = #tpu.dot_dimension_numbers<[1], [0], [0], [1], [0, 0, 1, 1], [], []>} : vector<8x8xf32>, vector<8x16xf32>, vector<8x16xf32> -> vector<8x16xf32>
    %106 = vector.extract_strided_slice %10 {offsets = [16, 0], sizes = [16, 32], strides = [1, 1]} : vector<32x32xf32> to vector<16x32xf32>
    %cst_41 = arith.constant dense<0.000000e+00> : vector<8x32xf32>
    %107 = tpu.matmul %105, %106, %cst_41 {dimension_numbers = #tpu.dot_dimension_numbers<[1], [0], [0], [1], [0, 0, 1, 1], [], []>} : vector<8x16xf32>, vector<16x32xf32>, vector<8x32xf32> -> vector<8x32xf32>
    %108 = arith.addf %86, %107 : vector<8x32xf32>
    %109 = tpu.concatenate %59, %108 in 0 : vector<8x32xf32>, vector<8x32xf32> -> vector<16x32xf32>
    %c0_42 = arith.constant 0 : index
    %c0_43 = arith.constant 0 : index
    %110 = vector.load %arg7[%c0_42, %c0_43] : memref<1x32xf32, #tpu.memory_space<vmem>>, vector<1x32xf32>
    %111 = vector.broadcast %110 : vector<1x32xf32> to vector<16x32xf32>
    %112 = arith.addf %109, %111 : vector<16x32xf32>
    %113 = arith.addf %112, %1 : vector<16x32xf32>
    %c0_44 = arith.constant 0 : index
    %c0_45 = arith.constant 0 : index
    %114 = vector.load %arg8[%c0_44, %c0_45] : memref<1x32xf32, #tpu.memory_space<vmem>>, vector<1x32xf32>
    %c0_46 = arith.constant 0 : index
    %c0_47 = arith.constant 0 : index
    %115 = vector.load %arg9[%c0_46, %c0_47] : memref<1x32xf32, #tpu.memory_space<vmem>>, vector<1x32xf32>
    %cst_48 = arith.constant dense<0.000000e+00> : vector<16xf32>
    %116 = vector.multi_reduction <add>, %113, %cst_48 [1] : vector<16x32xf32> to vector<16xf32>
    %117 = vector.shape_cast %116 : vector<16xf32> to vector<16x1xf32>
    %cst_49 = arith.constant 3.200000e+01 : f32
    %118 = vector.broadcast %cst_49 : f32 to vector<16x1xf32>
    %119 = arith.divf %117, %118 : vector<16x1xf32>
    %120 = vector.broadcast %119 : vector<16x1xf32> to vector<16x32xf32>
    %121 = arith.subf %113, %120 : vector<16x32xf32>
    %122 = arith.mulf %121, %121 : vector<16x32xf32>
    %cst_50 = arith.constant dense<0.000000e+00> : vector<16xf32>
    %123 = vector.multi_reduction <add>, %122, %cst_50 [1] : vector<16x32xf32> to vector<16xf32>
    %124 = vector.shape_cast %123 : vector<16xf32> to vector<16x1xf32>
    %cst_51 = arith.constant 3.200000e+01 : f32
    %125 = vector.broadcast %cst_51 : f32 to vector<16x1xf32>
    %126 = arith.divf %124, %125 : vector<16x1xf32>
    %127 = vector.broadcast %119 : vector<16x1xf32> to vector<16x32xf32>
    %128 = arith.subf %113, %127 : vector<16x32xf32>
    %cst_52 = arith.constant 9.99999974E-6 : f32
    %129 = vector.broadcast %cst_52 : f32 to vector<16x1xf32>
    %130 = arith.addf %126, %129 : vector<16x1xf32>
    %131 = math.rsqrt %130 : vector<16x1xf32>
    %132 = vector.broadcast %131 : vector<16x1xf32> to vector<16x32xf32>
    %133 = arith.mulf %128, %132 : vector<16x32xf32>
    %134 = vector.broadcast %114 : vector<1x32xf32> to vector<16x32xf32>
    %135 = arith.mulf %133, %134 : vector<16x32xf32>
    %136 = vector.broadcast %115 : vector<1x32xf32> to vector<16x32xf32>
    %137 = arith.addf %135, %136 : vector<16x32xf32>
    %138 = vector.broadcast %4 : vector<16x1xf32> to vector<16x32xf32>
    %139 = arith.mulf %137, %138 : vector<16x32xf32>
    %c0_53 = arith.constant 0 : index
    %c0_54 = arith.constant 0 : index
    %c0_55 = arith.constant 0 : index
    %140 = vector.load %arg10[%c0_53, %c0_54, %c0_55] : memref<9x32x64xf32, #tpu.memory_space<vmem>>, vector<9x32x64xf32>
    %c0_56 = arith.constant 0 : index
    %c0_57 = arith.constant 0 : index
    %141 = vector.load %arg11[%c0_56, %c0_57] : memref<1x64xf32, #tpu.memory_space<vmem>>, vector<1x64xf32>
    %cst_58 = arith.constant 0.000000e+00 : f32
    %142 = vector.broadcast %cst_58 : f32 to vector<4x32xf32>
    %143 = vector.extract_strided_slice %139 {offsets = [0, 0], sizes = [8, 32], strides = [1, 1]} : vector<16x32xf32> to vector<8x32xf32>
    %144 = tpu.concatenate %142, %143, %142 in 0 : vector<4x32xf32>, vector<8x32xf32>, vector<4x32xf32> -> vector<16x32xf32>
    %145 = vector.extract_strided_slice %144 {offsets = [0, 0], sizes = [8, 32], strides = [1, 1]} : vector<16x32xf32> to vector<8x32xf32>
    %146 = vector.extract_strided_slice %140 {offsets = [0, 0, 0], sizes = [1, 32, 64], strides = [1, 1, 1]} : vector<9x32x64xf32> to vector<1x32x64xf32>
    %147 = vector.shape_cast %146 : vector<1x32x64xf32> to vector<32x64xf32>
    %cst_59 = arith.constant dense<0.000000e+00> : vector<8x64xf32>
    %148 = tpu.matmul %145, %147, %cst_59 {dimension_numbers = #tpu.dot_dimension_numbers<[1], [0], [0], [1], [0, 0, 1, 1], [], []>} : vector<8x32xf32>, vector<32x64xf32>, vector<8x64xf32> -> vector<8x64xf32>
    %149 = vector.extract_strided_slice %144 {offsets = [1, 0], sizes = [8, 32], strides = [1, 1]} : vector<16x32xf32> to vector<8x32xf32>
    %150 = vector.extract_strided_slice %140 {offsets = [1, 0, 0], sizes = [1, 32, 64], strides = [1, 1, 1]} : vector<9x32x64xf32> to vector<1x32x64xf32>
    %151 = vector.shape_cast %150 : vector<1x32x64xf32> to vector<32x64xf32>
    %cst_60 = arith.constant dense<0.000000e+00> : vector<8x64xf32>
    %152 = tpu.matmul %149, %151, %cst_60 {dimension_numbers = #tpu.dot_dimension_numbers<[1], [0], [0], [1], [0, 0, 1, 1], [], []>} : vector<8x32xf32>, vector<32x64xf32>, vector<8x64xf32> -> vector<8x64xf32>
    %153 = arith.addf %148, %152 : vector<8x64xf32>
    %154 = vector.extract_strided_slice %144 {offsets = [2, 0], sizes = [8, 32], strides = [1, 1]} : vector<16x32xf32> to vector<8x32xf32>
    %155 = vector.extract_strided_slice %140 {offsets = [2, 0, 0], sizes = [1, 32, 64], strides = [1, 1, 1]} : vector<9x32x64xf32> to vector<1x32x64xf32>
    %156 = vector.shape_cast %155 : vector<1x32x64xf32> to vector<32x64xf32>
    %cst_61 = arith.constant dense<0.000000e+00> : vector<8x64xf32>
    %157 = tpu.matmul %154, %156, %cst_61 {dimension_numbers = #tpu.dot_dimension_numbers<[1], [0], [0], [1], [0, 0, 1, 1], [], []>} : vector<8x32xf32>, vector<32x64xf32>, vector<8x64xf32> -> vector<8x64xf32>
    %158 = arith.addf %153, %157 : vector<8x64xf32>
    %159 = vector.extract_strided_slice %144 {offsets = [3, 0], sizes = [8, 32], strides = [1, 1]} : vector<16x32xf32> to vector<8x32xf32>
    %160 = vector.extract_strided_slice %140 {offsets = [3, 0, 0], sizes = [1, 32, 64], strides = [1, 1, 1]} : vector<9x32x64xf32> to vector<1x32x64xf32>
    %161 = vector.shape_cast %160 : vector<1x32x64xf32> to vector<32x64xf32>
    %cst_62 = arith.constant dense<0.000000e+00> : vector<8x64xf32>
    %162 = tpu.matmul %159, %161, %cst_62 {dimension_numbers = #tpu.dot_dimension_numbers<[1], [0], [0], [1], [0, 0, 1, 1], [], []>} : vector<8x32xf32>, vector<32x64xf32>, vector<8x64xf32> -> vector<8x64xf32>
    %163 = arith.addf %158, %162 : vector<8x64xf32>
    %164 = vector.extract_strided_slice %144 {offsets = [4, 0], sizes = [8, 32], strides = [1, 1]} : vector<16x32xf32> to vector<8x32xf32>
    %165 = vector.extract_strided_slice %140 {offsets = [4, 0, 0], sizes = [1, 32, 64], strides = [1, 1, 1]} : vector<9x32x64xf32> to vector<1x32x64xf32>
    %166 = vector.shape_cast %165 : vector<1x32x64xf32> to vector<32x64xf32>
    %cst_63 = arith.constant dense<0.000000e+00> : vector<8x64xf32>
    %167 = tpu.matmul %164, %166, %cst_63 {dimension_numbers = #tpu.dot_dimension_numbers<[1], [0], [0], [1], [0, 0, 1, 1], [], []>} : vector<8x32xf32>, vector<32x64xf32>, vector<8x64xf32> -> vector<8x64xf32>
    %168 = arith.addf %163, %167 : vector<8x64xf32>
    %169 = vector.extract_strided_slice %144 {offsets = [5, 0], sizes = [8, 32], strides = [1, 1]} : vector<16x32xf32> to vector<8x32xf32>
    %170 = vector.extract_strided_slice %140 {offsets = [5, 0, 0], sizes = [1, 32, 64], strides = [1, 1, 1]} : vector<9x32x64xf32> to vector<1x32x64xf32>
    %171 = vector.shape_cast %170 : vector<1x32x64xf32> to vector<32x64xf32>
    %cst_64 = arith.constant dense<0.000000e+00> : vector<8x64xf32>
    %172 = tpu.matmul %169, %171, %cst_64 {dimension_numbers = #tpu.dot_dimension_numbers<[1], [0], [0], [1], [0, 0, 1, 1], [], []>} : vector<8x32xf32>, vector<32x64xf32>, vector<8x64xf32> -> vector<8x64xf32>
    %173 = arith.addf %168, %172 : vector<8x64xf32>
    %174 = vector.extract_strided_slice %144 {offsets = [6, 0], sizes = [8, 32], strides = [1, 1]} : vector<16x32xf32> to vector<8x32xf32>
    %175 = vector.extract_strided_slice %140 {offsets = [6, 0, 0], sizes = [1, 32, 64], strides = [1, 1, 1]} : vector<9x32x64xf32> to vector<1x32x64xf32>
    %176 = vector.shape_cast %175 : vector<1x32x64xf32> to vector<32x64xf32>
    %cst_65 = arith.constant dense<0.000000e+00> : vector<8x64xf32>
    %177 = tpu.matmul %174, %176, %cst_65 {dimension_numbers = #tpu.dot_dimension_numbers<[1], [0], [0], [1], [0, 0, 1, 1], [], []>} : vector<8x32xf32>, vector<32x64xf32>, vector<8x64xf32> -> vector<8x64xf32>
    %178 = arith.addf %173, %177 : vector<8x64xf32>
    %179 = vector.extract_strided_slice %144 {offsets = [7, 0], sizes = [8, 32], strides = [1, 1]} : vector<16x32xf32> to vector<8x32xf32>
    %180 = vector.extract_strided_slice %140 {offsets = [7, 0, 0], sizes = [1, 32, 64], strides = [1, 1, 1]} : vector<9x32x64xf32> to vector<1x32x64xf32>
    %181 = vector.shape_cast %180 : vector<1x32x64xf32> to vector<32x64xf32>
    %cst_66 = arith.constant dense<0.000000e+00> : vector<8x64xf32>
    %182 = tpu.matmul %179, %181, %cst_66 {dimension_numbers = #tpu.dot_dimension_numbers<[1], [0], [0], [1], [0, 0, 1, 1], [], []>} : vector<8x32xf32>, vector<32x64xf32>, vector<8x64xf32> -> vector<8x64xf32>
    %183 = arith.addf %178, %182 : vector<8x64xf32>
    %184 = vector.extract_strided_slice %144 {offsets = [8, 0], sizes = [8, 32], strides = [1, 1]} : vector<16x32xf32> to vector<8x32xf32>
    %185 = vector.extract_strided_slice %140 {offsets = [8, 0, 0], sizes = [1, 32, 64], strides = [1, 1, 1]} : vector<9x32x64xf32> to vector<1x32x64xf32>
    %186 = vector.shape_cast %185 : vector<1x32x64xf32> to vector<32x64xf32>
    %cst_67 = arith.constant dense<0.000000e+00> : vector<8x64xf32>
    %187 = tpu.matmul %184, %186, %cst_67 {dimension_numbers = #tpu.dot_dimension_numbers<[1], [0], [0], [1], [0, 0, 1, 1], [], []>} : vector<8x32xf32>, vector<32x64xf32>, vector<8x64xf32> -> vector<8x64xf32>
    %188 = arith.addf %183, %187 : vector<8x64xf32>
    %189 = vector.extract_strided_slice %139 {offsets = [8, 0], sizes = [8, 32], strides = [1, 1]} : vector<16x32xf32> to vector<8x32xf32>
    %190 = tpu.concatenate %142, %189, %142 in 0 : vector<4x32xf32>, vector<8x32xf32>, vector<4x32xf32> -> vector<16x32xf32>
    %191 = vector.extract_strided_slice %190 {offsets = [0, 0], sizes = [8, 32], strides = [1, 1]} : vector<16x32xf32> to vector<8x32xf32>
    %192 = vector.extract_strided_slice %140 {offsets = [0, 0, 0], sizes = [1, 32, 64], strides = [1, 1, 1]} : vector<9x32x64xf32> to vector<1x32x64xf32>
    %193 = vector.shape_cast %192 : vector<1x32x64xf32> to vector<32x64xf32>
    %cst_68 = arith.constant dense<0.000000e+00> : vector<8x64xf32>
    %194 = tpu.matmul %191, %193, %cst_68 {dimension_numbers = #tpu.dot_dimension_numbers<[1], [0], [0], [1], [0, 0, 1, 1], [], []>} : vector<8x32xf32>, vector<32x64xf32>, vector<8x64xf32> -> vector<8x64xf32>
    %195 = vector.extract_strided_slice %190 {offsets = [1, 0], sizes = [8, 32], strides = [1, 1]} : vector<16x32xf32> to vector<8x32xf32>
    %196 = vector.extract_strided_slice %140 {offsets = [1, 0, 0], sizes = [1, 32, 64], strides = [1, 1, 1]} : vector<9x32x64xf32> to vector<1x32x64xf32>
    %197 = vector.shape_cast %196 : vector<1x32x64xf32> to vector<32x64xf32>
    %cst_69 = arith.constant dense<0.000000e+00> : vector<8x64xf32>
    %198 = tpu.matmul %195, %197, %cst_69 {dimension_numbers = #tpu.dot_dimension_numbers<[1], [0], [0], [1], [0, 0, 1, 1], [], []>} : vector<8x32xf32>, vector<32x64xf32>, vector<8x64xf32> -> vector<8x64xf32>
    %199 = arith.addf %194, %198 : vector<8x64xf32>
    %200 = vector.extract_strided_slice %190 {offsets = [2, 0], sizes = [8, 32], strides = [1, 1]} : vector<16x32xf32> to vector<8x32xf32>
    %201 = vector.extract_strided_slice %140 {offsets = [2, 0, 0], sizes = [1, 32, 64], strides = [1, 1, 1]} : vector<9x32x64xf32> to vector<1x32x64xf32>
    %202 = vector.shape_cast %201 : vector<1x32x64xf32> to vector<32x64xf32>
    %cst_70 = arith.constant dense<0.000000e+00> : vector<8x64xf32>
    %203 = tpu.matmul %200, %202, %cst_70 {dimension_numbers = #tpu.dot_dimension_numbers<[1], [0], [0], [1], [0, 0, 1, 1], [], []>} : vector<8x32xf32>, vector<32x64xf32>, vector<8x64xf32> -> vector<8x64xf32>
    %204 = arith.addf %199, %203 : vector<8x64xf32>
    %205 = vector.extract_strided_slice %190 {offsets = [3, 0], sizes = [8, 32], strides = [1, 1]} : vector<16x32xf32> to vector<8x32xf32>
    %206 = vector.extract_strided_slice %140 {offsets = [3, 0, 0], sizes = [1, 32, 64], strides = [1, 1, 1]} : vector<9x32x64xf32> to vector<1x32x64xf32>
    %207 = vector.shape_cast %206 : vector<1x32x64xf32> to vector<32x64xf32>
    %cst_71 = arith.constant dense<0.000000e+00> : vector<8x64xf32>
    %208 = tpu.matmul %205, %207, %cst_71 {dimension_numbers = #tpu.dot_dimension_numbers<[1], [0], [0], [1], [0, 0, 1, 1], [], []>} : vector<8x32xf32>, vector<32x64xf32>, vector<8x64xf32> -> vector<8x64xf32>
    %209 = arith.addf %204, %208 : vector<8x64xf32>
    %210 = vector.extract_strided_slice %190 {offsets = [4, 0], sizes = [8, 32], strides = [1, 1]} : vector<16x32xf32> to vector<8x32xf32>
    %211 = vector.extract_strided_slice %140 {offsets = [4, 0, 0], sizes = [1, 32, 64], strides = [1, 1, 1]} : vector<9x32x64xf32> to vector<1x32x64xf32>
    %212 = vector.shape_cast %211 : vector<1x32x64xf32> to vector<32x64xf32>
    %cst_72 = arith.constant dense<0.000000e+00> : vector<8x64xf32>
    %213 = tpu.matmul %210, %212, %cst_72 {dimension_numbers = #tpu.dot_dimension_numbers<[1], [0], [0], [1], [0, 0, 1, 1], [], []>} : vector<8x32xf32>, vector<32x64xf32>, vector<8x64xf32> -> vector<8x64xf32>
    %214 = arith.addf %209, %213 : vector<8x64xf32>
    %215 = vector.extract_strided_slice %190 {offsets = [5, 0], sizes = [8, 32], strides = [1, 1]} : vector<16x32xf32> to vector<8x32xf32>
    %216 = vector.extract_strided_slice %140 {offsets = [5, 0, 0], sizes = [1, 32, 64], strides = [1, 1, 1]} : vector<9x32x64xf32> to vector<1x32x64xf32>
    %217 = vector.shape_cast %216 : vector<1x32x64xf32> to vector<32x64xf32>
    %cst_73 = arith.constant dense<0.000000e+00> : vector<8x64xf32>
    %218 = tpu.matmul %215, %217, %cst_73 {dimension_numbers = #tpu.dot_dimension_numbers<[1], [0], [0], [1], [0, 0, 1, 1], [], []>} : vector<8x32xf32>, vector<32x64xf32>, vector<8x64xf32> -> vector<8x64xf32>
    %219 = arith.addf %214, %218 : vector<8x64xf32>
    %220 = vector.extract_strided_slice %190 {offsets = [6, 0], sizes = [8, 32], strides = [1, 1]} : vector<16x32xf32> to vector<8x32xf32>
    %221 = vector.extract_strided_slice %140 {offsets = [6, 0, 0], sizes = [1, 32, 64], strides = [1, 1, 1]} : vector<9x32x64xf32> to vector<1x32x64xf32>
    %222 = vector.shape_cast %221 : vector<1x32x64xf32> to vector<32x64xf32>
    %cst_74 = arith.constant dense<0.000000e+00> : vector<8x64xf32>
    %223 = tpu.matmul %220, %222, %cst_74 {dimension_numbers = #tpu.dot_dimension_numbers<[1], [0], [0], [1], [0, 0, 1, 1], [], []>} : vector<8x32xf32>, vector<32x64xf32>, vector<8x64xf32> -> vector<8x64xf32>
    %224 = arith.addf %219, %223 : vector<8x64xf32>
    %225 = vector.extract_strided_slice %190 {offsets = [7, 0], sizes = [8, 32], strides = [1, 1]} : vector<16x32xf32> to vector<8x32xf32>
    %226 = vector.extract_strided_slice %140 {offsets = [7, 0, 0], sizes = [1, 32, 64], strides = [1, 1, 1]} : vector<9x32x64xf32> to vector<1x32x64xf32>
    %227 = vector.shape_cast %226 : vector<1x32x64xf32> to vector<32x64xf32>
    %cst_75 = arith.constant dense<0.000000e+00> : vector<8x64xf32>
    %228 = tpu.matmul %225, %227, %cst_75 {dimension_numbers = #tpu.dot_dimension_numbers<[1], [0], [0], [1], [0, 0, 1, 1], [], []>} : vector<8x32xf32>, vector<32x64xf32>, vector<8x64xf32> -> vector<8x64xf32>
    %229 = arith.addf %224, %228 : vector<8x64xf32>
    %230 = vector.extract_strided_slice %190 {offsets = [8, 0], sizes = [8, 32], strides = [1, 1]} : vector<16x32xf32> to vector<8x32xf32>
    %231 = vector.extract_strided_slice %140 {offsets = [8, 0, 0], sizes = [1, 32, 64], strides = [1, 1, 1]} : vector<9x32x64xf32> to vector<1x32x64xf32>
    %232 = vector.shape_cast %231 : vector<1x32x64xf32> to vector<32x64xf32>
    %cst_76 = arith.constant dense<0.000000e+00> : vector<8x64xf32>
    %233 = tpu.matmul %230, %232, %cst_76 {dimension_numbers = #tpu.dot_dimension_numbers<[1], [0], [0], [1], [0, 0, 1, 1], [], []>} : vector<8x32xf32>, vector<32x64xf32>, vector<8x64xf32> -> vector<8x64xf32>
    %234 = arith.addf %229, %233 : vector<8x64xf32>
    %235 = tpu.concatenate %188, %234 in 0 : vector<8x64xf32>, vector<8x64xf32> -> vector<16x64xf32>
    %236 = vector.broadcast %141 : vector<1x64xf32> to vector<16x64xf32>
    %237 = arith.addf %235, %236 : vector<16x64xf32>
    %cst_77 = arith.constant 0.000000e+00 : f32
    %238 = vector.broadcast %cst_77 : f32 to vector<16x64xf32>
    %239 = arith.maximumf %237, %238 : vector<16x64xf32>
    %c0_78 = arith.constant 0 : index
    %c0_79 = arith.constant 0 : index
    %c0_80 = arith.constant 0 : index
    %240 = vector.load %arg12[%c0_78, %c0_79, %c0_80] : memref<1x64x32xf32, #tpu.memory_space<vmem>>, vector<1x64x32xf32>
    %c0_81 = arith.constant 0 : index
    %c0_82 = arith.constant 0 : index
    %241 = vector.load %arg13[%c0_81, %c0_82] : memref<1x32xf32, #tpu.memory_space<vmem>>, vector<1x32xf32>
    %242 = vector.shape_cast %240 : vector<1x64x32xf32> to vector<64x32xf32>
    %cst_83 = arith.constant dense<0.000000e+00> : vector<16x32xf32>
    %243 = tpu.matmul %239, %242, %cst_83 {dimension_numbers = #tpu.dot_dimension_numbers<[1], [0], [0], [1], [0, 0, 1, 1], [], []>} : vector<16x64xf32>, vector<64x32xf32>, vector<16x32xf32> -> vector<16x32xf32>
    %244 = vector.broadcast %241 : vector<1x32xf32> to vector<16x32xf32>
    %245 = arith.addf %243, %244 : vector<16x32xf32>
    %246 = arith.addf %245, %139 : vector<16x32xf32>
    %c0_84 = arith.constant 0 : index
    %c0_85 = arith.constant 0 : index
    %247 = vector.load %arg14[%c0_84, %c0_85] : memref<1x32xf32, #tpu.memory_space<vmem>>, vector<1x32xf32>
    %c0_86 = arith.constant 0 : index
    %c0_87 = arith.constant 0 : index
    %248 = vector.load %arg15[%c0_86, %c0_87] : memref<1x32xf32, #tpu.memory_space<vmem>>, vector<1x32xf32>
    %cst_88 = arith.constant dense<0.000000e+00> : vector<16xf32>
    %249 = vector.multi_reduction <add>, %246, %cst_88 [1] : vector<16x32xf32> to vector<16xf32>
    %250 = vector.shape_cast %249 : vector<16xf32> to vector<16x1xf32>
    %cst_89 = arith.constant 3.200000e+01 : f32
    %251 = vector.broadcast %cst_89 : f32 to vector<16x1xf32>
    %252 = arith.divf %250, %251 : vector<16x1xf32>
    %253 = vector.broadcast %252 : vector<16x1xf32> to vector<16x32xf32>
    %254 = arith.subf %246, %253 : vector<16x32xf32>
    %255 = arith.mulf %254, %254 : vector<16x32xf32>
    %cst_90 = arith.constant dense<0.000000e+00> : vector<16xf32>
    %256 = vector.multi_reduction <add>, %255, %cst_90 [1] : vector<16x32xf32> to vector<16xf32>
    %257 = vector.shape_cast %256 : vector<16xf32> to vector<16x1xf32>
    %cst_91 = arith.constant 3.200000e+01 : f32
    %258 = vector.broadcast %cst_91 : f32 to vector<16x1xf32>
    %259 = arith.divf %257, %258 : vector<16x1xf32>
    %260 = vector.broadcast %252 : vector<16x1xf32> to vector<16x32xf32>
    %261 = arith.subf %246, %260 : vector<16x32xf32>
    %cst_92 = arith.constant 9.99999974E-6 : f32
    %262 = vector.broadcast %cst_92 : f32 to vector<16x1xf32>
    %263 = arith.addf %259, %262 : vector<16x1xf32>
    %264 = math.rsqrt %263 : vector<16x1xf32>
    %265 = vector.broadcast %264 : vector<16x1xf32> to vector<16x32xf32>
    %266 = arith.mulf %261, %265 : vector<16x32xf32>
    %267 = vector.broadcast %247 : vector<1x32xf32> to vector<16x32xf32>
    %268 = arith.mulf %266, %267 : vector<16x32xf32>
    %269 = vector.broadcast %248 : vector<1x32xf32> to vector<16x32xf32>
    %270 = arith.addf %268, %269 : vector<16x32xf32>
    %271 = vector.broadcast %4 : vector<16x1xf32> to vector<16x32xf32>
    %272 = arith.mulf %270, %271 : vector<16x32xf32>
    %273 = vector.shape_cast %272 : vector<16x32xf32> to vector<2x8x32xf32>
    %c0_93 = arith.constant 0 : index
    %c0_94 = arith.constant 0 : index
    %c0_95 = arith.constant 0 : index
    %274 = vector.load %arg26[%c0_93, %c0_94, %c0_95] : memref<2x8x32xf32, #tpu.memory_space<vmem>>, vector<2x8x32xf32>
    tpu.vector_store %arg26[%c0_93, %c0_94, %c0_95], %273 {strides = array<i32>} : memref<2x8x32xf32, #tpu.memory_space<vmem>>, vector<2x8x32xf32>,
    %c0_96 = arith.constant 0 : index
    %c0_97 = arith.constant 0 : index
    %c0_98 = arith.constant 0 : index
    %275 = vector.load %arg16[%c0_96, %c0_97, %c0_98] : memref<3x32x32xf32, #tpu.memory_space<vmem>>, vector<3x32x32xf32>
    %c0_99 = arith.constant 0 : index
    %c0_100 = arith.constant 0 : index
    %276 = vector.load %arg17[%c0_99, %c0_100] : memref<1x32xf32, #tpu.memory_space<vmem>>, vector<1x32xf32>
    %c0_101 = arith.constant 0 : index
    %c0_102 = arith.constant 0 : index
    %277 = vector.load %arg18[%c0_101, %c0_102] : memref<1x32xf32, #tpu.memory_space<vmem>>, vector<1x32xf32>
    %c0_103 = arith.constant 0 : index
    %c0_104 = arith.constant 0 : index
    %278 = vector.load %arg19[%c0_103, %c0_104] : memref<1x32xf32, #tpu.memory_space<vmem>>, vector<1x32xf32>
    %c0_105 = arith.constant 0 : index
    %c0_106 = arith.constant 0 : index
    %c0_107 = arith.constant 0 : index
    %279 = vector.load %arg20[%c0_105, %c0_106, %c0_107] : memref<3x32x32xf32, #tpu.memory_space<vmem>>, vector<3x32x32xf32>
    %c0_108 = arith.constant 0 : index
    %c0_109 = arith.constant 0 : index
    %280 = vector.load %arg21[%c0_108, %c0_109] : memref<1x32xf32, #tpu.memory_space<vmem>>, vector<1x32xf32>
    %c0_110 = arith.constant 0 : index
    %c0_111 = arith.constant 0 : index
    %281 = vector.load %arg22[%c0_110, %c0_111] : memref<1x32xf32, #tpu.memory_space<vmem>>, vector<1x32xf32>
    %c0_112 = arith.constant 0 : index
    %c0_113 = arith.constant 0 : index
    %282 = vector.load %arg23[%c0_112, %c0_113] : memref<1x32xf32, #tpu.memory_space<vmem>>, vector<1x32xf32>
    %c0_114 = arith.constant 0 : index
    %c0_115 = arith.constant 0 : index
    %283 = vector.load %arg24[%c0_114, %c0_115] : memref<32x1xf32, #tpu.memory_space<vmem>>, vector<32x1xf32>
    %c0_116 = arith.constant 0 : index
    %c0_117 = arith.constant 0 : index
    %284 = vector.load %arg25[%c0_116, %c0_117] : memref<1x1xf32, #tpu.memory_space<vmem>>, vector<1x1xf32>
    %cst_118 = arith.constant 0.000000e+00 : f32
    %285 = vector.broadcast %cst_118 : f32 to vector<1x32xf32>
    %286 = vector.extract_strided_slice %272 {offsets = [0, 0], sizes = [8, 32], strides = [1, 1]} : vector<16x32xf32> to vector<8x32xf32>
    %287 = tpu.concatenate %285, %286, %285 in 0 : vector<1x32xf32>, vector<8x32xf32>, vector<1x32xf32> -> vector<10x32xf32>
    %288 = vector.extract_strided_slice %287 {offsets = [0, 0], sizes = [8, 32], strides = [1, 1]} : vector<10x32xf32> to vector<8x32xf32>
    %289 = vector.extract_strided_slice %275 {offsets = [0, 0, 0], sizes = [1, 32, 32], strides = [1, 1, 1]} : vector<3x32x32xf32> to vector<1x32x32xf32>
    %290 = vector.shape_cast %289 : vector<1x32x32xf32> to vector<32x32xf32>
    %cst_119 = arith.constant dense<0.000000e+00> : vector<8x32xf32>
    %291 = tpu.matmul %288, %290, %cst_119 {dimension_numbers = #tpu.dot_dimension_numbers<[1], [0], [0], [1], [0, 0, 1, 1], [], []>} : vector<8x32xf32>, vector<32x32xf32>, vector<8x32xf32> -> vector<8x32xf32>
    %292 = vector.extract_strided_slice %287 {offsets = [1, 0], sizes = [8, 32], strides = [1, 1]} : vector<10x32xf32> to vector<8x32xf32>
    %293 = vector.extract_strided_slice %275 {offsets = [1, 0, 0], sizes = [1, 32, 32], strides = [1, 1, 1]} : vector<3x32x32xf32> to vector<1x32x32xf32>
    %294 = vector.shape_cast %293 : vector<1x32x32xf32> to vector<32x32xf32>
    %cst_120 = arith.constant dense<0.000000e+00> : vector<8x32xf32>
    %295 = tpu.matmul %292, %294, %cst_120 {dimension_numbers = #tpu.dot_dimension_numbers<[1], [0], [0], [1], [0, 0, 1, 1], [], []>} : vector<8x32xf32>, vector<32x32xf32>, vector<8x32xf32> -> vector<8x32xf32>
    %296 = arith.addf %291, %295 : vector<8x32xf32>
    %297 = vector.extract_strided_slice %287 {offsets = [2, 0], sizes = [8, 32], strides = [1, 1]} : vector<10x32xf32> to vector<8x32xf32>
    %298 = vector.extract_strided_slice %275 {offsets = [2, 0, 0], sizes = [1, 32, 32], strides = [1, 1, 1]} : vector<3x32x32xf32> to vector<1x32x32xf32>
    %299 = vector.shape_cast %298 : vector<1x32x32xf32> to vector<32x32xf32>
    %cst_121 = arith.constant dense<0.000000e+00> : vector<8x32xf32>
    %300 = tpu.matmul %297, %299, %cst_121 {dimension_numbers = #tpu.dot_dimension_numbers<[1], [0], [0], [1], [0, 0, 1, 1], [], []>} : vector<8x32xf32>, vector<32x32xf32>, vector<8x32xf32> -> vector<8x32xf32>
    %301 = arith.addf %296, %300 : vector<8x32xf32>
    %302 = vector.extract_strided_slice %272 {offsets = [8, 0], sizes = [8, 32], strides = [1, 1]} : vector<16x32xf32> to vector<8x32xf32>
    %303 = tpu.concatenate %285, %302, %285 in 0 : vector<1x32xf32>, vector<8x32xf32>, vector<1x32xf32> -> vector<10x32xf32>
    %304 = vector.extract_strided_slice %303 {offsets = [0, 0], sizes = [8, 32], strides = [1, 1]} : vector<10x32xf32> to vector<8x32xf32>
    %305 = vector.extract_strided_slice %275 {offsets = [0, 0, 0], sizes = [1, 32, 32], strides = [1, 1, 1]} : vector<3x32x32xf32> to vector<1x32x32xf32>
    %306 = vector.shape_cast %305 : vector<1x32x32xf32> to vector<32x32xf32>
    %cst_122 = arith.constant dense<0.000000e+00> : vector<8x32xf32>
    %307 = tpu.matmul %304, %306, %cst_122 {dimension_numbers = #tpu.dot_dimension_numbers<[1], [0], [0], [1], [0, 0, 1, 1], [], []>} : vector<8x32xf32>, vector<32x32xf32>, vector<8x32xf32> -> vector<8x32xf32>
    %308 = vector.extract_strided_slice %303 {offsets = [1, 0], sizes = [8, 32], strides = [1, 1]} : vector<10x32xf32> to vector<8x32xf32>
    %309 = vector.extract_strided_slice %275 {offsets = [1, 0, 0], sizes = [1, 32, 32], strides = [1, 1, 1]} : vector<3x32x32xf32> to vector<1x32x32xf32>
    %310 = vector.shape_cast %309 : vector<1x32x32xf32> to vector<32x32xf32>
    %cst_123 = arith.constant dense<0.000000e+00> : vector<8x32xf32>
    %311 = tpu.matmul %308, %310, %cst_123 {dimension_numbers = #tpu.dot_dimension_numbers<[1], [0], [0], [1], [0, 0, 1, 1], [], []>} : vector<8x32xf32>, vector<32x32xf32>, vector<8x32xf32> -> vector<8x32xf32>
    %312 = arith.addf %307, %311 : vector<8x32xf32>
    %313 = vector.extract_strided_slice %303 {offsets = [2, 0], sizes = [8, 32], strides = [1, 1]} : vector<10x32xf32> to vector<8x32xf32>
    %314 = vector.extract_strided_slice %275 {offsets = [2, 0, 0], sizes = [1, 32, 32], strides = [1, 1, 1]} : vector<3x32x32xf32> to vector<1x32x32xf32>
    %315 = vector.shape_cast %314 : vector<1x32x32xf32> to vector<32x32xf32>
    %cst_124 = arith.constant dense<0.000000e+00> : vector<8x32xf32>
    %316 = tpu.matmul %313, %315, %cst_124 {dimension_numbers = #tpu.dot_dimension_numbers<[1], [0], [0], [1], [0, 0, 1, 1], [], []>} : vector<8x32xf32>, vector<32x32xf32>, vector<8x32xf32> -> vector<8x32xf32>
    %317 = arith.addf %312, %316 : vector<8x32xf32>
    %318 = tpu.concatenate %301, %317 in 0 : vector<8x32xf32>, vector<8x32xf32> -> vector<16x32xf32>
    %319 = vector.broadcast %276 : vector<1x32xf32> to vector<16x32xf32>
    %320 = arith.addf %318, %319 : vector<16x32xf32>
    %cst_125 = arith.constant 0.000000e+00 : f32
    %321 = vector.broadcast %cst_125 : f32 to vector<16x32xf32>
    %322 = arith.maximumf %320, %321 : vector<16x32xf32>
    %cst_126 = arith.constant dense<0.000000e+00> : vector<16xf32>
    %323 = vector.multi_reduction <add>, %322, %cst_126 [1] : vector<16x32xf32> to vector<16xf32>
    %324 = vector.shape_cast %323 : vector<16xf32> to vector<16x1xf32>
    %cst_127 = arith.constant 3.200000e+01 : f32
    %325 = vector.broadcast %cst_127 : f32 to vector<16x1xf32>
    %326 = arith.divf %324, %325 : vector<16x1xf32>
    %327 = vector.broadcast %326 : vector<16x1xf32> to vector<16x32xf32>
    %328 = arith.subf %322, %327 : vector<16x32xf32>
    %329 = arith.mulf %328, %328 : vector<16x32xf32>
    %cst_128 = arith.constant dense<0.000000e+00> : vector<16xf32>
    %330 = vector.multi_reduction <add>, %329, %cst_128 [1] : vector<16x32xf32> to vector<16xf32>
    %331 = vector.shape_cast %330 : vector<16xf32> to vector<16x1xf32>
    %cst_129 = arith.constant 3.200000e+01 : f32
    %332 = vector.broadcast %cst_129 : f32 to vector<16x1xf32>
    %333 = arith.divf %331, %332 : vector<16x1xf32>
    %334 = vector.broadcast %326 : vector<16x1xf32> to vector<16x32xf32>
    %335 = arith.subf %322, %334 : vector<16x32xf32>
    %cst_130 = arith.constant 9.99999974E-6 : f32
    %336 = vector.broadcast %cst_130 : f32 to vector<16x1xf32>
    %337 = arith.addf %333, %336 : vector<16x1xf32>
    %338 = math.rsqrt %337 : vector<16x1xf32>
    %339 = vector.broadcast %338 : vector<16x1xf32> to vector<16x32xf32>
    %340 = arith.mulf %335, %339 : vector<16x32xf32>
    %341 = vector.broadcast %277 : vector<1x32xf32> to vector<16x32xf32>
    %342 = arith.mulf %340, %341 : vector<16x32xf32>
    %343 = vector.broadcast %278 : vector<1x32xf32> to vector<16x32xf32>
    %344 = arith.addf %342, %343 : vector<16x32xf32>
    %cst_131 = arith.constant 0.000000e+00 : f32
    %345 = vector.broadcast %cst_131 : f32 to vector<1x32xf32>
    %346 = vector.extract_strided_slice %344 {offsets = [0, 0], sizes = [8, 32], strides = [1, 1]} : vector<16x32xf32> to vector<8x32xf32>
    %347 = tpu.concatenate %345, %346, %345 in 0 : vector<1x32xf32>, vector<8x32xf32>, vector<1x32xf32> -> vector<10x32xf32>
    %348 = vector.extract_strided_slice %347 {offsets = [0, 0], sizes = [8, 32], strides = [1, 1]} : vector<10x32xf32> to vector<8x32xf32>
    %349 = vector.extract_strided_slice %279 {offsets = [0, 0, 0], sizes = [1, 32, 32], strides = [1, 1, 1]} : vector<3x32x32xf32> to vector<1x32x32xf32>
    %350 = vector.shape_cast %349 : vector<1x32x32xf32> to vector<32x32xf32>
    %cst_132 = arith.constant dense<0.000000e+00> : vector<8x32xf32>
    %351 = tpu.matmul %348, %350, %cst_132 {dimension_numbers = #tpu.dot_dimension_numbers<[1], [0], [0], [1], [0, 0, 1, 1], [], []>} : vector<8x32xf32>, vector<32x32xf32>, vector<8x32xf32> -> vector<8x32xf32>
    %352 = vector.extract_strided_slice %347 {offsets = [1, 0], sizes = [8, 32], strides = [1, 1]} : vector<10x32xf32> to vector<8x32xf32>
    %353 = vector.extract_strided_slice %279 {offsets = [1, 0, 0], sizes = [1, 32, 32], strides = [1, 1, 1]} : vector<3x32x32xf32> to vector<1x32x32xf32>
    %354 = vector.shape_cast %353 : vector<1x32x32xf32> to vector<32x32xf32>
    %cst_133 = arith.constant dense<0.000000e+00> : vector<8x32xf32>
    %355 = tpu.matmul %352, %354, %cst_133 {dimension_numbers = #tpu.dot_dimension_numbers<[1], [0], [0], [1], [0, 0, 1, 1], [], []>} : vector<8x32xf32>, vector<32x32xf32>, vector<8x32xf32> -> vector<8x32xf32>
    %356 = arith.addf %351, %355 : vector<8x32xf32>
    %357 = vector.extract_strided_slice %347 {offsets = [2, 0], sizes = [8, 32], strides = [1, 1]} : vector<10x32xf32> to vector<8x32xf32>
    %358 = vector.extract_strided_slice %279 {offsets = [2, 0, 0], sizes = [1, 32, 32], strides = [1, 1, 1]} : vector<3x32x32xf32> to vector<1x32x32xf32>
    %359 = vector.shape_cast %358 : vector<1x32x32xf32> to vector<32x32xf32>
    %cst_134 = arith.constant dense<0.000000e+00> : vector<8x32xf32>
    %360 = tpu.matmul %357, %359, %cst_134 {dimension_numbers = #tpu.dot_dimension_numbers<[1], [0], [0], [1], [0, 0, 1, 1], [], []>} : vector<8x32xf32>, vector<32x32xf32>, vector<8x32xf32> -> vector<8x32xf32>
    %361 = arith.addf %356, %360 : vector<8x32xf32>
    %362 = vector.extract_strided_slice %344 {offsets = [8, 0], sizes = [8, 32], strides = [1, 1]} : vector<16x32xf32> to vector<8x32xf32>
    %363 = tpu.concatenate %345, %362, %345 in 0 : vector<1x32xf32>, vector<8x32xf32>, vector<1x32xf32> -> vector<10x32xf32>
    %364 = vector.extract_strided_slice %363 {offsets = [0, 0], sizes = [8, 32], strides = [1, 1]} : vector<10x32xf32> to vector<8x32xf32>
    %365 = vector.extract_strided_slice %279 {offsets = [0, 0, 0], sizes = [1, 32, 32], strides = [1, 1, 1]} : vector<3x32x32xf32> to vector<1x32x32xf32>
    %366 = vector.shape_cast %365 : vector<1x32x32xf32> to vector<32x32xf32>
    %cst_135 = arith.constant dense<0.000000e+00> : vector<8x32xf32>
    %367 = tpu.matmul %364, %366, %cst_135 {dimension_numbers = #tpu.dot_dimension_numbers<[1], [0], [0], [1], [0, 0, 1, 1], [], []>} : vector<8x32xf32>, vector<32x32xf32>, vector<8x32xf32> -> vector<8x32xf32>
    %368 = vector.extract_strided_slice %363 {offsets = [1, 0], sizes = [8, 32], strides = [1, 1]} : vector<10x32xf32> to vector<8x32xf32>
    %369 = vector.extract_strided_slice %279 {offsets = [1, 0, 0], sizes = [1, 32, 32], strides = [1, 1, 1]} : vector<3x32x32xf32> to vector<1x32x32xf32>
    %370 = vector.shape_cast %369 : vector<1x32x32xf32> to vector<32x32xf32>
    %cst_136 = arith.constant dense<0.000000e+00> : vector<8x32xf32>
    %371 = tpu.matmul %368, %370, %cst_136 {dimension_numbers = #tpu.dot_dimension_numbers<[1], [0], [0], [1], [0, 0, 1, 1], [], []>} : vector<8x32xf32>, vector<32x32xf32>, vector<8x32xf32> -> vector<8x32xf32>
    %372 = arith.addf %367, %371 : vector<8x32xf32>
    %373 = vector.extract_strided_slice %363 {offsets = [2, 0], sizes = [8, 32], strides = [1, 1]} : vector<10x32xf32> to vector<8x32xf32>
    %374 = vector.extract_strided_slice %279 {offsets = [2, 0, 0], sizes = [1, 32, 32], strides = [1, 1, 1]} : vector<3x32x32xf32> to vector<1x32x32xf32>
    %375 = vector.shape_cast %374 : vector<1x32x32xf32> to vector<32x32xf32>
    %cst_137 = arith.constant dense<0.000000e+00> : vector<8x32xf32>
    %376 = tpu.matmul %373, %375, %cst_137 {dimension_numbers = #tpu.dot_dimension_numbers<[1], [0], [0], [1], [0, 0, 1, 1], [], []>} : vector<8x32xf32>, vector<32x32xf32>, vector<8x32xf32> -> vector<8x32xf32>
    %377 = arith.addf %372, %376 : vector<8x32xf32>
    %378 = tpu.concatenate %361, %377 in 0 : vector<8x32xf32>, vector<8x32xf32> -> vector<16x32xf32>
    %379 = vector.broadcast %280 : vector<1x32xf32> to vector<16x32xf32>
    %380 = arith.addf %378, %379 : vector<16x32xf32>
    %cst_138 = arith.constant 0.000000e+00 : f32
    %381 = vector.broadcast %cst_138 : f32 to vector<16x32xf32>
    %382 = arith.maximumf %380, %381 : vector<16x32xf32>
    %cst_139 = arith.constant dense<0.000000e+00> : vector<16xf32>
    %383 = vector.multi_reduction <add>, %382, %cst_139 [1] : vector<16x32xf32> to vector<16xf32>
    %384 = vector.shape_cast %383 : vector<16xf32> to vector<16x1xf32>
    %cst_140 = arith.constant 3.200000e+01 : f32
    %385 = vector.broadcast %cst_140 : f32 to vector<16x1xf32>
    %386 = arith.divf %384, %385 : vector<16x1xf32>
    %387 = vector.broadcast %386 : vector<16x1xf32> to vector<16x32xf32>
    %388 = arith.subf %382, %387 : vector<16x32xf32>
    %389 = arith.mulf %388, %388 : vector<16x32xf32>
    %cst_141 = arith.constant dense<0.000000e+00> : vector<16xf32>
    %390 = vector.multi_reduction <add>, %389, %cst_141 [1] : vector<16x32xf32> to vector<16xf32>
    %391 = vector.shape_cast %390 : vector<16xf32> to vector<16x1xf32>
    %cst_142 = arith.constant 3.200000e+01 : f32
    %392 = vector.broadcast %cst_142 : f32 to vector<16x1xf32>
    %393 = arith.divf %391, %392 : vector<16x1xf32>
    %394 = vector.broadcast %386 : vector<16x1xf32> to vector<16x32xf32>
    %395 = arith.subf %382, %394 : vector<16x32xf32>
    %cst_143 = arith.constant 9.99999974E-6 : f32
    %396 = vector.broadcast %cst_143 : f32 to vector<16x1xf32>
    %397 = arith.addf %393, %396 : vector<16x1xf32>
    %398 = math.rsqrt %397 : vector<16x1xf32>
    %399 = vector.broadcast %398 : vector<16x1xf32> to vector<16x32xf32>
    %400 = arith.mulf %395, %399 : vector<16x32xf32>
    %401 = vector.broadcast %281 : vector<1x32xf32> to vector<16x32xf32>
    %402 = arith.mulf %400, %401 : vector<16x32xf32>
    %403 = vector.broadcast %282 : vector<1x32xf32> to vector<16x32xf32>
    %404 = arith.addf %402, %403 : vector<16x32xf32>
    %cst_144 = arith.constant dense<0.000000e+00> : vector<16x1xf32>
    %405 = tpu.matmul %404, %283, %cst_144 {dimension_numbers = #tpu.dot_dimension_numbers<[1], [0], [0], [1], [0, 0, 1, 1], [], []>} : vector<16x32xf32>, vector<32x1xf32>, vector<16x1xf32> -> vector<16x1xf32>
    %406 = vector.broadcast %284 : vector<1x1xf32> to vector<16x1xf32>
    %407 = arith.addf %405, %406 : vector<16x1xf32>
    %cst_145 = arith.constant 0.000000e+00 : f32
    %408 = vector.broadcast %cst_145 : f32 to vector<16x1xf32>
    %409 = arith.maximumf %407, %408 : vector<16x1xf32>
    %410 = vector.shape_cast %409 : vector<16x1xf32> to vector<2x8x1xf32>
    %c0_146 = arith.constant 0 : index
    %c0_147 = arith.constant 0 : index
    %c0_148 = arith.constant 0 : index
    %411 = vector.load %arg27[%c0_146, %c0_147, %c0_148] : memref<2x8x1xf32, #tpu.memory_space<vmem>>, vector<2x8x1xf32>
    tpu.vector_store %arg27[%c0_146, %c0_147, %c0_148], %410 {strides = array<i32>} : memref<2x8x1xf32, #tpu.memory_space<vmem>>, vector<2x8x1xf32>,
    return
  }
  func.func @transform_0(%arg0: i32) -> (i32, i32, i32) {
    %c0_i32 = arith.constant 0 : i32
    %c0_i32_0 = arith.constant 0 : i32
    %c0_i32_1 = arith.constant 0 : i32
    return %arg0, %c0_i32, %c0_i32_0 : i32, i32, i32
  }
  func.func @transform_1(%arg0: i32) -> (i32, i32, i32) {
    %c0_i32 = arith.constant 0 : i32
    %c0_i32_0 = arith.constant 0 : i32
    %c0_i32_1 = arith.constant 0 : i32
    return %arg0, %c0_i32, %c0_i32_0 : i32, i32, i32
  }
  func.func @transform_2(%arg0: i32) -> (i32, i32, i32) {
    %c0_i32 = arith.constant 0 : i32
    %c0_i32_0 = arith.constant 0 : i32
    %c0_i32_1 = arith.constant 0 : i32
    return %arg0, %c0_i32, %c0_i32_0 : i32, i32, i32
  }
  func.func @transform_3(%arg0: i32) -> (i32, i32) {
    %c0_i32 = arith.constant 0 : i32
    %c0_i32_0 = arith.constant 0 : i32
    %c0_i32_1 = arith.constant 0 : i32
    return %c0_i32, %c0_i32_0 : i32, i32
  }
  func.func @transform_4(%arg0: i32) -> (i32, i32) {
    %c0_i32 = arith.constant 0 : i32
    %c0_i32_0 = arith.constant 0 : i32
    %c0_i32_1 = arith.constant 0 : i32
    return %c0_i32, %c0_i32_0 : i32, i32
  }
  func.func @transform_5(%arg0: i32) -> (i32, i32) {
    %c0_i32 = arith.constant 0 : i32
    %c0_i32_0 = arith.constant 0 : i32
    %c0_i32_1 = arith.constant 0 : i32
    return %c0_i32, %c0_i32_0 : i32, i32
  }
  func.func @transform_6(%arg0: i32) -> (i32, i32) {
    %c0_i32 = arith.constant 0 : i32
    %c0_i32_0 = arith.constant 0 : i32
    %c0_i32_1 = arith.constant 0 : i32
    return %c0_i32, %c0_i32_0 : i32, i32
  }
  func.func @transform_7(%arg0: i32) -> (i32, i32) {
    %c0_i32 = arith.constant 0 : i32
    %c0_i32_0 = arith.constant 0 : i32
    %c0_i32_1 = arith.constant 0 : i32
    return %c0_i32, %c0_i32_0 : i32, i32
  }
  func.func @transform_8(%arg0: i32) -> (i32, i32) {
    %c0_i32 = arith.constant 0 : i32
    %c0_i32_0 = arith.constant 0 : i32
    %c0_i32_1 = arith.constant 0 : i32
    return %c0_i32, %c0_i32_0 : i32, i32
  }
  func.func @transform_9(%arg0: i32) -> (i32, i32, i32) {
    %c0_i32 = arith.constant 0 : i32
    %c0_i32_0 = arith.constant 0 : i32
    %c0_i32_1 = arith.constant 0 : i32
    %c0_i32_2 = arith.constant 0 : i32
    return %c0_i32, %c0_i32_0, %c0_i32_1 : i32, i32, i32
  }
  func.func @transform_10(%arg0: i32) -> (i32, i32) {
    %c0_i32 = arith.constant 0 : i32
    %c0_i32_0 = arith.constant 0 : i32
    %c0_i32_1 = arith.constant 0 : i32
    return %c0_i32, %c0_i32_0 : i32, i32
  }
  func.func @transform_11(%arg0: i32) -> (i32, i32, i32) {
    %c0_i32 = arith.constant 0 : i32
    %c0_i32_0 = arith.constant 0 : i32
    %c0_i32_1 = arith.constant 0 : i32
    %c0_i32_2 = arith.constant 0 : i32
    return %c0_i32, %c0_i32_0, %c0_i32_1 : i32, i32, i32
  }
  func.func @transform_12(%arg0: i32) -> (i32, i32) {
    %c0_i32 = arith.constant 0 : i32
    %c0_i32_0 = arith.constant 0 : i32
    %c0_i32_1 = arith.constant 0 : i32
    return %c0_i32, %c0_i32_0 : i32, i32
  }
  func.func @transform_13(%arg0: i32) -> (i32, i32) {
    %c0_i32 = arith.constant 0 : i32
    %c0_i32_0 = arith.constant 0 : i32
    %c0_i32_1 = arith.constant 0 : i32
    return %c0_i32, %c0_i32_0 : i32, i32
  }
  func.func @transform_14(%arg0: i32) -> (i32, i32) {
    %c0_i32 = arith.constant 0 : i32
    %c0_i32_0 = arith.constant 0 : i32
    %c0_i32_1 = arith.constant 0 : i32
    return %c0_i32, %c0_i32_0 : i32, i32
  }
  func.func @transform_15(%arg0: i32) -> (i32, i32, i32) {
    %c0_i32 = arith.constant 0 : i32
    %c0_i32_0 = arith.constant 0 : i32
    %c0_i32_1 = arith.constant 0 : i32
    %c0_i32_2 = arith.constant 0 : i32
    return %c0_i32, %c0_i32_0, %c0_i32_1 : i32, i32, i32
  }
  func.func @transform_16(%arg0: i32) -> (i32, i32) {
    %c0_i32 = arith.constant 0 : i32
    %c0_i32_0 = arith.constant 0 : i32
    %c0_i32_1 = arith.constant 0 : i32
    return %c0_i32, %c0_i32_0 : i32, i32
  }
  func.func @transform_17(%arg0: i32) -> (i32, i32) {
    %c0_i32 = arith.constant 0 : i32
    %c0_i32_0 = arith.constant 0 : i32
    %c0_i32_1 = arith.constant 0 : i32
    return %c0_i32, %c0_i32_0 : i32, i32
  }
  func.func @transform_18(%arg0: i32) -> (i32, i32) {
    %c0_i32 = arith.constant 0 : i32
    %c0_i32_0 = arith.constant 0 : i32
    %c0_i32_1 = arith.constant 0 : i32
    return %c0_i32, %c0_i32_0 : i32, i32
  }
  func.func @transform_19(%arg0: i32) -> (i32, i32, i32) {
    %c0_i32 = arith.constant 0 : i32
    %c0_i32_0 = arith.constant 0 : i32
    %c0_i32_1 = arith.constant 0 : i32
    %c0_i32_2 = arith.constant 0 : i32
    return %c0_i32, %c0_i32_0, %c0_i32_1 : i32, i32, i32
  }
  func.func @transform_20(%arg0: i32) -> (i32, i32) {
    %c0_i32 = arith.constant 0 : i32
    %c0_i32_0 = arith.constant 0 : i32
    %c0_i32_1 = arith.constant 0 : i32
    return %c0_i32, %c0_i32_0 : i32, i32
  }
  func.func @transform_21(%arg0: i32) -> (i32, i32) {
    %c0_i32 = arith.constant 0 : i32
    %c0_i32_0 = arith.constant 0 : i32
    %c0_i32_1 = arith.constant 0 : i32
    return %c0_i32, %c0_i32_0 : i32, i32
  }
  func.func @transform_22(%arg0: i32) -> (i32, i32) {
    %c0_i32 = arith.constant 0 : i32
    %c0_i32_0 = arith.constant 0 : i32
    %c0_i32_1 = arith.constant 0 : i32
    return %c0_i32, %c0_i32_0 : i32, i32
  }
  func.func @transform_23(%arg0: i32) -> (i32, i32) {
    %c0_i32 = arith.constant 0 : i32
    %c0_i32_0 = arith.constant 0 : i32
    %c0_i32_1 = arith.constant 0 : i32
    return %c0_i32, %c0_i32_0 : i32, i32
  }
  func.func @transform_24(%arg0: i32) -> (i32, i32) {
    %c0_i32 = arith.constant 0 : i32
    %c0_i32_0 = arith.constant 0 : i32
    %c0_i32_1 = arith.constant 0 : i32
    return %c0_i32, %c0_i32_0 : i32, i32
  }
  func.func @transform_25(%arg0: i32) -> (i32, i32, i32) {
    %c0_i32 = arith.constant 0 : i32
    %c0_i32_0 = arith.constant 0 : i32
    %c0_i32_1 = arith.constant 0 : i32
    return %arg0, %c0_i32, %c0_i32_0 : i32, i32, i32
  }
  func.func @transform_26(%arg0: i32) -> (i32, i32, i32) {
    %c0_i32 = arith.constant 0 : i32
    %c0_i32_0 = arith.constant 0 : i32
    %c0_i32_1 = arith.constant 0 : i32
    return %arg0, %c0_i32, %c0_i32_0 : i32, i32, i32
  }
}

module attributes {stable_mosaic.version = 11 : i64} {
  func.func @_pitch_energy_kernel(%arg0: i32, %arg1: memref<2x16x32xf32, #tpu.memory_space<vmem>>, %arg2: memref<3x32x32xf32, #tpu.memory_space<vmem>>, %arg3: memref<1x32xf32, #tpu.memory_space<vmem>>, %arg4: memref<1x32xf32, #tpu.memory_space<vmem>>, %arg5: memref<1x32xf32, #tpu.memory_space<vmem>>, %arg6: memref<3x32x32xf32, #tpu.memory_space<vmem>>, %arg7: memref<1x32xf32, #tpu.memory_space<vmem>>, %arg8: memref<1x32xf32, #tpu.memory_space<vmem>>, %arg9: memref<1x32xf32, #tpu.memory_space<vmem>>, %arg10: memref<32x1xf32, #tpu.memory_space<vmem>>, %arg11: memref<1x1xf32, #tpu.memory_space<vmem>>, %arg12: memref<3x32x32xf32, #tpu.memory_space<vmem>>, %arg13: memref<1x32xf32, #tpu.memory_space<vmem>>, %arg14: memref<1x32xf32, #tpu.memory_space<vmem>>, %arg15: memref<1x32xf32, #tpu.memory_space<vmem>>, %arg16: memref<3x32x32xf32, #tpu.memory_space<vmem>>, %arg17: memref<1x32xf32, #tpu.memory_space<vmem>>, %arg18: memref<1x32xf32, #tpu.memory_space<vmem>>, %arg19: memref<1x32xf32, #tpu.memory_space<vmem>>, %arg20: memref<32x1xf32, #tpu.memory_space<vmem>>, %arg21: memref<1x1xf32, #tpu.memory_space<vmem>>, %arg22: memref<2x16x2xf32, #tpu.memory_space<vmem>>) attributes {dimension_semantics = [#tpu.dimension_semantics<parallel>], iteration_bounds = array<i64: 1>, scalar_prefetch = 0 : i64, scratch_operands = 0 : i64, tpu.core_type = #tpu.core_type<tc>, window_params = [{transform_indices = @transform_0, window_bounds = array<i64: 2, 16, 32>}, {pipeline_mode = #tpu.pipeline_mode<synchronous>, transform_indices = @transform_1, window_bounds = array<i64: 3, 32, 32>}, {pipeline_mode = #tpu.pipeline_mode<synchronous>, transform_indices = @transform_2, window_bounds = array<i64: 1, 32>}, {pipeline_mode = #tpu.pipeline_mode<synchronous>, transform_indices = @transform_3, window_bounds = array<i64: 1, 32>}, {pipeline_mode = #tpu.pipeline_mode<synchronous>, transform_indices = @transform_4, window_bounds = array<i64: 1, 32>}, {pipeline_mode = #tpu.pipeline_mode<synchronous>, transform_indices = @transform_5, window_bounds = array<i64: 3, 32, 32>}, {pipeline_mode = #tpu.pipeline_mode<synchronous>, transform_indices = @transform_6, window_bounds = array<i64: 1, 32>}, {pipeline_mode = #tpu.pipeline_mode<synchronous>, transform_indices = @transform_7, window_bounds = array<i64: 1, 32>}, {pipeline_mode = #tpu.pipeline_mode<synchronous>, transform_indices = @transform_8, window_bounds = array<i64: 1, 32>}, {pipeline_mode = #tpu.pipeline_mode<synchronous>, transform_indices = @transform_9, window_bounds = array<i64: 32, 1>}, {pipeline_mode = #tpu.pipeline_mode<synchronous>, transform_indices = @transform_10, window_bounds = array<i64: 1, 1>}, {pipeline_mode = #tpu.pipeline_mode<synchronous>, transform_indices = @transform_11, window_bounds = array<i64: 3, 32, 32>}, {pipeline_mode = #tpu.pipeline_mode<synchronous>, transform_indices = @transform_12, window_bounds = array<i64: 1, 32>}, {pipeline_mode = #tpu.pipeline_mode<synchronous>, transform_indices = @transform_13, window_bounds = array<i64: 1, 32>}, {pipeline_mode = #tpu.pipeline_mode<synchronous>, transform_indices = @transform_14, window_bounds = array<i64: 1, 32>}, {pipeline_mode = #tpu.pipeline_mode<synchronous>, transform_indices = @transform_15, window_bounds = array<i64: 3, 32, 32>}, {pipeline_mode = #tpu.pipeline_mode<synchronous>, transform_indices = @transform_16, window_bounds = array<i64: 1, 32>}, {pipeline_mode = #tpu.pipeline_mode<synchronous>, transform_indices = @transform_17, window_bounds = array<i64: 1, 32>}, {pipeline_mode = #tpu.pipeline_mode<synchronous>, transform_indices = @transform_18, window_bounds = array<i64: 1, 32>}, {pipeline_mode = #tpu.pipeline_mode<synchronous>, transform_indices = @transform_19, window_bounds = array<i64: 32, 1>}, {pipeline_mode = #tpu.pipeline_mode<synchronous>, transform_indices = @transform_20, window_bounds = array<i64: 1, 1>}, {transform_indices = @transform_21, window_bounds = array<i64: 2, 16, 2>}]} {
    %c0 = arith.constant 0 : index
    %c0_0 = arith.constant 0 : index
    %c0_1 = arith.constant 0 : index
    %0 = vector.load %arg1[%c0, %c0_0, %c0_1] : memref<2x16x32xf32, #tpu.memory_space<vmem>>, vector<2x16x32xf32>
    %1 = vector.shape_cast %0 : vector<2x16x32xf32> to vector<32x32xf32>
    %c0_2 = arith.constant 0 : index
    %c0_3 = arith.constant 0 : index
    %c0_4 = arith.constant 0 : index
    %2 = vector.load %arg2[%c0_2, %c0_3, %c0_4] : memref<3x32x32xf32, #tpu.memory_space<vmem>>, vector<3x32x32xf32>
    %c0_5 = arith.constant 0 : index
    %c0_6 = arith.constant 0 : index
    %3 = vector.load %arg3[%c0_5, %c0_6] : memref<1x32xf32, #tpu.memory_space<vmem>>, vector<1x32xf32>
    %c0_7 = arith.constant 0 : index
    %c0_8 = arith.constant 0 : index
    %4 = vector.load %arg4[%c0_7, %c0_8] : memref<1x32xf32, #tpu.memory_space<vmem>>, vector<1x32xf32>
    %c0_9 = arith.constant 0 : index
    %c0_10 = arith.constant 0 : index
    %5 = vector.load %arg5[%c0_9, %c0_10] : memref<1x32xf32, #tpu.memory_space<vmem>>, vector<1x32xf32>
    %c0_11 = arith.constant 0 : index
    %c0_12 = arith.constant 0 : index
    %c0_13 = arith.constant 0 : index
    %6 = vector.load %arg6[%c0_11, %c0_12, %c0_13] : memref<3x32x32xf32, #tpu.memory_space<vmem>>, vector<3x32x32xf32>
    %c0_14 = arith.constant 0 : index
    %c0_15 = arith.constant 0 : index
    %7 = vector.load %arg7[%c0_14, %c0_15] : memref<1x32xf32, #tpu.memory_space<vmem>>, vector<1x32xf32>
    %c0_16 = arith.constant 0 : index
    %c0_17 = arith.constant 0 : index
    %8 = vector.load %arg8[%c0_16, %c0_17] : memref<1x32xf32, #tpu.memory_space<vmem>>, vector<1x32xf32>
    %c0_18 = arith.constant 0 : index
    %c0_19 = arith.constant 0 : index
    %9 = vector.load %arg9[%c0_18, %c0_19] : memref<1x32xf32, #tpu.memory_space<vmem>>, vector<1x32xf32>
    %c0_20 = arith.constant 0 : index
    %c0_21 = arith.constant 0 : index
    %10 = vector.load %arg10[%c0_20, %c0_21] : memref<32x1xf32, #tpu.memory_space<vmem>>, vector<32x1xf32>
    %c0_22 = arith.constant 0 : index
    %c0_23 = arith.constant 0 : index
    %11 = vector.load %arg11[%c0_22, %c0_23] : memref<1x1xf32, #tpu.memory_space<vmem>>, vector<1x1xf32>
    %cst = arith.constant 0.000000e+00 : f32
    %12 = vector.broadcast %cst : f32 to vector<1x32xf32>
    %13 = vector.extract_strided_slice %1 {offsets = [0, 0], sizes = [16, 32], strides = [1, 1]} : vector<32x32xf32> to vector<16x32xf32>
    %14 = tpu.concatenate %12, %13, %12 in 0 : vector<1x32xf32>, vector<16x32xf32>, vector<1x32xf32> -> vector<18x32xf32>
    %15 = vector.extract_strided_slice %14 {offsets = [0, 0], sizes = [16, 32], strides = [1, 1]} : vector<18x32xf32> to vector<16x32xf32>
    %16 = vector.extract_strided_slice %2 {offsets = [0, 0, 0], sizes = [1, 32, 32], strides = [1, 1, 1]} : vector<3x32x32xf32> to vector<1x32x32xf32>
    %17 = vector.shape_cast %16 : vector<1x32x32xf32> to vector<32x32xf32>
    %cst_24 = arith.constant dense<0.000000e+00> : vector<16x32xf32>
    %18 = tpu.matmul %15, %17, %cst_24 {dimension_numbers = #tpu.dot_dimension_numbers<[1], [0], [0], [1], [0, 0, 1, 1], [], []>} : vector<16x32xf32>, vector<32x32xf32>, vector<16x32xf32> -> vector<16x32xf32>
    %19 = vector.extract_strided_slice %14 {offsets = [1, 0], sizes = [16, 32], strides = [1, 1]} : vector<18x32xf32> to vector<16x32xf32>
    %20 = vector.extract_strided_slice %2 {offsets = [1, 0, 0], sizes = [1, 32, 32], strides = [1, 1, 1]} : vector<3x32x32xf32> to vector<1x32x32xf32>
    %21 = vector.shape_cast %20 : vector<1x32x32xf32> to vector<32x32xf32>
    %cst_25 = arith.constant dense<0.000000e+00> : vector<16x32xf32>
    %22 = tpu.matmul %19, %21, %cst_25 {dimension_numbers = #tpu.dot_dimension_numbers<[1], [0], [0], [1], [0, 0, 1, 1], [], []>} : vector<16x32xf32>, vector<32x32xf32>, vector<16x32xf32> -> vector<16x32xf32>
    %23 = arith.addf %18, %22 : vector<16x32xf32>
    %24 = vector.extract_strided_slice %14 {offsets = [2, 0], sizes = [16, 32], strides = [1, 1]} : vector<18x32xf32> to vector<16x32xf32>
    %25 = vector.extract_strided_slice %2 {offsets = [2, 0, 0], sizes = [1, 32, 32], strides = [1, 1, 1]} : vector<3x32x32xf32> to vector<1x32x32xf32>
    %26 = vector.shape_cast %25 : vector<1x32x32xf32> to vector<32x32xf32>
    %cst_26 = arith.constant dense<0.000000e+00> : vector<16x32xf32>
    %27 = tpu.matmul %24, %26, %cst_26 {dimension_numbers = #tpu.dot_dimension_numbers<[1], [0], [0], [1], [0, 0, 1, 1], [], []>} : vector<16x32xf32>, vector<32x32xf32>, vector<16x32xf32> -> vector<16x32xf32>
    %28 = arith.addf %23, %27 : vector<16x32xf32>
    %29 = vector.extract_strided_slice %1 {offsets = [16, 0], sizes = [16, 32], strides = [1, 1]} : vector<32x32xf32> to vector<16x32xf32>
    %30 = tpu.concatenate %12, %29, %12 in 0 : vector<1x32xf32>, vector<16x32xf32>, vector<1x32xf32> -> vector<18x32xf32>
    %31 = vector.extract_strided_slice %30 {offsets = [0, 0], sizes = [16, 32], strides = [1, 1]} : vector<18x32xf32> to vector<16x32xf32>
    %32 = vector.extract_strided_slice %2 {offsets = [0, 0, 0], sizes = [1, 32, 32], strides = [1, 1, 1]} : vector<3x32x32xf32> to vector<1x32x32xf32>
    %33 = vector.shape_cast %32 : vector<1x32x32xf32> to vector<32x32xf32>
    %cst_27 = arith.constant dense<0.000000e+00> : vector<16x32xf32>
    %34 = tpu.matmul %31, %33, %cst_27 {dimension_numbers = #tpu.dot_dimension_numbers<[1], [0], [0], [1], [0, 0, 1, 1], [], []>} : vector<16x32xf32>, vector<32x32xf32>, vector<16x32xf32> -> vector<16x32xf32>
    %35 = vector.extract_strided_slice %30 {offsets = [1, 0], sizes = [16, 32], strides = [1, 1]} : vector<18x32xf32> to vector<16x32xf32>
    %36 = vector.extract_strided_slice %2 {offsets = [1, 0, 0], sizes = [1, 32, 32], strides = [1, 1, 1]} : vector<3x32x32xf32> to vector<1x32x32xf32>
    %37 = vector.shape_cast %36 : vector<1x32x32xf32> to vector<32x32xf32>
    %cst_28 = arith.constant dense<0.000000e+00> : vector<16x32xf32>
    %38 = tpu.matmul %35, %37, %cst_28 {dimension_numbers = #tpu.dot_dimension_numbers<[1], [0], [0], [1], [0, 0, 1, 1], [], []>} : vector<16x32xf32>, vector<32x32xf32>, vector<16x32xf32> -> vector<16x32xf32>
    %39 = arith.addf %34, %38 : vector<16x32xf32>
    %40 = vector.extract_strided_slice %30 {offsets = [2, 0], sizes = [16, 32], strides = [1, 1]} : vector<18x32xf32> to vector<16x32xf32>
    %41 = vector.extract_strided_slice %2 {offsets = [2, 0, 0], sizes = [1, 32, 32], strides = [1, 1, 1]} : vector<3x32x32xf32> to vector<1x32x32xf32>
    %42 = vector.shape_cast %41 : vector<1x32x32xf32> to vector<32x32xf32>
    %cst_29 = arith.constant dense<0.000000e+00> : vector<16x32xf32>
    %43 = tpu.matmul %40, %42, %cst_29 {dimension_numbers = #tpu.dot_dimension_numbers<[1], [0], [0], [1], [0, 0, 1, 1], [], []>} : vector<16x32xf32>, vector<32x32xf32>, vector<16x32xf32> -> vector<16x32xf32>
    %44 = arith.addf %39, %43 : vector<16x32xf32>
    %45 = tpu.concatenate %28, %44 in 0 : vector<16x32xf32>, vector<16x32xf32> -> vector<32x32xf32>
    %46 = vector.broadcast %3 : vector<1x32xf32> to vector<32x32xf32>
    %47 = arith.addf %45, %46 : vector<32x32xf32>
    %cst_30 = arith.constant 0.000000e+00 : f32
    %48 = vector.broadcast %cst_30 : f32 to vector<32x32xf32>
    %49 = arith.maximumf %47, %48 : vector<32x32xf32>
    %cst_31 = arith.constant dense<0.000000e+00> : vector<32xf32>
    %50 = vector.multi_reduction <add>, %49, %cst_31 [1] : vector<32x32xf32> to vector<32xf32>
    %51 = vector.shape_cast %50 : vector<32xf32> to vector<32x1xf32>
    %cst_32 = arith.constant 3.200000e+01 : f32
    %52 = vector.broadcast %cst_32 : f32 to vector<32x1xf32>
    %53 = arith.divf %51, %52 : vector<32x1xf32>
    %54 = vector.broadcast %53 : vector<32x1xf32> to vector<32x32xf32>
    %55 = arith.subf %49, %54 : vector<32x32xf32>
    %56 = arith.mulf %55, %55 : vector<32x32xf32>
    %cst_33 = arith.constant dense<0.000000e+00> : vector<32xf32>
    %57 = vector.multi_reduction <add>, %56, %cst_33 [1] : vector<32x32xf32> to vector<32xf32>
    %58 = vector.shape_cast %57 : vector<32xf32> to vector<32x1xf32>
    %cst_34 = arith.constant 3.200000e+01 : f32
    %59 = vector.broadcast %cst_34 : f32 to vector<32x1xf32>
    %60 = arith.divf %58, %59 : vector<32x1xf32>
    %61 = vector.broadcast %53 : vector<32x1xf32> to vector<32x32xf32>
    %62 = arith.subf %49, %61 : vector<32x32xf32>
    %cst_35 = arith.constant 9.99999974E-6 : f32
    %63 = vector.broadcast %cst_35 : f32 to vector<32x1xf32>
    %64 = arith.addf %60, %63 : vector<32x1xf32>
    %65 = math.rsqrt %64 : vector<32x1xf32>
    %66 = vector.broadcast %65 : vector<32x1xf32> to vector<32x32xf32>
    %67 = arith.mulf %62, %66 : vector<32x32xf32>
    %68 = vector.broadcast %4 : vector<1x32xf32> to vector<32x32xf32>
    %69 = arith.mulf %67, %68 : vector<32x32xf32>
    %70 = vector.broadcast %5 : vector<1x32xf32> to vector<32x32xf32>
    %71 = arith.addf %69, %70 : vector<32x32xf32>
    %cst_36 = arith.constant 0.000000e+00 : f32
    %72 = vector.broadcast %cst_36 : f32 to vector<1x32xf32>
    %73 = vector.extract_strided_slice %71 {offsets = [0, 0], sizes = [16, 32], strides = [1, 1]} : vector<32x32xf32> to vector<16x32xf32>
    %74 = tpu.concatenate %72, %73, %72 in 0 : vector<1x32xf32>, vector<16x32xf32>, vector<1x32xf32> -> vector<18x32xf32>
    %75 = vector.extract_strided_slice %74 {offsets = [0, 0], sizes = [16, 32], strides = [1, 1]} : vector<18x32xf32> to vector<16x32xf32>
    %76 = vector.extract_strided_slice %6 {offsets = [0, 0, 0], sizes = [1, 32, 32], strides = [1, 1, 1]} : vector<3x32x32xf32> to vector<1x32x32xf32>
    %77 = vector.shape_cast %76 : vector<1x32x32xf32> to vector<32x32xf32>
    %cst_37 = arith.constant dense<0.000000e+00> : vector<16x32xf32>
    %78 = tpu.matmul %75, %77, %cst_37 {dimension_numbers = #tpu.dot_dimension_numbers<[1], [0], [0], [1], [0, 0, 1, 1], [], []>} : vector<16x32xf32>, vector<32x32xf32>, vector<16x32xf32> -> vector<16x32xf32>
    %79 = vector.extract_strided_slice %74 {offsets = [1, 0], sizes = [16, 32], strides = [1, 1]} : vector<18x32xf32> to vector<16x32xf32>
    %80 = vector.extract_strided_slice %6 {offsets = [1, 0, 0], sizes = [1, 32, 32], strides = [1, 1, 1]} : vector<3x32x32xf32> to vector<1x32x32xf32>
    %81 = vector.shape_cast %80 : vector<1x32x32xf32> to vector<32x32xf32>
    %cst_38 = arith.constant dense<0.000000e+00> : vector<16x32xf32>
    %82 = tpu.matmul %79, %81, %cst_38 {dimension_numbers = #tpu.dot_dimension_numbers<[1], [0], [0], [1], [0, 0, 1, 1], [], []>} : vector<16x32xf32>, vector<32x32xf32>, vector<16x32xf32> -> vector<16x32xf32>
    %83 = arith.addf %78, %82 : vector<16x32xf32>
    %84 = vector.extract_strided_slice %74 {offsets = [2, 0], sizes = [16, 32], strides = [1, 1]} : vector<18x32xf32> to vector<16x32xf32>
    %85 = vector.extract_strided_slice %6 {offsets = [2, 0, 0], sizes = [1, 32, 32], strides = [1, 1, 1]} : vector<3x32x32xf32> to vector<1x32x32xf32>
    %86 = vector.shape_cast %85 : vector<1x32x32xf32> to vector<32x32xf32>
    %cst_39 = arith.constant dense<0.000000e+00> : vector<16x32xf32>
    %87 = tpu.matmul %84, %86, %cst_39 {dimension_numbers = #tpu.dot_dimension_numbers<[1], [0], [0], [1], [0, 0, 1, 1], [], []>} : vector<16x32xf32>, vector<32x32xf32>, vector<16x32xf32> -> vector<16x32xf32>
    %88 = arith.addf %83, %87 : vector<16x32xf32>
    %89 = vector.extract_strided_slice %71 {offsets = [16, 0], sizes = [16, 32], strides = [1, 1]} : vector<32x32xf32> to vector<16x32xf32>
    %90 = tpu.concatenate %72, %89, %72 in 0 : vector<1x32xf32>, vector<16x32xf32>, vector<1x32xf32> -> vector<18x32xf32>
    %91 = vector.extract_strided_slice %90 {offsets = [0, 0], sizes = [16, 32], strides = [1, 1]} : vector<18x32xf32> to vector<16x32xf32>
    %92 = vector.extract_strided_slice %6 {offsets = [0, 0, 0], sizes = [1, 32, 32], strides = [1, 1, 1]} : vector<3x32x32xf32> to vector<1x32x32xf32>
    %93 = vector.shape_cast %92 : vector<1x32x32xf32> to vector<32x32xf32>
    %cst_40 = arith.constant dense<0.000000e+00> : vector<16x32xf32>
    %94 = tpu.matmul %91, %93, %cst_40 {dimension_numbers = #tpu.dot_dimension_numbers<[1], [0], [0], [1], [0, 0, 1, 1], [], []>} : vector<16x32xf32>, vector<32x32xf32>, vector<16x32xf32> -> vector<16x32xf32>
    %95 = vector.extract_strided_slice %90 {offsets = [1, 0], sizes = [16, 32], strides = [1, 1]} : vector<18x32xf32> to vector<16x32xf32>
    %96 = vector.extract_strided_slice %6 {offsets = [1, 0, 0], sizes = [1, 32, 32], strides = [1, 1, 1]} : vector<3x32x32xf32> to vector<1x32x32xf32>
    %97 = vector.shape_cast %96 : vector<1x32x32xf32> to vector<32x32xf32>
    %cst_41 = arith.constant dense<0.000000e+00> : vector<16x32xf32>
    %98 = tpu.matmul %95, %97, %cst_41 {dimension_numbers = #tpu.dot_dimension_numbers<[1], [0], [0], [1], [0, 0, 1, 1], [], []>} : vector<16x32xf32>, vector<32x32xf32>, vector<16x32xf32> -> vector<16x32xf32>
    %99 = arith.addf %94, %98 : vector<16x32xf32>
    %100 = vector.extract_strided_slice %90 {offsets = [2, 0], sizes = [16, 32], strides = [1, 1]} : vector<18x32xf32> to vector<16x32xf32>
    %101 = vector.extract_strided_slice %6 {offsets = [2, 0, 0], sizes = [1, 32, 32], strides = [1, 1, 1]} : vector<3x32x32xf32> to vector<1x32x32xf32>
    %102 = vector.shape_cast %101 : vector<1x32x32xf32> to vector<32x32xf32>
    %cst_42 = arith.constant dense<0.000000e+00> : vector<16x32xf32>
    %103 = tpu.matmul %100, %102, %cst_42 {dimension_numbers = #tpu.dot_dimension_numbers<[1], [0], [0], [1], [0, 0, 1, 1], [], []>} : vector<16x32xf32>, vector<32x32xf32>, vector<16x32xf32> -> vector<16x32xf32>
    %104 = arith.addf %99, %103 : vector<16x32xf32>
    %105 = tpu.concatenate %88, %104 in 0 : vector<16x32xf32>, vector<16x32xf32> -> vector<32x32xf32>
    %106 = vector.broadcast %7 : vector<1x32xf32> to vector<32x32xf32>
    %107 = arith.addf %105, %106 : vector<32x32xf32>
    %cst_43 = arith.constant 0.000000e+00 : f32
    %108 = vector.broadcast %cst_43 : f32 to vector<32x32xf32>
    %109 = arith.maximumf %107, %108 : vector<32x32xf32>
    %cst_44 = arith.constant dense<0.000000e+00> : vector<32xf32>
    %110 = vector.multi_reduction <add>, %109, %cst_44 [1] : vector<32x32xf32> to vector<32xf32>
    %111 = vector.shape_cast %110 : vector<32xf32> to vector<32x1xf32>
    %cst_45 = arith.constant 3.200000e+01 : f32
    %112 = vector.broadcast %cst_45 : f32 to vector<32x1xf32>
    %113 = arith.divf %111, %112 : vector<32x1xf32>
    %114 = vector.broadcast %113 : vector<32x1xf32> to vector<32x32xf32>
    %115 = arith.subf %109, %114 : vector<32x32xf32>
    %116 = arith.mulf %115, %115 : vector<32x32xf32>
    %cst_46 = arith.constant dense<0.000000e+00> : vector<32xf32>
    %117 = vector.multi_reduction <add>, %116, %cst_46 [1] : vector<32x32xf32> to vector<32xf32>
    %118 = vector.shape_cast %117 : vector<32xf32> to vector<32x1xf32>
    %cst_47 = arith.constant 3.200000e+01 : f32
    %119 = vector.broadcast %cst_47 : f32 to vector<32x1xf32>
    %120 = arith.divf %118, %119 : vector<32x1xf32>
    %121 = vector.broadcast %113 : vector<32x1xf32> to vector<32x32xf32>
    %122 = arith.subf %109, %121 : vector<32x32xf32>
    %cst_48 = arith.constant 9.99999974E-6 : f32
    %123 = vector.broadcast %cst_48 : f32 to vector<32x1xf32>
    %124 = arith.addf %120, %123 : vector<32x1xf32>
    %125 = math.rsqrt %124 : vector<32x1xf32>
    %126 = vector.broadcast %125 : vector<32x1xf32> to vector<32x32xf32>
    %127 = arith.mulf %122, %126 : vector<32x32xf32>
    %128 = vector.broadcast %8 : vector<1x32xf32> to vector<32x32xf32>
    %129 = arith.mulf %127, %128 : vector<32x32xf32>
    %130 = vector.broadcast %9 : vector<1x32xf32> to vector<32x32xf32>
    %131 = arith.addf %129, %130 : vector<32x32xf32>
    %cst_49 = arith.constant dense<0.000000e+00> : vector<32x1xf32>
    %132 = tpu.matmul %131, %10, %cst_49 {dimension_numbers = #tpu.dot_dimension_numbers<[1], [0], [0], [1], [0, 0, 1, 1], [], []>} : vector<32x32xf32>, vector<32x1xf32>, vector<32x1xf32> -> vector<32x1xf32>
    %133 = vector.broadcast %11 : vector<1x1xf32> to vector<32x1xf32>
    %134 = arith.addf %132, %133 : vector<32x1xf32>
    %cst_50 = arith.constant 0.000000e+00 : f32
    %135 = vector.broadcast %cst_50 : f32 to vector<32x1xf32>
    %136 = arith.maximumf %134, %135 : vector<32x1xf32>
    %c0_51 = arith.constant 0 : index
    %c0_52 = arith.constant 0 : index
    %c0_53 = arith.constant 0 : index
    %137 = vector.load %arg12[%c0_51, %c0_52, %c0_53] : memref<3x32x32xf32, #tpu.memory_space<vmem>>, vector<3x32x32xf32>
    %c0_54 = arith.constant 0 : index
    %c0_55 = arith.constant 0 : index
    %138 = vector.load %arg13[%c0_54, %c0_55] : memref<1x32xf32, #tpu.memory_space<vmem>>, vector<1x32xf32>
    %c0_56 = arith.constant 0 : index
    %c0_57 = arith.constant 0 : index
    %139 = vector.load %arg14[%c0_56, %c0_57] : memref<1x32xf32, #tpu.memory_space<vmem>>, vector<1x32xf32>
    %c0_58 = arith.constant 0 : index
    %c0_59 = arith.constant 0 : index
    %140 = vector.load %arg15[%c0_58, %c0_59] : memref<1x32xf32, #tpu.memory_space<vmem>>, vector<1x32xf32>
    %c0_60 = arith.constant 0 : index
    %c0_61 = arith.constant 0 : index
    %c0_62 = arith.constant 0 : index
    %141 = vector.load %arg16[%c0_60, %c0_61, %c0_62] : memref<3x32x32xf32, #tpu.memory_space<vmem>>, vector<3x32x32xf32>
    %c0_63 = arith.constant 0 : index
    %c0_64 = arith.constant 0 : index
    %142 = vector.load %arg17[%c0_63, %c0_64] : memref<1x32xf32, #tpu.memory_space<vmem>>, vector<1x32xf32>
    %c0_65 = arith.constant 0 : index
    %c0_66 = arith.constant 0 : index
    %143 = vector.load %arg18[%c0_65, %c0_66] : memref<1x32xf32, #tpu.memory_space<vmem>>, vector<1x32xf32>
    %c0_67 = arith.constant 0 : index
    %c0_68 = arith.constant 0 : index
    %144 = vector.load %arg19[%c0_67, %c0_68] : memref<1x32xf32, #tpu.memory_space<vmem>>, vector<1x32xf32>
    %c0_69 = arith.constant 0 : index
    %c0_70 = arith.constant 0 : index
    %145 = vector.load %arg20[%c0_69, %c0_70] : memref<32x1xf32, #tpu.memory_space<vmem>>, vector<32x1xf32>
    %c0_71 = arith.constant 0 : index
    %c0_72 = arith.constant 0 : index
    %146 = vector.load %arg21[%c0_71, %c0_72] : memref<1x1xf32, #tpu.memory_space<vmem>>, vector<1x1xf32>
    %cst_73 = arith.constant 0.000000e+00 : f32
    %147 = vector.broadcast %cst_73 : f32 to vector<1x32xf32>
    %148 = vector.extract_strided_slice %1 {offsets = [0, 0], sizes = [16, 32], strides = [1, 1]} : vector<32x32xf32> to vector<16x32xf32>
    %149 = tpu.concatenate %147, %148, %147 in 0 : vector<1x32xf32>, vector<16x32xf32>, vector<1x32xf32> -> vector<18x32xf32>
    %150 = vector.extract_strided_slice %149 {offsets = [0, 0], sizes = [16, 32], strides = [1, 1]} : vector<18x32xf32> to vector<16x32xf32>
    %151 = vector.extract_strided_slice %137 {offsets = [0, 0, 0], sizes = [1, 32, 32], strides = [1, 1, 1]} : vector<3x32x32xf32> to vector<1x32x32xf32>
    %152 = vector.shape_cast %151 : vector<1x32x32xf32> to vector<32x32xf32>
    %cst_74 = arith.constant dense<0.000000e+00> : vector<16x32xf32>
    %153 = tpu.matmul %150, %152, %cst_74 {dimension_numbers = #tpu.dot_dimension_numbers<[1], [0], [0], [1], [0, 0, 1, 1], [], []>} : vector<16x32xf32>, vector<32x32xf32>, vector<16x32xf32> -> vector<16x32xf32>
    %154 = vector.extract_strided_slice %149 {offsets = [1, 0], sizes = [16, 32], strides = [1, 1]} : vector<18x32xf32> to vector<16x32xf32>
    %155 = vector.extract_strided_slice %137 {offsets = [1, 0, 0], sizes = [1, 32, 32], strides = [1, 1, 1]} : vector<3x32x32xf32> to vector<1x32x32xf32>
    %156 = vector.shape_cast %155 : vector<1x32x32xf32> to vector<32x32xf32>
    %cst_75 = arith.constant dense<0.000000e+00> : vector<16x32xf32>
    %157 = tpu.matmul %154, %156, %cst_75 {dimension_numbers = #tpu.dot_dimension_numbers<[1], [0], [0], [1], [0, 0, 1, 1], [], []>} : vector<16x32xf32>, vector<32x32xf32>, vector<16x32xf32> -> vector<16x32xf32>
    %158 = arith.addf %153, %157 : vector<16x32xf32>
    %159 = vector.extract_strided_slice %149 {offsets = [2, 0], sizes = [16, 32], strides = [1, 1]} : vector<18x32xf32> to vector<16x32xf32>
    %160 = vector.extract_strided_slice %137 {offsets = [2, 0, 0], sizes = [1, 32, 32], strides = [1, 1, 1]} : vector<3x32x32xf32> to vector<1x32x32xf32>
    %161 = vector.shape_cast %160 : vector<1x32x32xf32> to vector<32x32xf32>
    %cst_76 = arith.constant dense<0.000000e+00> : vector<16x32xf32>
    %162 = tpu.matmul %159, %161, %cst_76 {dimension_numbers = #tpu.dot_dimension_numbers<[1], [0], [0], [1], [0, 0, 1, 1], [], []>} : vector<16x32xf32>, vector<32x32xf32>, vector<16x32xf32> -> vector<16x32xf32>
    %163 = arith.addf %158, %162 : vector<16x32xf32>
    %164 = vector.extract_strided_slice %1 {offsets = [16, 0], sizes = [16, 32], strides = [1, 1]} : vector<32x32xf32> to vector<16x32xf32>
    %165 = tpu.concatenate %147, %164, %147 in 0 : vector<1x32xf32>, vector<16x32xf32>, vector<1x32xf32> -> vector<18x32xf32>
    %166 = vector.extract_strided_slice %165 {offsets = [0, 0], sizes = [16, 32], strides = [1, 1]} : vector<18x32xf32> to vector<16x32xf32>
    %167 = vector.extract_strided_slice %137 {offsets = [0, 0, 0], sizes = [1, 32, 32], strides = [1, 1, 1]} : vector<3x32x32xf32> to vector<1x32x32xf32>
    %168 = vector.shape_cast %167 : vector<1x32x32xf32> to vector<32x32xf32>
    %cst_77 = arith.constant dense<0.000000e+00> : vector<16x32xf32>
    %169 = tpu.matmul %166, %168, %cst_77 {dimension_numbers = #tpu.dot_dimension_numbers<[1], [0], [0], [1], [0, 0, 1, 1], [], []>} : vector<16x32xf32>, vector<32x32xf32>, vector<16x32xf32> -> vector<16x32xf32>
    %170 = vector.extract_strided_slice %165 {offsets = [1, 0], sizes = [16, 32], strides = [1, 1]} : vector<18x32xf32> to vector<16x32xf32>
    %171 = vector.extract_strided_slice %137 {offsets = [1, 0, 0], sizes = [1, 32, 32], strides = [1, 1, 1]} : vector<3x32x32xf32> to vector<1x32x32xf32>
    %172 = vector.shape_cast %171 : vector<1x32x32xf32> to vector<32x32xf32>
    %cst_78 = arith.constant dense<0.000000e+00> : vector<16x32xf32>
    %173 = tpu.matmul %170, %172, %cst_78 {dimension_numbers = #tpu.dot_dimension_numbers<[1], [0], [0], [1], [0, 0, 1, 1], [], []>} : vector<16x32xf32>, vector<32x32xf32>, vector<16x32xf32> -> vector<16x32xf32>
    %174 = arith.addf %169, %173 : vector<16x32xf32>
    %175 = vector.extract_strided_slice %165 {offsets = [2, 0], sizes = [16, 32], strides = [1, 1]} : vector<18x32xf32> to vector<16x32xf32>
    %176 = vector.extract_strided_slice %137 {offsets = [2, 0, 0], sizes = [1, 32, 32], strides = [1, 1, 1]} : vector<3x32x32xf32> to vector<1x32x32xf32>
    %177 = vector.shape_cast %176 : vector<1x32x32xf32> to vector<32x32xf32>
    %cst_79 = arith.constant dense<0.000000e+00> : vector<16x32xf32>
    %178 = tpu.matmul %175, %177, %cst_79 {dimension_numbers = #tpu.dot_dimension_numbers<[1], [0], [0], [1], [0, 0, 1, 1], [], []>} : vector<16x32xf32>, vector<32x32xf32>, vector<16x32xf32> -> vector<16x32xf32>
    %179 = arith.addf %174, %178 : vector<16x32xf32>
    %180 = tpu.concatenate %163, %179 in 0 : vector<16x32xf32>, vector<16x32xf32> -> vector<32x32xf32>
    %181 = vector.broadcast %138 : vector<1x32xf32> to vector<32x32xf32>
    %182 = arith.addf %180, %181 : vector<32x32xf32>
    %cst_80 = arith.constant 0.000000e+00 : f32
    %183 = vector.broadcast %cst_80 : f32 to vector<32x32xf32>
    %184 = arith.maximumf %182, %183 : vector<32x32xf32>
    %cst_81 = arith.constant dense<0.000000e+00> : vector<32xf32>
    %185 = vector.multi_reduction <add>, %184, %cst_81 [1] : vector<32x32xf32> to vector<32xf32>
    %186 = vector.shape_cast %185 : vector<32xf32> to vector<32x1xf32>
    %cst_82 = arith.constant 3.200000e+01 : f32
    %187 = vector.broadcast %cst_82 : f32 to vector<32x1xf32>
    %188 = arith.divf %186, %187 : vector<32x1xf32>
    %189 = vector.broadcast %188 : vector<32x1xf32> to vector<32x32xf32>
    %190 = arith.subf %184, %189 : vector<32x32xf32>
    %191 = arith.mulf %190, %190 : vector<32x32xf32>
    %cst_83 = arith.constant dense<0.000000e+00> : vector<32xf32>
    %192 = vector.multi_reduction <add>, %191, %cst_83 [1] : vector<32x32xf32> to vector<32xf32>
    %193 = vector.shape_cast %192 : vector<32xf32> to vector<32x1xf32>
    %cst_84 = arith.constant 3.200000e+01 : f32
    %194 = vector.broadcast %cst_84 : f32 to vector<32x1xf32>
    %195 = arith.divf %193, %194 : vector<32x1xf32>
    %196 = vector.broadcast %188 : vector<32x1xf32> to vector<32x32xf32>
    %197 = arith.subf %184, %196 : vector<32x32xf32>
    %cst_85 = arith.constant 9.99999974E-6 : f32
    %198 = vector.broadcast %cst_85 : f32 to vector<32x1xf32>
    %199 = arith.addf %195, %198 : vector<32x1xf32>
    %200 = math.rsqrt %199 : vector<32x1xf32>
    %201 = vector.broadcast %200 : vector<32x1xf32> to vector<32x32xf32>
    %202 = arith.mulf %197, %201 : vector<32x32xf32>
    %203 = vector.broadcast %139 : vector<1x32xf32> to vector<32x32xf32>
    %204 = arith.mulf %202, %203 : vector<32x32xf32>
    %205 = vector.broadcast %140 : vector<1x32xf32> to vector<32x32xf32>
    %206 = arith.addf %204, %205 : vector<32x32xf32>
    %cst_86 = arith.constant 0.000000e+00 : f32
    %207 = vector.broadcast %cst_86 : f32 to vector<1x32xf32>
    %208 = vector.extract_strided_slice %206 {offsets = [0, 0], sizes = [16, 32], strides = [1, 1]} : vector<32x32xf32> to vector<16x32xf32>
    %209 = tpu.concatenate %207, %208, %207 in 0 : vector<1x32xf32>, vector<16x32xf32>, vector<1x32xf32> -> vector<18x32xf32>
    %210 = vector.extract_strided_slice %209 {offsets = [0, 0], sizes = [16, 32], strides = [1, 1]} : vector<18x32xf32> to vector<16x32xf32>
    %211 = vector.extract_strided_slice %141 {offsets = [0, 0, 0], sizes = [1, 32, 32], strides = [1, 1, 1]} : vector<3x32x32xf32> to vector<1x32x32xf32>
    %212 = vector.shape_cast %211 : vector<1x32x32xf32> to vector<32x32xf32>
    %cst_87 = arith.constant dense<0.000000e+00> : vector<16x32xf32>
    %213 = tpu.matmul %210, %212, %cst_87 {dimension_numbers = #tpu.dot_dimension_numbers<[1], [0], [0], [1], [0, 0, 1, 1], [], []>} : vector<16x32xf32>, vector<32x32xf32>, vector<16x32xf32> -> vector<16x32xf32>
    %214 = vector.extract_strided_slice %209 {offsets = [1, 0], sizes = [16, 32], strides = [1, 1]} : vector<18x32xf32> to vector<16x32xf32>
    %215 = vector.extract_strided_slice %141 {offsets = [1, 0, 0], sizes = [1, 32, 32], strides = [1, 1, 1]} : vector<3x32x32xf32> to vector<1x32x32xf32>
    %216 = vector.shape_cast %215 : vector<1x32x32xf32> to vector<32x32xf32>
    %cst_88 = arith.constant dense<0.000000e+00> : vector<16x32xf32>
    %217 = tpu.matmul %214, %216, %cst_88 {dimension_numbers = #tpu.dot_dimension_numbers<[1], [0], [0], [1], [0, 0, 1, 1], [], []>} : vector<16x32xf32>, vector<32x32xf32>, vector<16x32xf32> -> vector<16x32xf32>
    %218 = arith.addf %213, %217 : vector<16x32xf32>
    %219 = vector.extract_strided_slice %209 {offsets = [2, 0], sizes = [16, 32], strides = [1, 1]} : vector<18x32xf32> to vector<16x32xf32>
    %220 = vector.extract_strided_slice %141 {offsets = [2, 0, 0], sizes = [1, 32, 32], strides = [1, 1, 1]} : vector<3x32x32xf32> to vector<1x32x32xf32>
    %221 = vector.shape_cast %220 : vector<1x32x32xf32> to vector<32x32xf32>
    %cst_89 = arith.constant dense<0.000000e+00> : vector<16x32xf32>
    %222 = tpu.matmul %219, %221, %cst_89 {dimension_numbers = #tpu.dot_dimension_numbers<[1], [0], [0], [1], [0, 0, 1, 1], [], []>} : vector<16x32xf32>, vector<32x32xf32>, vector<16x32xf32> -> vector<16x32xf32>
    %223 = arith.addf %218, %222 : vector<16x32xf32>
    %224 = vector.extract_strided_slice %206 {offsets = [16, 0], sizes = [16, 32], strides = [1, 1]} : vector<32x32xf32> to vector<16x32xf32>
    %225 = tpu.concatenate %207, %224, %207 in 0 : vector<1x32xf32>, vector<16x32xf32>, vector<1x32xf32> -> vector<18x32xf32>
    %226 = vector.extract_strided_slice %225 {offsets = [0, 0], sizes = [16, 32], strides = [1, 1]} : vector<18x32xf32> to vector<16x32xf32>
    %227 = vector.extract_strided_slice %141 {offsets = [0, 0, 0], sizes = [1, 32, 32], strides = [1, 1, 1]} : vector<3x32x32xf32> to vector<1x32x32xf32>
    %228 = vector.shape_cast %227 : vector<1x32x32xf32> to vector<32x32xf32>
    %cst_90 = arith.constant dense<0.000000e+00> : vector<16x32xf32>
    %229 = tpu.matmul %226, %228, %cst_90 {dimension_numbers = #tpu.dot_dimension_numbers<[1], [0], [0], [1], [0, 0, 1, 1], [], []>} : vector<16x32xf32>, vector<32x32xf32>, vector<16x32xf32> -> vector<16x32xf32>
    %230 = vector.extract_strided_slice %225 {offsets = [1, 0], sizes = [16, 32], strides = [1, 1]} : vector<18x32xf32> to vector<16x32xf32>
    %231 = vector.extract_strided_slice %141 {offsets = [1, 0, 0], sizes = [1, 32, 32], strides = [1, 1, 1]} : vector<3x32x32xf32> to vector<1x32x32xf32>
    %232 = vector.shape_cast %231 : vector<1x32x32xf32> to vector<32x32xf32>
    %cst_91 = arith.constant dense<0.000000e+00> : vector<16x32xf32>
    %233 = tpu.matmul %230, %232, %cst_91 {dimension_numbers = #tpu.dot_dimension_numbers<[1], [0], [0], [1], [0, 0, 1, 1], [], []>} : vector<16x32xf32>, vector<32x32xf32>, vector<16x32xf32> -> vector<16x32xf32>
    %234 = arith.addf %229, %233 : vector<16x32xf32>
    %235 = vector.extract_strided_slice %225 {offsets = [2, 0], sizes = [16, 32], strides = [1, 1]} : vector<18x32xf32> to vector<16x32xf32>
    %236 = vector.extract_strided_slice %141 {offsets = [2, 0, 0], sizes = [1, 32, 32], strides = [1, 1, 1]} : vector<3x32x32xf32> to vector<1x32x32xf32>
    %237 = vector.shape_cast %236 : vector<1x32x32xf32> to vector<32x32xf32>
    %cst_92 = arith.constant dense<0.000000e+00> : vector<16x32xf32>
    %238 = tpu.matmul %235, %237, %cst_92 {dimension_numbers = #tpu.dot_dimension_numbers<[1], [0], [0], [1], [0, 0, 1, 1], [], []>} : vector<16x32xf32>, vector<32x32xf32>, vector<16x32xf32> -> vector<16x32xf32>
    %239 = arith.addf %234, %238 : vector<16x32xf32>
    %240 = tpu.concatenate %223, %239 in 0 : vector<16x32xf32>, vector<16x32xf32> -> vector<32x32xf32>
    %241 = vector.broadcast %142 : vector<1x32xf32> to vector<32x32xf32>
    %242 = arith.addf %240, %241 : vector<32x32xf32>
    %cst_93 = arith.constant 0.000000e+00 : f32
    %243 = vector.broadcast %cst_93 : f32 to vector<32x32xf32>
    %244 = arith.maximumf %242, %243 : vector<32x32xf32>
    %cst_94 = arith.constant dense<0.000000e+00> : vector<32xf32>
    %245 = vector.multi_reduction <add>, %244, %cst_94 [1] : vector<32x32xf32> to vector<32xf32>
    %246 = vector.shape_cast %245 : vector<32xf32> to vector<32x1xf32>
    %cst_95 = arith.constant 3.200000e+01 : f32
    %247 = vector.broadcast %cst_95 : f32 to vector<32x1xf32>
    %248 = arith.divf %246, %247 : vector<32x1xf32>
    %249 = vector.broadcast %248 : vector<32x1xf32> to vector<32x32xf32>
    %250 = arith.subf %244, %249 : vector<32x32xf32>
    %251 = arith.mulf %250, %250 : vector<32x32xf32>
    %cst_96 = arith.constant dense<0.000000e+00> : vector<32xf32>
    %252 = vector.multi_reduction <add>, %251, %cst_96 [1] : vector<32x32xf32> to vector<32xf32>
    %253 = vector.shape_cast %252 : vector<32xf32> to vector<32x1xf32>
    %cst_97 = arith.constant 3.200000e+01 : f32
    %254 = vector.broadcast %cst_97 : f32 to vector<32x1xf32>
    %255 = arith.divf %253, %254 : vector<32x1xf32>
    %256 = vector.broadcast %248 : vector<32x1xf32> to vector<32x32xf32>
    %257 = arith.subf %244, %256 : vector<32x32xf32>
    %cst_98 = arith.constant 9.99999974E-6 : f32
    %258 = vector.broadcast %cst_98 : f32 to vector<32x1xf32>
    %259 = arith.addf %255, %258 : vector<32x1xf32>
    %260 = math.rsqrt %259 : vector<32x1xf32>
    %261 = vector.broadcast %260 : vector<32x1xf32> to vector<32x32xf32>
    %262 = arith.mulf %257, %261 : vector<32x32xf32>
    %263 = vector.broadcast %143 : vector<1x32xf32> to vector<32x32xf32>
    %264 = arith.mulf %262, %263 : vector<32x32xf32>
    %265 = vector.broadcast %144 : vector<1x32xf32> to vector<32x32xf32>
    %266 = arith.addf %264, %265 : vector<32x32xf32>
    %cst_99 = arith.constant dense<0.000000e+00> : vector<32x1xf32>
    %267 = tpu.matmul %266, %145, %cst_99 {dimension_numbers = #tpu.dot_dimension_numbers<[1], [0], [0], [1], [0, 0, 1, 1], [], []>} : vector<32x32xf32>, vector<32x1xf32>, vector<32x1xf32> -> vector<32x1xf32>
    %268 = vector.broadcast %146 : vector<1x1xf32> to vector<32x1xf32>
    %269 = arith.addf %267, %268 : vector<32x1xf32>
    %cst_100 = arith.constant 0.000000e+00 : f32
    %270 = vector.broadcast %cst_100 : f32 to vector<32x1xf32>
    %271 = arith.maximumf %269, %270 : vector<32x1xf32>
    %272 = tpu.concatenate %136, %271 in 1 : vector<32x1xf32>, vector<32x1xf32> -> vector<32x2xf32>
    %273 = vector.shape_cast %272 : vector<32x2xf32> to vector<2x16x2xf32>
    %c0_101 = arith.constant 0 : index
    %c0_102 = arith.constant 0 : index
    %c0_103 = arith.constant 0 : index
    %274 = vector.load %arg22[%c0_101, %c0_102, %c0_103] : memref<2x16x2xf32, #tpu.memory_space<vmem>>, vector<2x16x2xf32>
    tpu.vector_store %arg22[%c0_101, %c0_102, %c0_103], %273 {strides = array<i32>} : memref<2x16x2xf32, #tpu.memory_space<vmem>>, vector<2x16x2xf32>,
    return
  }
  func.func @transform_0(%arg0: i32) -> (i32, i32, i32) {
    %c0_i32 = arith.constant 0 : i32
    %c0_i32_0 = arith.constant 0 : i32
    %c0_i32_1 = arith.constant 0 : i32
    return %arg0, %c0_i32, %c0_i32_0 : i32, i32, i32
  }
  func.func @transform_1(%arg0: i32) -> (i32, i32, i32) {
    %c0_i32 = arith.constant 0 : i32
    %c0_i32_0 = arith.constant 0 : i32
    %c0_i32_1 = arith.constant 0 : i32
    %c0_i32_2 = arith.constant 0 : i32
    return %c0_i32, %c0_i32_0, %c0_i32_1 : i32, i32, i32
  }
  func.func @transform_2(%arg0: i32) -> (i32, i32) {
    %c0_i32 = arith.constant 0 : i32
    %c0_i32_0 = arith.constant 0 : i32
    %c0_i32_1 = arith.constant 0 : i32
    return %c0_i32, %c0_i32_0 : i32, i32
  }
  func.func @transform_3(%arg0: i32) -> (i32, i32) {
    %c0_i32 = arith.constant 0 : i32
    %c0_i32_0 = arith.constant 0 : i32
    %c0_i32_1 = arith.constant 0 : i32
    return %c0_i32, %c0_i32_0 : i32, i32
  }
  func.func @transform_4(%arg0: i32) -> (i32, i32) {
    %c0_i32 = arith.constant 0 : i32
    %c0_i32_0 = arith.constant 0 : i32
    %c0_i32_1 = arith.constant 0 : i32
    return %c0_i32, %c0_i32_0 : i32, i32
  }
  func.func @transform_5(%arg0: i32) -> (i32, i32, i32) {
    %c0_i32 = arith.constant 0 : i32
    %c0_i32_0 = arith.constant 0 : i32
    %c0_i32_1 = arith.constant 0 : i32
    %c0_i32_2 = arith.constant 0 : i32
    return %c0_i32, %c0_i32_0, %c0_i32_1 : i32, i32, i32
  }
  func.func @transform_6(%arg0: i32) -> (i32, i32) {
    %c0_i32 = arith.constant 0 : i32
    %c0_i32_0 = arith.constant 0 : i32
    %c0_i32_1 = arith.constant 0 : i32
    return %c0_i32, %c0_i32_0 : i32, i32
  }
  func.func @transform_7(%arg0: i32) -> (i32, i32) {
    %c0_i32 = arith.constant 0 : i32
    %c0_i32_0 = arith.constant 0 : i32
    %c0_i32_1 = arith.constant 0 : i32
    return %c0_i32, %c0_i32_0 : i32, i32
  }
  func.func @transform_8(%arg0: i32) -> (i32, i32) {
    %c0_i32 = arith.constant 0 : i32
    %c0_i32_0 = arith.constant 0 : i32
    %c0_i32_1 = arith.constant 0 : i32
    return %c0_i32, %c0_i32_0 : i32, i32
  }
  func.func @transform_9(%arg0: i32) -> (i32, i32) {
    %c0_i32 = arith.constant 0 : i32
    %c0_i32_0 = arith.constant 0 : i32
    %c0_i32_1 = arith.constant 0 : i32
    return %c0_i32, %c0_i32_0 : i32, i32
  }
  func.func @transform_10(%arg0: i32) -> (i32, i32) {
    %c0_i32 = arith.constant 0 : i32
    %c0_i32_0 = arith.constant 0 : i32
    %c0_i32_1 = arith.constant 0 : i32
    return %c0_i32, %c0_i32_0 : i32, i32
  }
  func.func @transform_11(%arg0: i32) -> (i32, i32, i32) {
    %c0_i32 = arith.constant 0 : i32
    %c0_i32_0 = arith.constant 0 : i32
    %c0_i32_1 = arith.constant 0 : i32
    %c0_i32_2 = arith.constant 0 : i32
    return %c0_i32, %c0_i32_0, %c0_i32_1 : i32, i32, i32
  }
  func.func @transform_12(%arg0: i32) -> (i32, i32) {
    %c0_i32 = arith.constant 0 : i32
    %c0_i32_0 = arith.constant 0 : i32
    %c0_i32_1 = arith.constant 0 : i32
    return %c0_i32, %c0_i32_0 : i32, i32
  }
  func.func @transform_13(%arg0: i32) -> (i32, i32) {
    %c0_i32 = arith.constant 0 : i32
    %c0_i32_0 = arith.constant 0 : i32
    %c0_i32_1 = arith.constant 0 : i32
    return %c0_i32, %c0_i32_0 : i32, i32
  }
  func.func @transform_14(%arg0: i32) -> (i32, i32) {
    %c0_i32 = arith.constant 0 : i32
    %c0_i32_0 = arith.constant 0 : i32
    %c0_i32_1 = arith.constant 0 : i32
    return %c0_i32, %c0_i32_0 : i32, i32
  }
  func.func @transform_15(%arg0: i32) -> (i32, i32, i32) {
    %c0_i32 = arith.constant 0 : i32
    %c0_i32_0 = arith.constant 0 : i32
    %c0_i32_1 = arith.constant 0 : i32
    %c0_i32_2 = arith.constant 0 : i32
    return %c0_i32, %c0_i32_0, %c0_i32_1 : i32, i32, i32
  }
  func.func @transform_16(%arg0: i32) -> (i32, i32) {
    %c0_i32 = arith.constant 0 : i32
    %c0_i32_0 = arith.constant 0 : i32
    %c0_i32_1 = arith.constant 0 : i32
    return %c0_i32, %c0_i32_0 : i32, i32
  }
  func.func @transform_17(%arg0: i32) -> (i32, i32) {
    %c0_i32 = arith.constant 0 : i32
    %c0_i32_0 = arith.constant 0 : i32
    %c0_i32_1 = arith.constant 0 : i32
    return %c0_i32, %c0_i32_0 : i32, i32
  }
  func.func @transform_18(%arg0: i32) -> (i32, i32) {
    %c0_i32 = arith.constant 0 : i32
    %c0_i32_0 = arith.constant 0 : i32
    %c0_i32_1 = arith.constant 0 : i32
    return %c0_i32, %c0_i32_0 : i32, i32
  }
  func.func @transform_19(%arg0: i32) -> (i32, i32) {
    %c0_i32 = arith.constant 0 : i32
    %c0_i32_0 = arith.constant 0 : i32
    %c0_i32_1 = arith.constant 0 : i32
    return %c0_i32, %c0_i32_0 : i32, i32
  }
  func.func @transform_20(%arg0: i32) -> (i32, i32) {
    %c0_i32 = arith.constant 0 : i32
    %c0_i32_0 = arith.constant 0 : i32
    %c0_i32_1 = arith.constant 0 : i32
    return %c0_i32, %c0_i32_0 : i32, i32
  }
  func.func @transform_21(%arg0: i32) -> (i32, i32, i32) {
    %c0_i32 = arith.constant 0 : i32
    %c0_i32_0 = arith.constant 0 : i32
    %c0_i32_1 = arith.constant 0 : i32
    return %arg0, %c0_i32, %c0_i32_0 : i32, i32, i32
  }
}

module attributes {stable_mosaic.version = 11 : i64} {
  func.func @_fft_block_kernel(%arg0: i32, %arg1: memref<2x16x32xf32, #tpu.memory_space<vmem>>, %arg2: memref<2x1x16xf32, #tpu.memory_space<vmem>>, %arg3: memref<2x16x1xf32, #tpu.memory_space<vmem>>, %arg4: memref<32x96xf32, #tpu.memory_space<vmem>>, %arg5: memref<1x96xf32, #tpu.memory_space<vmem>>, %arg6: memref<32x32xf32, #tpu.memory_space<vmem>>, %arg7: memref<1x32xf32, #tpu.memory_space<vmem>>, %arg8: memref<1x32xf32, #tpu.memory_space<vmem>>, %arg9: memref<1x32xf32, #tpu.memory_space<vmem>>, %arg10: memref<9x32x64xf32, #tpu.memory_space<vmem>>, %arg11: memref<1x64xf32, #tpu.memory_space<vmem>>, %arg12: memref<1x64x32xf32, #tpu.memory_space<vmem>>, %arg13: memref<1x32xf32, #tpu.memory_space<vmem>>, %arg14: memref<1x32xf32, #tpu.memory_space<vmem>>, %arg15: memref<1x32xf32, #tpu.memory_space<vmem>>, %arg16: memref<32x16xf32, #tpu.memory_space<vmem>>, %arg17: memref<1x16xf32, #tpu.memory_space<vmem>>, %arg18: memref<2x16x32xf32, #tpu.memory_space<vmem>>, %arg19: memref<2x16x16xf32, #tpu.memory_space<vmem>>) attributes {dimension_semantics = [#tpu.dimension_semantics<parallel>], iteration_bounds = array<i64: 1>, scalar_prefetch = 0 : i64, scratch_operands = 0 : i64, tpu.core_type = #tpu.core_type<tc>, window_params = [{transform_indices = @transform_0, window_bounds = array<i64: 2, 16, 32>}, {transform_indices = @transform_1, window_bounds = array<i64: 2, 1, 16>}, {transform_indices = @transform_2, window_bounds = array<i64: 2, 16, 1>}, {pipeline_mode = #tpu.pipeline_mode<synchronous>, transform_indices = @transform_3, window_bounds = array<i64: 32, 96>}, {pipeline_mode = #tpu.pipeline_mode<synchronous>, transform_indices = @transform_4, window_bounds = array<i64: 1, 96>}, {pipeline_mode = #tpu.pipeline_mode<synchronous>, transform_indices = @transform_5, window_bounds = array<i64: 32, 32>}, {pipeline_mode = #tpu.pipeline_mode<synchronous>, transform_indices = @transform_6, window_bounds = array<i64: 1, 32>}, {pipeline_mode = #tpu.pipeline_mode<synchronous>, transform_indices = @transform_7, window_bounds = array<i64: 1, 32>}, {pipeline_mode = #tpu.pipeline_mode<synchronous>, transform_indices = @transform_8, window_bounds = array<i64: 1, 32>}, {pipeline_mode = #tpu.pipeline_mode<synchronous>, transform_indices = @transform_9, window_bounds = array<i64: 9, 32, 64>}, {pipeline_mode = #tpu.pipeline_mode<synchronous>, transform_indices = @transform_10, window_bounds = array<i64: 1, 64>}, {pipeline_mode = #tpu.pipeline_mode<synchronous>, transform_indices = @transform_11, window_bounds = array<i64: 1, 64, 32>}, {pipeline_mode = #tpu.pipeline_mode<synchronous>, transform_indices = @transform_12, window_bounds = array<i64: 1, 32>}, {pipeline_mode = #tpu.pipeline_mode<synchronous>, transform_indices = @transform_13, window_bounds = array<i64: 1, 32>}, {pipeline_mode = #tpu.pipeline_mode<synchronous>, transform_indices = @transform_14, window_bounds = array<i64: 1, 32>}, {pipeline_mode = #tpu.pipeline_mode<synchronous>, transform_indices = @transform_15, window_bounds = array<i64: 32, 16>}, {pipeline_mode = #tpu.pipeline_mode<synchronous>, transform_indices = @transform_16, window_bounds = array<i64: 1, 16>}, {transform_indices = @transform_17, window_bounds = array<i64: 2, 16, 32>}, {transform_indices = @transform_18, window_bounds = array<i64: 2, 16, 16>}]} {
    %c0 = arith.constant 0 : index
    %c0_0 = arith.constant 0 : index
    %c0_1 = arith.constant 0 : index
    %0 = vector.load %arg1[%c0, %c0_0, %c0_1] : memref<2x16x32xf32, #tpu.memory_space<vmem>>, vector<2x16x32xf32>
    %1 = vector.shape_cast %0 : vector<2x16x32xf32> to vector<32x32xf32>
    %c0_2 = arith.constant 0 : index
    %c0_3 = arith.constant 0 : index
    %c0_4 = arith.constant 0 : index
    %2 = vector.load %arg2[%c0_2, %c0_3, %c0_4] : memref<2x1x16xf32, #tpu.memory_space<vmem>>, vector<2x1x16xf32>
    %c0_5 = arith.constant 0 : index
    %c0_6 = arith.constant 0 : index
    %c0_7 = arith.constant 0 : index
    %3 = vector.load %arg3[%c0_5, %c0_6, %c0_7] : memref<2x16x1xf32, #tpu.memory_space<vmem>>, vector<2x16x1xf32>
    %4 = vector.shape_cast %3 : vector<2x16x1xf32> to vector<32x1xf32>
    %c0_8 = arith.constant 0 : index
    %c0_9 = arith.constant 0 : index
    %5 = vector.load %arg4[%c0_8, %c0_9] : memref<32x96xf32, #tpu.memory_space<vmem>>, vector<32x96xf32>
    %cst = arith.constant dense<0.000000e+00> : vector<32x96xf32>
    %6 = tpu.matmul %1, %5, %cst {dimension_numbers = #tpu.dot_dimension_numbers<[1], [0], [0], [1], [0, 0, 1, 1], [], []>} : vector<32x32xf32>, vector<32x96xf32>, vector<32x96xf32> -> vector<32x96xf32>
    %c0_10 = arith.constant 0 : index
    %c0_11 = arith.constant 0 : index
    %7 = vector.load %arg5[%c0_10, %c0_11] : memref<1x96xf32, #tpu.memory_space<vmem>>, vector<1x96xf32>
    %8 = vector.broadcast %7 : vector<1x96xf32> to vector<32x96xf32>
    %9 = arith.addf %6, %8 : vector<32x96xf32>
    %c0_12 = arith.constant 0 : index
    %c0_13 = arith.constant 0 : index
    %10 = vector.load %arg6[%c0_12, %c0_13] : memref<32x32xf32, #tpu.memory_space<vmem>>, vector<32x32xf32>
    %11 = vector.extract_strided_slice %2 {offsets = [0, 0, 0], sizes = [1, 1, 16], strides = [1, 1, 1]} : vector<2x1x16xf32> to vector<1x1x16xf32>
    %12 = vector.shape_cast %11 : vector<1x1x16xf32> to vector<1x16xf32>
    %cst_14 = arith.constant 1.000000e+00 : f32
    %13 = vector.broadcast %cst_14 : f32 to vector<1x16xf32>
    %14 = arith.subf %12, %13 : vector<1x16xf32>
    %cst_15 = arith.constant 1.000000e+09 : f32
    %15 = vector.broadcast %cst_15 : f32 to vector<1x16xf32>
    %16 = arith.mulf %14, %15 : vector<1x16xf32>
    %17 = vector.extract_strided_slice %9 {offsets = [0, 0], sizes = [16, 16], strides = [1, 1]} : vector<32x96xf32> to vector<16x16xf32>
    %18 = vector.extract_strided_slice %9 {offsets = [0, 32], sizes = [16, 16], strides = [1, 1]} : vector<32x96xf32> to vector<16x16xf32>
    %19 = vector.extract_strided_slice %9 {offsets = [0, 64], sizes = [16, 16], strides = [1, 1]} : vector<32x96xf32> to vector<16x16xf32>
    %cst_16 = arith.constant dense<0.000000e+00> : vector<16x16xf32>
    %20 = tpu.matmul %17, %18, %cst_16 {dimension_numbers = #tpu.dot_dimension_numbers<[1], [1], [0], [0], [0, 0, 1, 0], [], []>} : vector<16x16xf32>, vector<16x16xf32>, vector<16x16xf32> -> vector<16x16xf32>
    %cst_17 = arith.constant 2.500000e-01 : f32
    %21 = vector.broadcast %cst_17 : f32 to vector<16x16xf32>
    %22 = arith.mulf %20, %21 : vector<16x16xf32>
    %23 = vector.broadcast %16 : vector<1x16xf32> to vector<16x16xf32>
    %24 = arith.addf %22, %23 : vector<16x16xf32>
    %cst_18 = arith.constant dense<0xFF800000> : vector<16xf32>
    %25 = vector.multi_reduction <maximumf>, %24, %cst_18 [1] : vector<16x16xf32> to vector<16xf32>
    %26 = vector.shape_cast %25 : vector<16xf32> to vector<16x1xf32>
    %27 = vector.broadcast %26 : vector<16x1xf32> to vector<16x16xf32>
    %28 = arith.subf %24, %27 : vector<16x16xf32>
    %29 = math.exp %28 : vector<16x16xf32>
    %cst_19 = arith.constant dense<0.000000e+00> : vector<16xf32>
    %30 = vector.multi_reduction <add>, %29, %cst_19 [1] : vector<16x16xf32> to vector<16xf32>
    %31 = vector.shape_cast %30 : vector<16xf32> to vector<16x1xf32>
    %32 = tpu.reciprocal %31 {approx = true} : vector<16x1xf32> -> vector<16x1xf32>
    %33 = vector.broadcast %32 : vector<16x1xf32> to vector<16x16xf32>
    %34 = arith.mulf %29, %33 : vector<16x16xf32>
    %cst_20 = arith.constant dense<0.000000e+00> : vector<16x16xf32>
    %35 = tpu.matmul %34, %19, %cst_20 {dimension_numbers = #tpu.dot_dimension_numbers<[1], [0], [0], [1], [0, 0, 1, 1], [], []>} : vector<16x16xf32>, vector<16x16xf32>, vector<16x16xf32> -> vector<16x16xf32>
    %36 = vector.extract_strided_slice %10 {offsets = [0, 0], sizes = [16, 32], strides = [1, 1]} : vector<32x32xf32> to vector<16x32xf32>
    %cst_21 = arith.constant dense<0.000000e+00> : vector<16x32xf32>
    %37 = tpu.matmul %35, %36, %cst_21 {dimension_numbers = #tpu.dot_dimension_numbers<[1], [0], [0], [1], [0, 0, 1, 1], [], []>} : vector<16x16xf32>, vector<16x32xf32>, vector<16x32xf32> -> vector<16x32xf32>
    %38 = vector.extract_strided_slice %9 {offsets = [0, 16], sizes = [16, 16], strides = [1, 1]} : vector<32x96xf32> to vector<16x16xf32>
    %39 = vector.extract_strided_slice %9 {offsets = [0, 48], sizes = [16, 16], strides = [1, 1]} : vector<32x96xf32> to vector<16x16xf32>
    %40 = vector.extract_strided_slice %9 {offsets = [0, 80], sizes = [16, 16], strides = [1, 1]} : vector<32x96xf32> to vector<16x16xf32>
    %cst_22 = arith.constant dense<0.000000e+00> : vector<16x16xf32>
    %41 = tpu.matmul %38, %39, %cst_22 {dimension_numbers = #tpu.dot_dimension_numbers<[1], [1], [0], [0], [0, 0, 1, 0], [], []>} : vector<16x16xf32>, vector<16x16xf32>, vector<16x16xf32> -> vector<16x16xf32>
    %cst_23 = arith.constant 2.500000e-01 : f32
    %42 = vector.broadcast %cst_23 : f32 to vector<16x16xf32>
    %43 = arith.mulf %41, %42 : vector<16x16xf32>
    %44 = vector.broadcast %16 : vector<1x16xf32> to vector<16x16xf32>
    %45 = arith.addf %43, %44 : vector<16x16xf32>
    %cst_24 = arith.constant dense<0xFF800000> : vector<16xf32>
    %46 = vector.multi_reduction <maximumf>, %45, %cst_24 [1] : vector<16x16xf32> to vector<16xf32>
    %47 = vector.shape_cast %46 : vector<16xf32> to vector<16x1xf32>
    %48 = vector.broadcast %47 : vector<16x1xf32> to vector<16x16xf32>
    %49 = arith.subf %45, %48 : vector<16x16xf32>
    %50 = math.exp %49 : vector<16x16xf32>
    %cst_25 = arith.constant dense<0.000000e+00> : vector<16xf32>
    %51 = vector.multi_reduction <add>, %50, %cst_25 [1] : vector<16x16xf32> to vector<16xf32>
    %52 = vector.shape_cast %51 : vector<16xf32> to vector<16x1xf32>
    %53 = tpu.reciprocal %52 {approx = true} : vector<16x1xf32> -> vector<16x1xf32>
    %54 = vector.broadcast %53 : vector<16x1xf32> to vector<16x16xf32>
    %55 = arith.mulf %50, %54 : vector<16x16xf32>
    %cst_26 = arith.constant dense<0.000000e+00> : vector<16x16xf32>
    %56 = tpu.matmul %55, %40, %cst_26 {dimension_numbers = #tpu.dot_dimension_numbers<[1], [0], [0], [1], [0, 0, 1, 1], [], []>} : vector<16x16xf32>, vector<16x16xf32>, vector<16x16xf32> -> vector<16x16xf32>
    %57 = vector.extract_strided_slice %10 {offsets = [16, 0], sizes = [16, 32], strides = [1, 1]} : vector<32x32xf32> to vector<16x32xf32>
    %cst_27 = arith.constant dense<0.000000e+00> : vector<16x32xf32>
    %58 = tpu.matmul %56, %57, %cst_27 {dimension_numbers = #tpu.dot_dimension_numbers<[1], [0], [0], [1], [0, 0, 1, 1], [], []>} : vector<16x16xf32>, vector<16x32xf32>, vector<16x32xf32> -> vector<16x32xf32>
    %59 = arith.addf %37, %58 : vector<16x32xf32>
    %60 = vector.extract_strided_slice %2 {offsets = [1, 0, 0], sizes = [1, 1, 16], strides = [1, 1, 1]} : vector<2x1x16xf32> to vector<1x1x16xf32>
    %61 = vector.shape_cast %60 : vector<1x1x16xf32> to vector<1x16xf32>
    %cst_28 = arith.constant 1.000000e+00 : f32
    %62 = vector.broadcast %cst_28 : f32 to vector<1x16xf32>
    %63 = arith.subf %61, %62 : vector<1x16xf32>
    %cst_29 = arith.constant 1.000000e+09 : f32
    %64 = vector.broadcast %cst_29 : f32 to vector<1x16xf32>
    %65 = arith.mulf %63, %64 : vector<1x16xf32>
    %66 = vector.extract_strided_slice %9 {offsets = [16, 0], sizes = [16, 16], strides = [1, 1]} : vector<32x96xf32> to vector<16x16xf32>
    %67 = vector.extract_strided_slice %9 {offsets = [16, 32], sizes = [16, 16], strides = [1, 1]} : vector<32x96xf32> to vector<16x16xf32>
    %68 = vector.extract_strided_slice %9 {offsets = [16, 64], sizes = [16, 16], strides = [1, 1]} : vector<32x96xf32> to vector<16x16xf32>
    %cst_30 = arith.constant dense<0.000000e+00> : vector<16x16xf32>
    %69 = tpu.matmul %66, %67, %cst_30 {dimension_numbers = #tpu.dot_dimension_numbers<[1], [1], [0], [0], [0, 0, 1, 0], [], []>} : vector<16x16xf32>, vector<16x16xf32>, vector<16x16xf32> -> vector<16x16xf32>
    %cst_31 = arith.constant 2.500000e-01 : f32
    %70 = vector.broadcast %cst_31 : f32 to vector<16x16xf32>
    %71 = arith.mulf %69, %70 : vector<16x16xf32>
    %72 = vector.broadcast %65 : vector<1x16xf32> to vector<16x16xf32>
    %73 = arith.addf %71, %72 : vector<16x16xf32>
    %cst_32 = arith.constant dense<0xFF800000> : vector<16xf32>
    %74 = vector.multi_reduction <maximumf>, %73, %cst_32 [1] : vector<16x16xf32> to vector<16xf32>
    %75 = vector.shape_cast %74 : vector<16xf32> to vector<16x1xf32>
    %76 = vector.broadcast %75 : vector<16x1xf32> to vector<16x16xf32>
    %77 = arith.subf %73, %76 : vector<16x16xf32>
    %78 = math.exp %77 : vector<16x16xf32>
    %cst_33 = arith.constant dense<0.000000e+00> : vector<16xf32>
    %79 = vector.multi_reduction <add>, %78, %cst_33 [1] : vector<16x16xf32> to vector<16xf32>
    %80 = vector.shape_cast %79 : vector<16xf32> to vector<16x1xf32>
    %81 = tpu.reciprocal %80 {approx = true} : vector<16x1xf32> -> vector<16x1xf32>
    %82 = vector.broadcast %81 : vector<16x1xf32> to vector<16x16xf32>
    %83 = arith.mulf %78, %82 : vector<16x16xf32>
    %cst_34 = arith.constant dense<0.000000e+00> : vector<16x16xf32>
    %84 = tpu.matmul %83, %68, %cst_34 {dimension_numbers = #tpu.dot_dimension_numbers<[1], [0], [0], [1], [0, 0, 1, 1], [], []>} : vector<16x16xf32>, vector<16x16xf32>, vector<16x16xf32> -> vector<16x16xf32>
    %85 = vector.extract_strided_slice %10 {offsets = [0, 0], sizes = [16, 32], strides = [1, 1]} : vector<32x32xf32> to vector<16x32xf32>
    %cst_35 = arith.constant dense<0.000000e+00> : vector<16x32xf32>
    %86 = tpu.matmul %84, %85, %cst_35 {dimension_numbers = #tpu.dot_dimension_numbers<[1], [0], [0], [1], [0, 0, 1, 1], [], []>} : vector<16x16xf32>, vector<16x32xf32>, vector<16x32xf32> -> vector<16x32xf32>
    %87 = vector.extract_strided_slice %9 {offsets = [16, 16], sizes = [16, 16], strides = [1, 1]} : vector<32x96xf32> to vector<16x16xf32>
    %88 = vector.extract_strided_slice %9 {offsets = [16, 48], sizes = [16, 16], strides = [1, 1]} : vector<32x96xf32> to vector<16x16xf32>
    %89 = vector.extract_strided_slice %9 {offsets = [16, 80], sizes = [16, 16], strides = [1, 1]} : vector<32x96xf32> to vector<16x16xf32>
    %cst_36 = arith.constant dense<0.000000e+00> : vector<16x16xf32>
    %90 = tpu.matmul %87, %88, %cst_36 {dimension_numbers = #tpu.dot_dimension_numbers<[1], [1], [0], [0], [0, 0, 1, 0], [], []>} : vector<16x16xf32>, vector<16x16xf32>, vector<16x16xf32> -> vector<16x16xf32>
    %cst_37 = arith.constant 2.500000e-01 : f32
    %91 = vector.broadcast %cst_37 : f32 to vector<16x16xf32>
    %92 = arith.mulf %90, %91 : vector<16x16xf32>
    %93 = vector.broadcast %65 : vector<1x16xf32> to vector<16x16xf32>
    %94 = arith.addf %92, %93 : vector<16x16xf32>
    %cst_38 = arith.constant dense<0xFF800000> : vector<16xf32>
    %95 = vector.multi_reduction <maximumf>, %94, %cst_38 [1] : vector<16x16xf32> to vector<16xf32>
    %96 = vector.shape_cast %95 : vector<16xf32> to vector<16x1xf32>
    %97 = vector.broadcast %96 : vector<16x1xf32> to vector<16x16xf32>
    %98 = arith.subf %94, %97 : vector<16x16xf32>
    %99 = math.exp %98 : vector<16x16xf32>
    %cst_39 = arith.constant dense<0.000000e+00> : vector<16xf32>
    %100 = vector.multi_reduction <add>, %99, %cst_39 [1] : vector<16x16xf32> to vector<16xf32>
    %101 = vector.shape_cast %100 : vector<16xf32> to vector<16x1xf32>
    %102 = tpu.reciprocal %101 {approx = true} : vector<16x1xf32> -> vector<16x1xf32>
    %103 = vector.broadcast %102 : vector<16x1xf32> to vector<16x16xf32>
    %104 = arith.mulf %99, %103 : vector<16x16xf32>
    %cst_40 = arith.constant dense<0.000000e+00> : vector<16x16xf32>
    %105 = tpu.matmul %104, %89, %cst_40 {dimension_numbers = #tpu.dot_dimension_numbers<[1], [0], [0], [1], [0, 0, 1, 1], [], []>} : vector<16x16xf32>, vector<16x16xf32>, vector<16x16xf32> -> vector<16x16xf32>
    %106 = vector.extract_strided_slice %10 {offsets = [16, 0], sizes = [16, 32], strides = [1, 1]} : vector<32x32xf32> to vector<16x32xf32>
    %cst_41 = arith.constant dense<0.000000e+00> : vector<16x32xf32>
    %107 = tpu.matmul %105, %106, %cst_41 {dimension_numbers = #tpu.dot_dimension_numbers<[1], [0], [0], [1], [0, 0, 1, 1], [], []>} : vector<16x16xf32>, vector<16x32xf32>, vector<16x32xf32> -> vector<16x32xf32>
    %108 = arith.addf %86, %107 : vector<16x32xf32>
    %109 = tpu.concatenate %59, %108 in 0 : vector<16x32xf32>, vector<16x32xf32> -> vector<32x32xf32>
    %c0_42 = arith.constant 0 : index
    %c0_43 = arith.constant 0 : index
    %110 = vector.load %arg7[%c0_42, %c0_43] : memref<1x32xf32, #tpu.memory_space<vmem>>, vector<1x32xf32>
    %111 = vector.broadcast %110 : vector<1x32xf32> to vector<32x32xf32>
    %112 = arith.addf %109, %111 : vector<32x32xf32>
    %113 = arith.addf %112, %1 : vector<32x32xf32>
    %c0_44 = arith.constant 0 : index
    %c0_45 = arith.constant 0 : index
    %114 = vector.load %arg8[%c0_44, %c0_45] : memref<1x32xf32, #tpu.memory_space<vmem>>, vector<1x32xf32>
    %c0_46 = arith.constant 0 : index
    %c0_47 = arith.constant 0 : index
    %115 = vector.load %arg9[%c0_46, %c0_47] : memref<1x32xf32, #tpu.memory_space<vmem>>, vector<1x32xf32>
    %cst_48 = arith.constant dense<0.000000e+00> : vector<32xf32>
    %116 = vector.multi_reduction <add>, %113, %cst_48 [1] : vector<32x32xf32> to vector<32xf32>
    %117 = vector.shape_cast %116 : vector<32xf32> to vector<32x1xf32>
    %cst_49 = arith.constant 3.200000e+01 : f32
    %118 = vector.broadcast %cst_49 : f32 to vector<32x1xf32>
    %119 = arith.divf %117, %118 : vector<32x1xf32>
    %120 = vector.broadcast %119 : vector<32x1xf32> to vector<32x32xf32>
    %121 = arith.subf %113, %120 : vector<32x32xf32>
    %122 = arith.mulf %121, %121 : vector<32x32xf32>
    %cst_50 = arith.constant dense<0.000000e+00> : vector<32xf32>
    %123 = vector.multi_reduction <add>, %122, %cst_50 [1] : vector<32x32xf32> to vector<32xf32>
    %124 = vector.shape_cast %123 : vector<32xf32> to vector<32x1xf32>
    %cst_51 = arith.constant 3.200000e+01 : f32
    %125 = vector.broadcast %cst_51 : f32 to vector<32x1xf32>
    %126 = arith.divf %124, %125 : vector<32x1xf32>
    %127 = vector.broadcast %119 : vector<32x1xf32> to vector<32x32xf32>
    %128 = arith.subf %113, %127 : vector<32x32xf32>
    %cst_52 = arith.constant 9.99999974E-6 : f32
    %129 = vector.broadcast %cst_52 : f32 to vector<32x1xf32>
    %130 = arith.addf %126, %129 : vector<32x1xf32>
    %131 = math.rsqrt %130 : vector<32x1xf32>
    %132 = vector.broadcast %131 : vector<32x1xf32> to vector<32x32xf32>
    %133 = arith.mulf %128, %132 : vector<32x32xf32>
    %134 = vector.broadcast %114 : vector<1x32xf32> to vector<32x32xf32>
    %135 = arith.mulf %133, %134 : vector<32x32xf32>
    %136 = vector.broadcast %115 : vector<1x32xf32> to vector<32x32xf32>
    %137 = arith.addf %135, %136 : vector<32x32xf32>
    %138 = vector.broadcast %4 : vector<32x1xf32> to vector<32x32xf32>
    %139 = arith.mulf %137, %138 : vector<32x32xf32>
    %c0_53 = arith.constant 0 : index
    %c0_54 = arith.constant 0 : index
    %c0_55 = arith.constant 0 : index
    %140 = vector.load %arg10[%c0_53, %c0_54, %c0_55] : memref<9x32x64xf32, #tpu.memory_space<vmem>>, vector<9x32x64xf32>
    %c0_56 = arith.constant 0 : index
    %c0_57 = arith.constant 0 : index
    %141 = vector.load %arg11[%c0_56, %c0_57] : memref<1x64xf32, #tpu.memory_space<vmem>>, vector<1x64xf32>
    %cst_58 = arith.constant 0.000000e+00 : f32
    %142 = vector.broadcast %cst_58 : f32 to vector<4x32xf32>
    %143 = vector.extract_strided_slice %139 {offsets = [0, 0], sizes = [16, 32], strides = [1, 1]} : vector<32x32xf32> to vector<16x32xf32>
    %144 = tpu.concatenate %142, %143, %142 in 0 : vector<4x32xf32>, vector<16x32xf32>, vector<4x32xf32> -> vector<24x32xf32>
    %145 = vector.extract_strided_slice %144 {offsets = [0, 0], sizes = [16, 32], strides = [1, 1]} : vector<24x32xf32> to vector<16x32xf32>
    %146 = vector.extract_strided_slice %140 {offsets = [0, 0, 0], sizes = [1, 32, 64], strides = [1, 1, 1]} : vector<9x32x64xf32> to vector<1x32x64xf32>
    %147 = vector.shape_cast %146 : vector<1x32x64xf32> to vector<32x64xf32>
    %cst_59 = arith.constant dense<0.000000e+00> : vector<16x64xf32>
    %148 = tpu.matmul %145, %147, %cst_59 {dimension_numbers = #tpu.dot_dimension_numbers<[1], [0], [0], [1], [0, 0, 1, 1], [], []>} : vector<16x32xf32>, vector<32x64xf32>, vector<16x64xf32> -> vector<16x64xf32>
    %149 = vector.extract_strided_slice %144 {offsets = [1, 0], sizes = [16, 32], strides = [1, 1]} : vector<24x32xf32> to vector<16x32xf32>
    %150 = vector.extract_strided_slice %140 {offsets = [1, 0, 0], sizes = [1, 32, 64], strides = [1, 1, 1]} : vector<9x32x64xf32> to vector<1x32x64xf32>
    %151 = vector.shape_cast %150 : vector<1x32x64xf32> to vector<32x64xf32>
    %cst_60 = arith.constant dense<0.000000e+00> : vector<16x64xf32>
    %152 = tpu.matmul %149, %151, %cst_60 {dimension_numbers = #tpu.dot_dimension_numbers<[1], [0], [0], [1], [0, 0, 1, 1], [], []>} : vector<16x32xf32>, vector<32x64xf32>, vector<16x64xf32> -> vector<16x64xf32>
    %153 = arith.addf %148, %152 : vector<16x64xf32>
    %154 = vector.extract_strided_slice %144 {offsets = [2, 0], sizes = [16, 32], strides = [1, 1]} : vector<24x32xf32> to vector<16x32xf32>
    %155 = vector.extract_strided_slice %140 {offsets = [2, 0, 0], sizes = [1, 32, 64], strides = [1, 1, 1]} : vector<9x32x64xf32> to vector<1x32x64xf32>
    %156 = vector.shape_cast %155 : vector<1x32x64xf32> to vector<32x64xf32>
    %cst_61 = arith.constant dense<0.000000e+00> : vector<16x64xf32>
    %157 = tpu.matmul %154, %156, %cst_61 {dimension_numbers = #tpu.dot_dimension_numbers<[1], [0], [0], [1], [0, 0, 1, 1], [], []>} : vector<16x32xf32>, vector<32x64xf32>, vector<16x64xf32> -> vector<16x64xf32>
    %158 = arith.addf %153, %157 : vector<16x64xf32>
    %159 = vector.extract_strided_slice %144 {offsets = [3, 0], sizes = [16, 32], strides = [1, 1]} : vector<24x32xf32> to vector<16x32xf32>
    %160 = vector.extract_strided_slice %140 {offsets = [3, 0, 0], sizes = [1, 32, 64], strides = [1, 1, 1]} : vector<9x32x64xf32> to vector<1x32x64xf32>
    %161 = vector.shape_cast %160 : vector<1x32x64xf32> to vector<32x64xf32>
    %cst_62 = arith.constant dense<0.000000e+00> : vector<16x64xf32>
    %162 = tpu.matmul %159, %161, %cst_62 {dimension_numbers = #tpu.dot_dimension_numbers<[1], [0], [0], [1], [0, 0, 1, 1], [], []>} : vector<16x32xf32>, vector<32x64xf32>, vector<16x64xf32> -> vector<16x64xf32>
    %163 = arith.addf %158, %162 : vector<16x64xf32>
    %164 = vector.extract_strided_slice %144 {offsets = [4, 0], sizes = [16, 32], strides = [1, 1]} : vector<24x32xf32> to vector<16x32xf32>
    %165 = vector.extract_strided_slice %140 {offsets = [4, 0, 0], sizes = [1, 32, 64], strides = [1, 1, 1]} : vector<9x32x64xf32> to vector<1x32x64xf32>
    %166 = vector.shape_cast %165 : vector<1x32x64xf32> to vector<32x64xf32>
    %cst_63 = arith.constant dense<0.000000e+00> : vector<16x64xf32>
    %167 = tpu.matmul %164, %166, %cst_63 {dimension_numbers = #tpu.dot_dimension_numbers<[1], [0], [0], [1], [0, 0, 1, 1], [], []>} : vector<16x32xf32>, vector<32x64xf32>, vector<16x64xf32> -> vector<16x64xf32>
    %168 = arith.addf %163, %167 : vector<16x64xf32>
    %169 = vector.extract_strided_slice %144 {offsets = [5, 0], sizes = [16, 32], strides = [1, 1]} : vector<24x32xf32> to vector<16x32xf32>
    %170 = vector.extract_strided_slice %140 {offsets = [5, 0, 0], sizes = [1, 32, 64], strides = [1, 1, 1]} : vector<9x32x64xf32> to vector<1x32x64xf32>
    %171 = vector.shape_cast %170 : vector<1x32x64xf32> to vector<32x64xf32>
    %cst_64 = arith.constant dense<0.000000e+00> : vector<16x64xf32>
    %172 = tpu.matmul %169, %171, %cst_64 {dimension_numbers = #tpu.dot_dimension_numbers<[1], [0], [0], [1], [0, 0, 1, 1], [], []>} : vector<16x32xf32>, vector<32x64xf32>, vector<16x64xf32> -> vector<16x64xf32>
    %173 = arith.addf %168, %172 : vector<16x64xf32>
    %174 = vector.extract_strided_slice %144 {offsets = [6, 0], sizes = [16, 32], strides = [1, 1]} : vector<24x32xf32> to vector<16x32xf32>
    %175 = vector.extract_strided_slice %140 {offsets = [6, 0, 0], sizes = [1, 32, 64], strides = [1, 1, 1]} : vector<9x32x64xf32> to vector<1x32x64xf32>
    %176 = vector.shape_cast %175 : vector<1x32x64xf32> to vector<32x64xf32>
    %cst_65 = arith.constant dense<0.000000e+00> : vector<16x64xf32>
    %177 = tpu.matmul %174, %176, %cst_65 {dimension_numbers = #tpu.dot_dimension_numbers<[1], [0], [0], [1], [0, 0, 1, 1], [], []>} : vector<16x32xf32>, vector<32x64xf32>, vector<16x64xf32> -> vector<16x64xf32>
    %178 = arith.addf %173, %177 : vector<16x64xf32>
    %179 = vector.extract_strided_slice %144 {offsets = [7, 0], sizes = [16, 32], strides = [1, 1]} : vector<24x32xf32> to vector<16x32xf32>
    %180 = vector.extract_strided_slice %140 {offsets = [7, 0, 0], sizes = [1, 32, 64], strides = [1, 1, 1]} : vector<9x32x64xf32> to vector<1x32x64xf32>
    %181 = vector.shape_cast %180 : vector<1x32x64xf32> to vector<32x64xf32>
    %cst_66 = arith.constant dense<0.000000e+00> : vector<16x64xf32>
    %182 = tpu.matmul %179, %181, %cst_66 {dimension_numbers = #tpu.dot_dimension_numbers<[1], [0], [0], [1], [0, 0, 1, 1], [], []>} : vector<16x32xf32>, vector<32x64xf32>, vector<16x64xf32> -> vector<16x64xf32>
    %183 = arith.addf %178, %182 : vector<16x64xf32>
    %184 = vector.extract_strided_slice %144 {offsets = [8, 0], sizes = [16, 32], strides = [1, 1]} : vector<24x32xf32> to vector<16x32xf32>
    %185 = vector.extract_strided_slice %140 {offsets = [8, 0, 0], sizes = [1, 32, 64], strides = [1, 1, 1]} : vector<9x32x64xf32> to vector<1x32x64xf32>
    %186 = vector.shape_cast %185 : vector<1x32x64xf32> to vector<32x64xf32>
    %cst_67 = arith.constant dense<0.000000e+00> : vector<16x64xf32>
    %187 = tpu.matmul %184, %186, %cst_67 {dimension_numbers = #tpu.dot_dimension_numbers<[1], [0], [0], [1], [0, 0, 1, 1], [], []>} : vector<16x32xf32>, vector<32x64xf32>, vector<16x64xf32> -> vector<16x64xf32>
    %188 = arith.addf %183, %187 : vector<16x64xf32>
    %189 = vector.extract_strided_slice %139 {offsets = [16, 0], sizes = [16, 32], strides = [1, 1]} : vector<32x32xf32> to vector<16x32xf32>
    %190 = tpu.concatenate %142, %189, %142 in 0 : vector<4x32xf32>, vector<16x32xf32>, vector<4x32xf32> -> vector<24x32xf32>
    %191 = vector.extract_strided_slice %190 {offsets = [0, 0], sizes = [16, 32], strides = [1, 1]} : vector<24x32xf32> to vector<16x32xf32>
    %192 = vector.extract_strided_slice %140 {offsets = [0, 0, 0], sizes = [1, 32, 64], strides = [1, 1, 1]} : vector<9x32x64xf32> to vector<1x32x64xf32>
    %193 = vector.shape_cast %192 : vector<1x32x64xf32> to vector<32x64xf32>
    %cst_68 = arith.constant dense<0.000000e+00> : vector<16x64xf32>
    %194 = tpu.matmul %191, %193, %cst_68 {dimension_numbers = #tpu.dot_dimension_numbers<[1], [0], [0], [1], [0, 0, 1, 1], [], []>} : vector<16x32xf32>, vector<32x64xf32>, vector<16x64xf32> -> vector<16x64xf32>
    %195 = vector.extract_strided_slice %190 {offsets = [1, 0], sizes = [16, 32], strides = [1, 1]} : vector<24x32xf32> to vector<16x32xf32>
    %196 = vector.extract_strided_slice %140 {offsets = [1, 0, 0], sizes = [1, 32, 64], strides = [1, 1, 1]} : vector<9x32x64xf32> to vector<1x32x64xf32>
    %197 = vector.shape_cast %196 : vector<1x32x64xf32> to vector<32x64xf32>
    %cst_69 = arith.constant dense<0.000000e+00> : vector<16x64xf32>
    %198 = tpu.matmul %195, %197, %cst_69 {dimension_numbers = #tpu.dot_dimension_numbers<[1], [0], [0], [1], [0, 0, 1, 1], [], []>} : vector<16x32xf32>, vector<32x64xf32>, vector<16x64xf32> -> vector<16x64xf32>
    %199 = arith.addf %194, %198 : vector<16x64xf32>
    %200 = vector.extract_strided_slice %190 {offsets = [2, 0], sizes = [16, 32], strides = [1, 1]} : vector<24x32xf32> to vector<16x32xf32>
    %201 = vector.extract_strided_slice %140 {offsets = [2, 0, 0], sizes = [1, 32, 64], strides = [1, 1, 1]} : vector<9x32x64xf32> to vector<1x32x64xf32>
    %202 = vector.shape_cast %201 : vector<1x32x64xf32> to vector<32x64xf32>
    %cst_70 = arith.constant dense<0.000000e+00> : vector<16x64xf32>
    %203 = tpu.matmul %200, %202, %cst_70 {dimension_numbers = #tpu.dot_dimension_numbers<[1], [0], [0], [1], [0, 0, 1, 1], [], []>} : vector<16x32xf32>, vector<32x64xf32>, vector<16x64xf32> -> vector<16x64xf32>
    %204 = arith.addf %199, %203 : vector<16x64xf32>
    %205 = vector.extract_strided_slice %190 {offsets = [3, 0], sizes = [16, 32], strides = [1, 1]} : vector<24x32xf32> to vector<16x32xf32>
    %206 = vector.extract_strided_slice %140 {offsets = [3, 0, 0], sizes = [1, 32, 64], strides = [1, 1, 1]} : vector<9x32x64xf32> to vector<1x32x64xf32>
    %207 = vector.shape_cast %206 : vector<1x32x64xf32> to vector<32x64xf32>
    %cst_71 = arith.constant dense<0.000000e+00> : vector<16x64xf32>
    %208 = tpu.matmul %205, %207, %cst_71 {dimension_numbers = #tpu.dot_dimension_numbers<[1], [0], [0], [1], [0, 0, 1, 1], [], []>} : vector<16x32xf32>, vector<32x64xf32>, vector<16x64xf32> -> vector<16x64xf32>
    %209 = arith.addf %204, %208 : vector<16x64xf32>
    %210 = vector.extract_strided_slice %190 {offsets = [4, 0], sizes = [16, 32], strides = [1, 1]} : vector<24x32xf32> to vector<16x32xf32>
    %211 = vector.extract_strided_slice %140 {offsets = [4, 0, 0], sizes = [1, 32, 64], strides = [1, 1, 1]} : vector<9x32x64xf32> to vector<1x32x64xf32>
    %212 = vector.shape_cast %211 : vector<1x32x64xf32> to vector<32x64xf32>
    %cst_72 = arith.constant dense<0.000000e+00> : vector<16x64xf32>
    %213 = tpu.matmul %210, %212, %cst_72 {dimension_numbers = #tpu.dot_dimension_numbers<[1], [0], [0], [1], [0, 0, 1, 1], [], []>} : vector<16x32xf32>, vector<32x64xf32>, vector<16x64xf32> -> vector<16x64xf32>
    %214 = arith.addf %209, %213 : vector<16x64xf32>
    %215 = vector.extract_strided_slice %190 {offsets = [5, 0], sizes = [16, 32], strides = [1, 1]} : vector<24x32xf32> to vector<16x32xf32>
    %216 = vector.extract_strided_slice %140 {offsets = [5, 0, 0], sizes = [1, 32, 64], strides = [1, 1, 1]} : vector<9x32x64xf32> to vector<1x32x64xf32>
    %217 = vector.shape_cast %216 : vector<1x32x64xf32> to vector<32x64xf32>
    %cst_73 = arith.constant dense<0.000000e+00> : vector<16x64xf32>
    %218 = tpu.matmul %215, %217, %cst_73 {dimension_numbers = #tpu.dot_dimension_numbers<[1], [0], [0], [1], [0, 0, 1, 1], [], []>} : vector<16x32xf32>, vector<32x64xf32>, vector<16x64xf32> -> vector<16x64xf32>
    %219 = arith.addf %214, %218 : vector<16x64xf32>
    %220 = vector.extract_strided_slice %190 {offsets = [6, 0], sizes = [16, 32], strides = [1, 1]} : vector<24x32xf32> to vector<16x32xf32>
    %221 = vector.extract_strided_slice %140 {offsets = [6, 0, 0], sizes = [1, 32, 64], strides = [1, 1, 1]} : vector<9x32x64xf32> to vector<1x32x64xf32>
    %222 = vector.shape_cast %221 : vector<1x32x64xf32> to vector<32x64xf32>
    %cst_74 = arith.constant dense<0.000000e+00> : vector<16x64xf32>
    %223 = tpu.matmul %220, %222, %cst_74 {dimension_numbers = #tpu.dot_dimension_numbers<[1], [0], [0], [1], [0, 0, 1, 1], [], []>} : vector<16x32xf32>, vector<32x64xf32>, vector<16x64xf32> -> vector<16x64xf32>
    %224 = arith.addf %219, %223 : vector<16x64xf32>
    %225 = vector.extract_strided_slice %190 {offsets = [7, 0], sizes = [16, 32], strides = [1, 1]} : vector<24x32xf32> to vector<16x32xf32>
    %226 = vector.extract_strided_slice %140 {offsets = [7, 0, 0], sizes = [1, 32, 64], strides = [1, 1, 1]} : vector<9x32x64xf32> to vector<1x32x64xf32>
    %227 = vector.shape_cast %226 : vector<1x32x64xf32> to vector<32x64xf32>
    %cst_75 = arith.constant dense<0.000000e+00> : vector<16x64xf32>
    %228 = tpu.matmul %225, %227, %cst_75 {dimension_numbers = #tpu.dot_dimension_numbers<[1], [0], [0], [1], [0, 0, 1, 1], [], []>} : vector<16x32xf32>, vector<32x64xf32>, vector<16x64xf32> -> vector<16x64xf32>
    %229 = arith.addf %224, %228 : vector<16x64xf32>
    %230 = vector.extract_strided_slice %190 {offsets = [8, 0], sizes = [16, 32], strides = [1, 1]} : vector<24x32xf32> to vector<16x32xf32>
    %231 = vector.extract_strided_slice %140 {offsets = [8, 0, 0], sizes = [1, 32, 64], strides = [1, 1, 1]} : vector<9x32x64xf32> to vector<1x32x64xf32>
    %232 = vector.shape_cast %231 : vector<1x32x64xf32> to vector<32x64xf32>
    %cst_76 = arith.constant dense<0.000000e+00> : vector<16x64xf32>
    %233 = tpu.matmul %230, %232, %cst_76 {dimension_numbers = #tpu.dot_dimension_numbers<[1], [0], [0], [1], [0, 0, 1, 1], [], []>} : vector<16x32xf32>, vector<32x64xf32>, vector<16x64xf32> -> vector<16x64xf32>
    %234 = arith.addf %229, %233 : vector<16x64xf32>
    %235 = tpu.concatenate %188, %234 in 0 : vector<16x64xf32>, vector<16x64xf32> -> vector<32x64xf32>
    %236 = vector.broadcast %141 : vector<1x64xf32> to vector<32x64xf32>
    %237 = arith.addf %235, %236 : vector<32x64xf32>
    %cst_77 = arith.constant 0.000000e+00 : f32
    %238 = vector.broadcast %cst_77 : f32 to vector<32x64xf32>
    %239 = arith.maximumf %237, %238 : vector<32x64xf32>
    %c0_78 = arith.constant 0 : index
    %c0_79 = arith.constant 0 : index
    %c0_80 = arith.constant 0 : index
    %240 = vector.load %arg12[%c0_78, %c0_79, %c0_80] : memref<1x64x32xf32, #tpu.memory_space<vmem>>, vector<1x64x32xf32>
    %c0_81 = arith.constant 0 : index
    %c0_82 = arith.constant 0 : index
    %241 = vector.load %arg13[%c0_81, %c0_82] : memref<1x32xf32, #tpu.memory_space<vmem>>, vector<1x32xf32>
    %242 = vector.shape_cast %240 : vector<1x64x32xf32> to vector<64x32xf32>
    %cst_83 = arith.constant dense<0.000000e+00> : vector<32x32xf32>
    %243 = tpu.matmul %239, %242, %cst_83 {dimension_numbers = #tpu.dot_dimension_numbers<[1], [0], [0], [1], [0, 0, 1, 1], [], []>} : vector<32x64xf32>, vector<64x32xf32>, vector<32x32xf32> -> vector<32x32xf32>
    %244 = vector.broadcast %241 : vector<1x32xf32> to vector<32x32xf32>
    %245 = arith.addf %243, %244 : vector<32x32xf32>
    %246 = arith.addf %245, %139 : vector<32x32xf32>
    %c0_84 = arith.constant 0 : index
    %c0_85 = arith.constant 0 : index
    %247 = vector.load %arg14[%c0_84, %c0_85] : memref<1x32xf32, #tpu.memory_space<vmem>>, vector<1x32xf32>
    %c0_86 = arith.constant 0 : index
    %c0_87 = arith.constant 0 : index
    %248 = vector.load %arg15[%c0_86, %c0_87] : memref<1x32xf32, #tpu.memory_space<vmem>>, vector<1x32xf32>
    %cst_88 = arith.constant dense<0.000000e+00> : vector<32xf32>
    %249 = vector.multi_reduction <add>, %246, %cst_88 [1] : vector<32x32xf32> to vector<32xf32>
    %250 = vector.shape_cast %249 : vector<32xf32> to vector<32x1xf32>
    %cst_89 = arith.constant 3.200000e+01 : f32
    %251 = vector.broadcast %cst_89 : f32 to vector<32x1xf32>
    %252 = arith.divf %250, %251 : vector<32x1xf32>
    %253 = vector.broadcast %252 : vector<32x1xf32> to vector<32x32xf32>
    %254 = arith.subf %246, %253 : vector<32x32xf32>
    %255 = arith.mulf %254, %254 : vector<32x32xf32>
    %cst_90 = arith.constant dense<0.000000e+00> : vector<32xf32>
    %256 = vector.multi_reduction <add>, %255, %cst_90 [1] : vector<32x32xf32> to vector<32xf32>
    %257 = vector.shape_cast %256 : vector<32xf32> to vector<32x1xf32>
    %cst_91 = arith.constant 3.200000e+01 : f32
    %258 = vector.broadcast %cst_91 : f32 to vector<32x1xf32>
    %259 = arith.divf %257, %258 : vector<32x1xf32>
    %260 = vector.broadcast %252 : vector<32x1xf32> to vector<32x32xf32>
    %261 = arith.subf %246, %260 : vector<32x32xf32>
    %cst_92 = arith.constant 9.99999974E-6 : f32
    %262 = vector.broadcast %cst_92 : f32 to vector<32x1xf32>
    %263 = arith.addf %259, %262 : vector<32x1xf32>
    %264 = math.rsqrt %263 : vector<32x1xf32>
    %265 = vector.broadcast %264 : vector<32x1xf32> to vector<32x32xf32>
    %266 = arith.mulf %261, %265 : vector<32x32xf32>
    %267 = vector.broadcast %247 : vector<1x32xf32> to vector<32x32xf32>
    %268 = arith.mulf %266, %267 : vector<32x32xf32>
    %269 = vector.broadcast %248 : vector<1x32xf32> to vector<32x32xf32>
    %270 = arith.addf %268, %269 : vector<32x32xf32>
    %271 = vector.broadcast %4 : vector<32x1xf32> to vector<32x32xf32>
    %272 = arith.mulf %270, %271 : vector<32x32xf32>
    %273 = vector.shape_cast %272 : vector<32x32xf32> to vector<2x16x32xf32>
    %c0_93 = arith.constant 0 : index
    %c0_94 = arith.constant 0 : index
    %c0_95 = arith.constant 0 : index
    %274 = vector.load %arg18[%c0_93, %c0_94, %c0_95] : memref<2x16x32xf32, #tpu.memory_space<vmem>>, vector<2x16x32xf32>
    tpu.vector_store %arg18[%c0_93, %c0_94, %c0_95], %273 {strides = array<i32>} : memref<2x16x32xf32, #tpu.memory_space<vmem>>, vector<2x16x32xf32>,
    %c0_96 = arith.constant 0 : index
    %c0_97 = arith.constant 0 : index
    %275 = vector.load %arg16[%c0_96, %c0_97] : memref<32x16xf32, #tpu.memory_space<vmem>>, vector<32x16xf32>
    %cst_98 = arith.constant dense<0.000000e+00> : vector<32x16xf32>
    %276 = tpu.matmul %272, %275, %cst_98 {dimension_numbers = #tpu.dot_dimension_numbers<[1], [0], [0], [1], [0, 0, 1, 1], [], []>} : vector<32x32xf32>, vector<32x16xf32>, vector<32x16xf32> -> vector<32x16xf32>
    %c0_99 = arith.constant 0 : index
    %c0_100 = arith.constant 0 : index
    %277 = vector.load %arg17[%c0_99, %c0_100] : memref<1x16xf32, #tpu.memory_space<vmem>>, vector<1x16xf32>
    %278 = vector.broadcast %277 : vector<1x16xf32> to vector<32x16xf32>
    %279 = arith.addf %276, %278 : vector<32x16xf32>
    %280 = vector.shape_cast %279 : vector<32x16xf32> to vector<2x16x16xf32>
    %c0_101 = arith.constant 0 : index
    %c0_102 = arith.constant 0 : index
    %c0_103 = arith.constant 0 : index
    %281 = vector.load %arg19[%c0_101, %c0_102, %c0_103] : memref<2x16x16xf32, #tpu.memory_space<vmem>>, vector<2x16x16xf32>
    tpu.vector_store %arg19[%c0_101, %c0_102, %c0_103], %280 {strides = array<i32>} : memref<2x16x16xf32, #tpu.memory_space<vmem>>, vector<2x16x16xf32>,
    return
  }
  func.func @transform_0(%arg0: i32) -> (i32, i32, i32) {
    %c0_i32 = arith.constant 0 : i32
    %c0_i32_0 = arith.constant 0 : i32
    %c0_i32_1 = arith.constant 0 : i32
    return %arg0, %c0_i32, %c0_i32_0 : i32, i32, i32
  }
  func.func @transform_1(%arg0: i32) -> (i32, i32, i32) {
    %c0_i32 = arith.constant 0 : i32
    %c0_i32_0 = arith.constant 0 : i32
    %c0_i32_1 = arith.constant 0 : i32
    return %arg0, %c0_i32, %c0_i32_0 : i32, i32, i32
  }
  func.func @transform_2(%arg0: i32) -> (i32, i32, i32) {
    %c0_i32 = arith.constant 0 : i32
    %c0_i32_0 = arith.constant 0 : i32
    %c0_i32_1 = arith.constant 0 : i32
    return %arg0, %c0_i32, %c0_i32_0 : i32, i32, i32
  }
  func.func @transform_3(%arg0: i32) -> (i32, i32) {
    %c0_i32 = arith.constant 0 : i32
    %c0_i32_0 = arith.constant 0 : i32
    %c0_i32_1 = arith.constant 0 : i32
    return %c0_i32, %c0_i32_0 : i32, i32
  }
  func.func @transform_4(%arg0: i32) -> (i32, i32) {
    %c0_i32 = arith.constant 0 : i32
    %c0_i32_0 = arith.constant 0 : i32
    %c0_i32_1 = arith.constant 0 : i32
    return %c0_i32, %c0_i32_0 : i32, i32
  }
  func.func @transform_5(%arg0: i32) -> (i32, i32) {
    %c0_i32 = arith.constant 0 : i32
    %c0_i32_0 = arith.constant 0 : i32
    %c0_i32_1 = arith.constant 0 : i32
    return %c0_i32, %c0_i32_0 : i32, i32
  }
  func.func @transform_6(%arg0: i32) -> (i32, i32) {
    %c0_i32 = arith.constant 0 : i32
    %c0_i32_0 = arith.constant 0 : i32
    %c0_i32_1 = arith.constant 0 : i32
    return %c0_i32, %c0_i32_0 : i32, i32
  }
  func.func @transform_7(%arg0: i32) -> (i32, i32) {
    %c0_i32 = arith.constant 0 : i32
    %c0_i32_0 = arith.constant 0 : i32
    %c0_i32_1 = arith.constant 0 : i32
    return %c0_i32, %c0_i32_0 : i32, i32
  }
  func.func @transform_8(%arg0: i32) -> (i32, i32) {
    %c0_i32 = arith.constant 0 : i32
    %c0_i32_0 = arith.constant 0 : i32
    %c0_i32_1 = arith.constant 0 : i32
    return %c0_i32, %c0_i32_0 : i32, i32
  }
  func.func @transform_9(%arg0: i32) -> (i32, i32, i32) {
    %c0_i32 = arith.constant 0 : i32
    %c0_i32_0 = arith.constant 0 : i32
    %c0_i32_1 = arith.constant 0 : i32
    %c0_i32_2 = arith.constant 0 : i32
    return %c0_i32, %c0_i32_0, %c0_i32_1 : i32, i32, i32
  }
  func.func @transform_10(%arg0: i32) -> (i32, i32) {
    %c0_i32 = arith.constant 0 : i32
    %c0_i32_0 = arith.constant 0 : i32
    %c0_i32_1 = arith.constant 0 : i32
    return %c0_i32, %c0_i32_0 : i32, i32
  }
  func.func @transform_11(%arg0: i32) -> (i32, i32, i32) {
    %c0_i32 = arith.constant 0 : i32
    %c0_i32_0 = arith.constant 0 : i32
    %c0_i32_1 = arith.constant 0 : i32
    %c0_i32_2 = arith.constant 0 : i32
    return %c0_i32, %c0_i32_0, %c0_i32_1 : i32, i32, i32
  }
  func.func @transform_12(%arg0: i32) -> (i32, i32) {
    %c0_i32 = arith.constant 0 : i32
    %c0_i32_0 = arith.constant 0 : i32
    %c0_i32_1 = arith.constant 0 : i32
    return %c0_i32, %c0_i32_0 : i32, i32
  }
  func.func @transform_13(%arg0: i32) -> (i32, i32) {
    %c0_i32 = arith.constant 0 : i32
    %c0_i32_0 = arith.constant 0 : i32
    %c0_i32_1 = arith.constant 0 : i32
    return %c0_i32, %c0_i32_0 : i32, i32
  }
  func.func @transform_14(%arg0: i32) -> (i32, i32) {
    %c0_i32 = arith.constant 0 : i32
    %c0_i32_0 = arith.constant 0 : i32
    %c0_i32_1 = arith.constant 0 : i32
    return %c0_i32, %c0_i32_0 : i32, i32
  }
  func.func @transform_15(%arg0: i32) -> (i32, i32) {
    %c0_i32 = arith.constant 0 : i32
    %c0_i32_0 = arith.constant 0 : i32
    %c0_i32_1 = arith.constant 0 : i32
    return %c0_i32, %c0_i32_0 : i32, i32
  }
  func.func @transform_16(%arg0: i32) -> (i32, i32) {
    %c0_i32 = arith.constant 0 : i32
    %c0_i32_0 = arith.constant 0 : i32
    %c0_i32_1 = arith.constant 0 : i32
    return %c0_i32, %c0_i32_0 : i32, i32
  }
  func.func @transform_17(%arg0: i32) -> (i32, i32, i32) {
    %c0_i32 = arith.constant 0 : i32
    %c0_i32_0 = arith.constant 0 : i32
    %c0_i32_1 = arith.constant 0 : i32
    return %arg0, %c0_i32, %c0_i32_0 : i32, i32, i32
  }
  func.func @transform_18(%arg0: i32) -> (i32, i32, i32) {
    %c0_i32 = arith.constant 0 : i32
    %c0_i32_0 = arith.constant 0 : i32
    %c0_i32_1 = arith.constant 0 : i32
    return %arg0, %c0_i32, %c0_i32_0 : i32, i32, i32
  }
}

</mosaic_0001>

<bundles_post_ra>
// kernel: custom-call.4
= control target key start
LH: loop header
LB: loop body
LE: loop exit
PB: predicated region body
PF: predicated region fallthrough
CT: control target
= control target key end

     0   :  { %s6_s0 = inlined_call_operand.vmem [shape: u32[2,16], index: 0, kind: output, shape index: {}]  }

// kernel: squeeze.16
= control target key start
LH: loop header
LB: loop body
LE: loop exit
PB: predicated region body
PF: predicated region fallthrough
CT: control target
= control target key end

     0   :  { %vm7_vm0 = vcmask 130048   ;;  %s39_s0 = inlined_call_operand.vmem [shape: f32[32], index: 0, kind: input, shape index: {}]   ;;  %s40_s1 = inlined_call_operand.vmem [shape: f32[2,16], index: 1, kind: output, shape index: {}]  }
   0x1   :  { %v4_v0 = vld [vmem:[%s39_s0] sm:$0x1]  ;;  %s22_s0 = smov 112  }
   0x2   :  { %5 = vst [vmem:[#allocation1] sm:$0x1] %v4_v0 }
   0x9   :  { %v9_v1 = vld [vmem:[#allocation1] sm:$0x1]  }
   0xa   :  { %v6_v2 = vld [vmem:[#allocation1] sm:$0x1]   ;;  %10 = vrot.lane.b32.xlu0 %v9_v1, %s22_s0 }
   0xb   :  { %8 = vst.msk [vmem:[#allocation0] sm:$0x1] %vm7_vm0, %v6_v2  }
  0x7c   :  { %v11_v3 = vpop.permute.xlu0 %10  }
  0x7d   :  { %14 = vst.msk [vmem:[#allocation0 + $0x1] sm:$0x1] %vm7_vm0, %v11_v3  }
  0x84   :  { %v18_v4 = vld [vmem:[#allocation0] sm:$0x3] }
  0x85   :  { %20 = vst [vmem:[%s40_s1] sm:$0x3] %v18_v4 }

// kernel: fastspeech2_forward.4
= control target key start
LH: loop header
LB: loop body
LE: loop exit
PB: predicated region body
PF: predicated region fallthrough
CT: control target
= control target key end

     0   :  { %vm113_vm0 = vcmask 1040384   ;;  %vm123_vm1 = vcmask 1046528   ;;  %vm129_vm2 = vcmask 261120   ;;  %vm288_vm3 = vcmask 1045504   ;;  %s4217_s1 = inlined_call_operand.vmem [shape: f32[3,32,32], index: 1, kind: input, shape index: {}]   ;;  %s4218_s0 = inlined_call_operand.vmem [shape: f32[2,16,32], index: 0, kind: input, shape index: {}]   ;;  %s4219_s2 = inlined_call_operand.vmem [shape: f32[1,32], index: 2, kind: input, shape index: {}]   ;;  %s4220_s5 = inlined_call_operand.vmem [shape: f32[3,32,32], index: 5, kind: input, shape index: {}]   ;;  %s4221_s3 = inlined_call_operand.vmem [shape: f32[1,32], index: 3, kind: input, shape index: {}]   ;;  %s4222_s4 = inlined_call_operand.vmem [shape: f32[1,32], index: 4, kind: input, shape index: {}]   ;;  %s4223_s6 = inlined_call_operand.vmem [shape: f32[1,32], index: 6, kind: input, shape index: {}]   ;;  %s4224_s11 = inlined_call_operand.vmem [shape: f32[3,32,32], index: 11, kind: input, shape index: {}]   ;;  %s4225_s9 = inlined_call_operand.vmem [shape: f32[32,1], index: 9, kind: input, shape index: {}]   ;;  %s4226_s10 = inlined_call_operand.<no memory space> [shape: f32[1,1], index: 10, kind: input, shape index: {}]   ;;  %s4227_s12 = inlined_call_operand.vmem [shape: f32[1,32], index: 12, kind: input, shape index: {}]   ;;  %s4228_s7 = inlined_call_operand.vmem [shape: f32[1,32], index: 7, kind: input, shape index: {}]   ;;  %s4229_s8 = inlined_call_operand.vmem [shape: f32[1,32], index: 8, kind: input, shape index: {}]   ;;  %s4230_s15 = inlined_call_operand.vmem [shape: f32[3,32,32], index: 15, kind: input, shape index: {}]   ;;  %s4231_s13 = inlined_call_operand.vmem [shape: f32[1,32], index: 13, kind: input, shape index: {}]   ;;  %s4232_s14 = inlined_call_operand.vmem [shape: f32[1,32], index: 14, kind: input, shape index: {}]   ;;  %s4233_s16 = inlined_call_operand.vmem [shape: f32[1,32], index: 16, kind: input, shape index: {}]   ;;  %s4234_s19 = inlined_call_operand.vmem [shape: f32[32,1], index: 19, kind: input, shape index: {}]   ;;  %s4235_s17 = inlined_call_operand.vmem [shape: f32[1,32], index: 17, kind: input, shape index: {}]   ;;  %s4236_s18 = inlined_call_operand.vmem [shape: f32[1,32], index: 18, kind: input, shape index: {}]   ;;  %s4237_s20 = inlined_call_operand.<no memory space> [shape: f32[1,1], index: 20, kind: input, shape index: {}]   ;;  %s4238_s21 = inlined_call_operand.vmem [shape: f32[2,16,2], index: 21, kind: output, shape index: {}]  }
   0x1   :  { %4242 = sst [smem:[#allocation4_spill]] %s4217_s1  ;;  %vm2739_vm4 = vcmask 7168   ;;  %vm2744_vm5 = vcmask 15360  }
   0x2   :  { %4243 = sst [smem:[#allocation5_spill]] %s4218_s0  ;;  %s4248_s26 = sld [smem:[#allocation4_spill]] }
   0x3   :  { %4244 = sst [smem:[#allocation6_spill]] %s4219_s2  ;;  %s4249_s22 = sld [smem:[#allocation5_spill]] }
   0x4   :  { %4245 = sst [smem:[#allocation7_spill]] %s4220_s5  ;;  %s4250_s1 = sld [smem:[#allocation6_spill]] }
   0x5   :  { %4246 = sst [smem:[#allocation8_spill]] %s4221_s3 }
   0x6   :  { %4247 = sst [smem:[#allocation9_spill]] %s4222_s4  ;;  %s4251_s4 = sld [smem:[#allocation7_spill]] }
   0x7   :  { %s4252_s3 = sld [smem:[#allocation8_spill]]  ;;  %s4253_s23 = sld [smem:[#allocation9_spill]] }
   0x8   :  { %v80_v0 = vld [vmem:[%s4248_s26 + $0x20] sm:$0xff]  ;;  %v81_v1 = vld [vmem:[%s4248_s26 + $0x28] sm:$0xff]  ;;  %v82_v2 = vld [vmem:[%s4248_s26 + $0x30] sm:$0xff] }
   0x9   :  { %v3275_v3 = vpack.c.bf16 %v81_v1, %v80_v0  ;;  %v83_v4 = vld [vmem:[%s4248_s26 + $0x38] sm:$0xff]  ;;  %v72_v5 = vld [vmem:[%s4249_s22] sm:$0xff]  ;;  %v73_v6 = vld [vmem:[%s4249_s22 + $0x8] sm:$0xff] }
   0xa   :  { %v3279_v7 = vpack.c.bf16 %v83_v4, %v82_v2  ;;  %v114_v8 = vrot.slane %v72_v5, 7  ;;  %v115_v9 = vrot.slane %v73_v6, 7  ;;  %v74_v10 = vld [vmem:[%s4249_s22 + $0x10] sm:$0xff]  ;;  %v75_v11 = vld [vmem:[%s4249_s22 + $0x18] sm:$0xff]  ;;  %v76_v14 = vld [vmem:[%s4248_s26] sm:$0xff] }
   0xb   :  { %3276 = vmatprep.subr.bf16.mxu0 %v3275_v3  ;;  %3300 = vmatprep.subr.bf16.mxu1 %v3275_v3  ;;  %v377_v12 = vrot.slane %v74_v10, 7  ;;  %v378_v13 = vrot.slane %v75_v11, 7  ;;  %v77_v15 = vld [vmem:[%s4248_s26 + $0x8] sm:$0xff]  ;;  %v78_v27 = vld [vmem:[%s4248_s26 + $0x10] sm:$0xff]  ;;  %v79_v28 = vld [vmem:[%s4248_s26 + $0x18] sm:$0xff] }
   0xc   :  { %3278 = vmatpush3.bf16.msra.mxu0 %v3275_v3  ;;  %3302 = vmatpush3.bf16.msra.mxu1 %v3275_v3  ;;  %v3690_v16 = vsel %vm113_vm0, %v114_v8, %v115_v9  ;;  %v3693_v17 = vsel %vm113_vm0, 0.0, %v114_v8  ;;  %v3696_v18 = vsel %vm113_vm0, %v115_v9, 0.0  ;;  %v3283_v26 = vpack.c.bf16 %v77_v15, %v76_v14  ;;  %v84_v36 = vld [vmem:[%s4248_s26 + $0x40] sm:$0xff]  ;;  %v85_v37 = vld [vmem:[%s4248_s26 + $0x48] sm:$0xff]  ;;  %v86_v39 = vld [vmem:[%s4248_s26 + $0x50] sm:$0xff] }
   0xd   :  { %3280 = vmatprep.subr.bf16.mxu0 %v3279_v7  ;;  %3304 = vmatprep.subr.bf16.mxu1 %v3279_v7  ;;  %v124_v19 = vrot.slane %v3693_v17, 1  ;;  %v125_v20 = vrot.slane %v3690_v16, 1  ;;  %v3701_v21 = vsel %vm113_vm0, %v377_v12, %v378_v13  ;;  %v3704_v22 = vsel %vm113_vm0, 0.0, %v377_v12  ;;  %v87_v40 = vld [vmem:[%s4248_s26 + $0x58] sm:$0xff]  ;;  %v2765_v52 = vld [vmem:[%s4250_s1] ss:$0 sm:$0xff] }
   0xe   :  { %v386_v23 = vrot.slane %v3704_v22, 1  ;;  %v387_v24 = vrot.slane %v3701_v21, 1  ;;  %v127_v25 = vrot.slane %v3696_v18, 1  ;;  %v383_v30 = vsel %vm113_vm0, %v378_v13, 0.0 }
   0xf   :  { %v3716_v29 = vsel %vm123_vm1, %v124_v19, %v125_v20  ;;  %v389_v33 = vrot.slane %v383_v30, 1  ;;  %v3287_v34 = vpack.c.bf16 %v79_v28, %v78_v27  ;;  %v3291_v38 = vpack.c.bf16 %v85_v37, %v84_v36  ;;  %v97_v36 = vld [vmem:[%s4251_s4 + $0x30] sm:$0xff]  ;;  %v98_v37 = vld [vmem:[%s4251_s4 + $0x38] sm:$0xff] }
  0x10   :  { %3282 = vmatpush3.bf16.msra.mxu0 %v3279_v7  ;;  %3306 = vmatpush3.bf16.msra.mxu1 %v3279_v7  ;;  %v3720_v31 = vsel %vm123_vm1, %v386_v23, %v387_v24  ;;  %v3723_v32 = vsel %vm123_vm1, %v125_v20, %v127_v25  ;;  %v289_v41 = vrot.slane %v3693_v17, 2  ;;  %v290_v42 = vrot.slane %v3690_v16, 2 }
  0x11   :  { %2991 = vmatprep.mubr.msk.f32.mxu0 %vm129_vm2, %v3716_v29  ;;  %3024 = vmatprep.mubr.msk.f32.mxu1 %vm129_vm2, %v3720_v31  ;;  %v3730_v35 = vsel %vm123_vm1, %v387_v24, %v389_v33  ;;  %v549_v43 = vrot.slane %v3704_v22, 2  ;;  %v550_v44 = vrot.slane %v3701_v21, 2  ;;  %v3295_v45 = vpack.c.bf16 %v87_v40, %v86_v39  ;;  %v96_v33 = vld [vmem:[%s4251_s4 + $0x28] sm:$0xff]  ;;  %v91_v39 = vld [vmem:[%s4251_s4] sm:$0xff] }
  0x12   :  { %3284 = vmatprep.subr.bf16.mxu0 %v3283_v26  ;;  %3308 = vmatprep.subr.bf16.mxu1 %v3283_v26  ;;  %v3761_v46 = vsel %vm288_vm3, %v289_v41, %v290_v42  ;;  %v292_v48 = vrot.slane %v3696_v18, 2  ;;  %v552_v49 = vrot.slane %v383_v30, 2  ;;  %v95_v30 = vld [vmem:[%s4251_s4 + $0x20] sm:$0xff]  ;;  %v92_v40 = vld [vmem:[%s4251_s4 + $0x8] sm:$0xff] }
  0x13   :  { %2992 = vmatmul.mubr.msk.f32.vlgmr.msra.gmra.mrb[0].mxu0 %vm129_vm2, %v3723_v32  ;;  %3025 = vmatmul.mubr.msk.f32.vlgmr.msra.gmra.mrb[0].mxu1 %vm129_vm2, %v3730_v35  ;;  %v3764_v47 = vsel %vm288_vm3, %v549_v43, %v550_v44  ;;  %v3818_v41 = vpack.c.bf16 %v92_v40, %v91_v39  ;;  %v100_v39 = vld [vmem:[%s4251_s4 + $0x48] sm:$0xff] }
  0x14   :  { %3286 = vmatpush3.bf16.msra.mxu0 %v3283_v26  ;;  %3310 = vmatpush3.bf16.msra.mxu1 %v3283_v26  ;;  %v3772_v50 = vsel %vm288_vm3, %v290_v42, %v292_v48  ;;  %v3775_v51 = vsel %vm288_vm3, %v550_v44, %v552_v49 }
  0x15   :  { %3288 = vmatprep.subr.bf16.mxu0 %v3287_v34  ;;  %3312 = vmatprep.subr.bf16.mxu1 %v3287_v34 }
  0x16   :  { %3002 = vmatprep.mubr.msk.f32.mxu0 %vm129_vm2, %v3693_v17  ;;  %3035 = vmatprep.mubr.msk.f32.mxu1 %vm129_vm2, %v3704_v22 }
  0x18   :  { %3290 = vmatpush3.bf16.msra.mxu0 %v3287_v34  ;;  %3314 = vmatpush3.bf16.msra.mxu1 %v3287_v34  ;;  %v3323_v34 = vpack.c.bf16 %v96_v33, %v95_v30 }
  0x19   :  { %3292 = vmatprep.subr.bf16.mxu0 %v3291_v38  ;;  %3316 = vmatprep.subr.bf16.mxu1 %v3291_v38 }
  0x1b   :  { %3003 = vmatmul.mubr.msk.f32.vlgmr.msra.gmra.mrb[0].mxu0 %vm129_vm2, %v3690_v16  ;;  %3036 = vmatmul.mubr.msk.f32.vlgmr.msra.gmra.mrb[0].mxu1 %vm129_vm2, %v3701_v21 }
  0x1c   :  { %3294 = vmatpush3.bf16.msra.mxu0 %v3291_v38  ;;  %3318 = vmatpush3.bf16.msra.mxu1 %v3291_v38  ;;  %v3327_v38 = vpack.c.bf16 %v98_v37, %v97_v36 }
  0x1d   :  { %3296 = vmatprep.subr.bf16.mxu0 %v3295_v45  ;;  %3320 = vmatprep.subr.bf16.mxu1 %v3295_v45 }
  0x1e   :  { %3013 = vmatprep.mubr.msk.f32.mxu0 %vm129_vm2, %v3761_v46  ;;  %3046 = vmatprep.mubr.msk.f32.mxu1 %vm129_vm2, %v3764_v47 }
  0x20   :  { %3298 = vmatpush3.bf16.msra.mxu0 %v3295_v45  ;;  %3322 = vmatpush3.bf16.msra.mxu1 %v3295_v45 }
  0x21   :  { %3324 = vmatprep.subr.bf16.mxu0 %v3323_v34  ;;  %3348 = vmatprep.subr.bf16.mxu1 %v3323_v34 }
  0x23   :  { %3014 = vmatmul.mubr.msk.f32.vlgmr.msra.gmra.mrb[0].mxu0 %vm129_vm2, %v3772_v50  ;;  %3047 = vmatmul.mubr.msk.f32.vlgmr.msra.gmra.mrb[0].mxu1 %vm129_vm2, %v3775_v51 }
  0x24   :  { %3326 = vmatpush3.bf16.msra.mxu0 %v3323_v34  ;;  %3350 = vmatpush3.bf16.msra.mxu1 %v3323_v34 }
  0x25   :  { %3328 = vmatprep.subr.bf16.mxu0 %v3327_v38  ;;  %3352 = vmatprep.subr.bf16.mxu1 %v3327_v38 }
  0x28   :  { %3330 = vmatpush3.bf16.msra.mxu0 %v3327_v38  ;;  %3354 = vmatpush3.bf16.msra.mxu1 %v3327_v38  ;;  %v99_v38 = vld [vmem:[%s4251_s4 + $0x40] sm:$0xff] }
  0x29   :  { %3332 = vmatprep.subr.bf16.mxu0 %v3818_v41  ;;  %3356 = vmatprep.subr.bf16.mxu1 %v3818_v41 }
  0xf6   :  { %v3015_v53 = vpop.f32.mrb[0].mxu0  ;;  %v3048_v54 = vpop.f32.mrb[0].mxu1 }
  0xf7   :  { %v364_v55 = vpop.f32.mrb[1].mxu0  ;;  %v624_v56 = vpop.f32.mrb[1].mxu1  ;;  %v642_v57 = vadd.f32 %v3015_v53, %v2765_v52  ;;  %v644_v58 = vadd.f32 %v3048_v54, %v2765_v52 }
  0xf8   :  { %v641_v59 = vadd.f32 %v2765_v52, %v364_v55  ;;  %v643_v60 = vadd.f32 %v2765_v52, %v624_v56 }
  0xf9   :  { %v646_v63 = vmax.f32 %v642_v57, 0.0  ;;  %v648_v0 = vmax.f32 %v644_v58, 0.0 }
  0xfa   :  { %v645_v61 = vmax.f32 %v641_v59, 0.0  ;;  %v647_v62 = vmax.f32 %v643_v60, 0.0  ;;  %v2766_v59 = vld [vmem:[%s4252_s3] ss:$0 sm:$0xff] }
  0xfb   :  { %v658_v3 = vsel %vm129_vm2, %v648_v0, 0.0  ;;  %v652_v4 = vsel %vm129_vm2, %v646_v63, 0.0 }
  0xfc   :  { %v655_v1 = vsel %vm129_vm2, %v647_v62, 0.0  ;;  %v649_v2 = vsel %vm129_vm2, %v645_v61, 0.0 }
  0xfd   :  { %656 = vadd.xlane.f32.xlu1 %v655_v1  ;;  %650 = vadd.xlane.f32.xlu0 %v649_v2 }
 0x101   :  { %659 = vadd.xlane.f32.xlu1 %v658_v3  ;;  %653 = vadd.xlane.f32.xlu0 %v652_v4 }
 0x18a   :  { %v657_v5 = vpop.xlane.xlu1 %656  ;;  %v651_v6 = vpop.xlane.xlu0 %650 }
 0x18b   :  { %v664_v7 = vmul.f32 0.03125, %v657_v5  ;;  %v662_v8 = vmul.f32 0.03125, %v651_v6 }
 0x18d   :  { %v3788_v9 = vsub.f32 %v647_v62, %v664_v7  ;;  %v666_v10 = vsub.f32 %v645_v61, %v662_v8  ;;  %v2767_v61 = vld [vmem:[%s4253_s23] ss:$0 sm:$0xff] }
 0x18e   :  { %v660_v11 = vpop.xlane.xlu1 %659  ;;  %v654_v12 = vpop.xlane.xlu0 %653 }
 0x18f   :  { %v665_v13 = vmul.f32 0.03125, %v660_v11  ;;  %v663_v14 = vmul.f32 0.03125, %v654_v12  ;;  %v670_v15 = vmul.f32 %v666_v10, %v666_v10  ;;  %v672_v23 = vmul.f32 %v3788_v9, %v3788_v9 }
 0x191   :  { %v3790_v18 = vsub.f32 %v648_v0, %v665_v13  ;;  %v667_v19 = vsub.f32 %v646_v63, %v663_v14  ;;  %v674_v20 = vsel %vm129_vm2, %v670_v15, 0.0  ;;  %v680_v25 = vsel %vm129_vm2, %v672_v23, 0.0 }
 0x192   :  { %675 = vadd.xlane.f32.xlu0 %v674_v20 }
 0x193   :  { %v671_v24 = vmul.f32 %v667_v19, %v667_v19  ;;  %v673_v27 = vmul.f32 %v3790_v18, %v3790_v18 }
 0x195   :  { %v677_v26 = vsel %vm129_vm2, %v671_v24, 0.0  ;;  %v683_v28 = vsel %vm129_vm2, %v673_v27, 0.0 }
 0x196   :  { %681 = vadd.xlane.f32.xlu0 %v680_v25  ;;  %678 = vadd.xlane.f32.xlu1 %v677_v26 }
 0x19a   :  { %684 = vadd.xlane.f32.xlu1 %v683_v28 }
 0x21f   :  { %v676_v42 = vpop.xlane.xlu0 %675 }
 0x220   :  { %v686_v43 = vmul.f32 0.03125, %v676_v42 }
 0x222   :  { %v690_v44 = vadd.f32 1e-05, %v686_v43 }
 0x223   :  { %v679_v45 = vpop.xlane.xlu1 %678  ;;  %v682_v48 = vpop.xlane.xlu0 %681 }
 0x224   :  { %3516 = vrsqrt.f32 %v690_v44  ;;  %v687_v49 = vmul.f32 0.03125, %v679_v45  ;;  %v688_v52 = vmul.f32 0.03125, %v682_v48  ;;  %v3339_v48 = vpack.c.bf16 %v100_v39, %v99_v38  ;;  %v1445_v38 = vld [vmem:[%s4224_s11 + $0x50] sm:$0xff]  ;;  %v1446_v39 = vld [vmem:[%s4224_s11 + $0x58] sm:$0xff] }
 0x226   :  { %v691_v53 = vadd.f32 1e-05, %v687_v49  ;;  %v692_v54 = vadd.f32 1e-05, %v688_v52  ;;  %v101_v49 = vld [vmem:[%s4251_s4 + $0x50] sm:$0xff]  ;;  %v102_v52 = vld [vmem:[%s4251_s4 + $0x58] sm:$0xff] }
 0x227   :  { %v685_v55 = vpop.xlane.xlu1 %684 }
 0x228   :  { %3518 = vrsqrt.f32 %v691_v53  ;;  %v689_v56 = vmul.f32 0.03125, %v685_v55  ;;  %v3343_v55 = vpack.c.bf16 %v102_v52, %v101_v49 }
 0x229   :  { %3520 = vrsqrt.f32 %v692_v54 }
 0x22a   :  { %v693_v57 = vadd.f32 1e-05, %v689_v56 }
 0x22c   :  { %3522 = vrsqrt.f32 %v693_v57 }
 0x22e   :  { %v3517_v58 = vpop.eup %3516 }
 0x22f   :  { %v698_v60 = vmul.f32 %v3517_v58, %v666_v10 }
 0x231   :  { %v708_v62 = vmul.f32 %v2766_v59, %v698_v60 }
 0x232   :  { %v3519_v63 = vpop.eup %3518 }
 0x233   :  { %v3521_v0 = vpop.eup %3520  ;;  %v699_v1 = vmul.f32 %v3519_v63, %v667_v19  ;;  %v718_v2 = vadd.f32 %v2767_v61, %v708_v62  ;;  %v2780_v63 = vld [vmem:[%s4223_s6] ss:$0 sm:$0xff] }
 0x234   :  { %v700_v3 = vmul.f32 %v3521_v0, %v3788_v9  ;;  %v93_v9 = vld [vmem:[%s4251_s4 + $0x10] sm:$0xff] }
 0x235   :  { %v709_v4 = vmul.f32 %v2766_v59, %v699_v1  ;;  %v724_v5 = vrot.slane %v718_v2, 7 }
 0x236   :  { %v3523_v6 = vpop.eup %3522  ;;  %v710_v7 = vmul.f32 %v2766_v59, %v700_v3 }
 0x237   :  { %v701_v8 = vmul.f32 %v3523_v6, %v3790_v18  ;;  %v719_v11 = vadd.f32 %v2767_v61, %v709_v4  ;;  %v729_v14 = vsel %vm113_vm0, 0.0, %v724_v5  ;;  %v94_v18 = vld [vmem:[%s4251_s4 + $0x18] sm:$0xff] }
 0x238   :  { %v720_v12 = vadd.f32 %v2767_v61, %v710_v7  ;;  %v733_v24 = vrot.slane %v729_v14, 1  ;;  %v3335_v34 = vpack.c.bf16 %v94_v18, %v93_v9  ;;  %v896_v54 = vrot.slane %v729_v14, 2  ;;  %v1441_v9 = vld [vmem:[%s4224_s11 + $0x30] sm:$0xff]  ;;  %v1442_v18 = vld [vmem:[%s4224_s11 + $0x38] sm:$0xff] }
 0x239   :  { %v711_v10 = vmul.f32 %v2766_v59, %v701_v8  ;;  %v725_v13 = vrot.slane %v719_v11, 7 }
 0x23a   :  { %v984_v15 = vrot.slane %v720_v12, 7 }
 0x23b   :  { %v726_v20 = vsel %vm113_vm0, %v724_v5, %v725_v13  ;;  %v730_v19 = vsel %vm113_vm0, %v725_v13, 0.0  ;;  %v721_v23 = vadd.f32 %v2767_v61, %v711_v10 }
 0x23c   :  { %v734_v25 = vrot.slane %v726_v20, 1  ;;  %v736_v26 = vrot.slane %v730_v19, 1  ;;  %v989_v28 = vsel %vm113_vm0, 0.0, %v984_v15  ;;  %v897_v53 = vrot.slane %v726_v20, 2 }
 0x23d   :  { %v985_v27 = vrot.slane %v721_v23, 7  ;;  %v993_v40 = vrot.slane %v989_v28, 1  ;;  %v1156_v58 = vrot.slane %v989_v28, 2  ;;  %v899_v59 = vrot.slane %v730_v19, 2  ;;  %v1440_v19 = vld [vmem:[%s4224_s11 + $0x28] sm:$0xff] }
 0x23e   :  { %v735_v30 = vsel %vm123_vm1, %v733_v24, %v734_v25  ;;  %v737_v33 = vsel %vm123_vm1, %v734_v25, %v736_v26  ;;  %v898_v56 = vsel %vm288_vm3, %v896_v54, %v897_v53  ;;  %v3901_v24 = vpack.c.bf16 %v1442_v18, %v1441_v9  ;;  %v1435_v25 = vld [vmem:[%s4224_s11] sm:$0xff]  ;;  %v1436_v26 = vld [vmem:[%s4224_s11 + $0x8] sm:$0xff] }
 0x23f   :  { %3057 = vmatprep.mubr.msk.f32.mxu0 %vm129_vm2, %v735_v30  ;;  %v986_v36 = vsel %vm113_vm0, %v984_v15, %v985_v27  ;;  %v990_v37 = vsel %vm113_vm0, %v985_v27, 0.0  ;;  %v900_v60 = vsel %vm288_vm3, %v897_v53, %v899_v59  ;;  %v3911_v27 = vpack.c.bf16 %v1436_v26, %v1435_v25  ;;  %v1438_v30 = vld [vmem:[%s4224_s11 + $0x18] sm:$0xff] }
 0x240   :  { %3058 = vmatmul.mubr.msk.f32.vlgmr.msra.gmra.mrb[2].mxu0 %vm129_vm2, %v737_v33  ;;  %v994_v42 = vrot.slane %v986_v36, 1  ;;  %v996_v43 = vrot.slane %v990_v37, 1  ;;  %v1157_v57 = vrot.slane %v986_v36, 2  ;;  %v1159_v61 = vrot.slane %v990_v37, 2 }
 0x241   :  { %3334 = vmatpush3.bf16.msra.mxu0 %v3818_v41  ;;  %3068 = vmatprep.mubr.msk.f32.mxu0 %vm129_vm2, %v729_v14 }
 0x242   :  { %v995_v44 = vsel %vm123_vm1, %v993_v40, %v994_v42  ;;  %3336 = vmatprep.subr.bf16.mxu0 %v3335_v34  ;;  %v997_v45 = vsel %vm123_vm1, %v994_v42, %v996_v43  ;;  %v1160_v62 = vsel %vm288_vm3, %v1157_v57, %v1159_v61  ;;  %v107_v61 = vld [vmem:[%s4225_s9 + $0x8] sm:$0xff] }
 0x243   :  { %3090 = vmatprep.mubr.msk.f32.mxu1 %vm129_vm2, %v995_v44 }
 0x244   :  { %3091 = vmatmul.mubr.msk.f32.vlgmr.msra.gmra.mrb[2].mxu1 %vm129_vm2, %v997_v45 }
 0x245   :  { %3338 = vmatpush3.bf16.msra.mxu0 %v3335_v34  ;;  %3358 = vmatpush3.bf16.msra.mxu1 %v3818_v41  ;;  %v1158_v41 = vsel %vm288_vm3, %v1156_v58, %v1157_v57 }
 0x246   :  { %3101 = vmatprep.mubr.msk.f32.mxu1 %vm129_vm2, %v989_v28  ;;  %3340 = vmatprep.subr.bf16.mxu0 %v3339_v48  ;;  %v1437_v28 = vld [vmem:[%s4224_s11 + $0x10] sm:$0xff] }
 0x247   :  { %3360 = vmatprep.subr.bf16.mxu1 %v3335_v34  ;;  %v3919_v33 = vpack.c.bf16 %v1438_v30, %v1437_v28 }
 0x248   :  { %3069 = vmatmul.mubr.msk.f32.vlgmr.msra.gmra.mrb[2].mxu0 %vm129_vm2, %v726_v20  ;;  %v1439_v20 = vld [vmem:[%s4224_s11 + $0x20] sm:$0xff] }
 0x249   :  { %3342 = vmatpush3.bf16.msra.mxu0 %v3339_v48  ;;  %3079 = vmatprep.mubr.msk.f32.mxu0 %vm129_vm2, %v898_v56  ;;  %v3891_v23 = vpack.c.bf16 %v1440_v19, %v1439_v20 }
 0x24a   :  { %3362 = vmatpush3.bf16.msra.mxu1 %v3335_v34  ;;  %3344 = vmatprep.subr.bf16.mxu0 %v3343_v55  ;;  %v1443_v34 = vld [vmem:[%s4224_s11 + $0x40] sm:$0xff] }
 0x24b   :  { %3364 = vmatprep.subr.bf16.mxu1 %v3339_v48 }
 0x24d   :  { %3102 = vmatmul.mubr.msk.f32.vlgmr.msra.gmra.mrb[2].mxu1 %vm129_vm2, %v986_v36  ;;  %3346 = vmatpush3.bf16.msra.mxu0 %v3343_v55  ;;  %v1444_v36 = vld [vmem:[%s4224_s11 + $0x48] sm:$0xff] }
 0x24e   :  { %3366 = vmatpush3.bf16.msra.mxu1 %v3339_v48  ;;  %3112 = vmatprep.mubr.msk.f32.mxu1 %vm129_vm2, %v1158_v41  ;;  %v3934_v37 = vpack.c.bf16 %v1444_v36, %v1443_v34  ;;  %v2781_v36 = vld [vmem:[%s4228_s7] ss:$0 sm:$0xff] }
 0x24f   :  { %3368 = vmatprep.subr.bf16.mxu1 %v3343_v55 }
 0x250   :  { %3080 = vmatmul.mubr.msk.f32.vlgmr.msra.gmra.mrb[2].mxu0 %vm129_vm2, %v900_v60  ;;  %v106_v60 = vld [vmem:[%s4225_s9] sm:$0xff] }
 0x252   :  { %3370 = vmatpush3.bf16.msra.mxu1 %v3343_v55 }
 0x253   :  { %3380 = vmatprep.subr.bf16.mxu1 %v3891_v23 }
 0x255   :  { %3113 = vmatmul.mubr.msk.f32.vlgmr.msra.gmra.mrb[2].mxu1 %vm129_vm2, %v1160_v62  ;;  %v3371_v62 = vpack.c.bf16 %v107_v61, %v106_v60 }
 0x256   :  { %3137 = vmatprep.mubr.msk.f32.mxu1 %vm129_vm2, %v3716_v29  ;;  %3382 = vmatpush3.bf16.msra.mxu1 %v3891_v23 }
 0x257   :  { %3384 = vmatprep.subr.bf16.mxu1 %v3901_v24  ;;  %3372 = vmatprep.subr.bf16.mxu0 %v3371_v62 }
 0x258   :  { %3374 = vmatpush3.bf16.msra.mxu0 %v3371_v62 }
 0x25a   :  { %3386 = vmatpush3.bf16.msra.mxu1 %v3901_v24 }
 0x25b   :  { %3388 = vmatprep.subr.bf16.mxu1 %v3911_v27 }
 0x25d   :  { %3138 = vmatmul.mubr.msk.f32.vlgmr.msra.gmra.mrb[4].mxu1 %vm129_vm2, %v3723_v32  ;;  %v3944_v32 = vpack.c.bf16 %v1446_v39, %v1445_v38 }
 0x25e   :  { %3390 = vmatpush3.bf16.msra.mxu1 %v3911_v27  ;;  %3148 = vmatprep.mubr.msk.f32.mxu1 %vm129_vm2, %v3693_v17 }
 0x25f   :  { %3392 = vmatprep.subr.bf16.mxu1 %v3919_v33 }
 0x262   :  { %3394 = vmatpush3.bf16.msra.mxu1 %v3919_v33 }
 0x263   :  { %3396 = vmatprep.subr.bf16.mxu1 %v3934_v37 }
 0x265   :  { %3149 = vmatmul.mubr.msk.f32.vlgmr.msra.gmra.mrb[4].mxu1 %vm129_vm2, %v3690_v16 }
 0x266   :  { %3398 = vmatpush3.bf16.msra.mxu1 %v3934_v37  ;;  %3159 = vmatprep.mubr.msk.f32.mxu1 %vm129_vm2, %v3761_v46 }
 0x267   :  { %3400 = vmatprep.subr.bf16.mxu1 %v3944_v32 }
 0x26a   :  { %3402 = vmatpush3.bf16.msra.mxu1 %v3944_v32 }
 0x26d   :  { %3160 = vmatmul.mubr.msk.f32.vlgmr.msra.gmra.mrb[4].mxu1 %vm129_vm2, %v3772_v50 }
 0x323   :  { %v3081_v0 = vpop.f32.mrb[2].mxu0 }
 0x324   :  { %v1249_v1 = vadd.f32 %v3081_v0, %v2780_v63  ;;  %v971_v2 = vpop.f32.mrb[3].mxu0  ;;  %v109_v0 = vld [vmem:[%s4225_s9 + $0x18] sm:$0xff] }
 0x325   :  { %v1248_v3 = vadd.f32 %v2780_v63, %v971_v2  ;;  %v26_v2 = vstv %s4226_s10 }
 0x326   :  { %v1253_v4 = vmax.f32 %v1249_v1, 0.0  ;;  %27 = vst [vmem:[#allocation2] sm:$0x1] %v26_v2 }
 0x327   :  { %v1252_v5 = vmax.f32 %v1248_v3, 0.0  ;;  %v3994_v3 = vld [vmem:[%s4227_s12] ss:$0 sm:$0xff] }
 0x328   :  { %v3114_v6 = vpop.f32.mrb[2].mxu1  ;;  %v1259_v7 = vsel %vm129_vm2, %v1253_v4, 0.0 }
 0x329   :  { %v1251_v8 = vadd.f32 %v3114_v6, %v2780_v63  ;;  %v1231_v11 = vpop.f32.mrb[3].mxu1  ;;  %1260 = vadd.xlane.f32.xlu1 %v1259_v7  ;;  %v1256_v12 = vsel %vm129_vm2, %v1252_v5, 0.0 }
 0x32a   :  { %v1250_v10 = vadd.f32 %v2780_v63, %v1231_v11  ;;  %1257 = vadd.xlane.f32.xlu0 %v1256_v12  ;;  %v108_v63 = vld [vmem:[%s4225_s9 + $0x10] sm:$0xff] }
 0x32b   :  { %v1255_v29 = vmax.f32 %v1251_v8, 0.0  ;;  %v3375_v1 = vpack.c.bf16 %v109_v0, %v108_v63 }
 0x32c   :  { %v1254_v13 = vmax.f32 %v1250_v10, 0.0 }
 0x32d   :  { %v1265_v14 = vsel %vm129_vm2, %v1255_v29, 0.0  ;;  %3376 = vmatprep.subr.bf16.mxu0 %v3375_v1 }
 0x32e   :  { %1266 = vadd.xlane.f32.xlu1 %v1265_v14  ;;  %v1262_v15 = vsel %vm129_vm2, %v1254_v13, 0.0  ;;  %3378 = vmatpush3.bf16.msra.mxu0 %v3375_v1 }
 0x32f   :  { %1263 = vadd.xlane.f32.xlu0 %v1262_v15  ;;  %3404 = vmatprep.subr.bf16.mxu0 %v3891_v23 }
 0x3b6   :  { %v1261_v17 = vpop.xlane.xlu1 %1260 }
 0x3b7   :  { %v1269_v40 = vmul.f32 0.03125, %v1261_v17  ;;  %v1258_v42 = vpop.xlane.xlu0 %1257 }
 0x3b8   :  { %v1268_v43 = vmul.f32 0.03125, %v1258_v42 }
 0x3b9   :  { %v3955_v44 = vsub.f32 %v1253_v4, %v1269_v40  ;;  %v3161_v4 = vpop.f32.mrb[4].mxu1  ;;  %v2782_v40 = vld [vmem:[%s4229_s8] ss:$0 sm:$0xff] }
 0x3ba   :  { %v3957_v45 = vsub.f32 %v1252_v5, %v1268_v43  ;;  %v3997_v5 = vadd.f32 %v3161_v4, %v3994_v3  ;;  %v1686_v6 = vpop.f32.mrb[5].mxu1  ;;  %v1455_v4 = vld [vmem:[%s4230_s15 + $0x28] sm:$0xff] }
 0x3bb   :  { %v1267_v16 = vpop.xlane.xlu1 %1266  ;;  %v1277_v48 = vmul.f32 %v3955_v44, %v3955_v44  ;;  %v4000_v7 = vadd.f32 %v3994_v3, %v1686_v6 }
 0x3bc   :  { %v1271_v46 = vmul.f32 0.03125, %v1267_v16  ;;  %v1264_v49 = vpop.xlane.xlu0 %1263  ;;  %v1276_v52 = vmul.f32 %v3957_v45, %v3957_v45  ;;  %v1935_v8 = vmax.f32 %v3997_v5, 0.0  ;;  %v1456_v5 = vld [vmem:[%s4230_s15 + $0x30] sm:$0xff] }
 0x3bd   :  { %v1270_v53 = vmul.f32 0.03125, %v1264_v49  ;;  %v1283_v50 = vsel %vm129_vm2, %v1277_v48, 0.0  ;;  %v1934_v11 = vmax.f32 %v4000_v7, 0.0  ;;  %v1457_v7 = vld [vmem:[%s4230_s15 + $0x38] sm:$0xff] }
 0x3be   :  { %v3964_v54 = vsub.f32 %v1255_v29, %v1271_v46  ;;  %1284 = vadd.xlane.f32.xlu1 %v1283_v50  ;;  %v1280_v55 = vsel %vm129_vm2, %v1276_v52, 0.0  ;;  %v1941_v12 = vsel %vm129_vm2, %v1935_v8, 0.0 }
 0x3bf   :  { %v3967_v56 = vsub.f32 %v1254_v13, %v1270_v53  ;;  %1281 = vadd.xlane.f32.xlu0 %v1280_v55  ;;  %v1938_v10 = vsel %vm129_vm2, %v1934_v11, 0.0 }
 0x3c0   :  { %v1279_v57 = vmul.f32 %v3964_v54, %v3964_v54 }
 0x3c1   :  { %v1278_v58 = vmul.f32 %v3967_v56, %v3967_v56 }
 0x3c2   :  { %v1289_v59 = vsel %vm129_vm2, %v1279_v57, 0.0 }
 0x3c3   :  { %1290 = vadd.xlane.f32.xlu1 %v1289_v59  ;;  %v1286_v41 = vsel %vm129_vm2, %v1278_v58, 0.0 }
 0x3c4   :  { %1287 = vadd.xlane.f32.xlu0 %v1286_v41 }
 0x3c7   :  { %1942 = vadd.xlane.f32.xlu1 %v1941_v12  ;;  %v1451_v12 = vld [vmem:[%s4230_s15 + $0x8] sm:$0xff] }
 0x3c8   :  { %1939 = vadd.xlane.f32.xlu0 %v1938_v10 }
 0x44b   :  { %v1285_v29 = vpop.xlane.xlu1 %1284 }
 0x44c   :  { %v1293_v13 = vmul.f32 0.03125, %v1285_v29  ;;  %v1282_v14 = vpop.xlane.xlu0 %1281 }
 0x44d   :  { %v1292_v15 = vmul.f32 0.03125, %v1282_v14 }
 0x44e   :  { %v1297_v20 = vadd.f32 1e-05, %v1293_v13 }
 0x44f   :  { %v1296_v19 = vadd.f32 1e-05, %v1292_v15 }
 0x450   :  { %3524 = vrsqrt.f32 %v1297_v20  ;;  %v1291_v9 = vpop.xlane.xlu1 %1290 }
 0x451   :  { %3526 = vrsqrt.f32 %v1296_v19  ;;  %v1295_v18 = vmul.f32 0.03125, %v1291_v9  ;;  %v1288_v25 = vpop.xlane.xlu0 %1287 }
 0x452   :  { %v1294_v26 = vmul.f32 0.03125, %v1288_v25 }
 0x453   :  { %v1299_v28 = vadd.f32 1e-05, %v1295_v18 }
 0x454   :  { %v1298_v30 = vadd.f32 1e-05, %v1294_v26 }
 0x455   :  { %3528 = vrsqrt.f32 %v1299_v28 }
 0x456   :  { %3530 = vrsqrt.f32 %v1298_v30 }
 0x45a   :  { %v3525_v34 = vpop.eup %3524 }
 0x45b   :  { %v3527_v38 = vpop.eup %3526  ;;  %v1305_v39 = vmul.f32 %v3525_v34, %v3955_v44 }
 0x45c   :  { %v1304_v17 = vmul.f32 %v3527_v38, %v3957_v45 }
 0x45d   :  { %v1315_v42 = vmul.f32 %v2781_v36, %v1305_v39 }
 0x45e   :  { %v1314_v43 = vmul.f32 %v2781_v36, %v1304_v17 }
 0x45f   :  { %v3529_v16 = vpop.eup %3528  ;;  %v1325_v52 = vadd.f32 %v2782_v40, %v1315_v42 }
 0x460   :  { %v3531_v48 = vpop.eup %3530  ;;  %v1324_v46 = vadd.f32 %v2782_v40, %v1314_v43  ;;  %v1307_v49 = vmul.f32 %v3529_v16, %v3964_v54 }
 0x461   :  { %v1306_v53 = vmul.f32 %v3531_v48, %v3967_v56  ;;  %v2802_v48 = vld [vmem:[%s4232_s14] ss:$0 sm:$0xff] }
 0x462   :  { %3123 = vmatprep.mubr.msk.f32.mxu0 %vm129_vm2, %v1324_v46  ;;  %v1317_v50 = vmul.f32 %v2781_v36, %v1307_v49 }
 0x463   :  { %3124 = vmatmul.mubr.msk.f32.vlgmr.msra.gmra.mrb[4].mxu0 %vm129_vm2, %v1325_v52  ;;  %v1316_v44 = vmul.f32 %v2781_v36, %v1306_v53 }
 0x464   :  { %3406 = vmatpush3.bf16.msra.mxu0 %v3891_v23  ;;  %v1327_v55 = vadd.f32 %v2782_v40, %v1317_v50 }
 0x465   :  { %v1326_v45 = vadd.f32 %v2782_v40, %v1316_v44  ;;  %3408 = vmatprep.subr.bf16.mxu0 %v3901_v24  ;;  %v2801_v40 = vld [vmem:[%s4231_s13] ss:$0 sm:$0xff] }
 0x467   :  { %3126 = vmatprep.mubr.msk.f32.mxu0 %vm129_vm2, %v1326_v45 }
 0x468   :  { %3127 = vmatmul.mubr.msk.f32.gmra.mrb[6].mxu0 %vm129_vm2, %v1327_v55 }
 0x469   :  { %3410 = vmatpush3.bf16.msra.mxu0 %v3901_v24  ;;  %3170 = vmatprep.mubr.msk.f32.mxu0 %vm129_vm2, %v3720_v31 }
 0x46a   :  { %3412 = vmatprep.subr.bf16.mxu0 %v3911_v27 }
 0x46c   :  { %3171 = vmatmul.mubr.msk.f32.vlgmr.msra.gmra.mrb[8].mxu0 %vm129_vm2, %v3730_v35  ;;  %v4051_v35 = vld [vmem:[#allocation2] ss:$0 sm:$0xff] }
 0x46d   :  { %3414 = vmatpush3.bf16.msra.mxu0 %v3911_v27  ;;  %3181 = vmatprep.mubr.msk.f32.mxu0 %vm129_vm2, %v3704_v22  ;;  %v1943_v27 = vpop.xlane.xlu1 %1942 }
 0x46e   :  { %3416 = vmatprep.subr.bf16.mxu0 %v3919_v33 }
 0x471   :  { %3418 = vmatpush3.bf16.msra.mxu0 %v3919_v33  ;;  %v1940_v33 = vpop.xlane.xlu0 %1939 }
 0x472   :  { %3420 = vmatprep.subr.bf16.mxu0 %v3934_v37 }
 0x474   :  { %3182 = vmatmul.mubr.msk.f32.vlgmr.msra.gmra.mrb[8].mxu0 %vm129_vm2, %v3701_v21 }
 0x475   :  { %3422 = vmatpush3.bf16.msra.mxu0 %v3934_v37  ;;  %3192 = vmatprep.mubr.msk.f32.mxu0 %vm129_vm2, %v3764_v47  ;;  %v1951_v37 = vmul.f32 0.03125, %v1943_v27  ;;  %v1452_v27 = vld [vmem:[%s4230_s15 + $0x10] sm:$0xff] }
 0x476   :  { %3424 = vmatprep.subr.bf16.mxu0 %v3944_v32 }
 0x479   :  { %3426 = vmatpush3.bf16.msra.mxu0 %v3944_v32  ;;  %v1950_v32 = vmul.f32 0.03125, %v1940_v33  ;;  %v1453_v33 = vld [vmem:[%s4230_s15 + $0x18] sm:$0xff] }
 0x47b   :  { %v1954_v58 = vsub.f32 %v1934_v11, %v1950_v32  ;;  %v1450_v11 = vld [vmem:[%s4230_s15] sm:$0xff] }
 0x47c   :  { %3193 = vmatmul.mubr.msk.f32.vlgmr.msra.gmra.mrb[8].mxu0 %vm129_vm2, %v3775_v51  ;;  %v1955_v51 = vsub.f32 %v1935_v8, %v1951_v37  ;;  %v3431_v8 = vpack.c.bf16 %v1457_v7, %v1456_v5  ;;  %v4087_v10 = vpack.c.bf16 %v1451_v12, %v1450_v11 }
 0x47d   :  { %v1958_v0 = vmul.f32 %v1954_v58, %v1954_v58 }
 0x47e   :  { %v1959_v62 = vmul.f32 %v1955_v51, %v1955_v51 }
 0x47f   :  { %v1962_v2 = vsel %vm129_vm2, %v1958_v0, 0.0 }
 0x480   :  { %v1965_v1 = vsel %vm129_vm2, %v1959_v62, 0.0 }
 0x536   :  { %v4047_v22 = vpop.f32.mrb[4].mxu0 }
 0x537   :  { %v4049_v31 = vpop.f32.mrb[5].mxu0 }
 0x53b   :  { %v3128_v23 = vpop.f32.mrb[6].mxu0 }
 0x53c   :  { %v4054_v21 = vadd.f32 %v3128_v23, %v4051_v35  ;;  %v1422_v24 = vpop.f32.mrb[7].mxu0 }
 0x53d   :  { %v4057_v47 = vadd.f32 %v4051_v35, %v1422_v24 }
 0x54f   :  { %v3194_v54 = vpop.f32.mrb[8].mxu0 }
 0x550   :  { %v1933_v56 = vadd.f32 %v3194_v54, %v3994_v3  ;;  %v1913_v57 = vpop.f32.mrb[9].mxu0 }
 0x551   :  { %v1932_v59 = vadd.f32 %v3994_v3, %v1913_v57  ;;  %v1454_v3 = vld [vmem:[%s4230_s15 + $0x20] sm:$0xff] }
 0x552   :  { %v1937_v41 = vmax.f32 %v1933_v56, 0.0  ;;  %v3427_v6 = vpack.c.bf16 %v1455_v4, %v1454_v3  ;;  %v3439_v56 = vpack.c.bf16 %v1453_v33, %v1452_v27  ;;  %v1458_v57 = vld [vmem:[%s4230_s15 + $0x40] sm:$0xff] }
 0x553   :  { %v1936_v60 = vmax.f32 %v1932_v59, 0.0 }
 0x554   :  { %v1947_v61 = vsel %vm129_vm2, %v1937_v41, 0.0  ;;  %3428 = vmatprep.subr.bf16.mxu1 %v3427_v6  ;;  %3452 = vmatprep.subr.bf16.mxu0 %v3427_v6 }
 0x555   :  { %1948 = vadd.xlane.f32.xlu1 %v1947_v61  ;;  %v1944_v63 = vsel %vm129_vm2, %v1936_v60, 0.0  ;;  %3430 = vmatpush3.bf16.msra.mxu1 %v3427_v6 }
 0x556   :  { %1945 = vadd.xlane.f32.xlu0 %v1944_v63  ;;  %3454 = vmatpush3.bf16.msra.mxu0 %v3427_v6 }
 0x557   :  { %3432 = vmatprep.subr.bf16.mxu1 %v3431_v8  ;;  %3456 = vmatprep.subr.bf16.mxu0 %v3431_v8 }
 0x559   :  { %1966 = vadd.xlane.f32.xlu1 %v1965_v1  ;;  %3434 = vmatpush3.bf16.msra.mxu1 %v3431_v8 }
 0x55a   :  { %1963 = vadd.xlane.f32.xlu0 %v1962_v2  ;;  %3458 = vmatpush3.bf16.msra.mxu0 %v3431_v8 }
 0x55b   :  { %3436 = vmatprep.subr.bf16.mxu1 %v4087_v10  ;;  %3460 = vmatprep.subr.bf16.mxu0 %v4087_v10 }
 0x5e2   :  { %v1949_v29 = vpop.xlane.xlu1 %1948 }
 0x5e3   :  { %v1953_v13 = vmul.f32 0.03125, %v1949_v29  ;;  %v1946_v14 = vpop.xlane.xlu0 %1945 }
 0x5e4   :  { %v1952_v15 = vmul.f32 0.03125, %v1946_v14 }
 0x5e5   :  { %v4091_v20 = vsub.f32 %v1937_v41, %v1953_v13  ;;  %v1460_v41 = vld [vmem:[%s4230_s15 + $0x50] sm:$0xff] }
 0x5e6   :  { %v4093_v19 = vsub.f32 %v1936_v60, %v1952_v15  ;;  %v1967_v9 = vpop.xlane.xlu1 %1966  ;;  %v1461_v60 = vld [vmem:[%s4230_s15 + $0x58] sm:$0xff] }
 0x5e7   :  { %v1975_v18 = vmul.f32 0.03125, %v1967_v9  ;;  %v1964_v25 = vpop.xlane.xlu0 %1963  ;;  %v1961_v26 = vmul.f32 %v4091_v20, %v4091_v20  ;;  %v3447_v63 = vpack.c.bf16 %v1461_v60, %v1460_v41 }
 0x5e8   :  { %v1974_v28 = vmul.f32 0.03125, %v1964_v25  ;;  %v1960_v30 = vmul.f32 %v4093_v19, %v4093_v19 }
 0x5e9   :  { %v1979_v34 = vadd.f32 1e-05, %v1975_v18  ;;  %v1971_v36 = vsel %vm129_vm2, %v1961_v26, 0.0 }
 0x5ea   :  { %v1978_v38 = vadd.f32 1e-05, %v1974_v28  ;;  %1972 = vadd.xlane.f32.xlu1 %v1971_v36  ;;  %v1968_v39 = vsel %vm129_vm2, %v1960_v30, 0.0 }
 0x5eb   :  { %3532 = vrsqrt.f32 %v1979_v34  ;;  %1969 = vadd.xlane.f32.xlu0 %v1968_v39 }
 0x5ec   :  { %3534 = vrsqrt.f32 %v1978_v38 }
 0x5f5   :  { %v3533_v17 = vpop.eup %3532 }
 0x5f6   :  { %v3535_v42 = vpop.eup %3534  ;;  %v1987_v43 = vmul.f32 %v3533_v17, %v1955_v51 }
 0x5f7   :  { %v1986_v16 = vmul.f32 %v3535_v42, %v1954_v58  ;;  %v1459_v58 = vld [vmem:[%s4230_s15 + $0x48] sm:$0xff] }
 0x5f8   :  { %v1997_v46 = vmul.f32 %v2801_v40, %v1987_v43  ;;  %v3443_v59 = vpack.c.bf16 %v1459_v58, %v1458_v57 }
 0x5f9   :  { %v1996_v49 = vmul.f32 %v2801_v40, %v1986_v16 }
 0x5fa   :  { %v2007_v52 = vadd.f32 %v2802_v48, %v1997_v46 }
 0x5fb   :  { %v2006_v53 = vadd.f32 %v2802_v48, %v1996_v49 }
 0x5fc   :  { %v2013_v50 = vrot.slane %v2007_v52, 7 }
 0x5fd   :  { %v2012_v44 = vrot.slane %v2006_v53, 7 }
 0x5fe   :  { %v2018_v45 = vsel %vm113_vm0, %v2013_v50, 0.0 }
 0x5ff   :  { %v2014_v55 = vsel %vm113_vm0, %v2012_v44, %v2013_v50  ;;  %v2017_v23 = vsel %vm113_vm0, 0.0, %v2012_v44  ;;  %v2024_v24 = vrot.slane %v2018_v45, 1  ;;  %v2187_v1 = vrot.slane %v2018_v45, 2 }
 0x600   :  { %v2021_v37 = vrot.slane %v2017_v23, 1  ;;  %v2022_v32 = vrot.slane %v2014_v55, 1  ;;  %v2184_v61 = vrot.slane %v2017_v23, 2  ;;  %v2185_v62 = vrot.slane %v2014_v55, 2 }
 0x602   :  { %v2023_v54 = vsel %vm123_vm1, %v2021_v37, %v2022_v32  ;;  %v2025_v51 = vsel %vm123_vm1, %v2022_v32, %v2024_v24  ;;  %v2186_v0 = vsel %vm288_vm3, %v2184_v61, %v2185_v62  ;;  %v2188_v2 = vsel %vm288_vm3, %v2185_v62, %v2187_v1  ;;  %v1466_v1 = vld [vmem:[%s4234_s19 + $0x8] sm:$0xff] }
 0x603   :  { %3203 = vmatprep.mubr.msk.f32.mxu1 %vm129_vm2, %v2023_v54 }
 0x604   :  { %3204 = vmatmul.mubr.msk.f32.vlgmr.msra.gmra.mrb[6].mxu1 %vm129_vm2, %v2025_v51 }
 0x605   :  { %3438 = vmatpush3.bf16.msra.mxu1 %v4087_v10  ;;  %3214 = vmatprep.mubr.msk.f32.mxu1 %vm129_vm2, %v2017_v23 }
 0x606   :  { %3440 = vmatprep.subr.bf16.mxu1 %v3439_v56 }
 0x609   :  { %3442 = vmatpush3.bf16.msra.mxu1 %v3439_v56 }
 0x60a   :  { %3444 = vmatprep.subr.bf16.mxu1 %v3443_v59 }
 0x60c   :  { %3215 = vmatmul.mubr.msk.f32.vlgmr.msra.gmra.mrb[6].mxu1 %vm129_vm2, %v2014_v55 }
 0x60d   :  { %3446 = vmatpush3.bf16.msra.mxu1 %v3443_v59  ;;  %3225 = vmatprep.mubr.msk.f32.mxu1 %vm129_vm2, %v2186_v0  ;;  %v1465_v0 = vld [vmem:[%s4234_s19] sm:$0xff] }
 0x60e   :  { %3448 = vmatprep.subr.bf16.mxu1 %v3447_v63 }
 0x611   :  { %3450 = vmatpush3.bf16.msra.mxu1 %v3447_v63 }
 0x614   :  { %3226 = vmatmul.mubr.msk.f32.vlgmr.msra.gmra.mrb[6].mxu1 %vm129_vm2, %v2188_v2  ;;  %v3475_v2 = vpack.c.bf16 %v1466_v1, %v1465_v0 }
 0x616   :  { %3476 = vmatprep.subr.bf16.mxu1 %v3475_v2 }
 0x617   :  { %3478 = vmatpush3.bf16.msra.mxu1 %v3475_v2 }
 0x677   :  { %v1973_v3 = vpop.xlane.xlu1 %1972 }
 0x678   :  { %v1977_v4 = vmul.f32 0.03125, %v1973_v3  ;;  %v1970_v5 = vpop.xlane.xlu0 %1969  ;;  %v1467_v3 = vld [vmem:[%s4234_s19 + $0x10] sm:$0xff] }
 0x679   :  { %v1976_v6 = vmul.f32 0.03125, %v1970_v5 }
 0x67a   :  { %v1981_v7 = vadd.f32 1e-05, %v1977_v4  ;;  %v1468_v4 = vld [vmem:[%s4234_s19 + $0x18] sm:$0xff] }
 0x67b   :  { %v1980_v8 = vadd.f32 1e-05, %v1976_v6  ;;  %v3479_v5 = vpack.c.bf16 %v1468_v4, %v1467_v3 }
 0x67c   :  { %3536 = vrsqrt.f32 %v1981_v7 }
 0x67d   :  { %3538 = vrsqrt.f32 %v1980_v8  ;;  %3480 = vmatprep.subr.bf16.mxu1 %v3479_v5 }
 0x67e   :  { %3482 = vmatpush3.bf16.msra.mxu1 %v3479_v5 }
 0x686   :  { %v3537_v11 = vpop.eup %3536 }
 0x687   :  { %v3539_v12 = vpop.eup %3538  ;;  %v1989_v29 = vmul.f32 %v3537_v11, %v4091_v20 }
 0x688   :  { %v1988_v13 = vmul.f32 %v3539_v12, %v4093_v19 }
 0x689   :  { %v1999_v14 = vmul.f32 %v2801_v40, %v1989_v29 }
 0x68a   :  { %v1998_v15 = vmul.f32 %v2801_v40, %v1988_v13 }
 0x68b   :  { %v2009_v9 = vadd.f32 %v2802_v48, %v1999_v14 }
 0x68c   :  { %v2008_v18 = vadd.f32 %v2802_v48, %v1998_v15 }
 0x68d   :  { %v2273_v25 = vrot.slane %v2009_v9, 7 }
 0x68e   :  { %v2272_v26 = vrot.slane %v2008_v18, 7 }
 0x68f   :  { %v2278_v28 = vsel %vm113_vm0, %v2273_v25, 0.0 }
 0x690   :  { %v2274_v30 = vsel %vm113_vm0, %v2272_v26, %v2273_v25  ;;  %v2277_v34 = vsel %vm113_vm0, 0.0, %v2272_v26  ;;  %v2284_v36 = vrot.slane %v2278_v28, 1  ;;  %v2447_v43 = vrot.slane %v2278_v28, 2 }
 0x691   :  { %v2281_v38 = vrot.slane %v2277_v34, 1  ;;  %v2282_v39 = vrot.slane %v2274_v30, 1  ;;  %v2444_v19 = vrot.slane %v2277_v34, 2  ;;  %v2445_v40 = vrot.slane %v2274_v30, 2 }
 0x693   :  { %v2283_v17 = vsel %vm123_vm1, %v2281_v38, %v2282_v39  ;;  %v2285_v20 = vsel %vm123_vm1, %v2282_v39, %v2284_v36  ;;  %v2446_v42 = vsel %vm288_vm3, %v2444_v19, %v2445_v40  ;;  %v2448_v16 = vsel %vm288_vm3, %v2445_v40, %v2447_v43  ;;  %v2816_v38 = vld [vmem:[%s4235_s17] ss:$0 sm:$0xff]  ;;  %s3548_s17 = smov 1  }
 0x694   :  { %3236 = vmatprep.mubr.msk.f32.mxu0 %vm129_vm2, %v2283_v17  ;;  %v2817_v19 = vld [vmem:[%s4236_s18] ss:$0 sm:$0xff] }
 0x695   :  { %3237 = vmatmul.mubr.msk.f32.vlgmr.msra.gmra.mrb[10].mxu0 %vm129_vm2, %v2285_v20 }
 0x696   :  { %3462 = vmatpush3.bf16.msra.mxu0 %v4087_v10  ;;  %3247 = vmatprep.mubr.msk.f32.mxu0 %vm129_vm2, %v2277_v34  ;;  %v2815_v10 = vld [vmem:[%s4233_s16] ss:$0 sm:$0xff] }
 0x697   :  { %3464 = vmatprep.subr.bf16.mxu0 %v3439_v56 }
 0x69a   :  { %3466 = vmatpush3.bf16.msra.mxu0 %v3439_v56 }
 0x69b   :  { %3468 = vmatprep.subr.bf16.mxu0 %v3443_v59 }
 0x69d   :  { %3248 = vmatmul.mubr.msk.f32.vlgmr.msra.gmra.mrb[10].mxu0 %vm129_vm2, %v2274_v30 }
 0x69e   :  { %3470 = vmatpush3.bf16.msra.mxu0 %v3443_v59  ;;  %3258 = vmatprep.mubr.msk.f32.mxu0 %vm129_vm2, %v2446_v42 }
 0x69f   :  { %3472 = vmatprep.subr.bf16.mxu0 %v3447_v63 }
 0x6a2   :  { %3474 = vmatpush3.bf16.msra.mxu0 %v3447_v63 }
 0x6a5   :  { %3259 = vmatmul.mubr.msk.f32.vlgmr.msra.gmra.mrb[10].mxu0 %vm129_vm2, %v2448_v16 }
 0x6e7   :  { %v3227_v48 = vpop.f32.mrb[6].mxu1 }
 0x6e8   :  { %v2537_v46 = vadd.f32 %v3227_v48, %v2815_v10  ;;  %v2259_v49 = vpop.f32.mrb[7].mxu1 }
 0x6e9   :  { %v2536_v52 = vadd.f32 %v2815_v10, %v2259_v49 }
 0x6ea   :  { %v2541_v53 = vmax.f32 %v2537_v46, 0.0 }
 0x6eb   :  { %v2540_v50 = vmax.f32 %v2536_v52, 0.0 }
 0x6ec   :  { %v2547_v44 = vsel %vm129_vm2, %v2541_v53, 0.0 }
 0x6ed   :  { %2548 = vadd.xlane.f32.xlu1 %v2547_v44  ;;  %v2544_v45 = vsel %vm129_vm2, %v2540_v50, 0.0 }
 0x6ee   :  { %2545 = vadd.xlane.f32.xlu0 %v2544_v45 }
 0x778   :  { %v3260_v55 = vpop.f32.mrb[10].mxu0 }
 0x779   :  { %v2539_v23 = vadd.f32 %v3260_v55, %v2815_v10  ;;  %v2519_v24 = vpop.f32.mrb[11].mxu0 }
 0x77a   :  { %v2538_v27 = vadd.f32 %v2815_v10, %v2519_v24  ;;  %v2549_v33 = vpop.xlane.xlu1 %2548  ;;  %v28_v10 = vstv %s4237_s20 }
 0x77b   :  { %v2543_v37 = vmax.f32 %v2539_v23, 0.0  ;;  %v2557_v32 = vmul.f32 0.03125, %v2549_v33  ;;  %v2546_v54 = vpop.xlane.xlu0 %2545  ;;  %29 = vst [vmem:[#allocation3] sm:$0x1] %v28_v10 }
 0x77c   :  { %v2542_v51 = vmax.f32 %v2538_v27, 0.0  ;;  %v2556_v56 = vmul.f32 0.03125, %v2546_v54 }
 0x77d   :  { %v2561_v57 = vsub.f32 %v2541_v53, %v2557_v32  ;;  %v2553_v58 = vsel %vm129_vm2, %v2543_v37, 0.0 }
 0x77e   :  { %v2560_v59 = vsub.f32 %v2540_v50, %v2556_v56  ;;  %2554 = vadd.xlane.f32.xlu1 %v2553_v58  ;;  %v2550_v41 = vsel %vm129_vm2, %v2542_v51, 0.0 }
 0x77f   :  { %2551 = vadd.xlane.f32.xlu0 %v2550_v41  ;;  %v2565_v60 = vmul.f32 %v2561_v57, %v2561_v57  ;;  %v1418_v41 = vadd.f32 %v4047_v22, %v4051_v35 }
 0x780   :  { %v2564_v61 = vmul.f32 %v2560_v59, %v2560_v59 }
 0x781   :  { %v2571_v62 = vsel %vm129_vm2, %v2565_v60, 0.0  ;;  %v1413_v60 = vadd.f32 %v4051_v35, %v4049_v31 }
 0x782   :  { %2572 = vadd.xlane.f32.xlu1 %v2571_v62  ;;  %v2568_v63 = vsel %vm129_vm2, %v2564_v61, 0.0  ;;  %v2818_v32 = vld [vmem:[#allocation3] ss:$0 sm:$0xff]  ;;  %v1432_v61 = vmax.f32 %v1418_v41, 0.0 }
 0x783   :  { %2569 = vadd.xlane.f32.xlu0 %v2568_v63  ;;  %v1431_v62 = vmax.f32 %v1413_v60, 0.0 }
 0x80b   :  { %v2555_v6 = vpop.xlane.xlu1 %2554 }
 0x80c   :  { %v2559_v7 = vmul.f32 0.03125, %v2555_v6  ;;  %v2552_v8 = vpop.xlane.xlu0 %2551  ;;  %v1433_v6 = vmax.f32 %v4057_v47, 0.0 }
 0x80d   :  { %v2558_v11 = vmul.f32 0.03125, %v2552_v8 }
 0x80e   :  { %v2563_v12 = vsub.f32 %v2543_v37, %v2559_v7 }
 0x80f   :  { %v2562_v29 = vsub.f32 %v2542_v51, %v2558_v11  ;;  %v2573_v13 = vpop.xlane.xlu1 %2572  ;;  %v1434_v11 = vmax.f32 %v4054_v21, 0.0 }
 0x810   :  { %v2581_v14 = vmul.f32 0.03125, %v2573_v13  ;;  %v2570_v15 = vpop.xlane.xlu0 %2569  ;;  %v2567_v9 = vmul.f32 %v2563_v12, %v2563_v12 }
 0x811   :  { %v2580_v18 = vmul.f32 0.03125, %v2570_v15  ;;  %v2566_v25 = vmul.f32 %v2562_v29, %v2562_v29 }
 0x812   :  { %v2585_v26 = vadd.f32 1e-05, %v2581_v14  ;;  %v2577_v28 = vsel %vm129_vm2, %v2567_v9, 0.0 }
 0x813   :  { %v2584_v30 = vadd.f32 1e-05, %v2580_v18  ;;  %2578 = vadd.xlane.f32.xlu1 %v2577_v28  ;;  %v2574_v34 = vsel %vm129_vm2, %v2566_v25, 0.0 }
 0x814   :  { %3540 = vrsqrt.f32 %v2585_v26  ;;  %2575 = vadd.xlane.f32.xlu0 %v2574_v34 }
 0x815   :  { %3542 = vrsqrt.f32 %v2584_v30 }
 0x81e   :  { %v3541_v36 = vpop.eup %3540 }
 0x81f   :  { %v3543_v39 = vpop.eup %3542  ;;  %v2593_v17 = vmul.f32 %v3541_v36, %v2561_v57 }
 0x820   :  { %v2592_v20 = vmul.f32 %v3543_v39, %v2560_v59 }
 0x821   :  { %v2603_v40 = vmul.f32 %v2816_v38, %v2593_v17 }
 0x822   :  { %v2602_v42 = vmul.f32 %v2816_v38, %v2592_v20 }
 0x823   :  { %v2613_v16 = vadd.f32 %v2817_v19, %v2603_v40 }
 0x824   :  { %v2612_v43 = vadd.f32 %v2817_v19, %v2602_v42 }
 0x826   :  { %3269 = vmatprep.mubr.msk.f32.mxu1 %vm129_vm2, %v2612_v43 }
 0x827   :  { %3270 = vmatmul.mubr.msk.f32.vlgmr.msra.gmra.mrb[8].mxu1 %vm129_vm2, %v2613_v16 }
 0x8a0   :  { %v2579_v48 = vpop.xlane.xlu1 %2578 }
 0x8a1   :  { %v2583_v46 = vmul.f32 0.03125, %v2579_v48  ;;  %v2576_v49 = vpop.xlane.xlu0 %2575 }
 0x8a2   :  { %v2582_v52 = vmul.f32 0.03125, %v2576_v49 }
 0x8a3   :  { %v2587_v53 = vadd.f32 1e-05, %v2583_v46 }
 0x8a4   :  { %v2586_v50 = vadd.f32 1e-05, %v2582_v52 }
 0x8a5   :  { %3544 = vrsqrt.f32 %v2587_v53 }
 0x8a6   :  { %3546 = vrsqrt.f32 %v2586_v50 }
 0x8af   :  { %v3545_v44 = vpop.eup %3544 }
 0x8b0   :  { %v3547_v45 = vpop.eup %3546  ;;  %v2595_v55 = vmul.f32 %v3545_v44, %v2563_v12 }
 0x8b1   :  { %v2594_v23 = vmul.f32 %v3547_v45, %v2562_v29 }
 0x8b2   :  { %v2605_v24 = vmul.f32 %v2816_v38, %v2595_v55 }
 0x8b3   :  { %v2604_v27 = vmul.f32 %v2816_v38, %v2594_v23 }
 0x8b4   :  { %v2615_v37 = vadd.f32 %v2817_v19, %v2605_v24 }
 0x8b5   :  { %v2614_v33 = vadd.f32 %v2817_v19, %v2604_v27 }
 0x8b7   :  { %3272 = vmatprep.mubr.msk.f32.mxu1 %vm129_vm2, %v2614_v33 }
 0x8b8   :  { %3273 = vmatmul.mubr.msk.f32.gmra.mrb[10].mxu1 %vm129_vm2, %v2615_v37 }
 0x8fa   :  { %v3271_v54 = vpop.f32.mrb[8].mxu1 }
 0x8fb   :  { %v2706_v51 = vadd.f32 %v3271_v54, %v2818_v32  ;;  %v2700_v56 = vpop.f32.mrb[9].mxu1 }
 0x8fc   :  { %v2701_v57 = vadd.f32 %v2818_v32, %v2700_v56 }
 0x8fd   :  { %v2720_v58 = vmax.f32 %v2706_v51, 0.0 }
 0x8fe   :  { %v2719_v59 = vmax.f32 %v2701_v57, 0.0 }
 0x8ff   :  { %2729 = vrot.lane.b32.xlu1 %v2720_v58, %s3548_s17 }
 0x900   :  { %2727 = vrot.lane.b32.xlu0 %v2719_v59, %s3548_s17 }
 0x971   :  { %v2730_v63 = vpop.permute.xlu1 %2729 }
 0x972   :  { %v2741_v0 = vsel %vm2739_vm4, %v1432_v61, %v2730_v63  ;;  %v2728_v1 = vpop.permute.xlu0 %2727 }
 0x973   :  { %2746 = vst.msk [vmem:[%s4238_s21 + $0x8] sm:$0xff] %vm2744_vm5, %v2741_v0  ;;  %v2740_v2 = vsel %vm2739_vm4, %v1431_v62, %v2728_v1 }
 0x974   :  { %2745 = vst.msk [vmem:[%s4238_s21] sm:$0xff] %vm2744_vm5, %v2740_v2 }
 0x98b   :  { %v3274_v22 = vpop.f32.mrb[10].mxu1 }
 0x98c   :  { %v2710_v31 = vpop.f32.mrb[11].mxu1  ;;  %v2716_v3 = vadd.f32 %v3274_v22, %v2818_v32 }
 0x98d   :  { %v2711_v35 = vadd.f32 %v2818_v32, %v2710_v31 }
 0x98e   :  { %v2722_v5 = vmax.f32 %v2716_v3, 0.0 }
 0x98f   :  { %v2721_v4 = vmax.f32 %v2711_v35, 0.0 }
 0x991   :  { %2731 = vrot.lane.b32.xlu1 %v2721_v4, %s3548_s17 }
 0x995   :  { %2733 = vrot.lane.b32.xlu1 %v2722_v5, %s3548_s17 }
 0xa03   :  { %v2732_v7 = vpop.permute.xlu1 %2731 }
 0xa04   :  { %v2742_v8 = vsel %vm2739_vm4, %v1433_v6, %v2732_v7 }
 0xa05   :  { %2747 = vst.msk [vmem:[%s4238_s21 + $0x10] sm:$0xff] %vm2744_vm5, %v2742_v8 }
 0xa07   :  { %v2734_v12 = vpop.permute.xlu1 %2733 }
 0xa08   :  { %v2743_v29 = vsel %vm2739_vm4, %v1434_v11, %v2734_v12 }
 0xa09   :  { %2748 = vst.msk [vmem:[%s4238_s21 + $0x18] sm:$0xff] %vm2744_vm5, %v2743_v29 }

// kernel: fastspeech2_forward.3
= control target key start
LH: loop header
LB: loop body
LE: loop exit
PB: predicated region body
PF: predicated region fallthrough
CT: control target
= control target key end

     0   :  { %vm101_vm0 = vcmask 261120   ;;  %v4932_v8 = vmov 0.0   ;;  %vm4933_vm1 = vmmov 0   ;;  %s4935_s28 = smov 96   ;;  %vm192_vm2 = vcmask 130048   ;;  %s4938_s30 = smov 48   ;;  %s5873_s3 = inlined_call_operand.vmem [shape: f32[32,96], index: 3, kind: input, shape index: {}]   ;;  %s5874_s0 = inlined_call_operand.vmem [shape: f32[2,8,32], index: 0, kind: input, shape index: {}]   ;;  %s5875_s4 = inlined_call_operand.vmem [shape: f32[1,96], index: 4, kind: input, shape index: {}]   ;;  %s5876_s1 = inlined_call_operand.vmem [shape: f32[2,1,8], index: 1, kind: input, shape index: {}]   ;;  %s5877_s5 = inlined_call_operand.vmem [shape: f32[32,32], index: 5, kind: input, shape index: {}]   ;;  %s5878_s6 = inlined_call_operand.vmem [shape: f32[1,32], index: 6, kind: input, shape index: {}]   ;;  %s5879_s2 = inlined_call_operand.vmem [shape: f32[2,8,1], index: 2, kind: input, shape index: {}]   ;;  %s5880_s9 = inlined_call_operand.vmem [shape: f32[9,32,64], index: 9, kind: input, shape index: {}]   ;;  %s5881_s7 = inlined_call_operand.vmem [shape: f32[1,32], index: 7, kind: input, shape index: {}]   ;;  %s5882_s8 = inlined_call_operand.vmem [shape: f32[1,32], index: 8, kind: input, shape index: {}]   ;;  %s5883_s10 = inlined_call_operand.vmem [shape: f32[1,64], index: 10, kind: input, shape index: {}]   ;;  %s5884_s11 = inlined_call_operand.vmem [shape: f32[1,64,32], index: 11, kind: input, shape index: {}]   ;;  %s5885_s12 = inlined_call_operand.vmem [shape: f32[1,32], index: 12, kind: input, shape index: {}]   ;;  %s5886_s15 = inlined_call_operand.vmem [shape: f32[3,32,32], index: 15, kind: input, shape index: {}]   ;;  %s5887_s13 = inlined_call_operand.vmem [shape: f32[1,32], index: 13, kind: input, shape index: {}]   ;;  %s5888_s14 = inlined_call_operand.vmem [shape: f32[1,32], index: 14, kind: input, shape index: {}]   ;;  %s5889_s25 = inlined_call_operand.vmem [shape: f32[2,8,32], index: 25, kind: output, shape index: {0}]   ;;  %s5890_s16 = inlined_call_operand.vmem [shape: f32[1,32], index: 16, kind: input, shape index: {}]   ;;  %s5891_s19 = inlined_call_operand.vmem [shape: f32[3,32,32], index: 19, kind: input, shape index: {}]   ;;  %s5892_s17 = inlined_call_operand.vmem [shape: f32[1,32], index: 17, kind: input, shape index: {}]   ;;  %s5893_s18 = inlined_call_operand.vmem [shape: f32[1,32], index: 18, kind: input, shape index: {}]   ;;  %s5894_s20 = inlined_call_operand.vmem [shape: f32[1,32], index: 20, kind: input, shape index: {}]   ;;  %s5895_s23 = inlined_call_operand.vmem [shape: f32[32,1], index: 23, kind: input, shape index: {}]   ;;  %s5896_s24 = inlined_call_operand.<no memory space> [shape: f32[1,1], index: 24, kind: input, shape index: {}]   ;;  %s5897_s21 = inlined_call_operand.vmem [shape: f32[1,32], index: 21, kind: input, shape index: {}]   ;;  %s5898_s22 = inlined_call_operand.vmem [shape: f32[1,32], index: 22, kind: input, shape index: {}]   ;;  %s5899_s26 = inlined_call_operand.vmem [shape: f32[2,8,1], index: 26, kind: output, shape index: {1}]  }
   0x1   :  { %5906 = sst [smem:[#allocation3_spill]] %s5873_s3  ;;  %4237 = vmatprep.subr.mxu1 %v4932_v8  ;;  %4239 = vmatprep.mubr.msk.f32.mxu1 %vm4933_vm1, %v4932_v8  ;;  %v269_v16 = vlaneseq  ;;  %vm275_vm3 = vcmask 64512   ;;  %v4939_v50 = vmov 0.0|0.0   ;;  %vm1271_vm4 = vcmask 1043456  }
   0x2   :  { %5907 = sst [smem:[#allocation4_spill]] %s5874_s0  ;;  %vm1276_vm5 = vcmask 1046528   ;;  %vm1501_vm6 = vcmask 1044480   ;;  %vm1424_vm7 = vcmask 1045504   ;;  %vm1654_vm8 = vcmask 1042432  }
   0x3   :  { %5908 = sst [smem:[#allocation5_spill]] %s5875_s4  ;;  %v5130_v19 = vshrl.u32 %v269_v16, 7  ;;  %vm1808_vm9 = vcmask 1040384   ;;  %vm1731_vm10 = vcmask 1041408   ;;  %vm2666_vm11 = vcmask 523264  }
   0x4   :  { %5909 = sst [smem:[#allocation6_spill]] %s5876_s1  ;;  %s5919_s1 = sld [smem:[#allocation5_spill]]  ;;  %vm3946_vm12 = vcmask 7168  }
   0x5   :  { %5910 = sst [smem:[#allocation7_spill]] %s5877_s5  ;;  %s5920_s3 = sld [smem:[#allocation6_spill]]  ;;  %v271_v21 = vsub.s32 0, %v5130_v19 }
   0x6   :  { %5911 = sst [smem:[#allocation8_spill]] %s5878_s6  ;;  %s5918_s6 = sld [smem:[#allocation4_spill]] }
   0x7   :  { %5912 = sst [smem:[#allocation9_spill]] %s5879_s2 }
   0x8   :  { %5913 = sst [smem:[#allocation10_spill]] %s5880_s9  ;;  %s5917_s9 = sld [smem:[#allocation3_spill]] }
   0x9   :  { %5914 = sst [smem:[#allocation11_spill]] %s5881_s7  ;;  %s4936_s7 = smov 80  }
   0xa   :  { %5915 = sst [smem:[#allocation12_spill]] %s5882_s8  ;;  %v3957_v9 = vld [vmem:[%s5919_s1] ss:$0 sm:$0xff]  ;;  %s4937_s8 = smov 112  }
   0xb   :  { %5916 = sst [smem:[#allocation13_spill]] %s5883_s10  ;;  %v86_v17 = vld [vmem:[%s5920_s3] sm:$0x1]  ;;  %s5921_s10 = sld [smem:[#allocation7_spill]] }
   0xc   :  { %v5091_v5 = vld [vmem:[%s5918_s6] sm:$0xff]  ;;  %v5098_v7 = vld [vmem:[%s5918_s6 + $0x8] sm:$0xff]  ;;  %v3960_v18 = vadd.f32 -1.0, %v86_v17  ;;  %s5923_s6 = sld [smem:[#allocation9_spill]]  ;;  %s5924_s0 = sld [smem:[#allocation10_spill]] }
   0xd   :  { %4234 = vmatprep.mubr.msk.f32.mxu0 %vm101_vm0, %v5091_v5  ;;  %s5925_s5 = sld [smem:[#allocation11_spill]]  ;;  %s5927_s27 = sld [smem:[#allocation13_spill]] }
   0xe   :  { %v90_v0 = vld [vmem:[%s5917_s9] sm:$0xff]  ;;  %v91_v1 = vld [vmem:[%s5917_s9 + $0x8] sm:$0xff]  ;;  %v92_v2 = vld [vmem:[%s5917_s9 + $0x10] sm:$0xff]  ;;  %v188_v20 = vmul.f32 1e+09, %v3960_v18 }
   0xf   :  { %v4665_v3 = vpack.c.bf16 %v91_v1, %v90_v0  ;;  %v93_v4 = vld [vmem:[%s5917_s9 + $0x18] sm:$0xff]  ;;  %s4934_s9 = smov 64  }
  0x10   :  { %v4669_v6 = vpack.c.bf16 %v93_v4, %v92_v2  ;;  %v272_v22 = vrot.slane %v188_v20, %v271_v21  ;;  %v87_v4 = vld [vmem:[%s5920_s3 + $0x1] sm:$0x1] }
  0x11   :  { %4666 = vmatprep.subr.bf16.mxu0 %v4665_v3  ;;  %v185_v51 = vld [vmem:[%s5921_s10 + $0x10] sm:$0xff]  ;;  %v186_v52 = vld [vmem:[%s5921_s10 + $0x18] sm:$0xff]  ;;  %v183_v56 = vld [vmem:[%s5921_s10] sm:$0xff] }
  0x12   :  { %4668 = vmatpush3.bf16.msra.mxu0 %v4665_v3  ;;  %v4674_v53 = vpack.c.bf16 %v186_v52, %v185_v51  ;;  %v184_v57 = vld [vmem:[%s5921_s10 + $0x8] sm:$0xff]  ;;  %v88_v52 = vld [vmem:[%s5923_s6] sm:$0xff] }
  0x13   :  { %4670 = vmatprep.subr.bf16.mxu0 %v4669_v6  ;;  %v5170_v59 = vpack.c.bf16 %v184_v57, %v183_v56  ;;  %v1231_v56 = vld [vmem:[%s5924_s0] sm:$0xff]  ;;  %v1232_v57 = vld [vmem:[%s5924_s0 + $0x8] sm:$0xff] }
  0x16   :  { %4672 = vmatpush3.bf16.msra.mxu0 %v4669_v6  ;;  %v3969_v6 = vadd.f32 -1.0, %v87_v4 }
  0x17   :  { %4673 = vmatprep.subr.bf16.mxu0 %v4939_v50 }
  0x19   :  { %4235 = vmatmul.mubr.msk.f32.vlgmr.msra.gmra.mrb[0].mxu0 %vm101_vm0, %v5098_v7 }
  0x1a   :  { %4261 = vmatprep.mubr.msk.f32.mxu0 %vm4933_vm1, %v4932_v8  ;;  %4675 = vmatpush3.bf16.msra.mxu0 %v4674_v53 }
  0x1b   :  { %4271 = vmatprep.subr.mxu0 %v4932_v8 }
  0xec   :  { %v4236_v10 = vpop.f32.mrb[0].mxu0 }
  0xed   :  { %v5110_v11 = vadd.f32 %v4236_v10, %v3957_v9  ;;  %v174_v12 = vpop.f32.mrb[1].mxu0 }
  0xee   :  { %v5112_v13 = vadd.f32 %v3957_v9, %v174_v12  ;;  %v677_v9 = vmul.f32 1e+09, %v3969_v6 }
  0xf0   :  { %287 = vrot.lane.b32.xlu1 %v5112_v13, %s4934_s9  ;;  %190 = vrot.lane.b32.xlu0 %v5112_v13, %s4935_s28 }
  0xf4   :  { %365 = vrot.lane.b32.xlu1 %v5112_v13, %s4936_s7 }
 0x162   :  { %v191_v14 = vpop.permute.xlu0 %190  ;;  %v288_v15 = vpop.permute.xlu1 %287 }
 0x163   :  { %4238 = vmatpush3.xpose.msk.msra.mxu1 %vm192_vm2, %v191_v14  ;;  %v760_v14 = vrot.slane %v677_v9, %v271_v21 }
 0x164   :  { %4242 = vmatprep.subr.mxu1 %v4932_v8 }
 0x166   :  { %4240 = vmatmul.mubr.msk.f32.vlgmr.msra.gmra.mrb[0].mxu1 %vm192_vm2, %v5112_v13  ;;  %v366_v33 = vpop.permute.xlu1 %365 }
 0x167   :  { %4243 = vmatpush3.msra.mxu1 %v288_v15  ;;  %4244 = vmatprep.mubr.msk.f32.mxu1 %vm4933_vm1, %v4932_v8 }
 0x168   :  { %4247 = vmatprep.subr.mxu1 %v4932_v8 }
 0x239   :  { %v263_v23 = vpop.f32.mrb[0].mxu1 }
 0x23a   :  { %v267_v24 = vmul.f32 0.25, %v263_v23  ;;  %v4241_v25 = vpop.f32.mrb[1].mxu1 }
 0x23c   :  { %v274_v26 = vadd.f32 %v272_v22, %v267_v24 }
 0x23e   :  { %v276_v27 = vsel %vm275_vm3, %v274_v26, -inf }
 0x23f   :  { %277 = vmax.xlane.f32.xlu0 %v276_v27 }
 0x2cc   :  { %v278_v28 = vpop.xlane.xlu0 %277 }
 0x2cd   :  { %v279_v29 = vsub.f32 %v274_v26, %v278_v28 }
 0x2cf   :  { %v280_v30 = vmul.f32 1.442695, %v279_v29 }
 0x2d1   :  { %4900 = vpow2.f32 %v280_v30 }
 0x2db   :  { %v4901_v31 = vpop.eup %4900 }
 0x2dc   :  { %v282_v32 = vsel %vm275_vm3, %v4901_v31, 0.0 }
 0x2dd   :  { %283 = vadd.xlane.f32.xlu1 %v282_v32 }
 0x2ee   :  { %363 = vrot.lane.b32.xlu1 %v5112_v13, %s4937_s8 }
 0x36a   :  { %v284_v34 = vpop.xlane.xlu1 %283 }
 0x36b   :  { %4902 = vrcp.f32 %v284_v34 }
 0x36e   :  { %v364_v37 = vpop.permute.xlu1 %363 }
 0x375   :  { %v4903_v35 = vpop.eup %4902 }
 0x376   :  { %v286_v36 = vmul.f32 %v4903_v35, %v4901_v31 }
 0x378   :  { %4245 = vmatmul.mubr.msk.f32.vlgmr.msra.gmra.mrb[2].mxu1 %vm275_vm3, %v286_v36 }
 0x379   :  { %4248 = vmatpush3.xpose.msk.msra.mxu1 %vm192_vm2, %v366_v33  ;;  %4249 = vmatprep.mubr.msk.f32.mxu1 %vm4933_vm1, %v4932_v8 }
 0x37a   :  { %4252 = vmatprep.subr.mxu1 %v4932_v8 }
 0x37c   :  { %4250 = vmatmul.mubr.msk.f32.vlgmr.msra.gmra.mrb[4].mxu1 %vm192_vm2, %v364_v37 }
 0x37d   :  { %4254 = vmatprep.mubr.msk.f32.mxu1 %vm4933_vm1, %v4932_v8 }
 0x44b   :  { %v359_v38 = vpop.f32.mrb[2].mxu1 }
 0x44c   :  { %v4246_v39 = vpop.f32.mrb[3].mxu1 }
 0x44d   :  { %v4940_v39 = vmov 0  }
 0x44e   :  { %4898 = vset.pattern.permute.xlu0 %v4940_v39  ;;  %4899 = vset.pattern.permute.xlu1 %v4940_v39  ;;  %v1252_v39 = vld [vmem:[%s5924_s0 + $0xa8] sm:$0xff] }
 0x44f   :  { %v437_v40 = vpop.f32.mrb[4].mxu1 }
 0x450   :  { %v441_v41 = vmul.f32 0.25, %v437_v40  ;;  %v4251_v42 = vpop.f32.mrb[5].mxu1 }
 0x452   :  { %v442_v43 = vadd.f32 %v441_v41, %v272_v22 }
 0x454   :  { %v443_v44 = vsel %vm275_vm3, %v442_v43, -inf }
 0x455   :  { %444 = vmax.xlane.f32.xlu1 %v443_v44 }
 0x466   :  { %850 = vrot.lane.b32.xlu1 %v5110_v11, %s4937_s8  ;;  %s5926_s8 = sld [smem:[#allocation12_spill]] }
 0x4e2   :  { %v445_v45 = vpop.xlane.xlu1 %444 }
 0x4e3   :  { %v446_v46 = vsub.f32 %v442_v43, %v445_v45 }
 0x4e5   :  { %v447_v47 = vmul.f32 1.442695, %v446_v46 }
 0x4e6   :  { %v851_v3 = vpop.permute.xlu1 %850 }
 0x4e7   :  { %4904 = vpow2.f32 %v447_v47 }
 0x4f1   :  { %v4905_v48 = vpop.eup %4904 }
 0x4f2   :  { %v449_v49 = vsel %vm275_vm3, %v4905_v48, 0.0 }
 0x4f3   :  { %450 = vadd.xlane.f32.xlu0 %v449_v49 }
 0x509   :  { %454 = vrot.lane.b32.xlu0 %v5112_v13, %s4938_s30 }
 0x50d   :  { %679 = vrot.lane.b32.xlu0 %v5110_v11, %s4935_s28 }
 0x511   :  { %852 = vrot.lane.b32.xlu0 %v5110_v11, %s4936_s7 }
 0x580   :  { %v451_v54 = vpop.xlane.xlu0 %450 }
 0x581   :  { %4906 = vrcp.f32 %v451_v54 }
 0x584   :  { %v455_v55 = vpop.permute.xlu0 %454 }
 0x585   :  { %4253 = vmatpush3.msra.mxu1 %v455_v55 }
 0x586   :  { %4676 = vmatprep.subr.bf16.mxu1 %v4939_v50 }
 0x588   :  { %v680_v61 = vpop.permute.xlu0 %679 }
 0x58b   :  { %v4907_v58 = vpop.eup %4906 }
 0x58c   :  { %v453_v60 = vmul.f32 %v4907_v58, %v4905_v48  ;;  %v853_v1 = vpop.permute.xlu0 %852 }
 0x58e   :  { %4255 = vmatmul.mubr.msk.f32.vlgmr.msra.gmra.mrb[6].mxu1 %vm275_vm3, %v453_v60 }
 0x58f   :  { %4678 = vmatpush3.bf16.msra.mxu1 %v5170_v59  ;;  %4268 = vmatprep.mubr.msk.f32.mxu1 %vm4933_vm1, %v4932_v8 }
 0x590   :  { %4276 = vmatprep.subr.mxu1 %v4932_v8 }
 0x592   :  { %4269 = vmatmul.mubr.msk.f32.vlgmr.msra.gmra.mrb[8].mxu1 %vm192_vm2, %v359_v38 }
 0x593   :  { %4278 = vmatprep.mubr.msk.f32.mxu1 %vm4933_vm1, %v4932_v8 }
 0x661   :  { %v526_v62 = vpop.f32.mrb[6].mxu1 }
 0x662   :  { %v4256_v63 = vpop.f32.mrb[7].mxu1  ;;  %4262 = vmatmul.mubr.msk.f32.vlgmr.msra.gmra.mrb[2].mxu0 %vm192_vm2, %v526_v62  ;;  %v5246_v62 = vld [vmem:[%s5926_s8] ss:$0 sm:$0xff] }
 0x663   :  { %4272 = vmatpush3.xpose.msk.msra.mxu0 %vm192_vm2, %v680_v61  ;;  %4273 = vmatprep.mubr.msk.f32.mxu0 %vm4933_vm1, %v4932_v8  ;;  %v5241_v61 = vpack.c.bf16 %v1232_v57, %v1231_v56  ;;  %v1235_v63 = vld [vmem:[%s5924_s0 + $0x20] sm:$0xff] }
 0x664   :  { %4281 = vmatprep.subr.mxu0 %v4932_v8 }
 0x665   :  { %v672_v0 = vpop.f32.mrb[8].mxu1 }
 0x666   :  { %v4270_v2 = vpop.f32.mrb[9].mxu1  ;;  %4274 = vmatmul.mubr.msk.f32.vlgmr.msra.gmra.mrb[4].mxu0 %vm192_vm2, %v5110_v11 }
 0x667   :  { %4282 = vmatpush3.xpose.msk.msra.mxu0 %vm192_vm2, %v853_v1  ;;  %4283 = vmatprep.mubr.msk.f32.mxu0 %vm4933_vm1, %v4932_v8  ;;  %v1236_v1 = vld [vmem:[%s5924_s0 + $0x28] sm:$0xff]  ;;  %v1233_v2 = vld [vmem:[%s5924_s0 + $0x10] sm:$0xff] }
 0x668   :  { %4679 = vmatprep.subr.bf16.mxu0 %v4939_v50 }
 0x66a   :  { %4284 = vmatmul.mubr.msk.f32.vlgmr.msra.gmra.mrb[6].mxu0 %vm192_vm2, %v851_v3  ;;  %v1234_v3 = vld [vmem:[%s5924_s0 + $0x18] sm:$0xff] }
 0x66b   :  { %4681 = vmatpush3.bf16.msra.mxu0 %v4674_v53  ;;  %4295 = vmatprep.mubr.msk.f32.mxu0 %vm4933_vm1, %v4932_v8 }
 0x66c   :  { %4685 = vmatprep.subr.bf16.mxu0 %v4939_v50 }
 0x735   :  { %v599_v10 = vpop.f32.mrb[2].mxu0 }
 0x736   :  { %v673_v12 = vadd.f32 %v672_v0, %v599_v10  ;;  %v4263_v13 = vpop.f32.mrb[3].mxu0 }
 0x737   :  { %v5268_v13 = vpack.c.bf16 %v1234_v3, %v1233_v2  ;;  %v1261_v2 = vld [vmem:[%s5924_s0 + $0xf0] sm:$0xff]  ;;  %v1262_v3 = vld [vmem:[%s5924_s0 + $0xf8] sm:$0xff] }
 0x739   :  { %v751_v15 = vpop.f32.mrb[4].mxu0 }
 0x73a   :  { %v755_v16 = vmul.f32 0.25, %v751_v15  ;;  %v4275_v17 = vpop.f32.mrb[5].mxu0 }
 0x73b   :  { %v1243_v17 = vld [vmem:[%s5924_s0 + $0x60] sm:$0xff] }
 0x73c   :  { %v762_v18 = vadd.f32 %v760_v14, %v755_v16  ;;  %v1238_v16 = vld [vmem:[%s5924_s0 + $0x38] sm:$0xff] }
 0x73d   :  { %v924_v20 = vpop.f32.mrb[6].mxu0 }
 0x73e   :  { %v928_v22 = vmul.f32 0.25, %v924_v20  ;;  %v4285_v23 = vpop.f32.mrb[7].mxu0  ;;  %v763_v24 = vsel %vm275_vm3, %v762_v18, -inf }
 0x73f   :  { %764 = vmax.xlane.f32.xlu0 %v763_v24 }
 0x740   :  { %v929_v25 = vadd.f32 %v928_v22, %v760_v14  ;;  %v1237_v14 = vld [vmem:[%s5924_s0 + $0x30] sm:$0xff] }
 0x741   :  { %v5292_v24 = vpack.c.bf16 %v1238_v16, %v1237_v14  ;;  %v5430_v16 = vpack.c.bf16 %v1262_v3, %v1261_v2 }
 0x742   :  { %v930_v26 = vsel %vm275_vm3, %v929_v25, -inf }
 0x743   :  { %931 = vmax.xlane.f32.xlu1 %v930_v26  ;;  %v1239_v26 = vld [vmem:[%s5924_s0 + $0x40] sm:$0xff] }
 0x754   :  { %941 = vrot.lane.b32.xlu1 %v5110_v11, %s4938_s30  ;;  %s5922_s30 = sld [smem:[#allocation8_spill]] }
 0x75a   :  { %v5211_v35 = vld [vmem:[%s5922_s30] ss:$0 sm:$0xff] }
 0x75b   :  { %v1170_v36 = vadd.f32 %v5211_v35, %v673_v12  ;;  %v5266_v12 = vpack.c.bf16 %v1236_v1, %v1235_v63  ;;  %v1256_v1 = vld [vmem:[%s5924_s0 + $0xc8] sm:$0xff] }
 0x75d   :  { %v1172_v37 = vadd.f32 %v1170_v36, %v5091_v5  ;;  %v1241_v36 = vld [vmem:[%s5924_s0 + $0x50] sm:$0xff] }
 0x75f   :  { %v1176_v38 = vsel %vm101_vm0, %v1172_v37, 0.0 }
 0x7cc   :  { %v765_v27 = vpop.xlane.xlu0 %764 }
 0x7cd   :  { %v766_v19 = vsub.f32 %v762_v18, %v765_v27  ;;  %v1244_v18 = vld [vmem:[%s5924_s0 + $0x68] sm:$0xff] }
 0x7cf   :  { %v767_v21 = vmul.f32 1.442695, %v766_v19 }
 0x7d0   :  { %v932_v28 = vpop.xlane.xlu1 %931 }
 0x7d1   :  { %4908 = vpow2.f32 %v767_v21  ;;  %v933_v29 = vsub.f32 %v929_v25, %v932_v28  ;;  %v5294_v25 = vpack.c.bf16 %v1244_v18, %v1243_v17  ;;  %v1240_v21 = vld [vmem:[%s5924_s0 + $0x48] sm:$0xff]  ;;  %v1245_v28 = vld [vmem:[%s5924_s0 + $0x70] sm:$0xff]  ;;  %v1258_v18 = vld [vmem:[%s5924_s0 + $0xd8] sm:$0xff] }
 0x7d2   :  { %v1257_v17 = vld [vmem:[%s5924_s0 + $0xd0] sm:$0xff] }
 0x7d3   :  { %v934_v30 = vmul.f32 1.442695, %v933_v29  ;;  %v1246_v29 = vld [vmem:[%s5924_s0 + $0x78] sm:$0xff] }
 0x7d4   :  { %v942_v44 = vpop.permute.xlu1 %941 }
 0x7d5   :  { %4910 = vpow2.f32 %v934_v30 }
 0x7db   :  { %v4909_v31 = vpop.eup %4908 }
 0x7dc   :  { %v769_v32 = vsel %vm275_vm3, %v4909_v31, 0.0 }
 0x7dd   :  { %770 = vadd.xlane.f32.xlu0 %v769_v32 }
 0x7df   :  { %v4911_v33 = vpop.eup %4910 }
 0x7e0   :  { %v936_v34 = vsel %vm275_vm3, %v4911_v33, 0.0 }
 0x7e1   :  { %937 = vadd.xlane.f32.xlu0 %v936_v34  ;;  %v5327_v34 = vpack.c.bf16 %v1246_v29, %v1245_v28  ;;  %v1264_v28 = vld [vmem:[%s5924_s0 + $0x108] sm:$0xff] }
 0x7f7   :  { %774 = vrot.lane.b32.xlu0 %v5110_v11, %s4934_s9 }
 0x816   :  { %1177 = vadd.xlane.f32.xlu0 %v1176_v38  ;;  %v1251_v38 = vld [vmem:[%s5924_s0 + $0xa0] sm:$0xff] }
 0x86a   :  { %v771_v40 = vpop.xlane.xlu0 %770 }
 0x86b   :  { %4912 = vrcp.f32 %v771_v40 }
 0x86e   :  { %v938_v41 = vpop.xlane.xlu0 %937 }
 0x86f   :  { %4914 = vrcp.f32 %v938_v41 }
 0x872   :  { %v775_v11 = vpop.permute.xlu0 %774 }
 0x873   :  { %4277 = vmatpush3.msra.mxu1 %v775_v11 }
 0x874   :  { %4286 = vmatprep.subr.mxu1 %v4932_v8 }
 0x875   :  { %v4913_v42 = vpop.eup %4912 }
 0x876   :  { %v773_v43 = vmul.f32 %v4913_v42, %v4909_v31  ;;  %v5352_v42 = vpack.c.bf16 %v1252_v39, %v1251_v38 }
 0x878   :  { %4279 = vmatmul.mubr.msk.f32.vlgmr.msra.gmra.mrb[10].mxu1 %vm275_vm3, %v773_v43  ;;  %v1247_v43 = vld [vmem:[%s5924_s0 + $0x80] sm:$0xff] }
 0x879   :  { %v4915_v5 = vpop.eup %4914  ;;  %4287 = vmatpush3.msra.mxu1 %v942_v44  ;;  %4288 = vmatprep.mubr.msk.f32.mxu1 %vm4933_vm1, %v4932_v8  ;;  %v1248_v44 = vld [vmem:[%s5924_s0 + $0x88] sm:$0xff] }
 0x87a   :  { %v940_v45 = vmul.f32 %v4915_v5, %v4911_v33  ;;  %4682 = vmatprep.subr.bf16.mxu1 %v4939_v50  ;;  %v5325_v33 = vpack.c.bf16 %v1240_v21, %v1239_v26  ;;  %v1253_v5 = vld [vmem:[%s5924_s0 + $0xb0] sm:$0xff]  ;;  %v5448_v26 = vpack.c.bf16 %v1258_v18, %v1257_v17  ;;  %v1263_v21 = vld [vmem:[%s5924_s0 + $0x100] sm:$0xff] }
 0x87c   :  { %4289 = vmatmul.mubr.msk.f32.vlgmr.msra.gmra.mrb[12].mxu1 %vm275_vm3, %v940_v45  ;;  %v1254_v45 = vld [vmem:[%s5924_s0 + $0xb8] sm:$0xff] }
 0x87d   :  { %4684 = vmatpush3.bf16.msra.mxu1 %v5170_v59  ;;  %4302 = vmatprep.mubr.msk.f32.mxu1 %vm4933_vm1, %v4932_v8  ;;  %v5239_v59 = vld [vmem:[%s5925_s5] ss:$0 sm:$0xff] }
 0x87e   :  { %4691 = vmatprep.subr.bf16.mxu1 %v4939_v50 }
 0x8a3   :  { %v1178_v46 = vpop.xlane.xlu0 %1177 }
 0x8a4   :  { %v1183_v47 = vmul.f32 0.03125, %v1178_v46 }
 0x8a6   :  { %v1185_v48 = vsub.f32 %v1172_v37, %v1183_v47  ;;  %v1242_v37 = vld [vmem:[%s5924_s0 + $0x58] sm:$0xff] }
 0x8a7   :  { %v5350_v11 = vpack.c.bf16 %v1242_v37, %v1241_v36  ;;  %v1265_v36 = vld [vmem:[%s5924_s0 + $0x110] sm:$0xff] }
 0x8a8   :  { %v1187_v49 = vmul.f32 %v1185_v48, %v1185_v48 }
 0x8aa   :  { %v1189_v51 = vsel %vm101_vm0, %v1187_v49, 0.0  ;;  %v5376_v49 = vpack.c.bf16 %v1248_v44, %v1247_v43 }
 0x8ab   :  { %1190 = vadd.xlane.f32.xlu0 %v1189_v51  ;;  %v5378_v51 = vpack.c.bf16 %v1254_v45, %v1253_v5 }
 0x8c1   :  { %1221 = vperm.xlu0 %4898, %v88_v52   ;;  %v1249_v52 = vld [vmem:[%s5924_s0 + $0x90] sm:$0xff] }
 0x938   :  { %v1191_v53 = vpop.xlane.xlu0 %1190 }
 0x939   :  { %v1195_v54 = vmul.f32 0.03125, %v1191_v53  ;;  %v1250_v53 = vld [vmem:[%s5924_s0 + $0x98] sm:$0xff] }
 0x93b   :  { %v1197_v55 = vadd.f32 1e-05, %v1195_v54  ;;  %v1259_v54 = vld [vmem:[%s5924_s0 + $0xe0] sm:$0xff] }
 0x93d   :  { %4916 = vrsqrt.f32 %v1197_v55  ;;  %v1260_v55 = vld [vmem:[%s5924_s0 + $0xe8] sm:$0xff] }
 0x93e   :  { %v5404_v63 = vpack.c.bf16 %v1260_v55, %v1259_v54 }
 0x940   :  { %v5261_v6 = vpop.permute.xlu0 %1221 }
 0x947   :  { %v4917_v58 = vpop.eup %4916 }
 0x948   :  { %v1201_v60 = vmul.f32 %v4917_v58, %v1185_v48 }
 0x94a   :  { %v1209_v0 = vmul.f32 %v5239_v59, %v1201_v60  ;;  %v5402_v60 = vpack.c.bf16 %v1250_v53, %v1249_v52 }
 0x94b   :  { %v846_v4 = vpop.f32.mrb[10].mxu1 }
 0x94c   :  { %v4280_v9 = vpop.f32.mrb[11].mxu1  ;;  %4303 = vmatmul.mubr.msk.f32.vlgmr.msra.gmra.mrb[14].mxu1 %vm192_vm2, %v846_v4  ;;  %v1217_v10 = vadd.f32 %v5246_v62, %v1209_v0  ;;  %v1255_v0 = vld [vmem:[%s5924_s0 + $0xc0] sm:$0xff] }
 0x94d   :  { %4693 = vmatpush3.bf16.msra.mxu1 %v5241_v61  ;;  %4324 = vmatprep.mubr.msk.f32.mxu1 %vm4933_vm1, %v4932_v8  ;;  %v5428_v14 = vpack.c.bf16 %v1256_v1, %v1255_v0 }
 0x94e   :  { %v5276_v15 = vmul.f32 %v5261_v6, %v1217_v10  ;;  %4694 = vmatprep.subr.bf16.mxu1 %v4939_v50 }
 0x94f   :  { %v1013_v20 = vpop.f32.mrb[12].mxu1 }
 0x950   :  { %v1269_v22 = vrot.slane %v5276_v15, 4  ;;  %v4290_v23 = vpop.f32.mrb[13].mxu1  ;;  %4296 = vmatmul.mubr.msk.f32.vlgmr.msra.gmra.mrb[8].mxu0 %vm192_vm2, %v1013_v20 }
 0x951   :  { %4687 = vmatpush3.bf16.msra.mxu0 %v5266_v12  ;;  %4696 = vmatpush3.bf16.msra.mxu1 %v5268_v13 }
 0x952   :  { %v5300_v27 = vsel %vm1271_vm4, 0.0, %v1269_v22  ;;  %v5303_v19 = vsel %vm1271_vm4, %v1269_v22, 0.0  ;;  %4688 = vmatprep.subr.bf16.mxu0 %v4939_v50  ;;  %4703 = vmatprep.subr.bf16.mxu1 %v4939_v50 }
 0x953   :  { %4313 = vmatprep.mubr.msk.f32.mxu0 %vm4933_vm1, %v4932_v8  ;;  %v1277_v30 = vrot.slane %v5300_v27, 1  ;;  %v1278_v31 = vrot.slane %v5303_v19, 1  ;;  %v1502_v40 = vrot.slane %v5300_v27, 3  ;;  %v1503_v41 = vrot.slane %v5303_v19, 3 }
 0x954   :  { %4325 = vmatmul.mubr.msk.f32.vlgmr.msra.gmra.mrb[16].mxu1 %vm101_vm0, %v5300_v27  ;;  %v1425_v47 = vrot.slane %v5300_v27, 2  ;;  %v1426_v48 = vrot.slane %v5303_v19, 2  ;;  %v1655_v57 = vrot.slane %v5300_v27, 5  ;;  %v1656_v58 = vrot.slane %v5303_v19, 5 }
 0x955   :  { %4690 = vmatpush3.bf16.msra.mxu0 %v5292_v24  ;;  %4705 = vmatpush3.bf16.msra.mxu1 %v5294_v25  ;;  %v1279_v32 = vsel %vm1276_vm5, %v1277_v30, %v1278_v31  ;;  %v1504_v46 = vsel %vm1501_vm6, %v1502_v40, %v1503_v41  ;;  %v1578_v9 = vrot.slane %v5300_v27, 4  ;;  %v1579_v10 = vrot.slane %v5303_v19, 4 }
 0x956   :  { %4697 = vmatprep.subr.bf16.mxu0 %v4939_v50  ;;  %4706 = vmatprep.subr.bf16.mxu1 %v4939_v50  ;;  %v1427_v56 = vsel %vm1424_vm7, %v1425_v47, %v1426_v48  ;;  %v1657_v4 = vsel %vm1654_vm8, %v1655_v57, %v1656_v58  ;;  %v1809_v22 = vrot.slane %v5300_v27, 7  ;;  %v1810_v23 = vrot.slane %v5303_v19, 7 }
 0x957   :  { %4346 = vmatprep.mubr.msk.f32.mxu1 %vm4933_vm1, %v4932_v8  ;;  %v1580_v20 = vsel %vm1271_vm4, %v1578_v9, %v1579_v10  ;;  %v1732_v30 = vrot.slane %v5300_v27, 6  ;;  %v1733_v31 = vrot.slane %v5303_v19, 6  ;;  %v1266_v27 = vld [vmem:[%s5924_s0 + $0x118] sm:$0xff] }
 0x958   :  { %4314 = vmatmul.mubr.msk.f32.vlgmr.msra.gmra.mrb[10].mxu0 %vm101_vm0, %v1279_v32  ;;  %v1811_v29 = vsel %vm1808_vm9, %v1809_v22, %v1810_v23  ;;  %v5465_v32 = vpack.c.bf16 %v1264_v28, %v1263_v21 }
 0x959   :  { %4699 = vmatpush3.bf16.msra.mxu0 %v5325_v33  ;;  %4708 = vmatpush3.bf16.msra.mxu1 %v5327_v34  ;;  %v1734_v37 = vsel %vm1731_vm10, %v1732_v30, %v1733_v31  ;;  %v89_v30 = vld [vmem:[%s5923_s6 + $0x8] sm:$0xff] }
 0x95a   :  { %4700 = vmatprep.subr.bf16.mxu0 %v4939_v50  ;;  %4715 = vmatprep.subr.bf16.mxu1 %v4939_v50 }
 0x95b   :  { %4335 = vmatprep.mubr.msk.f32.mxu0 %vm4933_vm1, %v4932_v8 }
 0x95c   :  { %4347 = vmatmul.mubr.msk.f32.vlgmr.msra.gmra.mrb[18].mxu1 %vm101_vm0, %v1504_v46 }
 0x95d   :  { %4702 = vmatpush3.bf16.msra.mxu0 %v5350_v11  ;;  %4717 = vmatpush3.bf16.msra.mxu1 %v5352_v42 }
 0x95e   :  { %4709 = vmatprep.subr.bf16.mxu0 %v4939_v50  ;;  %4718 = vmatprep.subr.bf16.mxu1 %v4939_v50 }
 0x95f   :  { %4368 = vmatprep.mubr.msk.f32.mxu1 %vm4933_vm1, %v4932_v8 }
 0x960   :  { %4336 = vmatmul.mubr.msk.f32.vlgmr.msra.gmra.mrb[12].mxu0 %vm101_vm0, %v1427_v56 }
 0x961   :  { %4711 = vmatpush3.bf16.msra.mxu0 %v5376_v49  ;;  %4720 = vmatpush3.bf16.msra.mxu1 %v5378_v51 }
 0x962   :  { %4712 = vmatprep.subr.bf16.mxu0 %v4939_v50  ;;  %4727 = vmatprep.subr.bf16.mxu1 %v4939_v50 }
 0x963   :  { %4357 = vmatprep.mubr.msk.f32.mxu0 %vm4933_vm1, %v4932_v8 }
 0x964   :  { %4369 = vmatmul.mubr.msk.f32.vlgmr.msra.gmra.mrb[20].mxu1 %vm101_vm0, %v1657_v4 }
 0x965   :  { %4714 = vmatpush3.bf16.msra.mxu0 %v5402_v60  ;;  %4729 = vmatpush3.bf16.msra.mxu1 %v5404_v63 }
 0x966   :  { %4721 = vmatprep.subr.bf16.mxu0 %v4939_v50  ;;  %4730 = vmatprep.subr.bf16.mxu1 %v4939_v50 }
 0x967   :  { %4390 = vmatprep.mubr.msk.f32.mxu1 %vm4933_vm1, %v4932_v8 }
 0x968   :  { %4358 = vmatmul.mubr.msk.f32.vlgmr.msra.gmra.mrb[14].mxu0 %vm101_vm0, %v1580_v20 }
 0x969   :  { %4723 = vmatpush3.bf16.msra.mxu0 %v5428_v14  ;;  %4732 = vmatpush3.bf16.msra.mxu1 %v5430_v16 }
 0x96a   :  { %4724 = vmatprep.subr.bf16.mxu0 %v4939_v50  ;;  %4379 = vmatprep.mubr.msk.f32.mxu0 %vm4933_vm1, %v4932_v8 }
 0x96b   :  { %4739 = vmatprep.subr.bf16.mxu1 %v4939_v50 }
 0x96c   :  { %4391 = vmatmul.mubr.msk.f32.vlgmr.msra.gmra.mrb[22].mxu1 %vm101_vm0, %v1811_v29 }
 0x96d   :  { %4726 = vmatpush3.bf16.msra.mxu0 %v5448_v26  ;;  %4741 = vmatpush3.bf16.msra.mxu1 %v5266_v12  ;;  %v5481_v12 = vpack.c.bf16 %v1266_v27, %v1265_v36 }
 0x96e   :  { %4733 = vmatprep.subr.bf16.mxu0 %v4939_v50  ;;  %4742 = vmatprep.subr.bf16.mxu1 %v4939_v50 }
 0x96f   :  { %4412 = vmatprep.mubr.msk.f32.mxu1 %vm4933_vm1, %v4932_v8 }
 0x970   :  { %4380 = vmatmul.mubr.msk.f32.vlgmr.msra.gmra.mrb[16].mxu0 %vm101_vm0, %v1734_v37 }
 0x971   :  { %4735 = vmatpush3.bf16.msra.mxu0 %v5465_v32  ;;  %4401 = vmatprep.mubr.msk.f32.mxu0 %vm4933_vm1, %v4932_v8 }
 0x972   :  { %4736 = vmatprep.subr.bf16.mxu0 %v4939_v50  ;;  %4744 = vmatpush3.bf16.msra.mxu1 %v5292_v24 }
 0x973   :  { %4751 = vmatprep.subr.bf16.mxu1 %v4939_v50 }
 0x975   :  { %4738 = vmatpush3.bf16.msra.mxu0 %v5481_v12 }
 0x976   :  { %4745 = vmatprep.subr.bf16.mxu0 %v4939_v50 }
 0x978   :  { %4402 = vmatmul.mubr.msk.f32.vlgmr.msra.gmra.mrb[18].mxu0 %vm101_vm0, %v5303_v19 }
 0x979   :  { %4747 = vmatpush3.bf16.msra.mxu0 %v5241_v61  ;;  %4423 = vmatprep.mubr.msk.f32.mxu0 %vm4933_vm1, %v4932_v8 }
 0x97a   :  { %4748 = vmatprep.subr.bf16.mxu0 %v4939_v50 }
 0x97d   :  { %4750 = vmatpush3.bf16.msra.mxu0 %v5268_v13 }
 0x97e   :  { %4757 = vmatprep.subr.bf16.mxu0 %v4939_v50 }
 0xa1f   :  { %v1159_v24 = vpop.f32.mrb[14].mxu1 }
 0xa20   :  { %v4304_v38 = vpop.f32.mrb[15].mxu1 }
 0xa23   :  { %v1086_v39 = vpop.f32.mrb[8].mxu0 }
 0xa24   :  { %v1160_v40 = vadd.f32 %v1159_v24, %v1086_v39  ;;  %v4297_v41 = vpop.f32.mrb[9].mxu0 }
 0xa26   :  { %v1171_v43 = vadd.f32 %v5211_v35, %v1160_v40 }
 0xa27   :  { %v1420_v44 = vpop.f32.mrb[16].mxu1 }
 0xa28   :  { %v4326_v19 = vpop.f32.mrb[17].mxu1  ;;  %v1173_v61 = vadd.f32 %v1171_v43, %v5098_v7 }
 0xa2a   :  { %v1179_v5 = vsel %vm101_vm0, %v1173_v61, 0.0 }
 0xa2b   :  { %v1348_v45 = vpop.f32.mrb[10].mxu0  ;;  %1180 = vadd.xlane.f32.xlu1 %v1179_v5 }
 0xa2c   :  { %v1421_v46 = vadd.f32 %v1420_v44, %v1348_v45  ;;  %v4315_v47 = vpop.f32.mrb[11].mxu0 }
 0xa2f   :  { %v1573_v13 = vpop.f32.mrb[18].mxu1 }
 0xa30   :  { %v4348_v48 = vpop.f32.mrb[19].mxu1 }
 0xa33   :  { %v1496_v52 = vpop.f32.mrb[12].mxu0 }
 0xa34   :  { %v1500_v53 = vadd.f32 %v1496_v52, %v1421_v46  ;;  %v4337_v54 = vpop.f32.mrb[13].mxu0  ;;  %v5565_v52 = vld [vmem:[%s5927_s27] ss:$0 sm:$0xff] }
 0xa36   :  { %v1577_v55 = vadd.f32 %v1573_v13, %v1500_v53 }
 0xa37   :  { %v1726_v56 = vpop.f32.mrb[20].mxu1 }
 0xa38   :  { %v4370_v57 = vpop.f32.mrb[21].mxu1 }
 0xa39   :  { %v2654_v57 = vld [vmem:[%s5884_s11 + $0x18] sm:$0xff] }
 0xa3b   :  { %v1649_v58 = vpop.f32.mrb[14].mxu0 }
 0xa3c   :  { %v1653_v35 = vadd.f32 %v1649_v58, %v1577_v55  ;;  %v4359_v0 = vpop.f32.mrb[15].mxu0  ;;  %v2655_v58 = vld [vmem:[%s5884_s11 + $0x20] sm:$0xff] }
 0xa3d   :  { %v2656_v0 = vld [vmem:[%s5884_s11 + $0x28] sm:$0xff] }
 0xa3e   :  { %v1730_v1 = vadd.f32 %v1726_v56, %v1653_v35 }
 0xa3f   :  { %v1880_v2 = vpop.f32.mrb[22].mxu1 }
 0xa40   :  { %v4392_v7 = vpop.f32.mrb[23].mxu1 }
 0xa41   :  { %v2658_v7 = vld [vmem:[%s5884_s11 + $0x38] sm:$0xff] }
 0xa43   :  { %v1803_v3 = vpop.f32.mrb[16].mxu0 }
 0xa44   :  { %v1807_v4 = vadd.f32 %v1803_v3, %v1730_v1  ;;  %v4381_v9 = vpop.f32.mrb[17].mxu0  ;;  %v4801_v1 = vpack.c.bf16 %v2656_v0, %v2655_v58  ;;  %v2805_v58 = vld [vmem:[%s5886_s15 + $0x38] sm:$0xff]  ;;  %v2808_v0 = vld [vmem:[%s5886_s15 + $0x50] sm:$0xff] }
 0xa46   :  { %v1884_v10 = vadd.f32 %v1880_v2, %v1807_v4  ;;  %v2657_v2 = vld [vmem:[%s5884_s11 + $0x30] sm:$0xff] }
 0xa47   :  { %v4805_v3 = vpack.c.bf16 %v2658_v7, %v2657_v2 }
 0xa4b   :  { %v1953_v17 = vpop.f32.mrb[18].mxu0 }
 0xa4c   :  { %v5501_v18 = vadd.f32 %v1953_v17, %v1884_v10  ;;  %v4403_v20 = vpop.f32.mrb[19].mxu0 }
 0xab8   :  { %v1181_v22 = vpop.xlane.xlu1 %1180 }
 0xab9   :  { %v1184_v23 = vmul.f32 0.03125, %v1181_v22 }
 0xabb   :  { %v1186_v21 = vsub.f32 %v1173_v61, %v1184_v23 }
 0xabd   :  { %v1188_v28 = vmul.f32 %v1186_v21, %v1186_v21 }
 0xabf   :  { %v1192_v29 = vsel %vm101_vm0, %v1188_v28, 0.0 }
 0xac0   :  { %1193 = vadd.xlane.f32.xlu1 %v1192_v29 }
 0xad1   :  { %1226 = vperm.xlu1 %4899, %v89_v30  }
 0xb4d   :  { %v1194_v31 = vpop.xlane.xlu1 %1193 }
 0xb4e   :  { %v1196_v36 = vmul.f32 0.03125, %v1194_v31 }
 0xb50   :  { %v1198_v27 = vadd.f32 1e-05, %v1196_v36 }
 0xb51   :  { %v5508_v39 = vpop.permute.xlu1 %1226 }
 0xb52   :  { %4918 = vrsqrt.f32 %v1198_v27 }
 0xb5c   :  { %v4919_v37 = vpop.eup %4918 }
 0xb5d   :  { %v1202_v24 = vmul.f32 %v4919_v37, %v1186_v21 }
 0xb5f   :  { %v1210_v38 = vmul.f32 %v5239_v59, %v1202_v24 }
 0xb61   :  { %v1218_v40 = vadd.f32 %v5246_v62, %v1210_v38 }
 0xb63   :  { %v5512_v41 = vmul.f32 %v5508_v39, %v1218_v40 }
 0xb65   :  { %v1959_v43 = vrot.slane %v5512_v41, 4 }
 0xb67   :  { %v5516_v44 = vsel %vm1271_vm4, 0.0, %v1959_v43  ;;  %v5519_v19 = vsel %vm1271_vm4, %v1959_v43, 0.0 }
 0xb68   :  { %4424 = vmatmul.mubr.msk.f32.vlgmr.msra.gmra.mrb[20].mxu0 %vm101_vm0, %v5516_v44  ;;  %v1965_v59 = vrot.slane %v5516_v44, 1  ;;  %v1966_v61 = vrot.slane %v5519_v19, 1  ;;  %v2188_v5 = vrot.slane %v5516_v44, 3  ;;  %v2189_v45 = vrot.slane %v5519_v19, 3 }
 0xb69   :  { %4759 = vmatpush3.bf16.msra.mxu0 %v5294_v25  ;;  %4445 = vmatprep.mubr.msk.f32.mxu0 %vm4933_vm1, %v4932_v8  ;;  %v2112_v25 = vrot.slane %v5516_v44, 2  ;;  %v2113_v46 = vrot.slane %v5519_v19, 2  ;;  %v2341_v13 = vrot.slane %v5519_v19, 5  ;;  %v2493_v53 = vrot.slane %v5519_v19, 7 }
 0xb6a   :  { %v1967_v62 = vsel %vm1276_vm5, %v1965_v59, %v1966_v61  ;;  %4760 = vmatprep.subr.bf16.mxu0 %v4939_v50  ;;  %v2190_v47 = vsel %vm1501_vm6, %v2188_v5, %v2189_v45  ;;  %v2417_v54 = vrot.slane %v5519_v19, 6 }
 0xb6b   :  { %4413 = vmatmul.mubr.msk.f32.vlgmr.msra.gmra.mrb[24].mxu1 %vm101_vm0, %v1967_v62 }
 0xb6c   :  { %4753 = vmatpush3.bf16.msra.mxu1 %v5325_v33  ;;  %4434 = vmatprep.mubr.msk.f32.mxu1 %vm4933_vm1, %v4932_v8  ;;  %v2114_v33 = vsel %vm1424_vm7, %v2112_v25, %v2113_v46  ;;  %v4000_v46 = vld [vmem:[%s5885_s12] ss:$0 sm:$0xff] }
 0xb6d   :  { %4762 = vmatpush3.bf16.msra.mxu0 %v5327_v34  ;;  %4754 = vmatprep.subr.bf16.mxu1 %v4939_v50  ;;  %v2340_v34 = vrot.slane %v5516_v44, 5 }
 0xb6e   :  { %4769 = vmatprep.subr.bf16.mxu0 %v4939_v50 }
 0xb6f   :  { %v2342_v48 = vsel %vm1654_vm8, %v2340_v34, %v2341_v13 }
 0xb70   :  { %4756 = vmatpush3.bf16.msra.mxu1 %v5350_v11  ;;  %4446 = vmatmul.mubr.msk.f32.vlgmr.msra.gmra.mrb[22].mxu0 %vm101_vm0, %v2190_v47  ;;  %v2264_v11 = vrot.slane %v5516_v44, 4 }
 0xb71   :  { %4771 = vmatpush3.bf16.msra.mxu0 %v5352_v42  ;;  %4763 = vmatprep.subr.bf16.mxu1 %v4939_v50  ;;  %v2265_v42 = vrot.slane %v5519_v19, 4 }
 0xb72   :  { %4772 = vmatprep.subr.bf16.mxu0 %v4939_v50  ;;  %4467 = vmatprep.mubr.msk.f32.mxu0 %vm4933_vm1, %v4932_v8 }
 0xb73   :  { %4435 = vmatmul.mubr.msk.f32.vlgmr.msra.gmra.mrb[26].mxu1 %vm101_vm0, %v2114_v33 }
 0xb74   :  { %4765 = vmatpush3.bf16.msra.mxu1 %v5376_v49  ;;  %4456 = vmatprep.mubr.msk.f32.mxu1 %vm4933_vm1, %v4932_v8  ;;  %v2266_v49 = vsel %vm1271_vm4, %v2264_v11, %v2265_v42 }
 0xb75   :  { %4774 = vmatpush3.bf16.msra.mxu0 %v5378_v51  ;;  %4766 = vmatprep.subr.bf16.mxu1 %v4939_v50  ;;  %v2647_v51 = vadd.f32 %v5565_v52, %v5501_v18 }
 0xb76   :  { %4781 = vmatprep.subr.bf16.mxu0 %v4939_v50 }
 0xb77   :  { %v2649_v55 = vmax.f32 %v2647_v51, 0.0 }
 0xb78   :  { %4768 = vmatpush3.bf16.msra.mxu1 %v5402_v60  ;;  %4468 = vmatmul.mubr.msk.f32.vlgmr.msra.gmra.mrb[24].mxu0 %vm101_vm0, %v2342_v48  ;;  %v2492_v60 = vrot.slane %v5516_v44, 7 }
 0xb79   :  { %4783 = vmatpush3.bf16.msra.mxu0 %v5404_v63  ;;  %4775 = vmatprep.subr.bf16.mxu1 %v4939_v50  ;;  %v2416_v63 = vrot.slane %v5516_v44, 6 }
 0xb7a   :  { %4784 = vmatprep.subr.bf16.mxu0 %v4939_v50  ;;  %4489 = vmatprep.mubr.msk.f32.mxu0 %vm4933_vm1, %v4932_v8  ;;  %v2494_v56 = vsel %vm1808_vm9, %v2492_v60, %v2493_v53 }
 0xb7b   :  { %4457 = vmatmul.mubr.msk.f32.vlgmr.msra.gmra.mrb[28].mxu1 %vm101_vm0, %v2266_v49 }
 0xb7c   :  { %4777 = vmatpush3.bf16.msra.mxu1 %v5428_v14  ;;  %4478 = vmatprep.mubr.msk.f32.mxu1 %vm4933_vm1, %v4932_v8  ;;  %v2418_v14 = vsel %vm1731_vm10, %v2416_v63, %v2417_v54 }
 0xb7d   :  { %4786 = vmatpush3.bf16.msra.mxu0 %v5430_v16  ;;  %4778 = vmatprep.subr.bf16.mxu1 %v4939_v50  ;;  %v2651_v16 = vld [vmem:[%s5884_s11] sm:$0xff] }
 0xb80   :  { %4780 = vmatpush3.bf16.msra.mxu1 %v5448_v26  ;;  %4490 = vmatmul.mubr.msk.f32.vlgmr.msra.gmra.mrb[26].mxu0 %vm101_vm0, %v2494_v56  ;;  %v2652_v26 = vld [vmem:[%s5884_s11 + $0x8] sm:$0xff] }
 0xb81   :  { %4519 = vmatprep.mubr.msk.f32.mxu0 %vm2666_vm11, %v2649_v55  ;;  %4787 = vmatprep.subr.bf16.mxu1 %v4939_v50 }
 0xb83   :  { %4479 = vmatmul.mubr.msk.f32.vlgmr.msra.gmra.mrb[30].mxu1 %vm101_vm0, %v2418_v14 }
 0xb84   :  { %4789 = vmatpush3.bf16.msra.mxu1 %v5465_v32  ;;  %4500 = vmatprep.mubr.msk.f32.mxu1 %vm4933_vm1, %v4932_v8  ;;  %v4793_v32 = vpack.c.bf16 %v2652_v26, %v2651_v16  ;;  %v2803_v16 = vld [vmem:[%s5886_s15 + $0x28] sm:$0xff]  ;;  %v2806_v26 = vld [vmem:[%s5886_s15 + $0x40] sm:$0xff] }
 0xb85   :  { %4790 = vmatprep.subr.bf16.mxu1 %v4939_v50 }
 0xb86   :  { %4794 = vmatprep.subr.bf16.mxu0 %v4793_v32 }
 0xb87   :  { %4796 = vmatpush3.bf16.msra.mxu0 %v4793_v32 }
 0xb88   :  { %4792 = vmatpush3.bf16.msra.mxu1 %v5481_v12  ;;  %v2653_v12 = vld [vmem:[%s5884_s11 + $0x10] sm:$0xff] }
 0xb89   :  { %4809 = vmatprep.subr.bf16.mxu1 %v4939_v50  ;;  %v4797_v35 = vpack.c.bf16 %v2654_v57, %v2653_v12  ;;  %v2807_v12 = vld [vmem:[%s5886_s15 + $0x48] sm:$0xff]  ;;  %v2804_v57 = vld [vmem:[%s5886_s15 + $0x30] sm:$0xff] }
 0xb8a   :  { %v5671_v2 = vpack.c.bf16 %v2805_v58, %v2804_v57 }
 0xb8b   :  { %4501 = vmatmul.mubr.msk.f32.vlgmr.msra.gmra.mrb[32].mxu1 %vm101_vm0, %v5519_v19  ;;  %4798 = vmatprep.subr.bf16.mxu0 %v4797_v35 }
 0xb8c   :  { %4530 = vmatprep.mubr.msk.f32.mxu1 %vm4933_vm1, %v4932_v8  ;;  %4800 = vmatpush3.bf16.msra.mxu0 %v4797_v35  ;;  %v5662_v35 = vpack.c.bf16 %v2807_v12, %v2806_v26 }
 0xb8d   :  { %4802 = vmatprep.subr.bf16.mxu0 %v4801_v1 }
 0xb90   :  { %4804 = vmatpush3.bf16.msra.mxu0 %v4801_v1  ;;  %v2809_v1 = vld [vmem:[%s5886_s15 + $0x58] sm:$0xff] }
 0xb91   :  { %4806 = vmatprep.subr.bf16.mxu0 %v4805_v3  ;;  %v5675_v7 = vpack.c.bf16 %v2809_v1, %v2808_v0 }
 0xb94   :  { %4808 = vmatpush3.bf16.msra.mxu0 %v4805_v3 }
 0xb95   :  { %4821 = vmatprep.subr.bf16.mxu0 %v4939_v50 }
 0xc3b   :  { %v2108_v4 = vpop.f32.mrb[20].mxu0 }
 0xc3c   :  { %v4425_v9 = vpop.f32.mrb[21].mxu0 }
 0xc3e   :  { %v2036_v10 = vpop.f32.mrb[24].mxu1 }
 0xc3f   :  { %v2109_v17 = vadd.f32 %v2108_v4, %v2036_v10  ;;  %v4414_v18 = vpop.f32.mrb[25].mxu1 }
 0xc43   :  { %v2259_v20 = vpop.f32.mrb[22].mxu0 }
 0xc44   :  { %v4447_v22 = vpop.f32.mrb[23].mxu0 }
 0xc45   :  { %v4003_v22 = vld [vmem:[%s5887_s13] ss:$0 sm:$0xff] }
 0xc46   :  { %v2183_v23 = vpop.f32.mrb[26].mxu1 }
 0xc47   :  { %v2187_v21 = vadd.f32 %v2183_v23, %v2109_v17  ;;  %v4436_v28 = vpop.f32.mrb[27].mxu1 }
 0xc49   :  { %v2263_v29 = vadd.f32 %v2259_v20, %v2187_v21  ;;  %v4004_v21 = vld [vmem:[%s5888_s14] ss:$0 sm:$0xff] }
 0xc4b   :  { %v2411_v30 = vpop.f32.mrb[24].mxu0 }
 0xc4c   :  { %v4469_v31 = vpop.f32.mrb[25].mxu0 }
 0xc4e   :  { %v2335_v36 = vpop.f32.mrb[28].mxu1 }
 0xc4f   :  { %v2339_v27 = vadd.f32 %v2335_v36, %v2263_v29  ;;  %v4458_v37 = vpop.f32.mrb[29].mxu1 }
 0xc50   :  { %v2798_v37 = vld [vmem:[%s5886_s15] sm:$0xff] }
 0xc51   :  { %v2415_v24 = vadd.f32 %v2411_v30, %v2339_v27 }
 0xc53   :  { %v2563_v38 = vpop.f32.mrb[26].mxu0 }
 0xc54   :  { %v4491_v40 = vpop.f32.mrb[27].mxu0 }
 0xc56   :  { %v2487_v43 = vpop.f32.mrb[30].mxu1 }
 0xc57   :  { %v2491_v44 = vadd.f32 %v2487_v43, %v2415_v24  ;;  %v4480_v19 = vpop.f32.mrb[31].mxu1  ;;  %v2799_v24 = vld [vmem:[%s5886_s15 + $0x8] sm:$0xff] }
 0xc59   :  { %v2567_v59 = vadd.f32 %v2563_v38, %v2491_v44  ;;  %v4816_v44 = vpack.c.bf16 %v2799_v24, %v2798_v37  ;;  %v2817_v37 = vld [vmem:[%s5891_s19 + $0x20] sm:$0xff]  ;;  %v2818_v24 = vld [vmem:[%s5891_s19 + $0x28] sm:$0xff] }
 0xc5e   :  { %v2636_v61 = vpop.f32.mrb[32].mxu1 }
 0xc5f   :  { %v2640_v62 = vadd.f32 %v2636_v61, %v2567_v59  ;;  %v4502_v5 = vpop.f32.mrb[33].mxu1 }
 0xc61   :  { %v2648_v45 = vadd.f32 %v5565_v52, %v2640_v62 }
 0xc63   :  { %v2650_v25 = vmax.f32 %v2648_v45, 0.0  ;;  %v2800_v45 = vld [vmem:[%s5886_s15 + $0x10] sm:$0xff] }
 0xc65   :  { %4520 = vmatmul.mubr.msk.f32.vlgmr.msra.gmra.mrb[28].mxu0 %vm2666_vm11, %v2650_v25  ;;  %v2801_v25 = vld [vmem:[%s5886_s15 + $0x18] sm:$0xff] }
 0xc66   :  { %4552 = vmatprep.mubr.msk.f32.mxu0 %vm4933_vm1, %v4932_v8  ;;  %4823 = vmatpush3.bf16.msra.mxu0 %v5662_v35 }
 0xc67   :  { %4824 = vmatprep.subr.bf16.mxu0 %v4939_v50 }
 0xc6a   :  { %4826 = vmatpush3.bf16.msra.mxu0 %v5675_v7 }
 0xc6b   :  { %4833 = vmatprep.subr.bf16.mxu0 %v4939_v50 }
 0xd38   :  { %v4521_v47 = vpop.f32.mrb[28].mxu0 }
 0xd39   :  { %v2745_v33 = vadd.f32 %v4521_v47, %v4000_v46  ;;  %v2739_v34 = vpop.f32.mrb[29].mxu0  ;;  %v4819_v47 = vpack.c.bf16 %v2801_v25, %v2800_v45 }
 0xd3a   :  { %v2740_v13 = vadd.f32 %v4000_v46, %v2739_v34 }
 0xd3b   :  { %v2749_v11 = vadd.f32 %v2745_v33, %v5512_v41 }
 0xd3c   :  { %v2748_v42 = vadd.f32 %v2740_v13, %v5276_v15  ;;  %v2802_v15 = vld [vmem:[%s5886_s15 + $0x20] sm:$0xff] }
 0xd3d   :  { %v2755_v48 = vsel %vm101_vm0, %v2749_v11, 0.0  ;;  %v5651_v32 = vpack.c.bf16 %v2803_v16, %v2802_v15  ;;  %v4011_v16 = vld [vmem:[%s5890_s16] ss:$0 sm:$0xff] }
 0xd3e   :  { %2756 = vadd.xlane.f32.xlu0 %v2755_v48  ;;  %v2752_v52 = vsel %vm101_vm0, %v2748_v42, 0.0 }
 0xd3f   :  { %2753 = vadd.xlane.f32.xlu1 %v2752_v52  ;;  %4811 = vmatpush3.bf16.msra.mxu1 %v5651_v32 }
 0xd40   :  { %4812 = vmatprep.subr.bf16.mxu1 %v4939_v50 }
 0xd43   :  { %4814 = vmatpush3.bf16.msra.mxu1 %v5671_v2 }
 0xd44   :  { %4815 = vmatprep.subr.bf16.mxu1 %v4939_v50 }
 0xdcb   :  { %v2757_v49 = vpop.xlane.xlu0 %2756 }
 0xdcc   :  { %v2759_v51 = vmul.f32 0.03125, %v2757_v49  ;;  %v2754_v60 = vpop.xlane.xlu1 %2753 }
 0xdcd   :  { %v2758_v53 = vmul.f32 0.03125, %v2754_v60 }
 0xdce   :  { %v2761_v63 = vsub.f32 %v2749_v11, %v2759_v51 }
 0xdcf   :  { %v2760_v54 = vsub.f32 %v2748_v42, %v2758_v53 }
 0xdd0   :  { %v2763_v14 = vmul.f32 %v2761_v63, %v2761_v63 }
 0xdd1   :  { %v2762_v55 = vmul.f32 %v2760_v54, %v2760_v54 }
 0xdd2   :  { %v2767_v41 = vsel %vm101_vm0, %v2763_v14, 0.0 }
 0xdd3   :  { %v2764_v56 = vsel %vm101_vm0, %v2762_v55, 0.0 }
 0xdd4   :  { %2765 = vadd.xlane.f32.xlu1 %v2764_v56 }
 0xdd8   :  { %2768 = vadd.xlane.f32.xlu1 %v2767_v41 }
 0xe61   :  { %v2766_v3 = vpop.xlane.xlu1 %2765 }
 0xe62   :  { %v2770_v4 = vmul.f32 0.03125, %v2766_v3 }
 0xe64   :  { %v2772_v9 = vadd.f32 1e-05, %v2770_v4 }
 0xe65   :  { %v2769_v10 = vpop.xlane.xlu1 %2768 }
 0xe66   :  { %4920 = vrsqrt.f32 %v2772_v9  ;;  %v2771_v17 = vmul.f32 0.03125, %v2769_v10 }
 0xe68   :  { %v2773_v18 = vadd.f32 1e-05, %v2771_v17 }
 0xe6a   :  { %4922 = vrsqrt.f32 %v2773_v18 }
 0xe70   :  { %v4921_v20 = vpop.eup %4920 }
 0xe71   :  { %v2776_v23 = vmul.f32 %v4921_v20, %v2760_v54 }
 0xe73   :  { %v2784_v28 = vmul.f32 %v4003_v22, %v2776_v23 }
 0xe74   :  { %v4923_v29 = vpop.eup %4922 }
 0xe75   :  { %v2792_v30 = vadd.f32 %v4004_v21, %v2784_v28  ;;  %v2777_v31 = vmul.f32 %v4923_v29, %v2761_v63 }
 0xe77   :  { %v2794_v36 = vmul.f32 %v2792_v30, %v5261_v6  ;;  %v2785_v27 = vmul.f32 %v4003_v22, %v2777_v31  ;;  %v2813_v31 = vld [vmem:[%s5891_s19] sm:$0xff] }
 0xe79   :  { %v2834_v38 = vrot.slane %v2794_v36, 7  ;;  %v2793_v40 = vadd.f32 %v4004_v21, %v2785_v27  ;;  %2796 = vst.msk [vmem:[%s5889_s25] sm:$0xff] %vm101_vm0, %v2794_v36  ;;  %v2814_v36 = vld [vmem:[%s5891_s19 + $0x8] sm:$0xff] }
 0xe7a   :  { %v5761_v27 = vpack.c.bf16 %v2814_v36, %v2813_v31 }
 0xe7b   :  { %v2836_v43 = vsel %vm1808_vm9, 0.0, %v2834_v38  ;;  %v2837_v6 = vsel %vm1808_vm9, %v2834_v38, 0.0  ;;  %v2795_v19 = vmul.f32 %v2793_v40, %v5508_v39  ;;  %v4846_v38 = vpack.c.bf16 %v2818_v24, %v2817_v37  ;;  %v2815_v40 = vld [vmem:[%s5891_s19 + $0x10] sm:$0xff] }
 0xe7c   :  { %v2840_v59 = vrot.slane %v2836_v43, 1  ;;  %v2841_v61 = vrot.slane %v2837_v6, 1  ;;  %v2987_v62 = vrot.slane %v2836_v43, 2  ;;  %v2988_v5 = vrot.slane %v2837_v6, 2 }
 0xe7d   :  { %2797 = vst.msk [vmem:[%s5889_s25 + $0x8] sm:$0xff] %vm101_vm0, %v2795_v19  ;;  %v3064_v33 = vrot.slane %v2795_v19, 7  ;;  %v2820_v19 = vld [vmem:[%s5891_s19 + $0x38] sm:$0xff] }
 0xe7e   :  { %v2842_v46 = vsel %vm1276_vm5, %v2840_v59, %v2841_v61  ;;  %v2989_v39 = vsel %vm1424_vm7, %v2987_v62, %v2988_v5 }
 0xe7f   :  { %4531 = vmatmul.mubr.msk.f32.vlgmr.msra.gmra.mrb[34].mxu1 %vm101_vm0, %v2842_v46  ;;  %4553 = vmatmul.mubr.msk.f32.vlgmr.msra.gmra.mrb[30].mxu0 %vm101_vm0, %v2989_v39  ;;  %v3066_v34 = vsel %vm1808_vm9, 0.0, %v3064_v33  ;;  %v3067_v13 = vsel %vm1808_vm9, %v3064_v33, 0.0  ;;  %v4012_v39 = vld [vmem:[%s5892_s17] ss:$0 sm:$0xff] }
 0xe80   :  { %4817 = vmatpush3.bf16.msra.mxu1 %v4816_v44  ;;  %4835 = vmatpush3.bf16.msra.mxu0 %v4816_v44  ;;  %v3070_v11 = vrot.slane %v3066_v34, 1  ;;  %v3071_v42 = vrot.slane %v3067_v13, 1  ;;  %v3217_v52 = vrot.slane %v3066_v34, 2  ;;  %v3218_v49 = vrot.slane %v3067_v13, 2  ;;  %v2819_v44 = vld [vmem:[%s5891_s19 + $0x30] sm:$0xff] }
 0xe81   :  { %4818 = vmatprep.subr.bf16.mxu1 %v4939_v50  ;;  %4836 = vmatprep.subr.bf16.mxu0 %v4939_v50  ;;  %v4849_v59 = vpack.c.bf16 %v2820_v19, %v2819_v44 }
 0xe82   :  { %4541 = vmatprep.mubr.msk.f32.mxu1 %vm4933_vm1, %v4932_v8  ;;  %4574 = vmatprep.mubr.msk.f32.mxu0 %vm4933_vm1, %v4932_v8  ;;  %v3072_v48 = vsel %vm1276_vm5, %v3070_v11, %v3071_v42  ;;  %v3219_v51 = vsel %vm1424_vm7, %v3217_v52, %v3218_v49  ;;  %v2822_v52 = vld [vmem:[%s5891_s19 + $0x48] sm:$0xff] }
 0xe84   :  { %4820 = vmatpush3.bf16.msra.mxu1 %v4819_v47  ;;  %4838 = vmatpush3.bf16.msra.mxu0 %v4819_v47 }
 0xe85   :  { %4827 = vmatprep.subr.bf16.mxu1 %v4939_v50  ;;  %4845 = vmatprep.subr.bf16.mxu0 %v4939_v50 }
 0xe87   :  { %4542 = vmatmul.mubr.msk.f32.vlgmr.msra.gmra.mrb[36].mxu1 %vm101_vm0, %v2836_v43  ;;  %4575 = vmatmul.mubr.msk.f32.vlgmr.msra.gmra.mrb[32].mxu0 %vm101_vm0, %v3066_v34  ;;  %v2816_v43 = vld [vmem:[%s5891_s19 + $0x18] sm:$0xff]  ;;  %v4013_v34 = vld [vmem:[%s5893_s18] ss:$0 sm:$0xff] }
 0xe88   :  { %4829 = vmatpush3.bf16.msra.mxu1 %v5651_v32  ;;  %4563 = vmatprep.mubr.msk.f32.mxu1 %vm4933_vm1, %v4932_v8  ;;  %v5777_v6 = vpack.c.bf16 %v2816_v43, %v2815_v40 }
 0xe89   :  { %4830 = vmatprep.subr.bf16.mxu1 %v4939_v50  ;;  %4596 = vmatprep.mubr.msk.f32.mxu0 %vm4933_vm1, %v4932_v8 }
 0xe8a   :  { %4847 = vmatpush3.bf16.msra.mxu0 %v4846_v38 }
 0xe8b   :  { %4848 = vmatprep.subr.bf16.mxu0 %v4939_v50 }
 0xe8c   :  { %4832 = vmatpush3.bf16.msra.mxu1 %v5671_v2 }
 0xe8d   :  { %4839 = vmatprep.subr.bf16.mxu1 %v4939_v50 }
 0xe8e   :  { %4850 = vmatpush3.bf16.msra.mxu0 %v4849_v59 }
 0xe8f   :  { %4564 = vmatmul.mubr.msk.f32.vlgmr.msra.gmra.mrb[38].mxu1 %vm101_vm0, %v3072_v48  ;;  %4857 = vmatprep.subr.bf16.mxu0 %v4939_v50  ;;  %v2821_v48 = vld [vmem:[%s5891_s19 + $0x40] sm:$0xff] }
 0xe90   :  { %4841 = vmatpush3.bf16.msra.mxu1 %v5662_v35  ;;  %4585 = vmatprep.mubr.msk.f32.mxu1 %vm4933_vm1, %v4932_v8 }
 0xe91   :  { %4842 = vmatprep.subr.bf16.mxu1 %v4939_v50 }
 0xe94   :  { %4844 = vmatpush3.bf16.msra.mxu1 %v5675_v7 }
 0xe95   :  { %4851 = vmatprep.subr.bf16.mxu1 %v4939_v50 }
 0xe97   :  { %4586 = vmatmul.mubr.msk.f32.vlgmr.msra.gmra.mrb[40].mxu1 %vm101_vm0, %v3219_v51 }
 0xe98   :  { %4607 = vmatprep.mubr.msk.f32.mxu1 %vm4933_vm1, %v4932_v8  ;;  %4853 = vmatpush3.bf16.msra.mxu1 %v5761_v27 }
 0xe99   :  { %4854 = vmatprep.subr.bf16.mxu1 %v4939_v50 }
 0xe9c   :  { %4856 = vmatpush3.bf16.msra.mxu1 %v5777_v6 }
 0xe9d   :  { %4863 = vmatprep.subr.bf16.mxu1 %v4939_v50 }
 0xf52   :  { %v2911_v60 = vpop.f32.mrb[34].mxu1  ;;  %v3058_v53 = vpop.f32.mrb[30].mxu0 }
 0xf53   :  { %v4532_v63 = vpop.f32.mrb[35].mxu1  ;;  %v4554_v54 = vpop.f32.mrb[31].mxu0 }
 0xf54   :  { %v4858_v63 = vpack.c.bf16 %v2822_v52, %v2821_v48  ;;  %v2823_v54 = vld [vmem:[%s5891_s19 + $0x50] sm:$0xff]  ;;  %v2831_v48 = vld [vmem:[%s5895_s23 + $0x18] sm:$0xff] }
 0xf5a   :  { %v2983_v55 = vpop.f32.mrb[36].mxu1  ;;  %v3213_v56 = vpop.f32.mrb[32].mxu0 }
 0xf5b   :  { %v2984_v14 = vadd.f32 %v2983_v55, %v2911_v60  ;;  %v4543_v41 = vpop.f32.mrb[37].mxu1  ;;  %v4576_v15 = vpop.f32.mrb[33].mxu0  ;;  %v2824_v55 = vld [vmem:[%s5891_s19 + $0x58] sm:$0xff] }
 0xf5c   :  { %v4861_v41 = vpack.c.bf16 %v2824_v55, %v2823_v54 }
 0xf5d   :  { %v3062_v26 = vadd.f32 %v3058_v53, %v2984_v14 }
 0xf5f   :  { %v3299_v32 = vadd.f32 %v4011_v16, %v3062_v26 }
 0xf61   :  { %v3301_v12 = vmax.f32 %v3299_v32, 0.0 }
 0xf62   :  { %v3141_v57 = vpop.f32.mrb[38].mxu1 }
 0xf63   :  { %v3214_v58 = vadd.f32 %v3213_v56, %v3141_v57  ;;  %v4565_v35 = vpop.f32.mrb[39].mxu1  ;;  %v3303_v0 = vsel %vm101_vm0, %v3301_v12, 0.0 }
 0xf64   :  { %3304 = vadd.xlane.f32.xlu1 %v3303_v0 }
 0xf6a   :  { %v3288_v1 = vpop.f32.mrb[40].mxu1 }
 0xf6b   :  { %v3292_v2 = vadd.f32 %v3288_v1, %v3214_v58  ;;  %v4587_v7 = vpop.f32.mrb[41].mxu1 }
 0xf6d   :  { %v3300_v3 = vadd.f32 %v4011_v16, %v3292_v2 }
 0xf6f   :  { %v3302_v4 = vmax.f32 %v3300_v3, 0.0 }
 0xf71   :  { %v3306_v9 = vsel %vm101_vm0, %v3302_v4, 0.0 }
 0xf72   :  { %3307 = vadd.xlane.f32.xlu0 %v3306_v9 }
 0xff1   :  { %v3305_v10 = vpop.xlane.xlu1 %3304 }
 0xff2   :  { %v3309_v17 = vmul.f32 0.03125, %v3305_v10 }
 0xff4   :  { %v3311_v18 = vsub.f32 %v3301_v12, %v3309_v17 }
 0xff6   :  { %v3313_v20 = vmul.f32 %v3311_v18, %v3311_v18 }
 0xff8   :  { %v3315_v22 = vsel %vm101_vm0, %v3313_v20, 0.0 }
 0xff9   :  { %3316 = vadd.xlane.f32.xlu1 %v3315_v22 }
 0xfff   :  { %v3308_v23 = vpop.xlane.xlu0 %3307 }
0x1000   :  { %v3310_v21 = vmul.f32 0.03125, %v3308_v23 }
0x1002   :  { %v3312_v28 = vsub.f32 %v3302_v4, %v3310_v21 }
0x1004   :  { %v3314_v29 = vmul.f32 %v3312_v28, %v3312_v28 }
0x1006   :  { %v3318_v30 = vsel %vm101_vm0, %v3314_v29, 0.0 }
0x1007   :  { %3319 = vadd.xlane.f32.xlu0 %v3318_v30 }
0x1086   :  { %v3317_v61 = vpop.xlane.xlu1 %3316 }
0x1087   :  { %v3321_v62 = vmul.f32 0.03125, %v3317_v61 }
0x1089   :  { %v3323_v5 = vadd.f32 1e-05, %v3321_v62 }
0x108b   :  { %4924 = vrsqrt.f32 %v3323_v5 }
0x1094   :  { %v3320_v45 = vpop.xlane.xlu0 %3319 }
0x1095   :  { %v4925_v25 = vpop.eup %4924  ;;  %v3322_v46 = vmul.f32 0.03125, %v3320_v45 }
0x1096   :  { %v3327_v47 = vmul.f32 %v4925_v25, %v3311_v18 }
0x1097   :  { %v3324_v33 = vadd.f32 1e-05, %v3322_v46 }
0x1098   :  { %v3335_v13 = vmul.f32 %v4012_v39, %v3327_v47 }
0x1099   :  { %4926 = vrsqrt.f32 %v3324_v33 }
0x109a   :  { %v3343_v11 = vadd.f32 %v4013_v34, %v3335_v13  ;;  %v2829_v13 = vld [vmem:[%s5895_s23 + $0x8] sm:$0xff] }
0x109c   :  { %v3346_v42 = vrot.slane %v3343_v11, 7 }
0x109e   :  { %v3348_v49 = vsel %vm1808_vm9, 0.0, %v3346_v42  ;;  %v3349_v51 = vsel %vm1808_vm9, %v3346_v42, 0.0  ;;  %v2830_v42 = vld [vmem:[%s5895_s23 + $0x10] sm:$0xff] }
0x109f   :  { %v3352_v60 = vrot.slane %v3348_v49, 1  ;;  %4608 = vmatmul.mubr.msk.f32.vlgmr.msra.gmra.mrb[42].mxu1 %vm101_vm0, %v3348_v49  ;;  %v3353_v53 = vrot.slane %v3349_v51, 1  ;;  %v3499_v16 = vrot.slane %v3348_v49, 2  ;;  %v3500_v26 = vrot.slane %v3349_v51, 2 }
0x10a0   :  { %4865 = vmatpush3.bf16.msra.mxu1 %v4846_v38  ;;  %4629 = vmatprep.mubr.msk.f32.mxu1 %vm4933_vm1, %v4932_v8  ;;  %v4885_v52 = vpack.c.bf16 %v2831_v48, %v2830_v42  ;;  %v32_v49 = vstv %s5896_s24 }
0x10a1   :  { %v3354_v56 = vsel %vm1276_vm5, %v3352_v60, %v3353_v53  ;;  %4866 = vmatprep.subr.bf16.mxu1 %v4939_v50  ;;  %v3501_v57 = vsel %vm1424_vm7, %v3499_v16, %v3500_v26  ;;  %33 = vst [vmem:[#allocation2] sm:$0x1] %v32_v49 }
0x10a2   :  { %4597 = vmatmul.mubr.msk.f32.vlgmr.msra.gmra.mrb[34].mxu0 %vm101_vm0, %v3354_v56  ;;  %v4021_v56 = vld [vmem:[%s5897_s21] ss:$0 sm:$0xff] }
0x10a3   :  { %v4927_v14 = vpop.eup %4926  ;;  %4859 = vmatpush3.bf16.msra.mxu0 %v4858_v63  ;;  %4618 = vmatprep.mubr.msk.f32.mxu0 %vm4933_vm1, %v4932_v8 }
0x10a4   :  { %v3328_v15 = vmul.f32 %v4927_v14, %v3312_v28  ;;  %4860 = vmatprep.subr.bf16.mxu0 %v4939_v50  ;;  %4868 = vmatpush3.bf16.msra.mxu1 %v4849_v59 }
0x10a5   :  { %4875 = vmatprep.subr.bf16.mxu1 %v4939_v50 }
0x10a6   :  { %v3336_v32 = vmul.f32 %v4012_v39, %v3328_v15  ;;  %v4022_v15 = vld [vmem:[%s5898_s22] ss:$0 sm:$0xff] }
0x10a7   :  { %4862 = vmatpush3.bf16.msra.mxu0 %v4861_v41 }
0x10a8   :  { %v3344_v12 = vadd.f32 %v4013_v34, %v3336_v32  ;;  %4869 = vmatprep.subr.bf16.mxu0 %v4939_v50  ;;  %v2828_v34 = vld [vmem:[%s5895_s23] sm:$0xff] }
0x10a9   :  { %v4881_v11 = vpack.c.bf16 %v2829_v13, %v2828_v34 }
0x10aa   :  { %v3576_v58 = vrot.slane %v3344_v12, 7  ;;  %4619 = vmatmul.mubr.msk.f32.vlgmr.msra.gmra.mrb[36].mxu0 %vm101_vm0, %v3501_v57 }
0x10ab   :  { %4871 = vmatpush3.bf16.msra.mxu0 %v5761_v27  ;;  %4640 = vmatprep.mubr.msk.f32.mxu0 %vm4933_vm1, %v4932_v8 }
0x10ac   :  { %4872 = vmatprep.subr.bf16.mxu0 %v4939_v50  ;;  %v3578_v35 = vsel %vm1808_vm9, 0.0, %v3576_v58  ;;  %v3579_v0 = vsel %vm1808_vm9, %v3576_v58, 0.0 }
0x10ad   :  { %v3582_v1 = vrot.slane %v3578_v35, 1  ;;  %v3583_v2 = vrot.slane %v3579_v0, 1  ;;  %v3729_v3 = vrot.slane %v3578_v35, 2  ;;  %v3730_v4 = vrot.slane %v3579_v0, 2 }
0x10af   :  { %4874 = vmatpush3.bf16.msra.mxu0 %v5777_v6  ;;  %v3584_v7 = vsel %vm1276_vm5, %v3582_v1, %v3583_v2  ;;  %v3731_v9 = vsel %vm1424_vm7, %v3729_v3, %v3730_v4 }
0x10b0   :  { %4630 = vmatmul.mubr.msk.f32.vlgmr.msra.gmra.mrb[44].mxu1 %vm101_vm0, %v3584_v7  ;;  %4882 = vmatprep.subr.bf16.mxu0 %v4881_v11 }
0x10b1   :  { %4877 = vmatpush3.bf16.msra.mxu1 %v4858_v63  ;;  %4651 = vmatprep.mubr.msk.f32.mxu1 %vm4933_vm1, %v4932_v8  ;;  %v4020_v8 = vld [vmem:[%s5894_s20] ss:$0 sm:$0xff] }
0x10b2   :  { %4641 = vmatmul.mubr.msk.f32.vlgmr.msra.gmra.mrb[38].mxu0 %vm101_vm0, %v3578_v35  ;;  %4878 = vmatprep.subr.bf16.mxu1 %v4939_v50  ;;  %v4023_v35 = vld [vmem:[#allocation2] ss:$0 sm:$0xff] }
0x10b3   :  { %4884 = vmatpush3.bf16.msra.mxu0 %v4881_v11 }
0x10b4   :  { %4886 = vmatprep.subr.bf16.mxu0 %v4885_v52 }
0x10b5   :  { %4880 = vmatpush3.bf16.msra.mxu1 %v4861_v41 }
0x10b7   :  { %4888 = vmatpush3.bf16.msra.mxu0 %v4885_v52 }
0x10b8   :  { %4652 = vmatmul.mubr.msk.f32.vlgmr.msra.gmra.mrb[46].mxu1 %vm101_vm0, %v3731_v9 }
0x1172   :  { %v3495_v10 = vpop.f32.mrb[42].mxu1 }
0x1173   :  { %v4609_v17 = vpop.f32.mrb[43].mxu1 }
0x1175   :  { %v3423_v18 = vpop.f32.mrb[34].mxu0 }
0x1176   :  { %v3496_v20 = vadd.f32 %v3495_v10, %v3423_v18  ;;  %v4598_v22 = vpop.f32.mrb[35].mxu0 }
0x117d   :  { %v3570_v23 = vpop.f32.mrb[36].mxu0 }
0x117e   :  { %v3574_v21 = vadd.f32 %v3570_v23, %v3496_v20  ;;  %v4620_v28 = vpop.f32.mrb[37].mxu0 }
0x1180   :  { %v3811_v50 = vadd.f32 %v4020_v8, %v3574_v21 }
0x1182   :  { %v3813_v29 = vmax.f32 %v3811_v50, 0.0 }
0x1183   :  { %v3653_v30 = vpop.f32.mrb[44].mxu1 }
0x1184   :  { %v3815_v31 = vsel %vm101_vm0, %v3813_v29, 0.0  ;;  %v4631_v36 = vpop.f32.mrb[45].mxu1 }
0x1185   :  { %v3725_v27 = vpop.f32.mrb[38].mxu0  ;;  %3816 = vadd.xlane.f32.xlu1 %v3815_v31 }
0x1186   :  { %v3726_v37 = vadd.f32 %v3725_v27, %v3653_v30  ;;  %v4642_v24 = vpop.f32.mrb[39].mxu0 }
0x118b   :  { %v3800_v38 = vpop.f32.mrb[46].mxu1 }
0x118c   :  { %v3804_v40 = vadd.f32 %v3800_v38, %v3726_v37  ;;  %v4653_v43 = vpop.f32.mrb[47].mxu1 }
0x118e   :  { %v3812_v6 = vadd.f32 %v4020_v8, %v3804_v40 }
0x1190   :  { %v3814_v44 = vmax.f32 %v3812_v6, 0.0 }
0x1192   :  { %v3818_v19 = vsel %vm101_vm0, %v3814_v44, 0.0 }
0x1193   :  { %3819 = vadd.xlane.f32.xlu0 %v3818_v19 }
0x1212   :  { %v3817_v59 = vpop.xlane.xlu1 %3816 }
0x1213   :  { %v3821_v61 = vmul.f32 0.03125, %v3817_v59 }
0x1215   :  { %v3823_v62 = vsub.f32 %v3813_v29, %v3821_v61 }
0x1217   :  { %v3825_v5 = vmul.f32 %v3823_v62, %v3823_v62 }
0x1219   :  { %v3827_v45 = vsel %vm101_vm0, %v3825_v5, 0.0 }
0x121a   :  { %3828 = vadd.xlane.f32.xlu1 %v3827_v45 }
0x1220   :  { %v3820_v25 = vpop.xlane.xlu0 %3819 }
0x1221   :  { %v3822_v46 = vmul.f32 0.03125, %v3820_v25 }
0x1223   :  { %v3824_v39 = vsub.f32 %v3814_v44, %v3822_v46 }
0x1225   :  { %v3826_v47 = vmul.f32 %v3824_v39, %v3824_v39 }
0x1227   :  { %v3830_v33 = vsel %vm101_vm0, %v3826_v47, 0.0 }
0x1228   :  { %3831 = vadd.xlane.f32.xlu0 %v3830_v33 }
0x12a7   :  { %v3829_v51 = vpop.xlane.xlu1 %3828 }
0x12a8   :  { %v3833_v60 = vmul.f32 0.03125, %v3829_v51 }
0x12aa   :  { %v3835_v53 = vadd.f32 1e-05, %v3833_v60 }
0x12ac   :  { %4928 = vrsqrt.f32 %v3835_v53 }
0x12b5   :  { %v3832_v63 = vpop.xlane.xlu0 %3831 }
0x12b6   :  { %v4929_v54 = vpop.eup %4928  ;;  %v3834_v55 = vmul.f32 0.03125, %v3832_v63 }
0x12b7   :  { %v3839_v14 = vmul.f32 %v4929_v54, %v3823_v62 }
0x12b8   :  { %v3836_v41 = vadd.f32 1e-05, %v3834_v55 }
0x12b9   :  { %v3847_v16 = vmul.f32 %v4021_v56, %v3839_v14 }
0x12ba   :  { %4930 = vrsqrt.f32 %v3836_v41 }
0x12bb   :  { %v3855_v26 = vadd.f32 %v4022_v15, %v3847_v16 }
0x12bd   :  { %4662 = vmatprep.mubr.msk.f32.mxu0 %vm101_vm0, %v3855_v26 }
0x12c4   :  { %v4931_v32 = vpop.eup %4930 }
0x12c5   :  { %v3840_v12 = vmul.f32 %v4931_v32, %v3824_v39 }
0x12c7   :  { %v3848_v57 = vmul.f32 %v4021_v56, %v3840_v12 }
0x12c9   :  { %v3856_v58 = vadd.f32 %v4022_v15, %v3848_v57 }
0x12cb   :  { %4663 = vmatmul.mubr.msk.f32.vlgmr.msra.gmra.mrb[40].mxu0 %vm101_vm0, %v3856_v58 }
0x139e   :  { %v4664_v0 = vpop.f32.mrb[40].mxu0 }
0x139f   :  { %v3941_v1 = vadd.f32 %v4664_v0, %v4023_v35  ;;  %v3935_v2 = vpop.f32.mrb[41].mxu0 }
0x13a0   :  { %v3936_v7 = vadd.f32 %v4023_v35, %v3935_v2 }
0x13a1   :  { %v3945_v3 = vmax.f32 %v3941_v1, 0.0 }
0x13a2   :  { %v3944_v4 = vmax.f32 %v3936_v7, 0.0 }
0x13a3   :  { %3948 = vst.msk [vmem:[%s5899_s26 + $0x8] sm:$0xff] %vm3946_vm12, %v3945_v3 }
0x13a4   :  { %3947 = vst.msk [vmem:[%s5899_s26] sm:$0xff] %vm3946_vm12, %v3944_v4 }

// kernel: fastspeech2_forward.5
= control target key start
LH: loop header
LB: loop body
LE: loop exit
PB: predicated region body
PF: predicated region fallthrough
CT: control target
= control target key end

     0   :  { %s5194_s0 = inlined_call_operand.vmem [shape: f32[2,16,32], index: 0, kind: input, shape index: {}]   ;;  %s5195_s1 = inlined_call_operand.vmem [shape: f32[2,1,16], index: 1, kind: input, shape index: {}]   ;;  %s5196_s2 = inlined_call_operand.vmem [shape: f32[2,16,1], index: 2, kind: input, shape index: {}]   ;;  %s5197_s3 = inlined_call_operand.vmem [shape: f32[32,96], index: 3, kind: input, shape index: {}]   ;;  %s5198_s4 = inlined_call_operand.vmem [shape: f32[1,96], index: 4, kind: input, shape index: {}]   ;;  %s5199_s5 = inlined_call_operand.vmem [shape: f32[32,32], index: 5, kind: input, shape index: {}]   ;;  %s5200_s6 = inlined_call_operand.vmem [shape: f32[1,32], index: 6, kind: input, shape index: {}]   ;;  %s5201_s7 = inlined_call_operand.vmem [shape: f32[1,32], index: 7, kind: input, shape index: {}]   ;;  %s5202_s8 = inlined_call_operand.vmem [shape: f32[1,32], index: 8, kind: input, shape index: {}]   ;;  %s5203_s9 = inlined_call_operand.vmem [shape: f32[9,32,64], index: 9, kind: input, shape index: {}]   ;;  %s5204_s10 = inlined_call_operand.vmem [shape: f32[1,64], index: 10, kind: input, shape index: {}]   ;;  %s5205_s11 = inlined_call_operand.vmem [shape: f32[1,64,32], index: 11, kind: input, shape index: {}]   ;;  %s5206_s12 = inlined_call_operand.vmem [shape: f32[1,32], index: 12, kind: input, shape index: {}]   ;;  %s5207_s13 = inlined_call_operand.vmem [shape: f32[1,32], index: 13, kind: input, shape index: {}]   ;;  %s5208_s14 = inlined_call_operand.vmem [shape: f32[1,32], index: 14, kind: input, shape index: {}]   ;;  %s5209_s15 = inlined_call_operand.vmem [shape: f32[32,16], index: 15, kind: input, shape index: {}]   ;;  %s5210_s16 = inlined_call_operand.vmem [shape: f32[1,16], index: 16, kind: input, shape index: {}]   ;;  %s5211_s17 = inlined_call_operand.hbm [shape: f32[2,16,32], index: 17, kind: output, shape index: {0}]   ;;  %s5212_s18 = inlined_call_operand.hbm [shape: f32[2,16,16], index: 18, kind: output, shape index: {1}]  }
   0x1   :  { %5216 = sst [smem:[#allocation8_spill]] %s5194_s0 }
   0x2   :  { %5217 = sst [smem:[#allocation9_spill]] %s5195_s1 }
   0x3   :  { %5218 = sst [smem:[#allocation10_spill]] %s5196_s2 }
   0x4   :  { %24 = vsyncpa [#allocation3], 0  ;;  %v70_v0 = vld [vmem:[%s5197_s3] sm:$0xff]  ;;  %v71_v1 = vld [vmem:[%s5197_s3 + $0x8] sm:$0xff]  ;;  %vm81_vm0 = vcmask 261120   ;;  %s5219_s2 = sld [smem:[#allocation8_spill]] }
   0x5   :  { %v72_v2 = vld [vmem:[%s5197_s3 + $0x10] sm:$0xff]  ;;  %v3996_v3 = vpack.c.bf16 %v71_v1, %v70_v0  ;;  %v73_v4 = vld [vmem:[%s5197_s3 + $0x18] sm:$0xff] }
   0x6   :  { %v4000_v6 = vpack.c.bf16 %v73_v4, %v72_v2 }
   0xa   :  { %v4532_v5 = vld [vmem:[%s5219_s2] sm:$0xff] }
   0xb   :  { %3672 = vmatprep.mubr.msk.f32.mxu0 %vm81_vm0, %v4532_v5 }
   0xc   :  { %25 = vsyncpa [#allocation5], 0  ;;  %3997 = vmatprep.subr.bf16.mxu0 %v3996_v3  ;;  %v4539_v7 = vld [vmem:[%s5219_s2 + $0x8] sm:$0xff]  ;;  %v4546_v8 = vld [vmem:[%s5219_s2 + $0x10] sm:$0xff]  ;;  %vm191_vm1 = vcmask 130048   ;;  %s4412_s30 = smov 112   ;;  %v278_v29 = vlaneseq }
   0xd   :  { %3999 = vmatpush3.bf16.msra.mxu0 %v3996_v3  ;;  %v4551_v9 = vld [vmem:[%s5219_s2 + $0x18] sm:$0xff]  ;;  %v4560_v10 = vld [vmem:[%s5198_s4] ss:$0 sm:$0xff]  ;;  %s4413_s0 = smov 96   ;;  %s4414_s4 = smov 80   ;;  %vm4576_vm2 = vmpackc.low %vm191_vm1, %vm191_vm1  ;;  %vm1489_vm3 = vcmask 1043456  }
   0xe   :  { %4001 = vmatprep.subr.bf16.mxu0 %v4000_v6  ;;  %s5222_s20 = sld [smem:[#allocation9_spill]]  ;;  %v4593_v32 = vshrl.u32 %v278_v29, 7  ;;  %s4415_s21 = smov 64   ;;  %v179_v20 = vld [vmem:[%s5199_s5] sm:$0xff]  ;;  %vm1499_vm4 = vcmask 1046528   ;;  %vm1663_vm5 = vcmask 1045504  }
   0xf   :  { %s4416_s22 = smov 48   ;;  %s5223_s19 = sld [smem:[#allocation10_spill]]  ;;  %vm1750_vm6 = vcmask 1044480   ;;  %vm1923_vm7 = vcmask 1042432   ;;  %vm2010_vm8 = vcmask 1041408   ;;  %vm2097_vm9 = vcmask 1040384  }
  0x10   :  { %v280_v34 = vsub.s32 0, %v4593_v32  ;;  %vm3061_vm10 = vcmask 523264  }
  0x11   :  { %4003 = vmatpush3.bf16.msra.mxu0 %v4000_v6 }
  0x14   :  { %3673 = vmatmul.mubr.msk.f32.vlgmr.msra.gmra.mrb[0].mxu0 %vm81_vm0, %v4539_v7  ;;  %v64_v30 = vld [vmem:[%s5222_s20] sm:$0x1] }
  0x15   :  { %3675 = vmatprep.mubr.msk.f32.mxu0 %vm81_vm0, %v4546_v8  ;;  %v3394_v31 = vadd.f32 -1.0, %v64_v30 }
  0x17   :  { %v184_v33 = vmul.f32 1e+09, %v3394_v31 }
  0x18   :  { %3676 = vmatmul.mubr.msk.f32.gmra.mrb[2].mxu0 %vm81_vm0, %v4551_v9 }
  0x19   :  { %v281_v35 = vrot.slane %v184_v33, %v280_v34 }
  0xe7   :  { %v3674_v11 = vpop.f32.mrb[0].mxu0 }
  0xe8   :  { %v166_v12 = vadd.f32 %v3674_v11, %v4560_v10  ;;  %v160_v13 = vpop.f32.mrb[1].mxu0 }
  0xe9   :  { %v161_v14 = vadd.f32 %v4560_v10, %v160_v13 }
  0xeb   :  { %394 = vrot.lane.b32.xlu1 %v161_v14, %s4412_s30  ;;  %3682 = vmatprep.mubr.msk.f32.mxu1 %vm191_vm1, %v161_v14  ;;  %v4566_v15 = vpack.i.bf16 %v166_v12, %v161_v14  ;;  %v3677_v27 = vpop.f32.mrb[2].mxu0 }
  0xec   :  { %v170_v28 = vpop.f32.mrb[3].mxu0  ;;  %v176_v13 = vadd.f32 %v3677_v27, %v4560_v10 }
  0xed   :  { %4275 = vrot.lane.b32.xlu0 %v4566_v15, %s4413_s0  ;;  %v171_v14 = vadd.f32 %v4560_v10, %v170_v28 }
  0xef   :  { %396 = vrot.lane.b32.xlu1 %v166_v12, %s4412_s30 }
  0xf1   :  { %4280 = vrot.lane.b32.xlu0 %v4566_v15, %s4414_s4 }
 0x15d   :  { %v395_v16 = vpop.permute.xlu1 %394 }
 0x15e   :  { %3696 = vmatprep.mubr.msk.f32.mxu0 %vm191_vm1, %v395_v16  ;;  %v4609_v16 = vpack.i.bf16 %v176_v13, %v171_v14 }
 0x15f   :  { %v4276_v17 = vpop.permute.xlu0 %4275 }
 0x160   :  { %v4278_v18 = vunpack.i.h.bf16 %v4276_v17  ;;  %v4277_v19 = vunpack.i.l.bf16 %v4276_v17 }
 0x161   :  { %v397_v26 = vpop.permute.xlu1 %396 }
 0x162   :  { %v4004_v21 = vpack.c.bf16 %v4278_v18, %v4277_v19 }
 0x163   :  { %v4281_v22 = vpop.permute.xlu0 %4280 }
 0x164   :  { %v4283_v23 = vunpack.i.h.bf16 %v4281_v22  ;;  %v4282_v24 = vunpack.i.l.bf16 %v4281_v22  ;;  %4006 = vmatprep.subr.msk.bf16.mxu1 %vm4576_vm2, %v4004_v21 }
 0x165   :  { %4009 = vmatpush3.bf16.xpose.msk.msra.mxu1 %vm4576_vm2, %v4004_v21 }
 0x166   :  { %v4014_v25 = vpack.c.bf16 %v4283_v23, %v4282_v24 }
 0x168   :  { %4016 = vmatprep.subr.msk.bf16.mxu0 %vm4576_vm2, %v4014_v25 }
 0x169   :  { %4019 = vmatpush3.bf16.xpose.msk.msra.mxu0 %vm4576_vm2, %v4014_v25 }
 0x16c   :  { %3683 = vmatmul.mubr.msk.f32.vlgmr.msra.gmra.mrb[0].mxu1 %vm191_vm1, %v166_v12 }
 0x170   :  { %3697 = vmatmul.mubr.msk.f32.vlgmr.msra.gmra.mrb[4].mxu0 %vm191_vm1, %v397_v26 }
 0x23f   :  { %v3684_v36 = vpop.f32.mrb[0].mxu1 }
 0x240   :  { %v276_v37 = vmul.f32 0.25, %v3684_v36  ;;  %v266_v38 = vpop.f32.mrb[1].mxu1 }
 0x241   :  { %v275_v39 = vmul.f32 0.25, %v266_v38 }
 0x242   :  { %v284_v40 = vadd.f32 %v281_v35, %v276_v37 }
 0x243   :  { %v3698_v41 = vpop.f32.mrb[4].mxu0  ;;  %v283_v42 = vadd.f32 %v281_v35, %v275_v39 }
 0x244   :  { %v476_v43 = vpop.f32.mrb[5].mxu0  ;;  %v288_v44 = vsel %vm191_vm1, %v284_v40, -inf  ;;  %v486_v45 = vmul.f32 0.25, %v3698_v41 }
 0x245   :  { %v485_v46 = vmul.f32 0.25, %v476_v43  ;;  %289 = vmax.xlane.f32.xlu1 %v288_v44  ;;  %v285_v47 = vsel %vm191_vm1, %v283_v42, -inf }
 0x246   :  { %286 = vmax.xlane.f32.xlu0 %v285_v47  ;;  %v488_v50 = vadd.f32 %v486_v45, %v281_v35 }
 0x247   :  { %v487_v48 = vadd.f32 %v485_v46, %v281_v35 }
 0x248   :  { %v492_v51 = vsel %vm191_vm1, %v488_v50, -inf }
 0x249   :  { %v489_v49 = vsel %vm191_vm1, %v487_v48, -inf }
 0x24a   :  { %490 = vmax.xlane.f32.xlu0 %v489_v49  ;;  %v182_v49 = vld [vmem:[%s5199_s5 + $0x18] sm:$0xff] }
 0x24e   :  { %493 = vmax.xlane.f32.xlu0 %v492_v51  ;;  %v180_v51 = vld [vmem:[%s5199_s5 + $0x8] sm:$0xff] }
 0x256   :  { %4285 = vrot.lane.b32.xlu1 %v4566_v15, %s4415_s21 }
 0x2d2   :  { %v290_v52 = vpop.xlane.xlu1 %289 }
 0x2d3   :  { %v292_v53 = vsub.f32 %v284_v40, %v290_v52  ;;  %v287_v54 = vpop.xlane.xlu0 %286  ;;  %v4652_v52 = vpack.c.bf16 %v180_v51, %v179_v20 }
 0x2d4   :  { %v291_v55 = vsub.f32 %v283_v42, %v287_v54 }
 0x2d5   :  { %v295_v56 = vmul.f32 1.442695, %v292_v53 }
 0x2d6   :  { %v293_v57 = vmul.f32 1.442695, %v291_v55  ;;  %v4286_v58 = vpop.permute.xlu1 %4285  ;;  %v65_v55 = vld [vmem:[%s5222_s20 + $0x1] sm:$0x1] }
 0x2d7   :  { %4316 = vpow2.f32 %v295_v56  ;;  %v4288_v59 = vunpack.i.h.bf16 %v4286_v58  ;;  %v4287_v60 = vunpack.i.l.bf16 %v4286_v58  ;;  %v491_v61 = vpop.xlane.xlu0 %490  ;;  %v3411_v56 = vadd.f32 -1.0, %v65_v55 }
 0x2d8   :  { %4318 = vpow2.f32 %v293_v57  ;;  %v495_v17 = vsub.f32 %v487_v48, %v491_v61  ;;  %v181_v48 = vld [vmem:[%s5199_s5 + $0x10] sm:$0xff] }
 0x2d9   :  { %v4010_v62 = vpack.c.bf16 %v4288_v59, %v4287_v60  ;;  %v761_v59 = vmul.f32 1e+09, %v3411_v56 }
 0x2da   :  { %v497_v18 = vmul.f32 1.442695, %v495_v17 }
 0x2db   :  { %4011 = vmatprep.subr.bf16.mxu1 %v4010_v62  ;;  %v494_v63 = vpop.xlane.xlu0 %493  ;;  %v857_v60 = vrot.slane %v761_v59, %v280_v34 }
 0x2dc   :  { %v496_v0 = vsub.f32 %v488_v50, %v494_v63  ;;  %4013 = vmatpush3.bf16.msra.mxu1 %v4010_v62  ;;  %v4642_v50 = vpack.c.bf16 %v182_v49, %v181_v48 }
 0x2de   :  { %v499_v1 = vmul.f32 1.442695, %v496_v0  ;;  %4025 = vmatprep.subr.bf16.mxu0 %v4642_v50 }
 0x2df   :  { %4027 = vmatpush3.bf16.msra.mxu0 %v4642_v50 }
 0x2e0   :  { %4320 = vpow2.f32 %v499_v1  ;;  %4029 = vmatprep.subr.bf16.mxu0 %v4652_v52 }
 0x2e1   :  { %v4317_v2 = vpop.eup %4316  ;;  %4322 = vpow2.f32 %v497_v18 }
 0x2e2   :  { %v4319_v3 = vpop.eup %4318  ;;  %v300_v4 = vsel %vm191_vm1, %v4317_v2, 0.0 }
 0x2e3   :  { %301 = vadd.xlane.f32.xlu0 %v300_v4  ;;  %v297_v6 = vsel %vm191_vm1, %v4319_v3, 0.0 }
 0x2e4   :  { %298 = vadd.xlane.f32.xlu1 %v297_v6 }
 0x2ea   :  { %v4321_v11 = vpop.eup %4320 }
 0x2eb   :  { %v504_v12 = vsel %vm191_vm1, %v4321_v11, 0.0  ;;  %v4323_v19 = vpop.eup %4322 }
 0x2ec   :  { %505 = vadd.xlane.f32.xlu0 %v504_v12  ;;  %v501_v21 = vsel %vm191_vm1, %v4323_v19, 0.0 }
 0x2f5   :  { %4295 = vrot.lane.b32.xlu1 %v4609_v16, %s4413_s0 }
 0x302   :  { %4290 = vrot.lane.b32.xlu0 %v4566_v15, %s4416_s22 }
 0x306   :  { %970 = vrot.lane.b32.xlu0 %v171_v14, %s4412_s30 }
 0x319   :  { %502 = vadd.xlane.f32.xlu1 %v501_v21 }
 0x32a   :  { %4300 = vrot.lane.b32.xlu1 %v4609_v16, %s4414_s4 }
 0x32e   :  { %972 = vrot.lane.b32.xlu1 %v176_v13, %s4412_s30 }
 0x370   :  { %v302_v10 = vpop.xlane.xlu0 %301 }
 0x371   :  { %4324 = vrcp.f32 %v302_v10  ;;  %v299_v22 = vpop.xlane.xlu1 %298 }
 0x372   :  { %4326 = vrcp.f32 %v299_v22 }
 0x375   :  { %v4296_v15 = vpop.permute.xlu1 %4295 }
 0x376   :  { %v4298_v26 = vunpack.i.h.bf16 %v4296_v15  ;;  %v4297_v30 = vunpack.i.l.bf16 %v4296_v15 }
 0x378   :  { %v4032_v36 = vpack.c.bf16 %v4298_v26, %v4297_v30 }
 0x379   :  { %v506_v23 = vpop.xlane.xlu0 %505 }
 0x37a   :  { %4328 = vrcp.f32 %v506_v23 }
 0x37b   :  { %v4325_v24 = vpop.eup %4324 }
 0x37c   :  { %v4327_v25 = vpop.eup %4326  ;;  %v306_v29 = vmul.f32 %v4325_v24, %v4317_v2 }
 0x37d   :  { %v4291_v27 = vpop.permute.xlu0 %4290  ;;  %v305_v28 = vmul.f32 %v4327_v25, %v4319_v3 }
 0x37e   :  { %v4293_v31 = vunpack.i.h.bf16 %v4291_v27  ;;  %v4292_v33 = vunpack.i.l.bf16 %v4291_v27 }
 0x37f   :  { %3689 = vmatprep.mubr.msk.f32.mxu1 %vm191_vm1, %v305_v28 }
 0x380   :  { %v4020_v35 = vpack.c.bf16 %v4293_v31, %v4292_v33  ;;  %3690 = vmatmul.mubr.msk.f32.vlgmr.msra.gmra.mrb[2].mxu1 %vm191_vm1, %v306_v29 }
 0x381   :  { %v971_v46 = vpop.permute.xlu0 %970 }
 0x382   :  { %4021 = vmatprep.subr.bf16.mxu1 %v4020_v35 }
 0x383   :  { %4023 = vmatpush3.bf16.msra.mxu1 %v4020_v35 }
 0x384   :  { %4034 = vmatprep.subr.msk.bf16.mxu1 %vm4576_vm2, %v4032_v36  ;;  %v4329_v39 = vpop.eup %4328 }
 0x385   :  { %v510_v44 = vmul.f32 %v4329_v39, %v4321_v11 }
 0x3a6   :  { %v503_v37 = vpop.xlane.xlu1 %502 }
 0x3a7   :  { %4330 = vrcp.f32 %v503_v37 }
 0x3aa   :  { %v4301_v38 = vpop.permute.xlu1 %4300 }
 0x3ab   :  { %v4303_v41 = vunpack.i.h.bf16 %v4301_v38  ;;  %v4302_v42 = vunpack.i.l.bf16 %v4301_v38 }
 0x3ad   :  { %v4042_v45 = vpack.c.bf16 %v4303_v41, %v4302_v42 }
 0x3ae   :  { %v973_v47 = vpop.permute.xlu1 %972 }
 0x3b1   :  { %v4331_v40 = vpop.eup %4330 }
 0x3b2   :  { %v509_v43 = vmul.f32 %v4331_v40, %v4323_v19  ;;  %v4680_v40 = vld [vmem:[%s5200_s6] ss:$0 sm:$0xff] }
 0x3b4   :  { %3703 = vmatprep.mubr.msk.f32.mxu1 %vm191_vm1, %v509_v43 }
 0x3b5   :  { %3704 = vmatmul.mubr.msk.f32.vlgmr.msra.gmra.mrb[4].mxu1 %vm191_vm1, %v510_v44 }
 0x3b6   :  { %4037 = vmatpush3.bf16.xpose.msk.msra.mxu1 %vm4576_vm2, %v4032_v36  ;;  %3724 = vmatprep.mubr.msk.f32.mxu1 %vm191_vm1, %v171_v14 }
 0x3b7   :  { %4044 = vmatprep.subr.msk.bf16.mxu1 %vm4576_vm2, %v4042_v45 }
 0x3bd   :  { %3725 = vmatmul.mubr.msk.f32.vlgmr.msra.gmra.mrb[6].mxu1 %vm191_vm1, %v176_v13 }
 0x3be   :  { %4047 = vmatpush3.bf16.xpose.msk.msra.mxu1 %vm4576_vm2, %v4042_v45  ;;  %3738 = vmatprep.mubr.msk.f32.mxu1 %vm191_vm1, %v971_v46 }
 0x3c5   :  { %3739 = vmatmul.mubr.msk.f32.vlgmr.msra.gmra.mrb[8].mxu1 %vm191_vm1, %v973_v47 }
 0x453   :  { %v3691_v53 = vpop.f32.mrb[2].mxu1 }
 0x454   :  { %v385_v54 = vpop.f32.mrb[3].mxu1 }
 0x488   :  { %v3705_v57 = vpop.f32.mrb[4].mxu1 }
 0x489   :  { %v589_v58 = vpop.f32.mrb[5].mxu1 }
 0x48a   :  { %3710 = vmatprep.mubr.msk.f32.mxu0 %vm191_vm1, %v589_v58 }
 0x48b   :  { %3711 = vmatmul.mubr.msk.f32.vlgmr.msra.gmra.mrb[6].mxu0 %vm191_vm1, %v3705_v57 }
 0x48c   :  { %3717 = vmatprep.mubr.msk.f32.mxu0 %vm191_vm1, %v385_v54  ;;  %4031 = vmatpush3.bf16.msra.mxu0 %v4652_v52 }
 0x490   :  { %v3726_v61 = vpop.f32.mrb[6].mxu1 }
 0x491   :  { %v852_v62 = vmul.f32 0.25, %v3726_v61  ;;  %v842_v63 = vpop.f32.mrb[7].mxu1 }
 0x492   :  { %v851_v0 = vmul.f32 0.25, %v842_v63 }
 0x493   :  { %3718 = vmatmul.mubr.msk.f32.vlgmr.msra.gmra.mrb[6].mxu0 %vm191_vm1, %v3691_v53  ;;  %v860_v1 = vadd.f32 %v857_v60, %v852_v62 }
 0x494   :  { %v859_v2 = vadd.f32 %v857_v60, %v851_v0 }
 0x495   :  { %v864_v3 = vsel %vm191_vm1, %v860_v1, -inf }
 0x496   :  { %865 = vmax.xlane.f32.xlu1 %v864_v3  ;;  %v861_v4 = vsel %vm191_vm1, %v859_v2, -inf }
 0x497   :  { %862 = vmax.xlane.f32.xlu0 %v861_v4 }
 0x498   :  { %v3740_v6 = vpop.f32.mrb[8].mxu1 }
 0x499   :  { %v1052_v11 = vpop.f32.mrb[9].mxu1  ;;  %v1062_v12 = vmul.f32 0.25, %v3740_v6 }
 0x49a   :  { %v1061_v13 = vmul.f32 0.25, %v1052_v11  ;;  %v4417_v11 = vmov 0  }
 0x49b   :  { %v1064_v14 = vadd.f32 %v1062_v12, %v857_v60  ;;  %4314 = vset.pattern.permute.xlu1 %v4417_v11  ;;  %4315 = vset.pattern.permute.xlu0 %v4417_v11 }
 0x49c   :  { %v1063_v32 = vadd.f32 %v1061_v13, %v857_v60 }
 0x49d   :  { %v1068_v17 = vsel %vm191_vm1, %v1064_v14, -inf }
 0x49e   :  { %v1065_v34 = vsel %vm191_vm1, %v1063_v32, -inf }
 0x49f   :  { %1066 = vmax.xlane.f32.xlu0 %v1065_v34 }
 0x4a3   :  { %1069 = vmax.xlane.f32.xlu0 %v1068_v17 }
 0x523   :  { %v866_v18 = vpop.xlane.xlu1 %865 }
 0x524   :  { %v868_v19 = vsub.f32 %v860_v1, %v866_v18  ;;  %v863_v21 = vpop.xlane.xlu0 %862 }
 0x525   :  { %v867_v10 = vsub.f32 %v859_v2, %v863_v21 }
 0x526   :  { %v871_v22 = vmul.f32 1.442695, %v868_v19 }
 0x527   :  { %v869_v23 = vmul.f32 1.442695, %v867_v10 }
 0x528   :  { %4332 = vpow2.f32 %v871_v22 }
 0x529   :  { %4334 = vpow2.f32 %v869_v23 }
 0x52c   :  { %v1067_v15 = vpop.xlane.xlu0 %1066 }
 0x52d   :  { %v1071_v24 = vsub.f32 %v1063_v32, %v1067_v15 }
 0x52f   :  { %v1073_v25 = vmul.f32 1.442695, %v1071_v24 }
 0x530   :  { %v1070_v26 = vpop.xlane.xlu0 %1069 }
 0x531   :  { %4336 = vpow2.f32 %v1073_v25  ;;  %v1072_v27 = vsub.f32 %v1064_v14, %v1070_v26 }
 0x532   :  { %v4333_v28 = vpop.eup %4332 }
 0x533   :  { %v4335_v29 = vpop.eup %4334  ;;  %v1075_v30 = vmul.f32 1.442695, %v1072_v27  ;;  %v876_v31 = vsel %vm191_vm1, %v4333_v28, 0.0 }
 0x534   :  { %877 = vadd.xlane.f32.xlu0 %v876_v31  ;;  %v873_v33 = vsel %vm191_vm1, %v4335_v29, 0.0 }
 0x535   :  { %4338 = vpow2.f32 %v1075_v30  ;;  %874 = vadd.xlane.f32.xlu1 %v873_v33 }
 0x53b   :  { %v4337_v35 = vpop.eup %4336 }
 0x53c   :  { %v1077_v36 = vsel %vm191_vm1, %v4337_v35, 0.0 }
 0x53d   :  { %1078 = vadd.xlane.f32.xlu1 %v1077_v36 }
 0x53f   :  { %v4339_v37 = vpop.eup %4338 }
 0x540   :  { %v1080_v38 = vsel %vm191_vm1, %v4339_v37, 0.0 }
 0x541   :  { %1081 = vadd.xlane.f32.xlu0 %v1080_v38 }
 0x54e   :  { %4305 = vrot.lane.b32.xlu1 %v4609_v16, %s4415_s21 }
 0x557   :  { %4310 = vrot.lane.b32.xlu0 %v4609_v16, %s4416_s22 }
 0x566   :  { %v3719_v39 = vpop.f32.mrb[6].mxu0 }
 0x567   :  { %v751_v41 = vpop.f32.mrb[7].mxu0  ;;  %v1344_v43 = vadd.f32 %v3719_v39, %v4680_v40  ;;  %v69_v39 = vld [vmem:[%s5223_s19 + $0x18] sm:$0xff] }
 0x568   :  { %v1343_v42 = vadd.f32 %v4680_v40, %v751_v41  ;;  %v1454_v41 = vld [vmem:[%s5203_s9 + $0x20] sm:$0xff] }
 0x569   :  { %v1348_v46 = vadd.f32 %v1344_v43, %v4539_v7 }
 0x56a   :  { %v1347_v44 = vadd.f32 %v1343_v42, %v4532_v5  ;;  %v1455_v42 = vld [vmem:[%s5203_s9 + $0x28] sm:$0xff] }
 0x56b   :  { %v1356_v16 = vsel %vm81_vm0, %v1348_v46, 0.0  ;;  %v4060_v43 = vpack.c.bf16 %v1455_v42, %v1454_v41 }
 0x56c   :  { %v1353_v45 = vsel %vm81_vm0, %v1347_v44, 0.0 }
 0x56d   :  { %4061 = vmatprep.subr.bf16.mxu1 %v4060_v43 }
 0x56e   :  { %4063 = vmatpush3.bf16.msra.mxu1 %v4060_v43 }
 0x572   :  { %1354 = vadd.xlane.f32.xlu1 %v1353_v45  ;;  %v1457_v45 = vld [vmem:[%s5203_s9 + $0x38] sm:$0xff] }
 0x576   :  { %1357 = vadd.xlane.f32.xlu0 %v1356_v16  ;;  %v1450_v16 = vld [vmem:[%s5203_s9] sm:$0xff] }
 0x5c1   :  { %v878_v48 = vpop.xlane.xlu0 %877 }
 0x5c2   :  { %v875_v47 = vpop.xlane.xlu1 %874 }
 0x5c3   :  { %4340 = vrcp.f32 %v875_v47  ;;  %v1451_v47 = vld [vmem:[%s5203_s9 + $0x8] sm:$0xff] }
 0x5c4   :  { %4342 = vrcp.f32 %v878_v48  ;;  %v4752_v48 = vpack.c.bf16 %v1451_v47, %v1450_v16  ;;  %v1462_v16 = vld [vmem:[%s5203_s9 + $0x60] sm:$0xff]  ;;  %v1463_v47 = vld [vmem:[%s5203_s9 + $0x68] sm:$0xff] }
 0x5ca   :  { %v1079_v49 = vpop.xlane.xlu1 %1078 }
 0x5cb   :  { %4344 = vrcp.f32 %v1079_v49 }
 0x5cd   :  { %v4341_v20 = vpop.eup %4340 }
 0x5ce   :  { %v4306_v51 = vpop.permute.xlu1 %4305  ;;  %v1082_v53 = vpop.xlane.xlu0 %1081  ;;  %v881_v54 = vmul.f32 %v4341_v20, %v4335_v29 }
 0x5cf   :  { %v4308_v55 = vunpack.i.h.bf16 %v4306_v51  ;;  %v4307_v5 = vunpack.i.l.bf16 %v4306_v51  ;;  %4346 = vrcp.f32 %v1082_v53  ;;  %v4343_v56 = vpop.eup %4342 }
 0x5d0   :  { %3731 = vmatprep.mubr.msk.f32.mxu0 %vm191_vm1, %v881_v54  ;;  %v882_v61 = vmul.f32 %v4343_v56, %v4333_v28  ;;  %v3429_v56 = vld [vmem:[%s5201_s7] ss:$0 sm:$0xff] }
 0x5d1   :  { %v4038_v7 = vpack.c.bf16 %v4308_v55, %v4307_v5 }
 0x5d2   :  { %v4311_v57 = vpop.permute.xlu0 %4310 }
 0x5d3   :  { %v4313_v58 = vunpack.i.h.bf16 %v4311_v57  ;;  %v4312_v59 = vunpack.i.l.bf16 %v4311_v57  ;;  %4039 = vmatprep.subr.bf16.mxu0 %v4038_v7 }
 0x5d4   :  { %4041 = vmatpush3.bf16.msra.mxu0 %v4038_v7 }
 0x5d5   :  { %v4345_v60 = vpop.eup %4344  ;;  %v4048_v62 = vpack.c.bf16 %v4313_v58, %v4312_v59 }
 0x5d6   :  { %v1085_v63 = vmul.f32 %v4345_v60, %v4337_v35  ;;  %v3430_v60 = vld [vmem:[%s5202_s8] ss:$0 sm:$0xff] }
 0x5d7   :  { %3732 = vmatmul.mubr.msk.f32.vlgmr.msra.gmra.mrb[8].mxu0 %vm191_vm1, %v882_v61  ;;  %4049 = vmatprep.subr.bf16.mxu0 %v4048_v62 }
 0x5d8   :  { %4051 = vmatpush3.bf16.msra.mxu0 %v4048_v62  ;;  %3745 = vmatprep.mubr.msk.f32.mxu0 %vm191_vm1, %v1085_v63 }
 0x5d9   :  { %v4347_v0 = vpop.eup %4346  ;;  %4053 = vmatprep.subr.bf16.mxu0 %v4642_v50 }
 0x5da   :  { %v1086_v1 = vmul.f32 %v4347_v0, %v4339_v37 }
 0x5dc   :  { %3746 = vmatmul.mubr.msk.f32.vlgmr.msra.gmra.mrb[10].mxu0 %vm191_vm1, %v1086_v1 }
 0x5dd   :  { %4055 = vmatpush3.bf16.msra.mxu0 %v4642_v50 }
 0x5de   :  { %4057 = vmatprep.subr.bf16.mxu0 %v4652_v52 }
 0x5ff   :  { %v1355_v12 = vpop.xlane.xlu1 %1354 }
 0x600   :  { %v1366_v32 = vmul.f32 0.03125, %v1355_v12 }
 0x602   :  { %v1370_v19 = vsub.f32 %v1347_v44, %v1366_v32  ;;  %v1456_v44 = vld [vmem:[%s5203_s9 + $0x30] sm:$0xff] }
 0x603   :  { %v1358_v50 = vpop.xlane.xlu0 %1357 }
 0x604   :  { %v1367_v13 = vmul.f32 0.03125, %v1358_v50  ;;  %v1374_v24 = vmul.f32 %v1370_v19, %v1370_v19 }
 0x606   :  { %v4700_v14 = vsub.f32 %v1348_v46, %v1367_v13  ;;  %v1378_v26 = vsel %vm81_vm0, %v1374_v24, 0.0  ;;  %v4064_v46 = vpack.c.bf16 %v1457_v45, %v1456_v44 }
 0x608   :  { %v1375_v23 = vmul.f32 %v4700_v14, %v4700_v14  ;;  %4065 = vmatprep.subr.bf16.mxu1 %v4064_v46 }
 0x609   :  { %4067 = vmatpush3.bf16.msra.mxu1 %v4064_v46 }
 0x60a   :  { %v1381_v25 = vsel %vm81_vm0, %v1375_v23, 0.0  ;;  %4069 = vmatprep.subr.bf16.mxu1 %v4752_v48 }
 0x6aa   :  { %v3733_v2 = vpop.f32.mrb[8].mxu0 }
 0x6ab   :  { %v961_v3 = vpop.f32.mrb[9].mxu0 }
 0x6af   :  { %v3747_v4 = vpop.f32.mrb[10].mxu0 }
 0x6b0   :  { %v1165_v6 = vpop.f32.mrb[11].mxu0 }
 0x6b1   :  { %3752 = vmatprep.mubr.msk.f32.mxu0 %vm191_vm1, %v1165_v6 }
 0x6b2   :  { %3753 = vmatmul.mubr.msk.f32.vlgmr.msra.gmra.mrb[12].mxu0 %vm191_vm1, %v3747_v4 }
 0x6b3   :  { %4059 = vmatpush3.bf16.msra.mxu0 %v4652_v52  ;;  %3759 = vmatprep.mubr.msk.f32.mxu0 %vm191_vm1, %v961_v3 }
 0x6b4   :  { %4133 = vmatprep.subr.bf16.mxu0 %v4060_v43 }
 0x6ba   :  { %3760 = vmatmul.mubr.msk.f32.vlgmr.msra.gmra.mrb[12].mxu0 %vm191_vm1, %v3733_v2 }
 0x6bb   :  { %4135 = vmatpush3.bf16.msra.mxu0 %v4060_v43 }
 0x6bc   :  { %4137 = vmatprep.subr.bf16.mxu0 %v4064_v46 }
 0x6bf   :  { %4139 = vmatpush3.bf16.msra.mxu0 %v4064_v46 }
 0x6c0   :  { %4141 = vmatprep.subr.bf16.mxu0 %v4752_v48 }
 0x78d   :  { %v3761_v34 = vpop.f32.mrb[12].mxu0 }
 0x78e   :  { %v1346_v17 = vadd.f32 %v3761_v34, %v4680_v40  ;;  %v1327_v18 = vpop.f32.mrb[13].mxu0 }
 0x78f   :  { %v1345_v52 = vadd.f32 %v4680_v40, %v1327_v18  ;;  %v67_v40 = vld [vmem:[%s5223_s19 + $0x8] sm:$0xff] }
 0x790   :  { %v1350_v21 = vadd.f32 %v1346_v17, %v4551_v9  ;;  %v68_v9 = vld [vmem:[%s5223_s19 + $0x10] sm:$0xff] }
 0x791   :  { %v1349_v10 = vadd.f32 %v1345_v52, %v4546_v8  ;;  %v66_v8 = vld [vmem:[%s5223_s19] sm:$0xff]  ;;  %v1452_v52 = vld [vmem:[%s5203_s9 + $0x10] sm:$0xff] }
 0x792   :  { %v1362_v22 = vsel %vm81_vm0, %v1350_v21, 0.0 }
 0x793   :  { %1363 = vadd.xlane.f32.xlu0 %v1362_v22  ;;  %v1359_v15 = vsel %vm81_vm0, %v1349_v10, 0.0 }
 0x794   :  { %1360 = vadd.xlane.f32.xlu1 %v1359_v15 }
 0x797   :  { %1382 = vadd.xlane.f32.xlu0 %v1381_v25 }
 0x798   :  { %1379 = vadd.xlane.f32.xlu1 %v1378_v26 }
 0x7a9   :  { %1428 = vperm.xlu1 %4314, %v66_v8  }
 0x7ad   :  { %1438 = vperm.xlu1 %4314, %v68_v9  }
 0x820   :  { %v1364_v27 = vpop.xlane.xlu0 %1363 }
 0x821   :  { %v1369_v28 = vmul.f32 0.03125, %v1364_v27  ;;  %v1361_v29 = vpop.xlane.xlu1 %1360 }
 0x822   :  { %v1368_v30 = vmul.f32 0.03125, %v1361_v29  ;;  %v1459_v29 = vld [vmem:[%s5203_s9 + $0x48] sm:$0xff] }
 0x823   :  { %v4718_v31 = vsub.f32 %v1350_v21, %v1369_v28  ;;  %v1453_v21 = vld [vmem:[%s5203_s9 + $0x18] sm:$0xff]  ;;  %v1458_v28 = vld [vmem:[%s5203_s9 + $0x40] sm:$0xff] }
 0x824   :  { %v4720_v33 = vsub.f32 %v1349_v10, %v1368_v30  ;;  %v1383_v53 = vpop.xlane.xlu0 %1382  ;;  %v4798_v9 = vpack.c.bf16 %v1453_v21, %v1452_v52  ;;  %v1469_v52 = vld [vmem:[%s5203_s9 + $0x98] sm:$0xff] }
 0x825   :  { %v1377_v35 = vmul.f32 %v4718_v31, %v4718_v31  ;;  %v1380_v49 = vpop.xlane.xlu1 %1379  ;;  %v1391_v54 = vmul.f32 0.03125, %v1383_v53 }
 0x826   :  { %v1376_v36 = vmul.f32 %v4720_v33, %v4720_v33  ;;  %v1390_v20 = vmul.f32 0.03125, %v1380_v49 }
 0x827   :  { %v1387_v37 = vsel %vm81_vm0, %v1377_v35, 0.0  ;;  %v1395_v55 = vadd.f32 1e-05, %v1391_v54  ;;  %v4813_v35 = vpack.c.bf16 %v1459_v29, %v1458_v28 }
 0x828   :  { %1388 = vadd.xlane.f32.xlu0 %v1387_v37  ;;  %v1384_v38 = vsel %vm81_vm0, %v1376_v36, 0.0  ;;  %v1394_v51 = vadd.f32 1e-05, %v1390_v20 }
 0x829   :  { %1385 = vadd.xlane.f32.xlu1 %v1384_v38  ;;  %v4759_v57 = vpop.permute.xlu1 %1428  ;;  %v1460_v38 = vld [vmem:[%s5203_s9 + $0x50] sm:$0xff] }
 0x82a   :  { %4348 = vrsqrt.f32 %v1394_v51 }
 0x82b   :  { %4350 = vrsqrt.f32 %v1395_v55 }
 0x82d   :  { %v4764_v61 = vpop.permute.xlu1 %1438 }
 0x834   :  { %v4349_v5 = vpop.eup %4348 }
 0x835   :  { %v1402_v7 = vmul.f32 %v4349_v5, %v1370_v19  ;;  %v4351_v59 = vpop.eup %4350 }
 0x836   :  { %v1403_v63 = vmul.f32 %v4351_v59, %v4700_v14  ;;  %v1465_v59 = vld [vmem:[%s5203_s9 + $0x78] sm:$0xff] }
 0x837   :  { %v1412_v58 = vmul.f32 %v3429_v56, %v1402_v7  ;;  %v4861_v7 = vpack.c.bf16 %v1463_v47, %v1462_v16 }
 0x838   :  { %v1413_v11 = vmul.f32 %v3429_v56, %v1403_v63 }
 0x839   :  { %v1422_v62 = vadd.f32 %v3430_v60, %v1412_v58  ;;  %v1464_v58 = vld [vmem:[%s5203_s9 + $0x70] sm:$0xff] }
 0x83a   :  { %1443 = vperm.xlu1 %4314, %v69_v39   ;;  %v1423_v13 = vadd.f32 %v3430_v60, %v1413_v11  ;;  %v1461_v39 = vld [vmem:[%s5203_s9 + $0x58] sm:$0xff] }
 0x83b   :  { %v4768_v4 = vmul.f32 %v4759_v57, %v1422_v62  ;;  %v4834_v45 = vpack.c.bf16 %v1461_v39, %v1460_v38 }
 0x83d   :  { %v1490_v12 = vrot.slane %v4768_v4, 4 }
 0x83e   :  { %1433 = vperm.xlu0 %4315, %v67_v40  }
 0x83f   :  { %v4777_v14 = vsel %vm1489_vm3, 0.0, %v1490_v12 }
 0x840   :  { %v1500_v10 = vrot.slane %v4777_v14, 1  ;;  %v1664_v44 = vrot.slane %v4777_v14, 2  ;;  %v1924_v38 = vrot.slane %v4777_v14, 5 }
 0x8b5   :  { %v1389_v0 = vpop.xlane.xlu0 %1388 }
 0x8b6   :  { %v1393_v1 = vmul.f32 0.03125, %v1389_v0  ;;  %v1386_v2 = vpop.xlane.xlu1 %1385  ;;  %v1751_v0 = vrot.slane %v4777_v14, 3 }
 0x8b7   :  { %v1392_v3 = vmul.f32 0.03125, %v1386_v2 }
 0x8b8   :  { %v1397_v6 = vadd.f32 1e-05, %v1393_v1  ;;  %v4878_v1 = vpack.c.bf16 %v1465_v59, %v1464_v58  ;;  %v2011_v59 = vrot.slane %v4777_v14, 6 }
 0x8b9   :  { %v1396_v50 = vadd.f32 1e-05, %v1392_v3  ;;  %v1466_v3 = vld [vmem:[%s5203_s9 + $0x80] sm:$0xff] }
 0x8ba   :  { %4352 = vrsqrt.f32 %v1397_v6  ;;  %v4815_v37 = vpop.permute.xlu1 %1443  ;;  %v1467_v6 = vld [vmem:[%s5203_s9 + $0x88] sm:$0xff] }
 0x8bb   :  { %4354 = vrsqrt.f32 %v1396_v50 }
 0x8bd   :  { %v4771_v32 = vpop.permute.xlu0 %1433 }
 0x8be   :  { %v4774_v34 = vmul.f32 %v4771_v32, %v1423_v13 }
 0x8c0   :  { %v1491_v17 = vrot.slane %v4774_v34, 4 }
 0x8c2   :  { %v4781_v18 = vsel %vm1489_vm3, %v1490_v12, %v1491_v17  ;;  %v4784_v19 = vsel %vm1489_vm3, %v1491_v17, 0.0  ;;  %v4898_v12 = vpack.c.bf16 %v1467_v6, %v1466_v3  ;;  %v1468_v17 = vld [vmem:[%s5203_s9 + $0x90] sm:$0xff] }
 0x8c3   :  { %v1501_v22 = vrot.slane %v4781_v18, 1  ;;  %v1503_v23 = vrot.slane %v4784_v19, 1  ;;  %v1665_v41 = vrot.slane %v4781_v18, 2  ;;  %v1752_v63 = vrot.slane %v4781_v18, 3 }
 0x8c4   :  { %v4353_v15 = vpop.eup %4352  ;;  %v1754_v13 = vrot.slane %v4784_v19, 3  ;;  %v1838_v21 = vrot.slane %v4781_v18, 4  ;;  %v1840_v29 = vrot.slane %v4784_v19, 4 }
 0x8c5   :  { %v4355_v24 = vpop.eup %4354  ;;  %v1405_v25 = vmul.f32 %v4353_v15, %v4718_v31  ;;  %v1502_v26 = vsel %vm1499_vm4, %v1500_v10, %v1501_v22  ;;  %v1504_v8 = vsel %vm1499_vm4, %v1501_v22, %v1503_v23  ;;  %v1666_v20 = vsel %vm1663_vm5, %v1664_v44, %v1665_v41  ;;  %v1475_v44 = vld [vmem:[%s5203_s9 + $0xc8] sm:$0xff] }
 0x8c6   :  { %v1404_v27 = vmul.f32 %v4355_v24, %v4720_v33  ;;  %3770 = vmatprep.mubr.msk.f32.mxu1 %vm81_vm0, %v1502_v26  ;;  %v1753_v11 = vsel %vm1750_vm6, %v1751_v0, %v1752_v63  ;;  %v1837_v22 = vrot.slane %v4777_v14, 4  ;;  %v4916_v23 = vpack.c.bf16 %v1469_v52, %v1468_v17  ;;  %v1470_v24 = vld [vmem:[%s5203_s9 + $0xa0] sm:$0xff]  ;;  %v1479_v0 = vld [vmem:[%s5203_s9 + $0xe8] sm:$0xff] }
 0x8c7   :  { %v1415_v30 = vmul.f32 %v3429_v56, %v1405_v25  ;;  %3771 = vmatmul.mubr.msk.f32.vlgmr.msra.gmra.mrb[10].mxu1 %vm81_vm0, %v1504_v8  ;;  %v1755_v15 = vsel %vm1750_vm6, %v1752_v63, %v1754_v13  ;;  %v1471_v25 = vld [vmem:[%s5203_s9 + $0xa8] sm:$0xff]  ;;  %v1478_v63 = vld [vmem:[%s5203_s9 + $0xe0] sm:$0xff]  ;;  %v2099_v13 = vrot.slane %v4781_v18, 7 }
 0x8c8   :  { %v1414_v31 = vmul.f32 %v3429_v56, %v1404_v27  ;;  %4071 = vmatpush3.bf16.msra.mxu1 %v4752_v48  ;;  %3781 = vmatprep.mubr.msk.f32.mxu1 %vm81_vm0, %v4777_v14  ;;  %v1667_v56 = vrot.slane %v4784_v19, 2  ;;  %v1839_v26 = vsel %vm1489_vm3, %v1837_v22, %v1838_v21  ;;  %v4936_v28 = vpack.c.bf16 %v1471_v25, %v1470_v24 }
 0x8c9   :  { %v1425_v33 = vadd.f32 %v3430_v60, %v1415_v30  ;;  %4073 = vmatprep.subr.bf16.mxu1 %v4798_v9  ;;  %v1472_v30 = vld [vmem:[%s5203_s9 + $0xb0] sm:$0xff] }
 0x8ca   :  { %v1424_v36 = vadd.f32 %v3430_v60, %v1414_v31  ;;  %v1668_v2 = vsel %vm1663_vm5, %v1665_v41, %v1667_v56  ;;  %v1473_v31 = vld [vmem:[%s5203_s9 + $0xb8] sm:$0xff]  ;;  %v1841_v41 = vsel %vm1489_vm3, %v1838_v21, %v1840_v29  ;;  %v2098_v21 = vrot.slane %v4777_v14, 7 }
 0x8cb   :  { %v4824_v40 = vmul.f32 %v4815_v37, %v1425_v33  ;;  %v1925_v33 = vrot.slane %v4781_v18, 5  ;;  %v4954_v39 = vpack.c.bf16 %v1473_v31, %v1472_v30 }
 0x8cc   :  { %v4828_v42 = vmul.f32 %v4764_v61, %v1424_v36  ;;  %4075 = vmatpush3.bf16.msra.mxu1 %v4798_v9  ;;  %v2100_v24 = vsel %vm2097_vm9, %v2098_v21, %v2099_v13 }
 0x8cd   :  { %v2266_v43 = vrot.slane %v4824_v40, 4  ;;  %4077 = vmatprep.subr.bf16.mxu1 %v4813_v35 }
 0x8ce   :  { %v2265_v46 = vrot.slane %v4828_v42, 4 }
 0x8cf   :  { %v4844_v49 = vsel %vm1489_vm3, %v2266_v43, 0.0  ;;  %3782 = vmatmul.mubr.msk.f32.vlgmr.msra.gmra.mrb[10].mxu1 %vm81_vm0, %v4781_v18 }
 0x8d0   :  { %v4850_v51 = vsel %vm1489_vm3, 0.0, %v2265_v46  ;;  %v4853_v53 = vsel %vm1489_vm3, %v2265_v46, %v2266_v43  ;;  %4079 = vmatpush3.bf16.msra.mxu1 %v4813_v35  ;;  %3792 = vmatprep.mubr.msk.f32.mxu1 %vm81_vm0, %v1666_v20  ;;  %v2277_v54 = vrot.slane %v4844_v49, 1  ;;  %v2440_v8 = vrot.slane %v4844_v49, 2  ;;  %v1474_v43 = vld [vmem:[%s5203_s9 + $0xc0] sm:$0xff] }
 0x8d1   :  { %4081 = vmatprep.subr.bf16.mxu1 %v4834_v45  ;;  %v2274_v55 = vrot.slane %v4850_v51, 1  ;;  %v2275_v5 = vrot.slane %v4853_v53, 1  ;;  %v2438_v50 = vrot.slane %v4853_v53, 2  ;;  %v2524_v27 = vrot.slane %v4853_v53, 3 }
 0x8d2   :  { %v2526_v46 = vrot.slane %v4844_v49, 3  ;;  %v2609_v16 = vrot.slane %v4850_v51, 4  ;;  %v2610_v47 = vrot.slane %v4853_v53, 4  ;;  %v4974_v20 = vpack.c.bf16 %v1475_v44, %v1474_v43  ;;  %v3048_v44 = vld [vmem:[%s5205_s11 + $0x10] sm:$0xff] }
 0x8d3   :  { %v2276_v60 = vsel %vm1499_vm4, %v2274_v55, %v2275_v5  ;;  %v2278_v62 = vsel %vm1499_vm4, %v2275_v5, %v2277_v54  ;;  %v1927_v54 = vrot.slane %v4784_v19, 5  ;;  %v1476_v55 = vld [vmem:[%s5203_s9 + $0xd0] sm:$0xff]  ;;  %v1477_v5 = vld [vmem:[%s5203_s9 + $0xd8] sm:$0xff]  ;;  %v2695_v3 = vrot.slane %v4850_v51, 5 }
 0x8d4   :  { %4083 = vmatpush3.bf16.msra.mxu1 %v4834_v45  ;;  %3869 = vmatprep.mubr.msk.f32.mxu0 %vm81_vm0, %v2276_v60  ;;  %v2527_v56 = vsel %vm1750_vm6, %v2524_v27, %v2526_v46  ;;  %v2611_v58 = vsel %vm1489_vm3, %v2609_v16, %v2610_v47  ;;  %v4992_v60 = vpack.c.bf16 %v1477_v5, %v1476_v55  ;;  %v2696_v6 = vrot.slane %v4853_v53, 5  ;;  %v3050_v16 = vld [vmem:[%s5205_s11 + $0x20] sm:$0xff]  ;;  %v3053_v5 = vld [vmem:[%s5205_s11 + $0x38] sm:$0xff] }
 0x8d5   :  { %3870 = vmatmul.mubr.msk.f32.vlgmr.msra.gmra.mrb[14].mxu0 %vm81_vm0, %v2278_v62  ;;  %4085 = vmatprep.subr.bf16.mxu1 %v4861_v7  ;;  %v1928_v62 = vsel %vm1923_vm7, %v1925_v33, %v1927_v54  ;;  %v2698_v14 = vrot.slane %v4844_v49, 5  ;;  %v2781_v25 = vrot.slane %v4850_v51, 6 }
 0x8d6   :  { %4143 = vmatpush3.bf16.msra.mxu0 %v4752_v48  ;;  %3880 = vmatprep.mubr.msk.f32.mxu0 %vm81_vm0, %v4850_v51  ;;  %v2437_v48 = vrot.slane %v4850_v51, 2  ;;  %v2697_v52 = vsel %vm1923_vm7, %v2695_v3, %v2696_v6 }
 0x8d7   :  { %3793 = vmatmul.mubr.msk.f32.vlgmr.msra.gmra.mrb[10].mxu1 %vm81_vm0, %v1668_v2  ;;  %4145 = vmatprep.subr.bf16.mxu0 %v4798_v9  ;;  %v2612_v2 = vrot.slane %v4844_v49, 4  ;;  %v2699_v29 = vsel %vm1923_vm7, %v2696_v6, %v2698_v14 }
 0x8d8   :  { %4087 = vmatpush3.bf16.msra.mxu1 %v4861_v7  ;;  %3803 = vmatprep.mubr.msk.f32.mxu1 %vm81_vm0, %v1753_v11  ;;  %v2439_v10 = vsel %vm1663_vm5, %v2437_v48, %v2438_v50  ;;  %v5012_v11 = vpack.c.bf16 %v1479_v0, %v1478_v63  ;;  %v2014_v48 = vrot.slane %v4784_v19, 6 }
 0x8d9   :  { %4089 = vmatprep.subr.bf16.mxu1 %v4878_v1  ;;  %v2613_v17 = vsel %vm1489_vm3, %v2610_v47, %v2612_v2  ;;  %v3051_v47 = vld [vmem:[%s5205_s11 + $0x28] sm:$0xff] }
 0x8da   :  { %4147 = vmatpush3.bf16.msra.mxu0 %v4798_v9  ;;  %v2523_v9 = vrot.slane %v4850_v51, 3  ;;  %v4212_v54 = vpack.c.bf16 %v3051_v47, %v3050_v16  ;;  %v3247_v47 = vld [vmem:[%s5209_s15 + $0x10] sm:$0xff] }
 0x8db   :  { %4149 = vmatprep.subr.bf16.mxu0 %v4813_v35 }
 0x8dc   :  { %4091 = vmatpush3.bf16.msra.mxu1 %v4878_v1  ;;  %v2525_v36 = vsel %vm1750_vm6, %v2523_v9, %v2524_v27  ;;  %v2101_v9 = vrot.slane %v4784_v19, 7  ;;  %v1484_v27 = vld [vmem:[%s5203_s9 + $0x110] sm:$0xff] }
 0x8dd   :  { %3881 = vmatmul.mubr.msk.f32.vlgmr.msra.gmra.mrb[14].mxu0 %vm81_vm0, %v4853_v53  ;;  %4093 = vmatprep.subr.bf16.mxu1 %v4898_v12 }
 0x8de   :  { %4151 = vmatpush3.bf16.msra.mxu0 %v4813_v35  ;;  %3891 = vmatprep.mubr.msk.f32.mxu0 %vm81_vm0, %v2439_v10  ;;  %v2441_v35 = vsel %vm1663_vm5, %v2438_v50, %v2440_v8  ;;  %v1480_v50 = vld [vmem:[%s5203_s9 + $0xf0] sm:$0xff] }
 0x8df   :  { %3804 = vmatmul.mubr.msk.f32.vlgmr.msra.gmra.mrb[10].mxu1 %vm81_vm0, %v1755_v15  ;;  %4153 = vmatprep.subr.bf16.mxu0 %v4834_v45  ;;  %v1483_v15 = vld [vmem:[%s5203_s9 + $0x108] sm:$0xff] }
 0x8e0   :  { %4095 = vmatpush3.bf16.msra.mxu1 %v4898_v12  ;;  %3814 = vmatprep.mubr.msk.f32.mxu1 %vm81_vm0, %v1839_v26  ;;  %v2782_v26 = vrot.slane %v4853_v53, 6 }
 0x8e1   :  { %4097 = vmatprep.subr.bf16.mxu1 %v4916_v23 }
 0x8e2   :  { %4155 = vmatpush3.bf16.msra.mxu0 %v4834_v45  ;;  %v1926_v45 = vsel %vm1923_vm7, %v1924_v38, %v1925_v33  ;;  %v2783_v30 = vsel %vm2010_vm8, %v2781_v25, %v2782_v26  ;;  %v2102_v33 = vsel %vm2097_vm9, %v2099_v13, %v2101_v9  ;;  %v2784_v38 = vrot.slane %v4844_v49, 6 }
 0x8e3   :  { %4157 = vmatprep.subr.bf16.mxu0 %v4861_v7 }
 0x8e4   :  { %4099 = vmatpush3.bf16.msra.mxu1 %v4916_v23 }
 0x8e5   :  { %3892 = vmatmul.mubr.msk.f32.vlgmr.msra.gmra.mrb[14].mxu0 %vm81_vm0, %v2441_v35  ;;  %4101 = vmatprep.subr.bf16.mxu1 %v4936_v28  ;;  %v3046_v35 = vld [vmem:[%s5205_s11] sm:$0xff] }
 0x8e6   :  { %4159 = vmatpush3.bf16.msra.mxu0 %v4861_v7  ;;  %3902 = vmatprep.mubr.msk.f32.mxu0 %vm81_vm0, %v2525_v36  ;;  %v2012_v7 = vrot.slane %v4781_v18, 6  ;;  %v3047_v36 = vld [vmem:[%s5205_s11 + $0x8] sm:$0xff] }
 0x8e7   :  { %3815 = vmatmul.mubr.msk.f32.vlgmr.msra.gmra.mrb[10].mxu1 %vm81_vm0, %v1841_v41  ;;  %4161 = vmatprep.subr.bf16.mxu0 %v4878_v1  ;;  %v2868_v41 = vrot.slane %v4853_v53, 7  ;;  %v4204_v43 = vpack.c.bf16 %v3047_v36, %v3046_v35 }
 0x8e8   :  { %4103 = vmatpush3.bf16.msra.mxu1 %v4936_v28  ;;  %3825 = vmatprep.mubr.msk.f32.mxu1 %vm81_vm0, %v1926_v45  ;;  %v2015_v22 = vsel %vm2010_vm8, %v2012_v7, %v2014_v48  ;;  %v3049_v45 = vld [vmem:[%s5205_s11 + $0x18] sm:$0xff] }
 0x8e9   :  { %4105 = vmatprep.subr.bf16.mxu1 %v4954_v39  ;;  %v4208_v46 = vpack.c.bf16 %v3049_v45, %v3048_v44 }
 0x8ea   :  { %4163 = vmatpush3.bf16.msra.mxu0 %v4878_v1  ;;  %v2013_v1 = vsel %vm2010_vm8, %v2011_v59, %v2012_v7 }
 0x8eb   :  { %4165 = vmatprep.subr.bf16.mxu0 %v4898_v12 }
 0x8ec   :  { %4107 = vmatpush3.bf16.msra.mxu1 %v4954_v39 }
 0x8ed   :  { %3903 = vmatmul.mubr.msk.f32.vlgmr.msra.gmra.mrb[14].mxu0 %vm81_vm0, %v2527_v56  ;;  %4109 = vmatprep.subr.bf16.mxu1 %v4974_v20 }
 0x8ee   :  { %4167 = vmatpush3.bf16.msra.mxu0 %v4898_v12  ;;  %3913 = vmatprep.mubr.msk.f32.mxu0 %vm81_vm0, %v2611_v58  ;;  %v1481_v12 = vld [vmem:[%s5203_s9 + $0xf8] sm:$0xff] }
 0x8ef   :  { %3826 = vmatmul.mubr.msk.f32.vlgmr.msra.gmra.mrb[10].mxu1 %vm81_vm0, %v1928_v62  ;;  %4169 = vmatprep.subr.bf16.mxu0 %v4916_v23  ;;  %v4120_v10 = vpack.c.bf16 %v1481_v12, %v1480_v50 }
 0x8f0   :  { %4111 = vmatpush3.bf16.msra.mxu1 %v4974_v20  ;;  %3836 = vmatprep.mubr.msk.f32.mxu1 %vm81_vm0, %v2013_v1 }
 0x8f1   :  { %4113 = vmatprep.subr.bf16.mxu1 %v4992_v60 }
 0x8f2   :  { %4171 = vmatpush3.bf16.msra.mxu0 %v4916_v23  ;;  %v1482_v23 = vld [vmem:[%s5203_s9 + $0x100] sm:$0xff] }
 0x8f3   :  { %4173 = vmatprep.subr.bf16.mxu0 %v4936_v28  ;;  %v4124_v8 = vpack.c.bf16 %v1483_v15, %v1482_v23 }
 0x8f4   :  { %4115 = vmatpush3.bf16.msra.mxu1 %v4992_v60 }
 0x8f5   :  { %3914 = vmatmul.mubr.msk.f32.vlgmr.msra.gmra.mrb[14].mxu0 %vm81_vm0, %v2613_v17  ;;  %4117 = vmatprep.subr.bf16.mxu1 %v5012_v11 }
 0x8f6   :  { %4175 = vmatpush3.bf16.msra.mxu0 %v4936_v28  ;;  %3924 = vmatprep.mubr.msk.f32.mxu0 %vm81_vm0, %v2697_v52  ;;  %v1485_v28 = vld [vmem:[%s5203_s9 + $0x118] sm:$0xff] }
 0x8f7   :  { %3837 = vmatmul.mubr.msk.f32.vlgmr.msra.gmra.mrb[10].mxu1 %vm81_vm0, %v2015_v22  ;;  %4177 = vmatprep.subr.bf16.mxu0 %v4954_v39  ;;  %v4128_v31 = vpack.c.bf16 %v1485_v28, %v1484_v27 }
 0x8f8   :  { %4119 = vmatpush3.bf16.msra.mxu1 %v5012_v11  ;;  %3847 = vmatprep.mubr.msk.f32.mxu1 %vm81_vm0, %v2100_v24 }
 0x8f9   :  { %4121 = vmatprep.subr.bf16.mxu1 %v4120_v10 }
 0x8fa   :  { %4179 = vmatpush3.bf16.msra.mxu0 %v4954_v39  ;;  %v2867_v39 = vrot.slane %v4850_v51, 7 }
 0x8fb   :  { %4181 = vmatprep.subr.bf16.mxu0 %v4974_v20 }
 0x8fc   :  { %4123 = vmatpush3.bf16.msra.mxu1 %v4120_v10  ;;  %v2869_v51 = vsel %vm2097_vm9, %v2867_v39, %v2868_v41 }
 0x8fd   :  { %3925 = vmatmul.mubr.msk.f32.vlgmr.msra.gmra.mrb[14].mxu0 %vm81_vm0, %v2699_v29  ;;  %4125 = vmatprep.subr.bf16.mxu1 %v4124_v8 }
 0x8fe   :  { %4183 = vmatpush3.bf16.msra.mxu0 %v4974_v20  ;;  %3935 = vmatprep.mubr.msk.f32.mxu0 %vm81_vm0, %v2783_v30  ;;  %v2870_v20 = vrot.slane %v4844_v49, 7 }
 0x8ff   :  { %3848 = vmatmul.mubr.msk.f32.vlgmr.msra.gmra.mrb[10].mxu1 %vm81_vm0, %v2102_v33  ;;  %4185 = vmatprep.subr.bf16.mxu0 %v4992_v60 }
 0x900   :  { %4127 = vmatpush3.bf16.msra.mxu1 %v4124_v8  ;;  %3858 = vmatprep.mubr.msk.f32.mxu1 %vm81_vm0, %v4781_v18  ;;  %v2785_v18 = vsel %vm2010_vm8, %v2782_v26, %v2784_v38  ;;  %v2871_v55 = vsel %vm2097_vm9, %v2868_v41, %v2870_v20  ;;  %v3248_v20 = vld [vmem:[%s5209_s15 + $0x18] sm:$0xff] }
 0x901   :  { %4129 = vmatprep.subr.bf16.mxu1 %v4128_v31 }
 0x902   :  { %4187 = vmatpush3.bf16.msra.mxu0 %v4992_v60 }
 0x903   :  { %4189 = vmatprep.subr.bf16.mxu0 %v5012_v11 }
 0x904   :  { %4131 = vmatpush3.bf16.msra.mxu1 %v4128_v31 }
 0x905   :  { %3936 = vmatmul.mubr.msk.f32.vlgmr.msra.gmra.mrb[14].mxu0 %vm81_vm0, %v2785_v18  ;;  %4205 = vmatprep.subr.bf16.mxu1 %v4204_v43 }
 0x906   :  { %4191 = vmatpush3.bf16.msra.mxu0 %v5012_v11  ;;  %3946 = vmatprep.mubr.msk.f32.mxu0 %vm81_vm0, %v2869_v51  ;;  %v3468_v11 = vld [vmem:[%s5206_s12] ss:$0 sm:$0xff] }
 0x907   :  { %3859 = vmatmul.mubr.msk.f32.vlgmr.msra.gmra.mrb[10].mxu1 %vm81_vm0, %v4784_v19  ;;  %4193 = vmatprep.subr.bf16.mxu0 %v4120_v10  ;;  %v3052_v19 = vld [vmem:[%s5205_s11 + $0x30] sm:$0xff]  ;;  %v3245_v51 = vld [vmem:[%s5209_s15] sm:$0xff] }
 0x908   :  { %4207 = vmatpush3.bf16.msra.mxu1 %v4204_v43  ;;  %v4216_v7 = vpack.c.bf16 %v3053_v5, %v3052_v19 }
 0x909   :  { %4209 = vmatprep.subr.bf16.mxu1 %v4208_v46 }
 0x90a   :  { %4195 = vmatpush3.bf16.msra.mxu0 %v4120_v10 }
 0x90b   :  { %4197 = vmatprep.subr.bf16.mxu0 %v4124_v8 }
 0x90c   :  { %4211 = vmatpush3.bf16.msra.mxu1 %v4208_v46  ;;  %v3246_v46 = vld [vmem:[%s5209_s15 + $0x8] sm:$0xff] }
 0x90d   :  { %3947 = vmatmul.mubr.msk.f32.vlgmr.msra.gmra.mrb[14].mxu0 %vm81_vm0, %v2871_v55  ;;  %4213 = vmatprep.subr.bf16.mxu1 %v4212_v54  ;;  %v4220_v16 = vpack.c.bf16 %v3246_v46, %v3245_v51 }
 0x90e   :  { %4199 = vmatpush3.bf16.msra.mxu0 %v4124_v8  ;;  %3957 = vmatprep.mubr.msk.f32.mxu0 %vm81_vm0, %v4853_v53  ;;  %v3467_v53 = vld [vmem:[%s5204_s10] ss:$0 sm:$0xff] }
 0x90f   :  { %4201 = vmatprep.subr.bf16.mxu0 %v4128_v31 }
 0x910   :  { %4215 = vmatpush3.bf16.msra.mxu1 %v4212_v54  ;;  %v4224_v54 = vpack.c.bf16 %v3248_v20, %v3247_v47 }
 0x911   :  { %4217 = vmatprep.subr.bf16.mxu1 %v4216_v7 }
 0x912   :  { %4203 = vmatpush3.bf16.msra.mxu0 %v4128_v31 }
 0x913   :  { %4221 = vmatprep.subr.bf16.mxu0 %v4220_v16 }
 0x914   :  { %4219 = vmatpush3.bf16.msra.mxu1 %v4216_v7 }
 0x915   :  { %3958 = vmatmul.mubr.msk.f32.vlgmr.msra.gmra.mrb[14].mxu0 %vm81_vm0, %v4844_v49 }
 0x916   :  { %4223 = vmatpush3.bf16.msra.mxu0 %v4220_v16 }
 0x917   :  { %4225 = vmatprep.subr.bf16.mxu0 %v4224_v54 }
 0x91a   :  { %4227 = vmatpush3.bf16.msra.mxu0 %v4224_v54 }
 0x9da   :  { %v3860_v56 = vpop.f32.mrb[10].mxu1 }
 0x9db   :  { %v3039_v58 = vadd.f32 %v3860_v56, %v3467_v53  ;;  %v2252_v59 = vpop.f32.mrb[11].mxu1 }
 0x9dc   :  { %v3038_v60 = vadd.f32 %v3467_v53, %v2252_v59 }
 0x9dd   :  { %v3043_v62 = vmax.f32 %v3039_v58, 0.0 }
 0x9de   :  { %v3042_v49 = vmax.f32 %v3038_v60, 0.0  ;;  %v3473_v60 = vld [vmem:[%s5207_s13] ss:$0 sm:$0xff]  ;;  %s4418_s13 = smov [#allocation2]  }
 0x9e0   :  { %3976 = vmatprep.mubr.msk.f32.mxu1 %vm3061_vm10, %v3042_v49 }
 0x9e1   :  { %3977 = vmatmul.mubr.msk.f32.vlgmr.msra.gmra.mrb[12].mxu1 %vm3061_vm10, %v3043_v62 }
 0x9e8   :  { %v3959_v63 = vpop.f32.mrb[14].mxu0 }
 0x9e9   :  { %v3041_v0 = vadd.f32 %v3959_v63, %v3467_v53  ;;  %v3021_v1 = vpop.f32.mrb[15].mxu0 }
 0x9ea   :  { %v3040_v2 = vadd.f32 %v3467_v53, %v3021_v1 }
 0x9eb   :  { %v3045_v6 = vmax.f32 %v3041_v0, 0.0  ;;  %v3474_v0 = vld [vmem:[%s5208_s14] ss:$0 sm:$0xff]  ;;  %s3362_s14 = sshll.u32 %s4418_s13, 4  ;;  %s3363_s14 = int_to_ptr.vmem [resolvable:$true] %s3362_s14 }
 0x9ec   :  { %v3044_v3 = vmax.f32 %v3040_v2, 0.0  ;;  %s4364_s22 = scalar_lea.vmem %s3363_s14, 512  ;;  %p4369_p1 = scmp.lt.s32.totalorder %s3363_s14, %s3363_s14 }
 0x9ed   :  { %p4365_p0 = scmp.ne.s32.totalorder %s3363_s14, %s4364_s22  ;;  %p4370_p2 = scmp.lt.s32.totalorder %s4364_s22, %s4364_s22 }
 0x9ee   :  { %3979 = vmatprep.mubr.msk.f32.mxu1 %vm3061_vm10, %v3044_v3 }
 0x9ef   :  { %3980 = vmatmul.mubr.msk.f32.gmra.mrb[14].mxu1 %vm3061_vm10, %v3045_v6  ;;  %p4371_p3 = por %p4370_p2, %p4369_p1 }
 0x9f1   :  { %p4372_p4 = pnand %p4371_p3, %p4365_p0 }
 0xab4   :  { %v3978_v48 = vpop.f32.mrb[12].mxu1 }
 0xab5   :  { %v3146_v50 = vadd.f32 %v3978_v48, %v3468_v11  ;;  %v3140_v12 = vpop.f32.mrb[13].mxu1 }
 0xab6   :  { %v3141_v13 = vadd.f32 %v3468_v11, %v3140_v12 }
 0xab7   :  { %v3160_v17 = vadd.f32 %v3146_v50, %v4774_v34 }
 0xab8   :  { %v3159_v52 = vadd.f32 %v3141_v13, %v4768_v4 }
 0xab9   :  { %v3168_v21 = vsel %vm81_vm0, %v3160_v17, 0.0 }
 0xaba   :  { %3169 = vadd.xlane.f32.xlu0 %v3168_v21  ;;  %v3165_v10 = vsel %vm81_vm0, %v3159_v52, 0.0 }
 0xabb   :  { %3166 = vadd.xlane.f32.xlu1 %v3165_v10 }
 0xac2   :  { %v3981_v22 = vpop.f32.mrb[14].mxu1 }
 0xac3   :  { %v3150_v23 = vpop.f32.mrb[15].mxu1  ;;  %v3156_v15 = vadd.f32 %v3981_v22, %v3468_v11 }
 0xac4   :  { %v3151_v24 = vadd.f32 %v3468_v11, %v3150_v23 }
 0xac5   :  { %v3162_v26 = vadd.f32 %v3156_v15, %v4824_v40 }
 0xac6   :  { %v3161_v14 = vadd.f32 %v3151_v24, %v4828_v42 }
 0xac7   :  { %v3174_v34 = vsel %vm81_vm0, %v3162_v26, 0.0 }
 0xac8   :  { %v3171_v25 = vsel %vm81_vm0, %v3161_v14, 0.0 }
 0xac9   :  { %3172 = vadd.xlane.f32.xlu1 %v3171_v25 }
 0xacd   :  { %3175 = vadd.xlane.f32.xlu1 %v3174_v34 }
 0xb47   :  { %v3170_v4 = vpop.xlane.xlu0 %3169 }
 0xb48   :  { %v3178_v8 = vmul.f32 0.03125, %v3170_v4  ;;  %v3167_v9 = vpop.xlane.xlu1 %3166 }
 0xb49   :  { %v3177_v27 = vmul.f32 0.03125, %v3167_v9 }
 0xb4a   :  { %v3182_v28 = vsub.f32 %v3160_v17, %v3178_v8 }
 0xb4b   :  { %v3181_v29 = vsub.f32 %v3159_v52, %v3177_v27 }
 0xb4c   :  { %v3186_v33 = vmul.f32 %v3182_v28, %v3182_v28 }
 0xb4d   :  { %v3185_v30 = vmul.f32 %v3181_v29, %v3181_v29 }
 0xb4e   :  { %v3192_v42 = vsel %vm81_vm0, %v3186_v33, 0.0 }
 0xb4f   :  { %v3189_v31 = vsel %vm81_vm0, %v3185_v30, 0.0 }
 0xb50   :  { %3190 = vadd.xlane.f32.xlu1 %v3189_v31 }
 0xb54   :  { %3193 = vadd.xlane.f32.xlu1 %v3192_v42 }
 0xb56   :  { %v3173_v35 = vpop.xlane.xlu1 %3172 }
 0xb57   :  { %v3179_v40 = vmul.f32 0.03125, %v3173_v35 }
 0xb59   :  { %v3183_v36 = vsub.f32 %v3161_v14, %v3179_v40 }
 0xb5a   :  { %v3176_v38 = vpop.xlane.xlu1 %3175 }
 0xb5b   :  { %v3180_v39 = vmul.f32 0.03125, %v3176_v38  ;;  %v3187_v41 = vmul.f32 %v3183_v36, %v3183_v36 }
 0xb5d   :  { %v3184_v43 = vsub.f32 %v3162_v26, %v3180_v39  ;;  %v3195_v44 = vsel %vm81_vm0, %v3187_v41, 0.0 }
 0xb5e   :  { %3196 = vadd.xlane.f32.xlu1 %v3195_v44 }
 0xb5f   :  { %v3188_v45 = vmul.f32 %v3184_v43, %v3184_v43 }
 0xb61   :  { %v3198_v18 = vsel %vm81_vm0, %v3188_v45, 0.0 }
 0xb62   :  { %3199 = vadd.xlane.f32.xlu0 %v3198_v18 }
 0xbdd   :  { %v3191_v55 = vpop.xlane.xlu1 %3190 }
 0xbde   :  { %v3201_v19 = vmul.f32 0.03125, %v3191_v55 }
 0xbe0   :  { %v3205_v5 = vadd.f32 1e-05, %v3201_v19 }
 0xbe1   :  { %v3194_v7 = vpop.xlane.xlu1 %3193 }
 0xbe2   :  { %4356 = vrsqrt.f32 %v3205_v5  ;;  %v3202_v53 = vmul.f32 0.03125, %v3194_v7 }
 0xbe4   :  { %v3206_v56 = vadd.f32 1e-05, %v3202_v53 }
 0xbe6   :  { %4358 = vrsqrt.f32 %v3206_v56 }
 0xbeb   :  { %v3197_v58 = vpop.xlane.xlu1 %3196 }
 0xbec   :  { %v4357_v59 = vpop.eup %4356  ;;  %v3203_v49 = vmul.f32 0.03125, %v3197_v58 }
 0xbed   :  { %v3213_v62 = vmul.f32 %v4357_v59, %v3181_v29 }
 0xbee   :  { %v3207_v63 = vadd.f32 1e-05, %v3203_v49 }
 0xbef   :  { %v3200_v1 = vpop.xlane.xlu0 %3199  ;;  %v3223_v2 = vmul.f32 %v3473_v60, %v3213_v62 }
 0xbf0   :  { %v4359_v3 = vpop.eup %4358  ;;  %4360 = vrsqrt.f32 %v3207_v63  ;;  %v3204_v6 = vmul.f32 0.03125, %v3200_v1 }
 0xbf1   :  { %v3214_v11 = vmul.f32 %v4359_v3, %v3182_v28  ;;  %v3233_v48 = vadd.f32 %v3474_v0, %v3223_v2 }
 0xbf2   :  { %v3208_v50 = vadd.f32 1e-05, %v3204_v6 }
 0xbf3   :  { %v3224_v12 = vmul.f32 %v3473_v60, %v3214_v11  ;;  %v3237_v13 = vmul.f32 %v3233_v48, %v4759_v57 }
 0xbf4   :  { %4362 = vrsqrt.f32 %v3208_v50 }
 0xbf5   :  { %3241 = vst.msk [vmem:[#allocation2] sm:$0xff] %vm81_vm0, %v3237_v13  ;;  %3990 = vmatprep.mubr.msk.f32.mxu0 %vm81_vm0, %v3237_v13  ;;  %v3234_v17 = vadd.f32 %v3474_v0, %v3224_v12 }
 0xbf7   :  { %v3238_v52 = vmul.f32 %v3234_v17, %v4771_v32 }
 0xbf9   :  { %3991 = vmatmul.mubr.msk.f32.vlgmr.msra.gmra.mrb[16].mxu0 %vm81_vm0, %v3238_v52  ;;  %3242 = vst.msk [vmem:[#allocation2 + $0x8] sm:$0xff] %vm81_vm0, %v3238_v52 }
 0xbfa   :  { %v4361_v21 = vpop.eup %4360 }
 0xbfb   :  { %v3215_v10 = vmul.f32 %v4361_v21, %v3183_v36 }
 0xbfd   :  { %v3225_v22 = vmul.f32 %v3473_v60, %v3215_v10 }
 0xbfe   :  { %v4363_v23 = vpop.eup %4362 }
 0xbff   :  { %v3216_v15 = vmul.f32 %v4363_v23, %v3184_v43  ;;  %v3235_v24 = vadd.f32 %v3474_v0, %v3225_v22 }
 0xc01   :  { %v3239_v57 = vmul.f32 %v3235_v24, %v4764_v61  ;;  %v3226_v14 = vmul.f32 %v3473_v60, %v3216_v15 }
 0xc03   :  { %3243 = vst.msk [vmem:[#allocation2 + $0x10] sm:$0xff] %vm81_vm0, %v3239_v57  ;;  %3993 = vmatprep.mubr.msk.f32.mxu0 %vm81_vm0, %v3239_v57  ;;  %v3236_v25 = vadd.f32 %v3474_v0, %v3226_v14 }
 0xc05   :  { %v3240_v32 = vmul.f32 %v3236_v25, %v4815_v37 }
 0xc07   :  { %3244 = vst.msk [vmem:[#allocation2 + $0x18] sm:$0xff] %vm81_vm0, %v3240_v32  ;;  %3994 = vmatmul.mubr.msk.f32.gmra.mrb[18].mxu0 %vm81_vm0, %v3240_v32 }
 0xc08   :  { %4375 = shalt.err (!%p4372_p4)
}
 0xc09   :  { %s4376_s24 = scalar_lea.hbm %s5211_s17, 512 }
 0xc0a   :  { %p4377_p5 = scmp.ne.s32.totalorder %s5211_s17, %s4376_s24  ;;  %p4380_p6 = scmp.lt.u32.totalorder %s4376_s24, %s5211_s17 }
 0xc0c   :  { %p4382_p7 = pnand %p4380_p6, %p4377_p5 }
 0xc0e   :  { %4385 = shalt.err (!%p4382_p7)
}
 0xc0f   :  { %s4419_s28 = smov 128   ;;  %s4420_s29 = smov 8   ;;  %v3475_v61 = vld [vmem:[%s5210_s16] ss:$0 sm:$0xff] }
 0xc10   :  { %3368 = dma.vmem_to_hbm [thread:$0]  %s3363_s14, 512, %s5211_s17, [#allocation3], %s4419_s28, %s4419_s28, %s4420_s29  }
 0xc11   :  { %s4421_s10 = smov [#allocation4]  }
 0xc12   :  { %s3374_s12 = sshll.u32 %s4421_s10, 4  ;;  %s3375_s12 = int_to_ptr.vmem [resolvable:$true] %s3374_s12 }
 0xc13   :  { %s4386_s16 = scalar_lea.vmem %s3375_s12, 512  ;;  %p4391_p9 = scmp.lt.s32.totalorder %s3375_s12, %s3375_s12 }
 0xc14   :  { %p4387_p8 = scmp.ne.s32.totalorder %s3375_s12, %s4386_s16  ;;  %p4392_p10 = scmp.lt.s32.totalorder %s4386_s16, %s4386_s16 }
 0xc16   :  { %p4393_p11 = por %p4392_p10, %p4391_p9 }
 0xc18   :  { %p4394_p12 = pnand %p4393_p11, %p4387_p8 }
 0xccc   :  { %v3992_v37 = vpop.f32.mrb[16].mxu0 }
 0xccd   :  { %v3340_v26 = vadd.f32 %v3992_v37, %v3475_v61  ;;  %v3334_v34 = vpop.f32.mrb[17].mxu0 }
 0xcce   :  { %v3335_v4 = vadd.f32 %v3475_v61, %v3334_v34 }
 0xccf   :  { %3354 = vst.msk [vmem:[#allocation4 + $0x8] sm:$0xff] %vm191_vm1, %v3340_v26 }
 0xcd0   :  { %3353 = vst.msk [vmem:[#allocation4] sm:$0xff] %vm191_vm1, %v3335_v4 }
 0xcda   :  { %v3995_v8 = vpop.f32.mrb[18].mxu0 }
 0xcdb   :  { %v3350_v9 = vadd.f32 %v3995_v8, %v3475_v61  ;;  %v3344_v27 = vpop.f32.mrb[19].mxu0 }
 0xcdc   :  { %v3345_v28 = vadd.f32 %v3475_v61, %v3344_v27 }
 0xcdd   :  { %3356 = vst.msk [vmem:[#allocation4 + $0x18] sm:$0xff] %vm191_vm1, %v3350_v9 }
 0xcde   :  { %3355 = vst.msk [vmem:[#allocation4 + $0x10] sm:$0xff] %vm191_vm1, %v3345_v28 }
 0xcdf   :  { %4397 = shalt.err (!%p4394_p12)
}
 0xce0   :  { %s4398_s4 = scalar_lea.hbm %s5212_s18, 512 }
 0xce1   :  { %p4399_p13 = scmp.ne.s32.totalorder %s5212_s18, %s4398_s4  ;;  %p4402_p0 = scmp.lt.u32.totalorder %s4398_s4, %s5212_s18 }
 0xce3   :  { %p4404_p1 = pnand %p4402_p0, %p4399_p13 }
 0xce5   :  { %4407 = shalt.err (!%p4404_p1)
}
 0xce6   :  { %3380 = dma.vmem_to_hbm [thread:$0]  %s3375_s12, 512, %s5212_s18, [#allocation5], %s4419_s28, %s4419_s28, %s4420_s29  }
 0xce7   :  { %4408 = dma.done.wait [#allocation3], 512  }
 0xce8   :  { %4409 = vsyncadd [#allocation3], 4294966784 }
 0xce9   :  { %4410 = dma.done.wait [#allocation5], 512  }
 0xcea   :  { %4411 = vsyncadd [#allocation5], 4294966784 }
 0xceb   :  { %3387 = vsyncpa [#allocation3], 1 }
 0xcec   :  { %3388 = vsyncpa [#allocation5], 1 }

</bundles_post_ra>
